<compile_context>
chip_gen: v6e
topology: v6e:2x2x1
jax: 0.10.0
libtpu: 0.0.40
codegen_flags: <defaults>
</compile_context>

<pallas_src>
import functools
import math

import jax
import jax.numpy as jnp
from jax.experimental import pallas as pl
from jax.experimental.pallas import tpu as pltpu


# ---------------------------------------------------------------------------
# Fused whole-model Pallas kernel (10 operands, gridless, everything VMEM-resident)
# ---------------------------------------------------------------------------

def _pm_forward_kernel(
        # activations
        step_ref,      # (B, 1, 1)      raw num_step_states
        vm_ref,        # (B, S_vm, C_vm)
        pm_ref,        # (B, S_pm, C_pm)
        # packed weights
        misc_ref,      # (C_vm+1+C_pm+1+6, D): [vm_w; vm_b; pm_w; pm_b; enc_g; enc_b; dec_g; dec_b; out_w; out_b_row]
        e_wA_ref,      # (L, D, 3D+D+F):  [qkv_w | wo | w1]
        e_w2_ref,      # (L, F, D)
        e_vec_ref,     # (L, 8, VW):      rows = qkv_b, bo, b1, b2, ln1_g, ln1_b, ln2_g, ln2_b
        d_wA_ref,      # (L, D, 8D+F):    [sqkv_w | swo | cq_w | ckv_w | cwo | w1]
        d_w2_ref,      # (L, F, D)
        d_vec_ref,     # (L, 13, VW):     sqkv_b, sbo, cq_b, ckv_b, cbo, b1, b2, ln1_g..ln3_b
        # output
        o_ref,         # (B, S_pm)
        # scratch
        src_scr,       # (B, 1+S_vm, D) VMEM
        *, num_head, eps):
    f32 = jnp.float32
    B, S_vm, C_vm = vm_ref.shape
    _, S_pm, C_pm = pm_ref.shape
    D = misc_ref.shape[1]
    L, F, _ = e_w2_ref.shape
    H = num_head
    dh = D // H
    S_src = 1 + S_vm
    scale = 1.0 / math.sqrt(dh)

    # ---- unpack the misc slab (static row slices, trace-time offsets) ----
    misc = misc_ref[...]
    vm_w = misc[0:C_vm, :]
    vm_b = misc[C_vm:C_vm + 1, :]
    pm_w = misc[C_vm + 1:C_vm + 1 + C_pm, :]
    pm_b = misc[C_vm + 1 + C_pm:C_vm + 2 + C_pm, :]
    r0 = C_vm + C_pm + 2
    enc_g, enc_b = misc[r0:r0 + 1, :], misc[r0 + 1:r0 + 2, :]
    dec_g, dec_b = misc[r0 + 2:r0 + 3, :], misc[r0 + 3:r0 + 4, :]
    out_w = misc[r0 + 4:r0 + 5, :]
    out_b = misc[r0 + 5:r0 + 6, 0:1]                       # (1, 1)

    # ---- helpers (all operate on VMEM-resident values) ----
    def linear(x2, w, b=None):
        y = jnp.dot(x2, w, preferred_element_type=f32)
        return y if b is None else y + b

    def gelu(y):                                   # exact erf gelu (torch F.gelu default)
        return 0.5 * y * (1.0 + jax.lax.erf(y * (1.0 / math.sqrt(2.0))))

    def layernorm(h2, g, b):
        mu = jnp.mean(h2, axis=-1, keepdims=True)
        c = h2 - mu
        var = jnp.mean(c * c, axis=-1, keepdims=True)
        return c * jax.lax.rsqrt(var + eps) * g + b

    def attention(q3, k3, v3, wo, bo):
        # q3: (B, Sq, D); k3/v3: (B, Sk, D); wo: (D, D); bo: (1, D) -> (B*Sq, D)
        # Output projection folded per head: concat(heads) @ Wo == sum_h head_h @ Wo[h*dh:(h+1)*dh]
        # (removes the lane-dim concat of head outputs).
        Sq = q3.shape[1]
        out2 = jnp.broadcast_to(bo, (B * Sq, D))
        for h in range(H):
            lo = h * dh
            qh = q3[:, :, lo:lo + dh]
            kh = k3[:, :, lo:lo + dh]
            vh = v3[:, :, lo:lo + dh]
            s = jax.lax.dot_general(qh, kh, (((2,), (2,)), ((0,), (0,))),
                                    preferred_element_type=f32) * scale       # (B, Sq, Sk)
            m = jnp.max(s, axis=-1, keepdims=True)
            p = jnp.exp(s - m)
            p = p / jnp.sum(p, axis=-1, keepdims=True)                        # exact softmax
            ah = jax.lax.dot_general(p, vh, (((2,), (1,)), ((0,), (0,))),
                                     preferred_element_type=f32)              # (B, Sq, dh)
            out2 = out2 + jnp.dot(ah.reshape(B * Sq, dh), wo[lo:lo + dh, :],
                                  preferred_element_type=f32)
        return out2

    # ---- input encodings ----
    # src = cat([num_step.repeat(1,1,D), vm_encode(vm_state)], dim=1) built in a VMEM scratch:
    src_scr[:, 0:1, :] = jnp.broadcast_to(step_ref[...], (B, 1, D))
    vm2 = linear(vm_ref[...].reshape(B * S_vm, C_vm), vm_w, vm_b)
    src_scr[:, 1:, :] = vm2.reshape(B, S_vm, D)
    mem2 = src_scr[...].reshape(B * S_src, D)                                  # (B*S_src, D)
    tgt2 = linear(pm_ref[...].reshape(B * S_pm, C_pm), pm_w, pm_b)             # (B*S_pm, D)

    # ---- encoder stack (post-LN, gelu) ----
    for l in range(L):
        wA, vec, w2 = e_wA_ref[l], e_vec_ref[l], e_w2_ref[l]
        qkv_w, wo, w1 = wA[:, 0:3 * D], wA[:, 3 * D:4 * D], wA[:, 4 * D:4 * D + F]
        qkv_b = vec[0:1, 0:3 * D]
        bo, b1, b2 = vec[1:2, 0:D], vec[2:3, 0:F], vec[3:4, 0:D]
        ln1_g, ln1_b = vec[4:5, 0:D], vec[5:6, 0:D]
        ln2_g, ln2_b = vec[6:7, 0:D], vec[7:8, 0:D]

        qkv = linear(mem2, qkv_w, qkv_b)                                       # fused QKV
        q3 = qkv[:, 0 * D:1 * D].reshape(B, S_src, D)
        k3 = qkv[:, 1 * D:2 * D].reshape(B, S_src, D)
        v3 = qkv[:, 2 * D:3 * D].reshape(B, S_src, D)
        a2 = attention(q3, k3, v3, wo, bo)
        mem2 = layernorm(mem2 + a2, ln1_g, ln1_b)
        f2 = linear(gelu(linear(mem2, w1, b1)), w2, b2)
        mem2 = layernorm(mem2 + f2, ln2_g, ln2_b)
    mem2 = layernorm(mem2, enc_g, enc_b)                                       # final encoder norm

    # ---- decoder stack (post-LN, gelu) ----
    out2 = tgt2
    for l in range(L):
        wA, vec, w2 = d_wA_ref[l], d_vec_ref[l], d_w2_ref[l]
        sqkv_w = wA[:, 0:3 * D]
        swo = wA[:, 3 * D:4 * D]
        cq_w = wA[:, 4 * D:5 * D]
        ckv_w = wA[:, 5 * D:7 * D]
        cwo = wA[:, 7 * D:8 * D]
        w1 = wA[:, 8 * D:8 * D + F]
        sqkv_b = vec[0:1, 0:3 * D]
        sbo = vec[1:2, 0:D]
        cq_b = vec[2:3, 0:D]
        ckv_b = vec[3:4, 0:2 * D]
        cbo = vec[4:5, 0:D]
        b1, b2 = vec[5:6, 0:F], vec[6:7, 0:D]
        ln1_g, ln1_b = vec[7:8, 0:D], vec[8:9, 0:D]
        ln2_g, ln2_b = vec[9:10, 0:D], vec[10:11, 0:D]
        ln3_g, ln3_b = vec[11:12, 0:D], vec[12:13, 0:D]

        # self-attention
        qkv = linear(out2, sqkv_w, sqkv_b)
        q3 = qkv[:, 0 * D:1 * D].reshape(B, S_pm, D)
        k3 = qkv[:, 1 * D:2 * D].reshape(B, S_pm, D)
        v3 = qkv[:, 2 * D:3 * D].reshape(B, S_pm, D)
        a2 = attention(q3, k3, v3, swo, sbo)
        out2 = layernorm(out2 + a2, ln1_g, ln1_b)

        # cross-attention: queries from decoder, fused K/V from encoder memory
        q3 = linear(out2, cq_w, cq_b).reshape(B, S_pm, D)
        kv = linear(mem2, ckv_w, ckv_b)                                        # (B*S_src, 2D)
        k3 = kv[:, 0 * D:1 * D].reshape(B, S_src, D)
        v3 = kv[:, 1 * D:2 * D].reshape(B, S_src, D)
        c2 = attention(q3, k3, v3, cwo, cbo)
        out2 = layernorm(out2 + c2, ln2_g, ln2_b)

        # feed-forward
        f2 = linear(gelu(linear(out2, w1, b1)), w2, b2)
        out2 = layernorm(out2 + f2, ln3_g, ln3_b)
    out2 = layernorm(out2, dec_g, dec_b)                                       # final decoder norm

    # ---- output head: Linear(D, 1) as a fused row-wise reduction, lane-dense (B, S_pm) ----
    out3 = out2.reshape(B, S_pm, D)
    score = jnp.sum(out3 * out_w, axis=-1) + out_b                             # (B, S_pm)
    o_ref[...] = score


# ---------------------------------------------------------------------------
# Parameter init: weights are stored directly in the packed/stacked kernel layout
# (packing cost paid once at init, never per forward call).
# ---------------------------------------------------------------------------

def init_params(key, *, pm_cov, vm_cov, d_hidden, num_head, d_ff, num_blocks):
    assert d_hidden % num_head == 0, "d_hidden must be divisible by num_head"
    D, F, L = d_hidden, d_ff, num_blocks
    VW = max(3 * D, F)                                     # packed bias/LN row width
    keys = iter(jax.random.split(key, 8))

    def W(*shape):
        return 0.05 * jax.random.normal(next(keys), shape, jnp.float32)

    zeros_row = jnp.zeros((1, D), jnp.float32)
    ones_row = jnp.ones((1, D), jnp.float32)

    # misc slab: [vm_w; vm_b; pm_w; pm_b; enc_g; enc_b; dec_g; dec_b; out_w; out_b_row]
    misc = jnp.concatenate(
        [W(vm_cov, D), zeros_row, W(pm_cov, D), zeros_row,
         ones_row, zeros_row, ones_row, zeros_row,
         W(1, D), zeros_row], axis=0)                      # (vm_cov+pm_cov+8, D)

    # encoder: [qkv_w | wo | w1] and w2; packed vectors (biases zero, LN gammas one)
    e_wA = W(L, D, 3 * D + D + F)
    e_w2 = W(L, F, D)
    ln_g_row = jnp.concatenate([jnp.ones((D,), jnp.float32),
                                jnp.zeros((VW - D,), jnp.float32)])
    e_vec = jnp.zeros((L, 8, VW), jnp.float32)
    for g_row in (4, 6):                                   # ln1_g, ln2_g
        e_vec = e_vec.at[:, g_row, :].set(ln_g_row)

    # decoder: [sqkv_w | swo | cq_w | ckv_w | cwo | w1] and w2; packed vectors
    d_wA = W(L, D, 3 * D + D + D + 2 * D + D + F)
    d_w2 = W(L, F, D)
    d_vec = jnp.zeros((L, 13, VW), jnp.float32)
    for g_row in (7, 9, 11):                               # ln1_g, ln2_g, ln3_g
        d_vec = d_vec.at[:, g_row, :].set(ln_g_row)

    return dict(misc=misc, e_wA=e_wA, e_w2=e_w2, e_vec=e_vec,
                d_wA=d_wA, d_w2=d_w2, d_vec=d_vec)


# ---------------------------------------------------------------------------
# Forward (mirrors PM_candidate_model.forward, return_attns=False) — zero wrapper-side ops
# ---------------------------------------------------------------------------

@functools.partial(jax.jit, static_argnames=("num_head",))
def pm_candidate_forward(params, chosen_vm_state, num_step_states, pm_states, *, num_head):
    B, S_vm, _ = chosen_vm_state.shape
    _, S_pm, _ = pm_states.shape
    D = params["misc"].shape[1]

    kernel = functools.partial(_pm_forward_kernel, num_head=num_head, eps=1e-5)
    # Single fused, gridless kernel: every operand is a whole-array VMEM block (<1 MiB total).
    score = pl.pallas_call(
        kernel,
        out_shape=jax.ShapeDtypeStruct((B, S_pm), jnp.float32),
        scratch_shapes=[pltpu.VMEM((B, 1 + S_vm, D), jnp.float32)],
    )(num_step_states, chosen_vm_state, pm_states,
      params["misc"], params["e_wA"], params["e_w2"], params["e_vec"],
      params["d_wA"], params["d_w2"], params["d_vec"])
    # torch.squeeze(score) squeezes every size-1 dim; replicate that exactly.
    return jnp.squeeze(score)


# ---------------------------------------------------------------------------
# Main
# ---------------------------------------------------------------------------

if __name__ == "__main__":
    B = 2
    S_vm, S_pm = 6, 8
    pm_cov = vm_cov = 8
    d_hidden, num_head, d_ff, blocks = 32, 4, 64, 2

    root = jax.random.PRNGKey(0)
    kp, k1, k2, k3 = jax.random.split(root, 4)

    params = init_params(kp, pm_cov=pm_cov, vm_cov=vm_cov, d_hidden=d_hidden,
                         num_head=num_head, d_ff=d_ff, num_blocks=blocks)

    chosen_vm_state = jax.random.normal(k1, (B, S_vm, vm_cov), jnp.float32)
    num_step_states = jax.random.normal(k2, (B, 1, 1), jnp.float32)
    pm_states = jax.random.normal(k3, (B, S_pm, pm_cov), jnp.float32)

    score = pm_candidate_forward(params, chosen_vm_state, num_step_states, pm_states,
                                 num_head=num_head)
    jax.block_until_ready(score)
    assert score.shape == (B, S_pm)
    print("KERNEL_OK")
</pallas_src>

<mosaic_0001>
module attributes {stable_mosaic.version = 11 : i64} {
  func.func @_pm_forward_kernel(%arg0: memref<2x1x1xf32, #tpu.memory_space<vmem>>, %arg1: memref<2x6x8xf32, #tpu.memory_space<vmem>>, %arg2: memref<2x8x8xf32, #tpu.memory_space<vmem>>, %arg3: memref<24x32xf32, #tpu.memory_space<vmem>>, %arg4: memref<2x32x192xf32, #tpu.memory_space<vmem>>, %arg5: memref<2x64x32xf32, #tpu.memory_space<vmem>>, %arg6: memref<2x8x96xf32, #tpu.memory_space<vmem>>, %arg7: memref<2x32x320xf32, #tpu.memory_space<vmem>>, %arg8: memref<2x64x32xf32, #tpu.memory_space<vmem>>, %arg9: memref<2x13x96xf32, #tpu.memory_space<vmem>>, %arg10: memref<2x8xf32, #tpu.memory_space<vmem>>, %arg11: memref<2x7x32xf32, #tpu.memory_space<vmem>>) attributes {dimension_semantics = [], scalar_prefetch = 0 : i64, scratch_operands = 1 : i64, tpu.core_type = #tpu.core_type<tc>} {
    %c0 = arith.constant 0 : index
    %c0_0 = arith.constant 0 : index
    %0 = vector.load %arg3[%c0, %c0_0] : memref<24x32xf32, #tpu.memory_space<vmem>>, vector<24x32xf32>
    %1 = vector.extract_strided_slice %0 {offsets = [0, 0], sizes = [8, 32], strides = [1, 1]} : vector<24x32xf32> to vector<8x32xf32>
    %2 = vector.extract_strided_slice %0 {offsets = [8, 0], sizes = [1, 32], strides = [1, 1]} : vector<24x32xf32> to vector<1x32xf32>
    %3 = vector.extract_strided_slice %0 {offsets = [9, 0], sizes = [8, 32], strides = [1, 1]} : vector<24x32xf32> to vector<8x32xf32>
    %4 = vector.extract_strided_slice %0 {offsets = [17, 0], sizes = [1, 32], strides = [1, 1]} : vector<24x32xf32> to vector<1x32xf32>
    %5 = vector.extract_strided_slice %0 {offsets = [18, 0], sizes = [1, 32], strides = [1, 1]} : vector<24x32xf32> to vector<1x32xf32>
    %6 = vector.extract_strided_slice %0 {offsets = [19, 0], sizes = [1, 32], strides = [1, 1]} : vector<24x32xf32> to vector<1x32xf32>
    %7 = vector.extract_strided_slice %0 {offsets = [20, 0], sizes = [1, 32], strides = [1, 1]} : vector<24x32xf32> to vector<1x32xf32>
    %8 = vector.extract_strided_slice %0 {offsets = [21, 0], sizes = [1, 32], strides = [1, 1]} : vector<24x32xf32> to vector<1x32xf32>
    %9 = vector.extract_strided_slice %0 {offsets = [22, 0], sizes = [1, 32], strides = [1, 1]} : vector<24x32xf32> to vector<1x32xf32>
    %10 = vector.extract_strided_slice %0 {offsets = [23, 0], sizes = [1, 1], strides = [1, 1]} : vector<24x32xf32> to vector<1x1xf32>
    %c0_1 = arith.constant 0 : index
    %c0_2 = arith.constant 0 : index
    %c0_3 = arith.constant 0 : index
    %11 = vector.load %arg0[%c0_1, %c0_2, %c0_3] : memref<2x1x1xf32, #tpu.memory_space<vmem>>, vector<2x1x1xf32>
    %12 = vector.shape_cast %11 : vector<2x1x1xf32> to vector<2x1x1xf32>
    %13 = vector.broadcast %12 : vector<2x1x1xf32> to vector<2x1x32xf32>
    %c0_4 = arith.constant 0 : index
    %c0_5 = arith.constant 0 : index
    %c0_6 = arith.constant 0 : index
    %14 = vector.load %arg11[%c0_4, %c0_5, %c0_6] : memref<2x7x32xf32, #tpu.memory_space<vmem>>, vector<2x1x32xf32>
    tpu.vector_store %arg11[%c0_4, %c0_5, %c0_6], %13 {strides = array<i32>} : memref<2x7x32xf32, #tpu.memory_space<vmem>>, vector<2x1x32xf32>,
    %c0_7 = arith.constant 0 : index
    %c0_8 = arith.constant 0 : index
    %c0_9 = arith.constant 0 : index
    %15 = vector.load %arg1[%c0_7, %c0_8, %c0_9] : memref<2x6x8xf32, #tpu.memory_space<vmem>>, vector<2x6x8xf32>
    %16 = vector.shape_cast %15 : vector<2x6x8xf32> to vector<12x8xf32>
    %cst = arith.constant dense<0.000000e+00> : vector<12x32xf32>
    %17 = tpu.matmul %16, %1, %cst {dimension_numbers = #tpu.dot_dimension_numbers<[1], [0], [0], [1], [0, 0, 1, 1], [], []>} : vector<12x8xf32>, vector<8x32xf32>, vector<12x32xf32> -> vector<12x32xf32>
    %18 = vector.broadcast %2 : vector<1x32xf32> to vector<12x32xf32>
    %19 = arith.addf %17, %18 : vector<12x32xf32>
    %20 = vector.shape_cast %19 : vector<12x32xf32> to vector<2x6x32xf32>
    %c0_10 = arith.constant 0 : index
    %c1 = arith.constant 1 : index
    %c0_11 = arith.constant 0 : index
    %21 = vector.load %arg11[%c0_10, %c1, %c0_11] : memref<2x7x32xf32, #tpu.memory_space<vmem>>, vector<2x6x32xf32>
    tpu.vector_store %arg11[%c0_10, %c1, %c0_11], %20 {strides = array<i32>} : memref<2x7x32xf32, #tpu.memory_space<vmem>>, vector<2x6x32xf32>,
    %c0_12 = arith.constant 0 : index
    %c0_13 = arith.constant 0 : index
    %c0_14 = arith.constant 0 : index
    %22 = vector.load %arg11[%c0_12, %c0_13, %c0_14] : memref<2x7x32xf32, #tpu.memory_space<vmem>>, vector<2x7x32xf32>
    %23 = vector.shape_cast %22 : vector<2x7x32xf32> to vector<14x32xf32>
    %c0_15 = arith.constant 0 : index
    %c0_16 = arith.constant 0 : index
    %c0_17 = arith.constant 0 : index
    %24 = vector.load %arg2[%c0_15, %c0_16, %c0_17] : memref<2x8x8xf32, #tpu.memory_space<vmem>>, vector<2x8x8xf32>
    %25 = vector.shape_cast %24 : vector<2x8x8xf32> to vector<16x8xf32>
    %cst_18 = arith.constant dense<0.000000e+00> : vector<16x32xf32>
    %26 = tpu.matmul %25, %3, %cst_18 {dimension_numbers = #tpu.dot_dimension_numbers<[1], [0], [0], [1], [0, 0, 1, 1], [], []>} : vector<16x8xf32>, vector<8x32xf32>, vector<16x32xf32> -> vector<16x32xf32>
    %27 = vector.broadcast %4 : vector<1x32xf32> to vector<16x32xf32>
    %28 = arith.addf %26, %27 : vector<16x32xf32>
    %c0_19 = arith.constant 0 : index
    %c0_20 = arith.constant 0 : index
    %c0_21 = arith.constant 0 : index
    %29 = vector.load %arg4[%c0_19, %c0_20, %c0_21] : memref<2x32x192xf32, #tpu.memory_space<vmem>>, vector<1x32x192xf32>
    %30 = vector.shape_cast %29 : vector<1x32x192xf32> to vector<32x192xf32>
    %c0_22 = arith.constant 0 : index
    %c0_23 = arith.constant 0 : index
    %c0_24 = arith.constant 0 : index
    %31 = vector.load %arg6[%c0_22, %c0_23, %c0_24] : memref<2x8x96xf32, #tpu.memory_space<vmem>>, vector<1x8x96xf32>
    %32 = vector.shape_cast %31 : vector<1x8x96xf32> to vector<8x96xf32>
    %c0_25 = arith.constant 0 : index
    %c0_26 = arith.constant 0 : index
    %c0_27 = arith.constant 0 : index
    %33 = vector.load %arg5[%c0_25, %c0_26, %c0_27] : memref<2x64x32xf32, #tpu.memory_space<vmem>>, vector<1x64x32xf32>
    %34 = vector.shape_cast %33 : vector<1x64x32xf32> to vector<64x32xf32>
    %35 = vector.extract_strided_slice %30 {offsets = [0, 0], sizes = [32, 96], strides = [1, 1]} : vector<32x192xf32> to vector<32x96xf32>
    %36 = vector.extract_strided_slice %30 {offsets = [0, 96], sizes = [32, 32], strides = [1, 1]} : vector<32x192xf32> to vector<32x32xf32>
    %37 = vector.extract_strided_slice %30 {offsets = [0, 128], sizes = [32, 64], strides = [1, 1]} : vector<32x192xf32> to vector<32x64xf32>
    %38 = vector.extract_strided_slice %32 {offsets = [0, 0], sizes = [1, 96], strides = [1, 1]} : vector<8x96xf32> to vector<1x96xf32>
    %39 = vector.extract_strided_slice %32 {offsets = [1, 0], sizes = [1, 32], strides = [1, 1]} : vector<8x96xf32> to vector<1x32xf32>
    %40 = vector.extract_strided_slice %32 {offsets = [2, 0], sizes = [1, 64], strides = [1, 1]} : vector<8x96xf32> to vector<1x64xf32>
    %41 = vector.extract_strided_slice %32 {offsets = [3, 0], sizes = [1, 32], strides = [1, 1]} : vector<8x96xf32> to vector<1x32xf32>
    %42 = vector.extract_strided_slice %32 {offsets = [4, 0], sizes = [1, 32], strides = [1, 1]} : vector<8x96xf32> to vector<1x32xf32>
    %43 = vector.extract_strided_slice %32 {offsets = [5, 0], sizes = [1, 32], strides = [1, 1]} : vector<8x96xf32> to vector<1x32xf32>
    %44 = vector.extract_strided_slice %32 {offsets = [6, 0], sizes = [1, 32], strides = [1, 1]} : vector<8x96xf32> to vector<1x32xf32>
    %45 = vector.extract_strided_slice %32 {offsets = [7, 0], sizes = [1, 32], strides = [1, 1]} : vector<8x96xf32> to vector<1x32xf32>
    %cst_28 = arith.constant dense<0.000000e+00> : vector<14x96xf32>
    %46 = tpu.matmul %23, %35, %cst_28 {dimension_numbers = #tpu.dot_dimension_numbers<[1], [0], [0], [1], [0, 0, 1, 1], [], []>} : vector<14x32xf32>, vector<32x96xf32>, vector<14x96xf32> -> vector<14x96xf32>
    %47 = vector.broadcast %38 : vector<1x96xf32> to vector<14x96xf32>
    %48 = arith.addf %46, %47 : vector<14x96xf32>
    %49 = vector.extract_strided_slice %48 {offsets = [0, 0], sizes = [14, 32], strides = [1, 1]} : vector<14x96xf32> to vector<14x32xf32>
    %50 = vector.shape_cast %49 : vector<14x32xf32> to vector<2x7x32xf32>
    %51 = vector.extract_strided_slice %48 {offsets = [0, 32], sizes = [14, 32], strides = [1, 1]} : vector<14x96xf32> to vector<14x32xf32>
    %52 = vector.shape_cast %51 : vector<14x32xf32> to vector<2x7x32xf32>
    %53 = vector.extract_strided_slice %48 {offsets = [0, 64], sizes = [14, 32], strides = [1, 1]} : vector<14x96xf32> to vector<14x32xf32>
    %54 = vector.shape_cast %53 : vector<14x32xf32> to vector<2x7x32xf32>
    %55 = vector.shape_cast %39 : vector<1x32xf32> to vector<1x32xf32>
    %56 = vector.broadcast %55 : vector<1x32xf32> to vector<14x32xf32>
    %57 = vector.extract_strided_slice %50 {offsets = [0, 0, 0], sizes = [2, 7, 8], strides = [1, 1, 1]} : vector<2x7x32xf32> to vector<2x7x8xf32>
    %58 = vector.extract_strided_slice %52 {offsets = [0, 0, 0], sizes = [2, 7, 8], strides = [1, 1, 1]} : vector<2x7x32xf32> to vector<2x7x8xf32>
    %59 = vector.extract_strided_slice %54 {offsets = [0, 0, 0], sizes = [2, 7, 8], strides = [1, 1, 1]} : vector<2x7x32xf32> to vector<2x7x8xf32>
    %cst_29 = arith.constant dense<0.000000e+00> : vector<2x7x7xf32>
    %60 = tpu.matmul %57, %58, %cst_29 {dimension_numbers = #tpu.dot_dimension_numbers<[2], [2], [1], [1], [0, 0, 0, 1, 1, 1], [0], [0]>} : vector<2x7x8xf32>, vector<2x7x8xf32>, vector<2x7x7xf32> -> vector<2x7x7xf32>
    %cst_30 = arith.constant 0.353553385 : f32
    %61 = vector.broadcast %cst_30 : f32 to vector<2x7x7xf32>
    %62 = arith.mulf %60, %61 : vector<2x7x7xf32>
    %cst_31 = arith.constant dense<0xFF800000> : vector<2x7xf32>
    %63 = vector.multi_reduction <maximumf>, %62, %cst_31 [2] : vector<2x7x7xf32> to vector<2x7xf32>
    %64 = vector.shape_cast %63 : vector<2x7xf32> to vector<2x7x1xf32>
    %65 = vector.broadcast %64 : vector<2x7x1xf32> to vector<2x7x7xf32>
    %66 = arith.subf %62, %65 : vector<2x7x7xf32>
    %67 = math.exp %66 : vector<2x7x7xf32>
    %cst_32 = arith.constant dense<0.000000e+00> : vector<2x7xf32>
    %68 = vector.multi_reduction <add>, %67, %cst_32 [2] : vector<2x7x7xf32> to vector<2x7xf32>
    %69 = vector.shape_cast %68 : vector<2x7xf32> to vector<2x7x1xf32>
    %70 = vector.broadcast %69 : vector<2x7x1xf32> to vector<2x7x7xf32>
    %71 = arith.divf %67, %70 : vector<2x7x7xf32>
    %cst_33 = arith.constant dense<0.000000e+00> : vector<2x7x8xf32>
    %72 = tpu.matmul %71, %59, %cst_33 {dimension_numbers = #tpu.dot_dimension_numbers<[2], [1], [1], [2], [0, 0, 0, 1, 1, 2], [0], [0]>} : vector<2x7x7xf32>, vector<2x7x8xf32>, vector<2x7x8xf32> -> vector<2x7x8xf32>
    %73 = vector.shape_cast %72 : vector<2x7x8xf32> to vector<14x8xf32>
    %74 = vector.extract_strided_slice %36 {offsets = [0, 0], sizes = [8, 32], strides = [1, 1]} : vector<32x32xf32> to vector<8x32xf32>
    %cst_34 = arith.constant dense<0.000000e+00> : vector<14x32xf32>
    %75 = tpu.matmul %73, %74, %cst_34 {dimension_numbers = #tpu.dot_dimension_numbers<[1], [0], [0], [1], [0, 0, 1, 1], [], []>} : vector<14x8xf32>, vector<8x32xf32>, vector<14x32xf32> -> vector<14x32xf32>
    %76 = arith.addf %56, %75 : vector<14x32xf32>
    %77 = vector.extract_strided_slice %50 {offsets = [0, 0, 8], sizes = [2, 7, 8], strides = [1, 1, 1]} : vector<2x7x32xf32> to vector<2x7x8xf32>
    %78 = vector.extract_strided_slice %52 {offsets = [0, 0, 8], sizes = [2, 7, 8], strides = [1, 1, 1]} : vector<2x7x32xf32> to vector<2x7x8xf32>
    %79 = vector.extract_strided_slice %54 {offsets = [0, 0, 8], sizes = [2, 7, 8], strides = [1, 1, 1]} : vector<2x7x32xf32> to vector<2x7x8xf32>
    %cst_35 = arith.constant dense<0.000000e+00> : vector<2x7x7xf32>
    %80 = tpu.matmul %77, %78, %cst_35 {dimension_numbers = #tpu.dot_dimension_numbers<[2], [2], [1], [1], [0, 0, 0, 1, 1, 1], [0], [0]>} : vector<2x7x8xf32>, vector<2x7x8xf32>, vector<2x7x7xf32> -> vector<2x7x7xf32>
    %cst_36 = arith.constant 0.353553385 : f32
    %81 = vector.broadcast %cst_36 : f32 to vector<2x7x7xf32>
    %82 = arith.mulf %80, %81 : vector<2x7x7xf32>
    %cst_37 = arith.constant dense<0xFF800000> : vector<2x7xf32>
    %83 = vector.multi_reduction <maximumf>, %82, %cst_37 [2] : vector<2x7x7xf32> to vector<2x7xf32>
    %84 = vector.shape_cast %83 : vector<2x7xf32> to vector<2x7x1xf32>
    %85 = vector.broadcast %84 : vector<2x7x1xf32> to vector<2x7x7xf32>
    %86 = arith.subf %82, %85 : vector<2x7x7xf32>
    %87 = math.exp %86 : vector<2x7x7xf32>
    %cst_38 = arith.constant dense<0.000000e+00> : vector<2x7xf32>
    %88 = vector.multi_reduction <add>, %87, %cst_38 [2] : vector<2x7x7xf32> to vector<2x7xf32>
    %89 = vector.shape_cast %88 : vector<2x7xf32> to vector<2x7x1xf32>
    %90 = vector.broadcast %89 : vector<2x7x1xf32> to vector<2x7x7xf32>
    %91 = arith.divf %87, %90 : vector<2x7x7xf32>
    %cst_39 = arith.constant dense<0.000000e+00> : vector<2x7x8xf32>
    %92 = tpu.matmul %91, %79, %cst_39 {dimension_numbers = #tpu.dot_dimension_numbers<[2], [1], [1], [2], [0, 0, 0, 1, 1, 2], [0], [0]>} : vector<2x7x7xf32>, vector<2x7x8xf32>, vector<2x7x8xf32> -> vector<2x7x8xf32>
    %93 = vector.shape_cast %92 : vector<2x7x8xf32> to vector<14x8xf32>
    %94 = vector.extract_strided_slice %36 {offsets = [8, 0], sizes = [8, 32], strides = [1, 1]} : vector<32x32xf32> to vector<8x32xf32>
    %cst_40 = arith.constant dense<0.000000e+00> : vector<14x32xf32>
    %95 = tpu.matmul %93, %94, %cst_40 {dimension_numbers = #tpu.dot_dimension_numbers<[1], [0], [0], [1], [0, 0, 1, 1], [], []>} : vector<14x8xf32>, vector<8x32xf32>, vector<14x32xf32> -> vector<14x32xf32>
    %96 = arith.addf %76, %95 : vector<14x32xf32>
    %97 = vector.extract_strided_slice %50 {offsets = [0, 0, 16], sizes = [2, 7, 8], strides = [1, 1, 1]} : vector<2x7x32xf32> to vector<2x7x8xf32>
    %98 = vector.extract_strided_slice %52 {offsets = [0, 0, 16], sizes = [2, 7, 8], strides = [1, 1, 1]} : vector<2x7x32xf32> to vector<2x7x8xf32>
    %99 = vector.extract_strided_slice %54 {offsets = [0, 0, 16], sizes = [2, 7, 8], strides = [1, 1, 1]} : vector<2x7x32xf32> to vector<2x7x8xf32>
    %cst_41 = arith.constant dense<0.000000e+00> : vector<2x7x7xf32>
    %100 = tpu.matmul %97, %98, %cst_41 {dimension_numbers = #tpu.dot_dimension_numbers<[2], [2], [1], [1], [0, 0, 0, 1, 1, 1], [0], [0]>} : vector<2x7x8xf32>, vector<2x7x8xf32>, vector<2x7x7xf32> -> vector<2x7x7xf32>
    %cst_42 = arith.constant 0.353553385 : f32
    %101 = vector.broadcast %cst_42 : f32 to vector<2x7x7xf32>
    %102 = arith.mulf %100, %101 : vector<2x7x7xf32>
    %cst_43 = arith.constant dense<0xFF800000> : vector<2x7xf32>
    %103 = vector.multi_reduction <maximumf>, %102, %cst_43 [2] : vector<2x7x7xf32> to vector<2x7xf32>
    %104 = vector.shape_cast %103 : vector<2x7xf32> to vector<2x7x1xf32>
    %105 = vector.broadcast %104 : vector<2x7x1xf32> to vector<2x7x7xf32>
    %106 = arith.subf %102, %105 : vector<2x7x7xf32>
    %107 = math.exp %106 : vector<2x7x7xf32>
    %cst_44 = arith.constant dense<0.000000e+00> : vector<2x7xf32>
    %108 = vector.multi_reduction <add>, %107, %cst_44 [2] : vector<2x7x7xf32> to vector<2x7xf32>
    %109 = vector.shape_cast %108 : vector<2x7xf32> to vector<2x7x1xf32>
    %110 = vector.broadcast %109 : vector<2x7x1xf32> to vector<2x7x7xf32>
    %111 = arith.divf %107, %110 : vector<2x7x7xf32>
    %cst_45 = arith.constant dense<0.000000e+00> : vector<2x7x8xf32>
    %112 = tpu.matmul %111, %99, %cst_45 {dimension_numbers = #tpu.dot_dimension_numbers<[2], [1], [1], [2], [0, 0, 0, 1, 1, 2], [0], [0]>} : vector<2x7x7xf32>, vector<2x7x8xf32>, vector<2x7x8xf32> -> vector<2x7x8xf32>
    %113 = vector.shape_cast %112 : vector<2x7x8xf32> to vector<14x8xf32>
    %114 = vector.extract_strided_slice %36 {offsets = [16, 0], sizes = [8, 32], strides = [1, 1]} : vector<32x32xf32> to vector<8x32xf32>
    %cst_46 = arith.constant dense<0.000000e+00> : vector<14x32xf32>
    %115 = tpu.matmul %113, %114, %cst_46 {dimension_numbers = #tpu.dot_dimension_numbers<[1], [0], [0], [1], [0, 0, 1, 1], [], []>} : vector<14x8xf32>, vector<8x32xf32>, vector<14x32xf32> -> vector<14x32xf32>
    %116 = arith.addf %96, %115 : vector<14x32xf32>
    %117 = vector.extract_strided_slice %50 {offsets = [0, 0, 24], sizes = [2, 7, 8], strides = [1, 1, 1]} : vector<2x7x32xf32> to vector<2x7x8xf32>
    %118 = vector.extract_strided_slice %52 {offsets = [0, 0, 24], sizes = [2, 7, 8], strides = [1, 1, 1]} : vector<2x7x32xf32> to vector<2x7x8xf32>
    %119 = vector.extract_strided_slice %54 {offsets = [0, 0, 24], sizes = [2, 7, 8], strides = [1, 1, 1]} : vector<2x7x32xf32> to vector<2x7x8xf32>
    %cst_47 = arith.constant dense<0.000000e+00> : vector<2x7x7xf32>
    %120 = tpu.matmul %117, %118, %cst_47 {dimension_numbers = #tpu.dot_dimension_numbers<[2], [2], [1], [1], [0, 0, 0, 1, 1, 1], [0], [0]>} : vector<2x7x8xf32>, vector<2x7x8xf32>, vector<2x7x7xf32> -> vector<2x7x7xf32>
    %cst_48 = arith.constant 0.353553385 : f32
    %121 = vector.broadcast %cst_48 : f32 to vector<2x7x7xf32>
    %122 = arith.mulf %120, %121 : vector<2x7x7xf32>
    %cst_49 = arith.constant dense<0xFF800000> : vector<2x7xf32>
    %123 = vector.multi_reduction <maximumf>, %122, %cst_49 [2] : vector<2x7x7xf32> to vector<2x7xf32>
    %124 = vector.shape_cast %123 : vector<2x7xf32> to vector<2x7x1xf32>
    %125 = vector.broadcast %124 : vector<2x7x1xf32> to vector<2x7x7xf32>
    %126 = arith.subf %122, %125 : vector<2x7x7xf32>
    %127 = math.exp %126 : vector<2x7x7xf32>
    %cst_50 = arith.constant dense<0.000000e+00> : vector<2x7xf32>
    %128 = vector.multi_reduction <add>, %127, %cst_50 [2] : vector<2x7x7xf32> to vector<2x7xf32>
    %129 = vector.shape_cast %128 : vector<2x7xf32> to vector<2x7x1xf32>
    %130 = vector.broadcast %129 : vector<2x7x1xf32> to vector<2x7x7xf32>
    %131 = arith.divf %127, %130 : vector<2x7x7xf32>
    %cst_51 = arith.constant dense<0.000000e+00> : vector<2x7x8xf32>
    %132 = tpu.matmul %131, %119, %cst_51 {dimension_numbers = #tpu.dot_dimension_numbers<[2], [1], [1], [2], [0, 0, 0, 1, 1, 2], [0], [0]>} : vector<2x7x7xf32>, vector<2x7x8xf32>, vector<2x7x8xf32> -> vector<2x7x8xf32>
    %133 = vector.shape_cast %132 : vector<2x7x8xf32> to vector<14x8xf32>
    %134 = vector.extract_strided_slice %36 {offsets = [24, 0], sizes = [8, 32], strides = [1, 1]} : vector<32x32xf32> to vector<8x32xf32>
    %cst_52 = arith.constant dense<0.000000e+00> : vector<14x32xf32>
    %135 = tpu.matmul %133, %134, %cst_52 {dimension_numbers = #tpu.dot_dimension_numbers<[1], [0], [0], [1], [0, 0, 1, 1], [], []>} : vector<14x8xf32>, vector<8x32xf32>, vector<14x32xf32> -> vector<14x32xf32>
    %136 = arith.addf %116, %135 : vector<14x32xf32>
    %137 = arith.addf %23, %136 : vector<14x32xf32>
    %cst_53 = arith.constant dense<0.000000e+00> : vector<14xf32>
    %138 = vector.multi_reduction <add>, %137, %cst_53 [1] : vector<14x32xf32> to vector<14xf32>
    %139 = vector.shape_cast %138 : vector<14xf32> to vector<14x1xf32>
    %cst_54 = arith.constant 3.200000e+01 : f32
    %140 = vector.broadcast %cst_54 : f32 to vector<14x1xf32>
    %141 = arith.divf %139, %140 : vector<14x1xf32>
    %142 = vector.broadcast %141 : vector<14x1xf32> to vector<14x32xf32>
    %143 = arith.subf %137, %142 : vector<14x32xf32>
    %144 = arith.mulf %143, %143 : vector<14x32xf32>
    %cst_55 = arith.constant dense<0.000000e+00> : vector<14xf32>
    %145 = vector.multi_reduction <add>, %144, %cst_55 [1] : vector<14x32xf32> to vector<14xf32>
    %146 = vector.shape_cast %145 : vector<14xf32> to vector<14x1xf32>
    %cst_56 = arith.constant 3.200000e+01 : f32
    %147 = vector.broadcast %cst_56 : f32 to vector<14x1xf32>
    %148 = arith.divf %146, %147 : vector<14x1xf32>
    %cst_57 = arith.constant 9.99999974E-6 : f32
    %149 = vector.broadcast %cst_57 : f32 to vector<14x1xf32>
    %150 = arith.addf %148, %149 : vector<14x1xf32>
    %151 = math.rsqrt %150 : vector<14x1xf32>
    %152 = vector.broadcast %151 : vector<14x1xf32> to vector<14x32xf32>
    %153 = arith.mulf %143, %152 : vector<14x32xf32>
    %154 = vector.broadcast %42 : vector<1x32xf32> to vector<14x32xf32>
    %155 = arith.mulf %153, %154 : vector<14x32xf32>
    %156 = vector.broadcast %43 : vector<1x32xf32> to vector<14x32xf32>
    %157 = arith.addf %155, %156 : vector<14x32xf32>
    %cst_58 = arith.constant dense<0.000000e+00> : vector<14x64xf32>
    %158 = tpu.matmul %157, %37, %cst_58 {dimension_numbers = #tpu.dot_dimension_numbers<[1], [0], [0], [1], [0, 0, 1, 1], [], []>} : vector<14x32xf32>, vector<32x64xf32>, vector<14x64xf32> -> vector<14x64xf32>
    %159 = vector.broadcast %40 : vector<1x64xf32> to vector<14x64xf32>
    %160 = arith.addf %158, %159 : vector<14x64xf32>
    %cst_59 = arith.constant 5.000000e-01 : f32
    %161 = vector.broadcast %cst_59 : f32 to vector<14x64xf32>
    %162 = arith.mulf %161, %160 : vector<14x64xf32>
    %cst_60 = arith.constant 0.707106769 : f32
    %163 = vector.broadcast %cst_60 : f32 to vector<14x64xf32>
    %164 = arith.mulf %160, %163 : vector<14x64xf32>
    %165 = math.erf %164 : vector<14x64xf32>
    %cst_61 = arith.constant 1.000000e+00 : f32
    %166 = vector.broadcast %cst_61 : f32 to vector<14x64xf32>
    %167 = arith.addf %166, %165 : vector<14x64xf32>
    %168 = arith.mulf %162, %167 : vector<14x64xf32>
    %cst_62 = arith.constant dense<0.000000e+00> : vector<14x32xf32>
    %169 = tpu.matmul %168, %34, %cst_62 {dimension_numbers = #tpu.dot_dimension_numbers<[1], [0], [0], [1], [0, 0, 1, 1], [], []>} : vector<14x64xf32>, vector<64x32xf32>, vector<14x32xf32> -> vector<14x32xf32>
    %170 = vector.broadcast %41 : vector<1x32xf32> to vector<14x32xf32>
    %171 = arith.addf %169, %170 : vector<14x32xf32>
    %172 = arith.addf %157, %171 : vector<14x32xf32>
    %cst_63 = arith.constant dense<0.000000e+00> : vector<14xf32>
    %173 = vector.multi_reduction <add>, %172, %cst_63 [1] : vector<14x32xf32> to vector<14xf32>
    %174 = vector.shape_cast %173 : vector<14xf32> to vector<14x1xf32>
    %cst_64 = arith.constant 3.200000e+01 : f32
    %175 = vector.broadcast %cst_64 : f32 to vector<14x1xf32>
    %176 = arith.divf %174, %175 : vector<14x1xf32>
    %177 = vector.broadcast %176 : vector<14x1xf32> to vector<14x32xf32>
    %178 = arith.subf %172, %177 : vector<14x32xf32>
    %179 = arith.mulf %178, %178 : vector<14x32xf32>
    %cst_65 = arith.constant dense<0.000000e+00> : vector<14xf32>
    %180 = vector.multi_reduction <add>, %179, %cst_65 [1] : vector<14x32xf32> to vector<14xf32>
    %181 = vector.shape_cast %180 : vector<14xf32> to vector<14x1xf32>
    %cst_66 = arith.constant 3.200000e+01 : f32
    %182 = vector.broadcast %cst_66 : f32 to vector<14x1xf32>
    %183 = arith.divf %181, %182 : vector<14x1xf32>
    %cst_67 = arith.constant 9.99999974E-6 : f32
    %184 = vector.broadcast %cst_67 : f32 to vector<14x1xf32>
    %185 = arith.addf %183, %184 : vector<14x1xf32>
    %186 = math.rsqrt %185 : vector<14x1xf32>
    %187 = vector.broadcast %186 : vector<14x1xf32> to vector<14x32xf32>
    %188 = arith.mulf %178, %187 : vector<14x32xf32>
    %189 = vector.broadcast %44 : vector<1x32xf32> to vector<14x32xf32>
    %190 = arith.mulf %188, %189 : vector<14x32xf32>
    %191 = vector.broadcast %45 : vector<1x32xf32> to vector<14x32xf32>
    %192 = arith.addf %190, %191 : vector<14x32xf32>
    %c1_68 = arith.constant 1 : index
    %c0_69 = arith.constant 0 : index
    %c0_70 = arith.constant 0 : index
    %193 = vector.load %arg4[%c1_68, %c0_69, %c0_70] : memref<2x32x192xf32, #tpu.memory_space<vmem>>, vector<1x32x192xf32>
    %194 = vector.shape_cast %193 : vector<1x32x192xf32> to vector<32x192xf32>
    %c1_71 = arith.constant 1 : index
    %c0_72 = arith.constant 0 : index
    %c0_73 = arith.constant 0 : index
    %195 = vector.load %arg6[%c1_71, %c0_72, %c0_73] : memref<2x8x96xf32, #tpu.memory_space<vmem>>, vector<1x8x96xf32>
    %196 = vector.shape_cast %195 : vector<1x8x96xf32> to vector<8x96xf32>
    %c1_74 = arith.constant 1 : index
    %c0_75 = arith.constant 0 : index
    %c0_76 = arith.constant 0 : index
    %197 = vector.load %arg5[%c1_74, %c0_75, %c0_76] : memref<2x64x32xf32, #tpu.memory_space<vmem>>, vector<1x64x32xf32>
    %198 = vector.shape_cast %197 : vector<1x64x32xf32> to vector<64x32xf32>
    %199 = vector.extract_strided_slice %194 {offsets = [0, 0], sizes = [32, 96], strides = [1, 1]} : vector<32x192xf32> to vector<32x96xf32>
    %200 = vector.extract_strided_slice %194 {offsets = [0, 96], sizes = [32, 32], strides = [1, 1]} : vector<32x192xf32> to vector<32x32xf32>
    %201 = vector.extract_strided_slice %194 {offsets = [0, 128], sizes = [32, 64], strides = [1, 1]} : vector<32x192xf32> to vector<32x64xf32>
    %202 = vector.extract_strided_slice %196 {offsets = [0, 0], sizes = [1, 96], strides = [1, 1]} : vector<8x96xf32> to vector<1x96xf32>
    %203 = vector.extract_strided_slice %196 {offsets = [1, 0], sizes = [1, 32], strides = [1, 1]} : vector<8x96xf32> to vector<1x32xf32>
    %204 = vector.extract_strided_slice %196 {offsets = [2, 0], sizes = [1, 64], strides = [1, 1]} : vector<8x96xf32> to vector<1x64xf32>
    %205 = vector.extract_strided_slice %196 {offsets = [3, 0], sizes = [1, 32], strides = [1, 1]} : vector<8x96xf32> to vector<1x32xf32>
    %206 = vector.extract_strided_slice %196 {offsets = [4, 0], sizes = [1, 32], strides = [1, 1]} : vector<8x96xf32> to vector<1x32xf32>
    %207 = vector.extract_strided_slice %196 {offsets = [5, 0], sizes = [1, 32], strides = [1, 1]} : vector<8x96xf32> to vector<1x32xf32>
    %208 = vector.extract_strided_slice %196 {offsets = [6, 0], sizes = [1, 32], strides = [1, 1]} : vector<8x96xf32> to vector<1x32xf32>
    %209 = vector.extract_strided_slice %196 {offsets = [7, 0], sizes = [1, 32], strides = [1, 1]} : vector<8x96xf32> to vector<1x32xf32>
    %cst_77 = arith.constant dense<0.000000e+00> : vector<14x96xf32>
    %210 = tpu.matmul %192, %199, %cst_77 {dimension_numbers = #tpu.dot_dimension_numbers<[1], [0], [0], [1], [0, 0, 1, 1], [], []>} : vector<14x32xf32>, vector<32x96xf32>, vector<14x96xf32> -> vector<14x96xf32>
    %211 = vector.broadcast %202 : vector<1x96xf32> to vector<14x96xf32>
    %212 = arith.addf %210, %211 : vector<14x96xf32>
    %213 = vector.extract_strided_slice %212 {offsets = [0, 0], sizes = [14, 32], strides = [1, 1]} : vector<14x96xf32> to vector<14x32xf32>
    %214 = vector.shape_cast %213 : vector<14x32xf32> to vector<2x7x32xf32>
    %215 = vector.extract_strided_slice %212 {offsets = [0, 32], sizes = [14, 32], strides = [1, 1]} : vector<14x96xf32> to vector<14x32xf32>
    %216 = vector.shape_cast %215 : vector<14x32xf32> to vector<2x7x32xf32>
    %217 = vector.extract_strided_slice %212 {offsets = [0, 64], sizes = [14, 32], strides = [1, 1]} : vector<14x96xf32> to vector<14x32xf32>
    %218 = vector.shape_cast %217 : vector<14x32xf32> to vector<2x7x32xf32>
    %219 = vector.shape_cast %203 : vector<1x32xf32> to vector<1x32xf32>
    %220 = vector.broadcast %219 : vector<1x32xf32> to vector<14x32xf32>
    %221 = vector.extract_strided_slice %214 {offsets = [0, 0, 0], sizes = [2, 7, 8], strides = [1, 1, 1]} : vector<2x7x32xf32> to vector<2x7x8xf32>
    %222 = vector.extract_strided_slice %216 {offsets = [0, 0, 0], sizes = [2, 7, 8], strides = [1, 1, 1]} : vector<2x7x32xf32> to vector<2x7x8xf32>
    %223 = vector.extract_strided_slice %218 {offsets = [0, 0, 0], sizes = [2, 7, 8], strides = [1, 1, 1]} : vector<2x7x32xf32> to vector<2x7x8xf32>
    %cst_78 = arith.constant dense<0.000000e+00> : vector<2x7x7xf32>
    %224 = tpu.matmul %221, %222, %cst_78 {dimension_numbers = #tpu.dot_dimension_numbers<[2], [2], [1], [1], [0, 0, 0, 1, 1, 1], [0], [0]>} : vector<2x7x8xf32>, vector<2x7x8xf32>, vector<2x7x7xf32> -> vector<2x7x7xf32>
    %cst_79 = arith.constant 0.353553385 : f32
    %225 = vector.broadcast %cst_79 : f32 to vector<2x7x7xf32>
    %226 = arith.mulf %224, %225 : vector<2x7x7xf32>
    %cst_80 = arith.constant dense<0xFF800000> : vector<2x7xf32>
    %227 = vector.multi_reduction <maximumf>, %226, %cst_80 [2] : vector<2x7x7xf32> to vector<2x7xf32>
    %228 = vector.shape_cast %227 : vector<2x7xf32> to vector<2x7x1xf32>
    %229 = vector.broadcast %228 : vector<2x7x1xf32> to vector<2x7x7xf32>
    %230 = arith.subf %226, %229 : vector<2x7x7xf32>
    %231 = math.exp %230 : vector<2x7x7xf32>
    %cst_81 = arith.constant dense<0.000000e+00> : vector<2x7xf32>
    %232 = vector.multi_reduction <add>, %231, %cst_81 [2] : vector<2x7x7xf32> to vector<2x7xf32>
    %233 = vector.shape_cast %232 : vector<2x7xf32> to vector<2x7x1xf32>
    %234 = vector.broadcast %233 : vector<2x7x1xf32> to vector<2x7x7xf32>
    %235 = arith.divf %231, %234 : vector<2x7x7xf32>
    %cst_82 = arith.constant dense<0.000000e+00> : vector<2x7x8xf32>
    %236 = tpu.matmul %235, %223, %cst_82 {dimension_numbers = #tpu.dot_dimension_numbers<[2], [1], [1], [2], [0, 0, 0, 1, 1, 2], [0], [0]>} : vector<2x7x7xf32>, vector<2x7x8xf32>, vector<2x7x8xf32> -> vector<2x7x8xf32>
    %237 = vector.shape_cast %236 : vector<2x7x8xf32> to vector<14x8xf32>
    %238 = vector.extract_strided_slice %200 {offsets = [0, 0], sizes = [8, 32], strides = [1, 1]} : vector<32x32xf32> to vector<8x32xf32>
    %cst_83 = arith.constant dense<0.000000e+00> : vector<14x32xf32>
    %239 = tpu.matmul %237, %238, %cst_83 {dimension_numbers = #tpu.dot_dimension_numbers<[1], [0], [0], [1], [0, 0, 1, 1], [], []>} : vector<14x8xf32>, vector<8x32xf32>, vector<14x32xf32> -> vector<14x32xf32>
    %240 = arith.addf %220, %239 : vector<14x32xf32>
    %241 = vector.extract_strided_slice %214 {offsets = [0, 0, 8], sizes = [2, 7, 8], strides = [1, 1, 1]} : vector<2x7x32xf32> to vector<2x7x8xf32>
    %242 = vector.extract_strided_slice %216 {offsets = [0, 0, 8], sizes = [2, 7, 8], strides = [1, 1, 1]} : vector<2x7x32xf32> to vector<2x7x8xf32>
    %243 = vector.extract_strided_slice %218 {offsets = [0, 0, 8], sizes = [2, 7, 8], strides = [1, 1, 1]} : vector<2x7x32xf32> to vector<2x7x8xf32>
    %cst_84 = arith.constant dense<0.000000e+00> : vector<2x7x7xf32>
    %244 = tpu.matmul %241, %242, %cst_84 {dimension_numbers = #tpu.dot_dimension_numbers<[2], [2], [1], [1], [0, 0, 0, 1, 1, 1], [0], [0]>} : vector<2x7x8xf32>, vector<2x7x8xf32>, vector<2x7x7xf32> -> vector<2x7x7xf32>
    %cst_85 = arith.constant 0.353553385 : f32
    %245 = vector.broadcast %cst_85 : f32 to vector<2x7x7xf32>
    %246 = arith.mulf %244, %245 : vector<2x7x7xf32>
    %cst_86 = arith.constant dense<0xFF800000> : vector<2x7xf32>
    %247 = vector.multi_reduction <maximumf>, %246, %cst_86 [2] : vector<2x7x7xf32> to vector<2x7xf32>
    %248 = vector.shape_cast %247 : vector<2x7xf32> to vector<2x7x1xf32>
    %249 = vector.broadcast %248 : vector<2x7x1xf32> to vector<2x7x7xf32>
    %250 = arith.subf %246, %249 : vector<2x7x7xf32>
    %251 = math.exp %250 : vector<2x7x7xf32>
    %cst_87 = arith.constant dense<0.000000e+00> : vector<2x7xf32>
    %252 = vector.multi_reduction <add>, %251, %cst_87 [2] : vector<2x7x7xf32> to vector<2x7xf32>
    %253 = vector.shape_cast %252 : vector<2x7xf32> to vector<2x7x1xf32>
    %254 = vector.broadcast %253 : vector<2x7x1xf32> to vector<2x7x7xf32>
    %255 = arith.divf %251, %254 : vector<2x7x7xf32>
    %cst_88 = arith.constant dense<0.000000e+00> : vector<2x7x8xf32>
    %256 = tpu.matmul %255, %243, %cst_88 {dimension_numbers = #tpu.dot_dimension_numbers<[2], [1], [1], [2], [0, 0, 0, 1, 1, 2], [0], [0]>} : vector<2x7x7xf32>, vector<2x7x8xf32>, vector<2x7x8xf32> -> vector<2x7x8xf32>
    %257 = vector.shape_cast %256 : vector<2x7x8xf32> to vector<14x8xf32>
    %258 = vector.extract_strided_slice %200 {offsets = [8, 0], sizes = [8, 32], strides = [1, 1]} : vector<32x32xf32> to vector<8x32xf32>
    %cst_89 = arith.constant dense<0.000000e+00> : vector<14x32xf32>
    %259 = tpu.matmul %257, %258, %cst_89 {dimension_numbers = #tpu.dot_dimension_numbers<[1], [0], [0], [1], [0, 0, 1, 1], [], []>} : vector<14x8xf32>, vector<8x32xf32>, vector<14x32xf32> -> vector<14x32xf32>
    %260 = arith.addf %240, %259 : vector<14x32xf32>
    %261 = vector.extract_strided_slice %214 {offsets = [0, 0, 16], sizes = [2, 7, 8], strides = [1, 1, 1]} : vector<2x7x32xf32> to vector<2x7x8xf32>
    %262 = vector.extract_strided_slice %216 {offsets = [0, 0, 16], sizes = [2, 7, 8], strides = [1, 1, 1]} : vector<2x7x32xf32> to vector<2x7x8xf32>
    %263 = vector.extract_strided_slice %218 {offsets = [0, 0, 16], sizes = [2, 7, 8], strides = [1, 1, 1]} : vector<2x7x32xf32> to vector<2x7x8xf32>
    %cst_90 = arith.constant dense<0.000000e+00> : vector<2x7x7xf32>
    %264 = tpu.matmul %261, %262, %cst_90 {dimension_numbers = #tpu.dot_dimension_numbers<[2], [2], [1], [1], [0, 0, 0, 1, 1, 1], [0], [0]>} : vector<2x7x8xf32>, vector<2x7x8xf32>, vector<2x7x7xf32> -> vector<2x7x7xf32>
    %cst_91 = arith.constant 0.353553385 : f32
    %265 = vector.broadcast %cst_91 : f32 to vector<2x7x7xf32>
    %266 = arith.mulf %264, %265 : vector<2x7x7xf32>
    %cst_92 = arith.constant dense<0xFF800000> : vector<2x7xf32>
    %267 = vector.multi_reduction <maximumf>, %266, %cst_92 [2] : vector<2x7x7xf32> to vector<2x7xf32>
    %268 = vector.shape_cast %267 : vector<2x7xf32> to vector<2x7x1xf32>
    %269 = vector.broadcast %268 : vector<2x7x1xf32> to vector<2x7x7xf32>
    %270 = arith.subf %266, %269 : vector<2x7x7xf32>
    %271 = math.exp %270 : vector<2x7x7xf32>
    %cst_93 = arith.constant dense<0.000000e+00> : vector<2x7xf32>
    %272 = vector.multi_reduction <add>, %271, %cst_93 [2] : vector<2x7x7xf32> to vector<2x7xf32>
    %273 = vector.shape_cast %272 : vector<2x7xf32> to vector<2x7x1xf32>
    %274 = vector.broadcast %273 : vector<2x7x1xf32> to vector<2x7x7xf32>
    %275 = arith.divf %271, %274 : vector<2x7x7xf32>
    %cst_94 = arith.constant dense<0.000000e+00> : vector<2x7x8xf32>
    %276 = tpu.matmul %275, %263, %cst_94 {dimension_numbers = #tpu.dot_dimension_numbers<[2], [1], [1], [2], [0, 0, 0, 1, 1, 2], [0], [0]>} : vector<2x7x7xf32>, vector<2x7x8xf32>, vector<2x7x8xf32> -> vector<2x7x8xf32>
    %277 = vector.shape_cast %276 : vector<2x7x8xf32> to vector<14x8xf32>
    %278 = vector.extract_strided_slice %200 {offsets = [16, 0], sizes = [8, 32], strides = [1, 1]} : vector<32x32xf32> to vector<8x32xf32>
    %cst_95 = arith.constant dense<0.000000e+00> : vector<14x32xf32>
    %279 = tpu.matmul %277, %278, %cst_95 {dimension_numbers = #tpu.dot_dimension_numbers<[1], [0], [0], [1], [0, 0, 1, 1], [], []>} : vector<14x8xf32>, vector<8x32xf32>, vector<14x32xf32> -> vector<14x32xf32>
    %280 = arith.addf %260, %279 : vector<14x32xf32>
    %281 = vector.extract_strided_slice %214 {offsets = [0, 0, 24], sizes = [2, 7, 8], strides = [1, 1, 1]} : vector<2x7x32xf32> to vector<2x7x8xf32>
    %282 = vector.extract_strided_slice %216 {offsets = [0, 0, 24], sizes = [2, 7, 8], strides = [1, 1, 1]} : vector<2x7x32xf32> to vector<2x7x8xf32>
    %283 = vector.extract_strided_slice %218 {offsets = [0, 0, 24], sizes = [2, 7, 8], strides = [1, 1, 1]} : vector<2x7x32xf32> to vector<2x7x8xf32>
    %cst_96 = arith.constant dense<0.000000e+00> : vector<2x7x7xf32>
    %284 = tpu.matmul %281, %282, %cst_96 {dimension_numbers = #tpu.dot_dimension_numbers<[2], [2], [1], [1], [0, 0, 0, 1, 1, 1], [0], [0]>} : vector<2x7x8xf32>, vector<2x7x8xf32>, vector<2x7x7xf32> -> vector<2x7x7xf32>
    %cst_97 = arith.constant 0.353553385 : f32
    %285 = vector.broadcast %cst_97 : f32 to vector<2x7x7xf32>
    %286 = arith.mulf %284, %285 : vector<2x7x7xf32>
    %cst_98 = arith.constant dense<0xFF800000> : vector<2x7xf32>
    %287 = vector.multi_reduction <maximumf>, %286, %cst_98 [2] : vector<2x7x7xf32> to vector<2x7xf32>
    %288 = vector.shape_cast %287 : vector<2x7xf32> to vector<2x7x1xf32>
    %289 = vector.broadcast %288 : vector<2x7x1xf32> to vector<2x7x7xf32>
    %290 = arith.subf %286, %289 : vector<2x7x7xf32>
    %291 = math.exp %290 : vector<2x7x7xf32>
    %cst_99 = arith.constant dense<0.000000e+00> : vector<2x7xf32>
    %292 = vector.multi_reduction <add>, %291, %cst_99 [2] : vector<2x7x7xf32> to vector<2x7xf32>
    %293 = vector.shape_cast %292 : vector<2x7xf32> to vector<2x7x1xf32>
    %294 = vector.broadcast %293 : vector<2x7x1xf32> to vector<2x7x7xf32>
    %295 = arith.divf %291, %294 : vector<2x7x7xf32>
    %cst_100 = arith.constant dense<0.000000e+00> : vector<2x7x8xf32>
    %296 = tpu.matmul %295, %283, %cst_100 {dimension_numbers = #tpu.dot_dimension_numbers<[2], [1], [1], [2], [0, 0, 0, 1, 1, 2], [0], [0]>} : vector<2x7x7xf32>, vector<2x7x8xf32>, vector<2x7x8xf32> -> vector<2x7x8xf32>
    %297 = vector.shape_cast %296 : vector<2x7x8xf32> to vector<14x8xf32>
    %298 = vector.extract_strided_slice %200 {offsets = [24, 0], sizes = [8, 32], strides = [1, 1]} : vector<32x32xf32> to vector<8x32xf32>
    %cst_101 = arith.constant dense<0.000000e+00> : vector<14x32xf32>
    %299 = tpu.matmul %297, %298, %cst_101 {dimension_numbers = #tpu.dot_dimension_numbers<[1], [0], [0], [1], [0, 0, 1, 1], [], []>} : vector<14x8xf32>, vector<8x32xf32>, vector<14x32xf32> -> vector<14x32xf32>
    %300 = arith.addf %280, %299 : vector<14x32xf32>
    %301 = arith.addf %192, %300 : vector<14x32xf32>
    %cst_102 = arith.constant dense<0.000000e+00> : vector<14xf32>
    %302 = vector.multi_reduction <add>, %301, %cst_102 [1] : vector<14x32xf32> to vector<14xf32>
    %303 = vector.shape_cast %302 : vector<14xf32> to vector<14x1xf32>
    %cst_103 = arith.constant 3.200000e+01 : f32
    %304 = vector.broadcast %cst_103 : f32 to vector<14x1xf32>
    %305 = arith.divf %303, %304 : vector<14x1xf32>
    %306 = vector.broadcast %305 : vector<14x1xf32> to vector<14x32xf32>
    %307 = arith.subf %301, %306 : vector<14x32xf32>
    %308 = arith.mulf %307, %307 : vector<14x32xf32>
    %cst_104 = arith.constant dense<0.000000e+00> : vector<14xf32>
    %309 = vector.multi_reduction <add>, %308, %cst_104 [1] : vector<14x32xf32> to vector<14xf32>
    %310 = vector.shape_cast %309 : vector<14xf32> to vector<14x1xf32>
    %cst_105 = arith.constant 3.200000e+01 : f32
    %311 = vector.broadcast %cst_105 : f32 to vector<14x1xf32>
    %312 = arith.divf %310, %311 : vector<14x1xf32>
    %cst_106 = arith.constant 9.99999974E-6 : f32
    %313 = vector.broadcast %cst_106 : f32 to vector<14x1xf32>
    %314 = arith.addf %312, %313 : vector<14x1xf32>
    %315 = math.rsqrt %314 : vector<14x1xf32>
    %316 = vector.broadcast %315 : vector<14x1xf32> to vector<14x32xf32>
    %317 = arith.mulf %307, %316 : vector<14x32xf32>
    %318 = vector.broadcast %206 : vector<1x32xf32> to vector<14x32xf32>
    %319 = arith.mulf %317, %318 : vector<14x32xf32>
    %320 = vector.broadcast %207 : vector<1x32xf32> to vector<14x32xf32>
    %321 = arith.addf %319, %320 : vector<14x32xf32>
    %cst_107 = arith.constant dense<0.000000e+00> : vector<14x64xf32>
    %322 = tpu.matmul %321, %201, %cst_107 {dimension_numbers = #tpu.dot_dimension_numbers<[1], [0], [0], [1], [0, 0, 1, 1], [], []>} : vector<14x32xf32>, vector<32x64xf32>, vector<14x64xf32> -> vector<14x64xf32>
    %323 = vector.broadcast %204 : vector<1x64xf32> to vector<14x64xf32>
    %324 = arith.addf %322, %323 : vector<14x64xf32>
    %cst_108 = arith.constant 5.000000e-01 : f32
    %325 = vector.broadcast %cst_108 : f32 to vector<14x64xf32>
    %326 = arith.mulf %325, %324 : vector<14x64xf32>
    %cst_109 = arith.constant 0.707106769 : f32
    %327 = vector.broadcast %cst_109 : f32 to vector<14x64xf32>
    %328 = arith.mulf %324, %327 : vector<14x64xf32>
    %329 = math.erf %328 : vector<14x64xf32>
    %cst_110 = arith.constant 1.000000e+00 : f32
    %330 = vector.broadcast %cst_110 : f32 to vector<14x64xf32>
    %331 = arith.addf %330, %329 : vector<14x64xf32>
    %332 = arith.mulf %326, %331 : vector<14x64xf32>
    %cst_111 = arith.constant dense<0.000000e+00> : vector<14x32xf32>
    %333 = tpu.matmul %332, %198, %cst_111 {dimension_numbers = #tpu.dot_dimension_numbers<[1], [0], [0], [1], [0, 0, 1, 1], [], []>} : vector<14x64xf32>, vector<64x32xf32>, vector<14x32xf32> -> vector<14x32xf32>
    %334 = vector.broadcast %205 : vector<1x32xf32> to vector<14x32xf32>
    %335 = arith.addf %333, %334 : vector<14x32xf32>
    %336 = arith.addf %321, %335 : vector<14x32xf32>
    %cst_112 = arith.constant dense<0.000000e+00> : vector<14xf32>
    %337 = vector.multi_reduction <add>, %336, %cst_112 [1] : vector<14x32xf32> to vector<14xf32>
    %338 = vector.shape_cast %337 : vector<14xf32> to vector<14x1xf32>
    %cst_113 = arith.constant 3.200000e+01 : f32
    %339 = vector.broadcast %cst_113 : f32 to vector<14x1xf32>
    %340 = arith.divf %338, %339 : vector<14x1xf32>
    %341 = vector.broadcast %340 : vector<14x1xf32> to vector<14x32xf32>
    %342 = arith.subf %336, %341 : vector<14x32xf32>
    %343 = arith.mulf %342, %342 : vector<14x32xf32>
    %cst_114 = arith.constant dense<0.000000e+00> : vector<14xf32>
    %344 = vector.multi_reduction <add>, %343, %cst_114 [1] : vector<14x32xf32> to vector<14xf32>
    %345 = vector.shape_cast %344 : vector<14xf32> to vector<14x1xf32>
    %cst_115 = arith.constant 3.200000e+01 : f32
    %346 = vector.broadcast %cst_115 : f32 to vector<14x1xf32>
    %347 = arith.divf %345, %346 : vector<14x1xf32>
    %cst_116 = arith.constant 9.99999974E-6 : f32
    %348 = vector.broadcast %cst_116 : f32 to vector<14x1xf32>
    %349 = arith.addf %347, %348 : vector<14x1xf32>
    %350 = math.rsqrt %349 : vector<14x1xf32>
    %351 = vector.broadcast %350 : vector<14x1xf32> to vector<14x32xf32>
    %352 = arith.mulf %342, %351 : vector<14x32xf32>
    %353 = vector.broadcast %208 : vector<1x32xf32> to vector<14x32xf32>
    %354 = arith.mulf %352, %353 : vector<14x32xf32>
    %355 = vector.broadcast %209 : vector<1x32xf32> to vector<14x32xf32>
    %356 = arith.addf %354, %355 : vector<14x32xf32>
    %cst_117 = arith.constant dense<0.000000e+00> : vector<14xf32>
    %357 = vector.multi_reduction <add>, %356, %cst_117 [1] : vector<14x32xf32> to vector<14xf32>
    %358 = vector.shape_cast %357 : vector<14xf32> to vector<14x1xf32>
    %cst_118 = arith.constant 3.200000e+01 : f32
    %359 = vector.broadcast %cst_118 : f32 to vector<14x1xf32>
    %360 = arith.divf %358, %359 : vector<14x1xf32>
    %361 = vector.broadcast %360 : vector<14x1xf32> to vector<14x32xf32>
    %362 = arith.subf %356, %361 : vector<14x32xf32>
    %363 = arith.mulf %362, %362 : vector<14x32xf32>
    %cst_119 = arith.constant dense<0.000000e+00> : vector<14xf32>
    %364 = vector.multi_reduction <add>, %363, %cst_119 [1] : vector<14x32xf32> to vector<14xf32>
    %365 = vector.shape_cast %364 : vector<14xf32> to vector<14x1xf32>
    %cst_120 = arith.constant 3.200000e+01 : f32
    %366 = vector.broadcast %cst_120 : f32 to vector<14x1xf32>
    %367 = arith.divf %365, %366 : vector<14x1xf32>
    %cst_121 = arith.constant 9.99999974E-6 : f32
    %368 = vector.broadcast %cst_121 : f32 to vector<14x1xf32>
    %369 = arith.addf %367, %368 : vector<14x1xf32>
    %370 = math.rsqrt %369 : vector<14x1xf32>
    %371 = vector.broadcast %370 : vector<14x1xf32> to vector<14x32xf32>
    %372 = arith.mulf %362, %371 : vector<14x32xf32>
    %373 = vector.broadcast %5 : vector<1x32xf32> to vector<14x32xf32>
    %374 = arith.mulf %372, %373 : vector<14x32xf32>
    %375 = vector.broadcast %6 : vector<1x32xf32> to vector<14x32xf32>
    %376 = arith.addf %374, %375 : vector<14x32xf32>
    %c0_122 = arith.constant 0 : index
    %c0_123 = arith.constant 0 : index
    %c0_124 = arith.constant 0 : index
    %377 = vector.load %arg7[%c0_122, %c0_123, %c0_124] : memref<2x32x320xf32, #tpu.memory_space<vmem>>, vector<1x32x320xf32>
    %378 = vector.shape_cast %377 : vector<1x32x320xf32> to vector<32x320xf32>
    %c0_125 = arith.constant 0 : index
    %c0_126 = arith.constant 0 : index
    %c0_127 = arith.constant 0 : index
    %379 = vector.load %arg9[%c0_125, %c0_126, %c0_127] : memref<2x13x96xf32, #tpu.memory_space<vmem>>, vector<1x13x96xf32>
    %380 = vector.shape_cast %379 : vector<1x13x96xf32> to vector<13x96xf32>
    %c0_128 = arith.constant 0 : index
    %c0_129 = arith.constant 0 : index
    %c0_130 = arith.constant 0 : index
    %381 = vector.load %arg8[%c0_128, %c0_129, %c0_130] : memref<2x64x32xf32, #tpu.memory_space<vmem>>, vector<1x64x32xf32>
    %382 = vector.shape_cast %381 : vector<1x64x32xf32> to vector<64x32xf32>
    %383 = vector.extract_strided_slice %378 {offsets = [0, 0], sizes = [32, 96], strides = [1, 1]} : vector<32x320xf32> to vector<32x96xf32>
    %384 = vector.extract_strided_slice %378 {offsets = [0, 96], sizes = [32, 32], strides = [1, 1]} : vector<32x320xf32> to vector<32x32xf32>
    %385 = vector.extract_strided_slice %378 {offsets = [0, 128], sizes = [32, 32], strides = [1, 1]} : vector<32x320xf32> to vector<32x32xf32>
    %386 = vector.extract_strided_slice %378 {offsets = [0, 160], sizes = [32, 64], strides = [1, 1]} : vector<32x320xf32> to vector<32x64xf32>
    %387 = vector.extract_strided_slice %378 {offsets = [0, 224], sizes = [32, 32], strides = [1, 1]} : vector<32x320xf32> to vector<32x32xf32>
    %388 = vector.extract_strided_slice %378 {offsets = [0, 256], sizes = [32, 64], strides = [1, 1]} : vector<32x320xf32> to vector<32x64xf32>
    %389 = vector.extract_strided_slice %380 {offsets = [0, 0], sizes = [1, 96], strides = [1, 1]} : vector<13x96xf32> to vector<1x96xf32>
    %390 = vector.extract_strided_slice %380 {offsets = [1, 0], sizes = [1, 32], strides = [1, 1]} : vector<13x96xf32> to vector<1x32xf32>
    %391 = vector.extract_strided_slice %380 {offsets = [2, 0], sizes = [1, 32], strides = [1, 1]} : vector<13x96xf32> to vector<1x32xf32>
    %392 = vector.extract_strided_slice %380 {offsets = [3, 0], sizes = [1, 64], strides = [1, 1]} : vector<13x96xf32> to vector<1x64xf32>
    %393 = vector.extract_strided_slice %380 {offsets = [4, 0], sizes = [1, 32], strides = [1, 1]} : vector<13x96xf32> to vector<1x32xf32>
    %394 = vector.extract_strided_slice %380 {offsets = [5, 0], sizes = [1, 64], strides = [1, 1]} : vector<13x96xf32> to vector<1x64xf32>
    %395 = vector.extract_strided_slice %380 {offsets = [6, 0], sizes = [1, 32], strides = [1, 1]} : vector<13x96xf32> to vector<1x32xf32>
    %396 = vector.extract_strided_slice %380 {offsets = [7, 0], sizes = [1, 32], strides = [1, 1]} : vector<13x96xf32> to vector<1x32xf32>
    %397 = vector.extract_strided_slice %380 {offsets = [8, 0], sizes = [1, 32], strides = [1, 1]} : vector<13x96xf32> to vector<1x32xf32>
    %398 = vector.extract_strided_slice %380 {offsets = [9, 0], sizes = [1, 32], strides = [1, 1]} : vector<13x96xf32> to vector<1x32xf32>
    %399 = vector.extract_strided_slice %380 {offsets = [10, 0], sizes = [1, 32], strides = [1, 1]} : vector<13x96xf32> to vector<1x32xf32>
    %400 = vector.extract_strided_slice %380 {offsets = [11, 0], sizes = [1, 32], strides = [1, 1]} : vector<13x96xf32> to vector<1x32xf32>
    %401 = vector.extract_strided_slice %380 {offsets = [12, 0], sizes = [1, 32], strides = [1, 1]} : vector<13x96xf32> to vector<1x32xf32>
    %cst_131 = arith.constant dense<0.000000e+00> : vector<16x96xf32>
    %402 = tpu.matmul %28, %383, %cst_131 {dimension_numbers = #tpu.dot_dimension_numbers<[1], [0], [0], [1], [0, 0, 1, 1], [], []>} : vector<16x32xf32>, vector<32x96xf32>, vector<16x96xf32> -> vector<16x96xf32>
    %403 = vector.broadcast %389 : vector<1x96xf32> to vector<16x96xf32>
    %404 = arith.addf %402, %403 : vector<16x96xf32>
    %405 = vector.extract_strided_slice %404 {offsets = [0, 0], sizes = [16, 32], strides = [1, 1]} : vector<16x96xf32> to vector<16x32xf32>
    %406 = vector.shape_cast %405 : vector<16x32xf32> to vector<2x8x32xf32>
    %407 = vector.extract_strided_slice %404 {offsets = [0, 32], sizes = [16, 32], strides = [1, 1]} : vector<16x96xf32> to vector<16x32xf32>
    %408 = vector.shape_cast %407 : vector<16x32xf32> to vector<2x8x32xf32>
    %409 = vector.extract_strided_slice %404 {offsets = [0, 64], sizes = [16, 32], strides = [1, 1]} : vector<16x96xf32> to vector<16x32xf32>
    %410 = vector.shape_cast %409 : vector<16x32xf32> to vector<2x8x32xf32>
    %411 = vector.shape_cast %390 : vector<1x32xf32> to vector<1x32xf32>
    %412 = vector.broadcast %411 : vector<1x32xf32> to vector<16x32xf32>
    %413 = vector.extract_strided_slice %406 {offsets = [0, 0, 0], sizes = [2, 8, 8], strides = [1, 1, 1]} : vector<2x8x32xf32> to vector<2x8x8xf32>
    %414 = vector.extract_strided_slice %408 {offsets = [0, 0, 0], sizes = [2, 8, 8], strides = [1, 1, 1]} : vector<2x8x32xf32> to vector<2x8x8xf32>
    %415 = vector.extract_strided_slice %410 {offsets = [0, 0, 0], sizes = [2, 8, 8], strides = [1, 1, 1]} : vector<2x8x32xf32> to vector<2x8x8xf32>
    %cst_132 = arith.constant dense<0.000000e+00> : vector<2x8x8xf32>
    %416 = tpu.matmul %413, %414, %cst_132 {dimension_numbers = #tpu.dot_dimension_numbers<[2], [2], [1], [1], [0, 0, 0, 1, 1, 1], [0], [0]>} : vector<2x8x8xf32>, vector<2x8x8xf32>, vector<2x8x8xf32> -> vector<2x8x8xf32>
    %cst_133 = arith.constant 0.353553385 : f32
    %417 = vector.broadcast %cst_133 : f32 to vector<2x8x8xf32>
    %418 = arith.mulf %416, %417 : vector<2x8x8xf32>
    %cst_134 = arith.constant dense<0xFF800000> : vector<2x8xf32>
    %419 = vector.multi_reduction <maximumf>, %418, %cst_134 [2] : vector<2x8x8xf32> to vector<2x8xf32>
    %420 = vector.shape_cast %419 : vector<2x8xf32> to vector<2x8x1xf32>
    %421 = vector.broadcast %420 : vector<2x8x1xf32> to vector<2x8x8xf32>
    %422 = arith.subf %418, %421 : vector<2x8x8xf32>
    %423 = math.exp %422 : vector<2x8x8xf32>
    %cst_135 = arith.constant dense<0.000000e+00> : vector<2x8xf32>
    %424 = vector.multi_reduction <add>, %423, %cst_135 [2] : vector<2x8x8xf32> to vector<2x8xf32>
    %425 = vector.shape_cast %424 : vector<2x8xf32> to vector<2x8x1xf32>
    %426 = vector.broadcast %425 : vector<2x8x1xf32> to vector<2x8x8xf32>
    %427 = arith.divf %423, %426 : vector<2x8x8xf32>
    %cst_136 = arith.constant dense<0.000000e+00> : vector<2x8x8xf32>
    %428 = tpu.matmul %427, %415, %cst_136 {dimension_numbers = #tpu.dot_dimension_numbers<[2], [1], [1], [2], [0, 0, 0, 1, 1, 2], [0], [0]>} : vector<2x8x8xf32>, vector<2x8x8xf32>, vector<2x8x8xf32> -> vector<2x8x8xf32>
    %429 = vector.shape_cast %428 : vector<2x8x8xf32> to vector<16x8xf32>
    %430 = vector.extract_strided_slice %384 {offsets = [0, 0], sizes = [8, 32], strides = [1, 1]} : vector<32x32xf32> to vector<8x32xf32>
    %cst_137 = arith.constant dense<0.000000e+00> : vector<16x32xf32>
    %431 = tpu.matmul %429, %430, %cst_137 {dimension_numbers = #tpu.dot_dimension_numbers<[1], [0], [0], [1], [0, 0, 1, 1], [], []>} : vector<16x8xf32>, vector<8x32xf32>, vector<16x32xf32> -> vector<16x32xf32>
    %432 = arith.addf %412, %431 : vector<16x32xf32>
    %433 = vector.extract_strided_slice %406 {offsets = [0, 0, 8], sizes = [2, 8, 8], strides = [1, 1, 1]} : vector<2x8x32xf32> to vector<2x8x8xf32>
    %434 = vector.extract_strided_slice %408 {offsets = [0, 0, 8], sizes = [2, 8, 8], strides = [1, 1, 1]} : vector<2x8x32xf32> to vector<2x8x8xf32>
    %435 = vector.extract_strided_slice %410 {offsets = [0, 0, 8], sizes = [2, 8, 8], strides = [1, 1, 1]} : vector<2x8x32xf32> to vector<2x8x8xf32>
    %cst_138 = arith.constant dense<0.000000e+00> : vector<2x8x8xf32>
    %436 = tpu.matmul %433, %434, %cst_138 {dimension_numbers = #tpu.dot_dimension_numbers<[2], [2], [1], [1], [0, 0, 0, 1, 1, 1], [0], [0]>} : vector<2x8x8xf32>, vector<2x8x8xf32>, vector<2x8x8xf32> -> vector<2x8x8xf32>
    %cst_139 = arith.constant 0.353553385 : f32
    %437 = vector.broadcast %cst_139 : f32 to vector<2x8x8xf32>
    %438 = arith.mulf %436, %437 : vector<2x8x8xf32>
    %cst_140 = arith.constant dense<0xFF800000> : vector<2x8xf32>
    %439 = vector.multi_reduction <maximumf>, %438, %cst_140 [2] : vector<2x8x8xf32> to vector<2x8xf32>
    %440 = vector.shape_cast %439 : vector<2x8xf32> to vector<2x8x1xf32>
    %441 = vector.broadcast %440 : vector<2x8x1xf32> to vector<2x8x8xf32>
    %442 = arith.subf %438, %441 : vector<2x8x8xf32>
    %443 = math.exp %442 : vector<2x8x8xf32>
    %cst_141 = arith.constant dense<0.000000e+00> : vector<2x8xf32>
    %444 = vector.multi_reduction <add>, %443, %cst_141 [2] : vector<2x8x8xf32> to vector<2x8xf32>
    %445 = vector.shape_cast %444 : vector<2x8xf32> to vector<2x8x1xf32>
    %446 = vector.broadcast %445 : vector<2x8x1xf32> to vector<2x8x8xf32>
    %447 = arith.divf %443, %446 : vector<2x8x8xf32>
    %cst_142 = arith.constant dense<0.000000e+00> : vector<2x8x8xf32>
    %448 = tpu.matmul %447, %435, %cst_142 {dimension_numbers = #tpu.dot_dimension_numbers<[2], [1], [1], [2], [0, 0, 0, 1, 1, 2], [0], [0]>} : vector<2x8x8xf32>, vector<2x8x8xf32>, vector<2x8x8xf32> -> vector<2x8x8xf32>
    %449 = vector.shape_cast %448 : vector<2x8x8xf32> to vector<16x8xf32>
    %450 = vector.extract_strided_slice %384 {offsets = [8, 0], sizes = [8, 32], strides = [1, 1]} : vector<32x32xf32> to vector<8x32xf32>
    %cst_143 = arith.constant dense<0.000000e+00> : vector<16x32xf32>
    %451 = tpu.matmul %449, %450, %cst_143 {dimension_numbers = #tpu.dot_dimension_numbers<[1], [0], [0], [1], [0, 0, 1, 1], [], []>} : vector<16x8xf32>, vector<8x32xf32>, vector<16x32xf32> -> vector<16x32xf32>
    %452 = arith.addf %432, %451 : vector<16x32xf32>
    %453 = vector.extract_strided_slice %406 {offsets = [0, 0, 16], sizes = [2, 8, 8], strides = [1, 1, 1]} : vector<2x8x32xf32> to vector<2x8x8xf32>
    %454 = vector.extract_strided_slice %408 {offsets = [0, 0, 16], sizes = [2, 8, 8], strides = [1, 1, 1]} : vector<2x8x32xf32> to vector<2x8x8xf32>
    %455 = vector.extract_strided_slice %410 {offsets = [0, 0, 16], sizes = [2, 8, 8], strides = [1, 1, 1]} : vector<2x8x32xf32> to vector<2x8x8xf32>
    %cst_144 = arith.constant dense<0.000000e+00> : vector<2x8x8xf32>
    %456 = tpu.matmul %453, %454, %cst_144 {dimension_numbers = #tpu.dot_dimension_numbers<[2], [2], [1], [1], [0, 0, 0, 1, 1, 1], [0], [0]>} : vector<2x8x8xf32>, vector<2x8x8xf32>, vector<2x8x8xf32> -> vector<2x8x8xf32>
    %cst_145 = arith.constant 0.353553385 : f32
    %457 = vector.broadcast %cst_145 : f32 to vector<2x8x8xf32>
    %458 = arith.mulf %456, %457 : vector<2x8x8xf32>
    %cst_146 = arith.constant dense<0xFF800000> : vector<2x8xf32>
    %459 = vector.multi_reduction <maximumf>, %458, %cst_146 [2] : vector<2x8x8xf32> to vector<2x8xf32>
    %460 = vector.shape_cast %459 : vector<2x8xf32> to vector<2x8x1xf32>
    %461 = vector.broadcast %460 : vector<2x8x1xf32> to vector<2x8x8xf32>
    %462 = arith.subf %458, %461 : vector<2x8x8xf32>
    %463 = math.exp %462 : vector<2x8x8xf32>
    %cst_147 = arith.constant dense<0.000000e+00> : vector<2x8xf32>
    %464 = vector.multi_reduction <add>, %463, %cst_147 [2] : vector<2x8x8xf32> to vector<2x8xf32>
    %465 = vector.shape_cast %464 : vector<2x8xf32> to vector<2x8x1xf32>
    %466 = vector.broadcast %465 : vector<2x8x1xf32> to vector<2x8x8xf32>
    %467 = arith.divf %463, %466 : vector<2x8x8xf32>
    %cst_148 = arith.constant dense<0.000000e+00> : vector<2x8x8xf32>
    %468 = tpu.matmul %467, %455, %cst_148 {dimension_numbers = #tpu.dot_dimension_numbers<[2], [1], [1], [2], [0, 0, 0, 1, 1, 2], [0], [0]>} : vector<2x8x8xf32>, vector<2x8x8xf32>, vector<2x8x8xf32> -> vector<2x8x8xf32>
    %469 = vector.shape_cast %468 : vector<2x8x8xf32> to vector<16x8xf32>
    %470 = vector.extract_strided_slice %384 {offsets = [16, 0], sizes = [8, 32], strides = [1, 1]} : vector<32x32xf32> to vector<8x32xf32>
    %cst_149 = arith.constant dense<0.000000e+00> : vector<16x32xf32>
    %471 = tpu.matmul %469, %470, %cst_149 {dimension_numbers = #tpu.dot_dimension_numbers<[1], [0], [0], [1], [0, 0, 1, 1], [], []>} : vector<16x8xf32>, vector<8x32xf32>, vector<16x32xf32> -> vector<16x32xf32>
    %472 = arith.addf %452, %471 : vector<16x32xf32>
    %473 = vector.extract_strided_slice %406 {offsets = [0, 0, 24], sizes = [2, 8, 8], strides = [1, 1, 1]} : vector<2x8x32xf32> to vector<2x8x8xf32>
    %474 = vector.extract_strided_slice %408 {offsets = [0, 0, 24], sizes = [2, 8, 8], strides = [1, 1, 1]} : vector<2x8x32xf32> to vector<2x8x8xf32>
    %475 = vector.extract_strided_slice %410 {offsets = [0, 0, 24], sizes = [2, 8, 8], strides = [1, 1, 1]} : vector<2x8x32xf32> to vector<2x8x8xf32>
    %cst_150 = arith.constant dense<0.000000e+00> : vector<2x8x8xf32>
    %476 = tpu.matmul %473, %474, %cst_150 {dimension_numbers = #tpu.dot_dimension_numbers<[2], [2], [1], [1], [0, 0, 0, 1, 1, 1], [0], [0]>} : vector<2x8x8xf32>, vector<2x8x8xf32>, vector<2x8x8xf32> -> vector<2x8x8xf32>
    %cst_151 = arith.constant 0.353553385 : f32
    %477 = vector.broadcast %cst_151 : f32 to vector<2x8x8xf32>
    %478 = arith.mulf %476, %477 : vector<2x8x8xf32>
    %cst_152 = arith.constant dense<0xFF800000> : vector<2x8xf32>
    %479 = vector.multi_reduction <maximumf>, %478, %cst_152 [2] : vector<2x8x8xf32> to vector<2x8xf32>
    %480 = vector.shape_cast %479 : vector<2x8xf32> to vector<2x8x1xf32>
    %481 = vector.broadcast %480 : vector<2x8x1xf32> to vector<2x8x8xf32>
    %482 = arith.subf %478, %481 : vector<2x8x8xf32>
    %483 = math.exp %482 : vector<2x8x8xf32>
    %cst_153 = arith.constant dense<0.000000e+00> : vector<2x8xf32>
    %484 = vector.multi_reduction <add>, %483, %cst_153 [2] : vector<2x8x8xf32> to vector<2x8xf32>
    %485 = vector.shape_cast %484 : vector<2x8xf32> to vector<2x8x1xf32>
    %486 = vector.broadcast %485 : vector<2x8x1xf32> to vector<2x8x8xf32>
    %487 = arith.divf %483, %486 : vector<2x8x8xf32>
    %cst_154 = arith.constant dense<0.000000e+00> : vector<2x8x8xf32>
    %488 = tpu.matmul %487, %475, %cst_154 {dimension_numbers = #tpu.dot_dimension_numbers<[2], [1], [1], [2], [0, 0, 0, 1, 1, 2], [0], [0]>} : vector<2x8x8xf32>, vector<2x8x8xf32>, vector<2x8x8xf32> -> vector<2x8x8xf32>
    %489 = vector.shape_cast %488 : vector<2x8x8xf32> to vector<16x8xf32>
    %490 = vector.extract_strided_slice %384 {offsets = [24, 0], sizes = [8, 32], strides = [1, 1]} : vector<32x32xf32> to vector<8x32xf32>
    %cst_155 = arith.constant dense<0.000000e+00> : vector<16x32xf32>
    %491 = tpu.matmul %489, %490, %cst_155 {dimension_numbers = #tpu.dot_dimension_numbers<[1], [0], [0], [1], [0, 0, 1, 1], [], []>} : vector<16x8xf32>, vector<8x32xf32>, vector<16x32xf32> -> vector<16x32xf32>
    %492 = arith.addf %472, %491 : vector<16x32xf32>
    %493 = arith.addf %28, %492 : vector<16x32xf32>
    %cst_156 = arith.constant dense<0.000000e+00> : vector<16xf32>
    %494 = vector.multi_reduction <add>, %493, %cst_156 [1] : vector<16x32xf32> to vector<16xf32>
    %495 = vector.shape_cast %494 : vector<16xf32> to vector<16x1xf32>
    %cst_157 = arith.constant 3.200000e+01 : f32
    %496 = vector.broadcast %cst_157 : f32 to vector<16x1xf32>
    %497 = arith.divf %495, %496 : vector<16x1xf32>
    %498 = vector.broadcast %497 : vector<16x1xf32> to vector<16x32xf32>
    %499 = arith.subf %493, %498 : vector<16x32xf32>
    %500 = arith.mulf %499, %499 : vector<16x32xf32>
    %cst_158 = arith.constant dense<0.000000e+00> : vector<16xf32>
    %501 = vector.multi_reduction <add>, %500, %cst_158 [1] : vector<16x32xf32> to vector<16xf32>
    %502 = vector.shape_cast %501 : vector<16xf32> to vector<16x1xf32>
    %cst_159 = arith.constant 3.200000e+01 : f32
    %503 = vector.broadcast %cst_159 : f32 to vector<16x1xf32>
    %504 = arith.divf %502, %503 : vector<16x1xf32>
    %cst_160 = arith.constant 9.99999974E-6 : f32
    %505 = vector.broadcast %cst_160 : f32 to vector<16x1xf32>
    %506 = arith.addf %504, %505 : vector<16x1xf32>
    %507 = math.rsqrt %506 : vector<16x1xf32>
    %508 = vector.broadcast %507 : vector<16x1xf32> to vector<16x32xf32>
    %509 = arith.mulf %499, %508 : vector<16x32xf32>
    %510 = vector.broadcast %396 : vector<1x32xf32> to vector<16x32xf32>
    %511 = arith.mulf %509, %510 : vector<16x32xf32>
    %512 = vector.broadcast %397 : vector<1x32xf32> to vector<16x32xf32>
    %513 = arith.addf %511, %512 : vector<16x32xf32>
    %cst_161 = arith.constant dense<0.000000e+00> : vector<16x32xf32>
    %514 = tpu.matmul %513, %385, %cst_161 {dimension_numbers = #tpu.dot_dimension_numbers<[1], [0], [0], [1], [0, 0, 1, 1], [], []>} : vector<16x32xf32>, vector<32x32xf32>, vector<16x32xf32> -> vector<16x32xf32>
    %515 = vector.broadcast %391 : vector<1x32xf32> to vector<16x32xf32>
    %516 = arith.addf %514, %515 : vector<16x32xf32>
    %517 = vector.shape_cast %516 : vector<16x32xf32> to vector<2x8x32xf32>
    %cst_162 = arith.constant dense<0.000000e+00> : vector<14x64xf32>
    %518 = tpu.matmul %376, %386, %cst_162 {dimension_numbers = #tpu.dot_dimension_numbers<[1], [0], [0], [1], [0, 0, 1, 1], [], []>} : vector<14x32xf32>, vector<32x64xf32>, vector<14x64xf32> -> vector<14x64xf32>
    %519 = vector.broadcast %392 : vector<1x64xf32> to vector<14x64xf32>
    %520 = arith.addf %518, %519 : vector<14x64xf32>
    %521 = vector.extract_strided_slice %520 {offsets = [0, 0], sizes = [14, 32], strides = [1, 1]} : vector<14x64xf32> to vector<14x32xf32>
    %522 = vector.shape_cast %521 : vector<14x32xf32> to vector<2x7x32xf32>
    %523 = vector.extract_strided_slice %520 {offsets = [0, 32], sizes = [14, 32], strides = [1, 1]} : vector<14x64xf32> to vector<14x32xf32>
    %524 = vector.shape_cast %523 : vector<14x32xf32> to vector<2x7x32xf32>
    %525 = vector.shape_cast %393 : vector<1x32xf32> to vector<1x32xf32>
    %526 = vector.broadcast %525 : vector<1x32xf32> to vector<16x32xf32>
    %527 = vector.extract_strided_slice %517 {offsets = [0, 0, 0], sizes = [2, 8, 8], strides = [1, 1, 1]} : vector<2x8x32xf32> to vector<2x8x8xf32>
    %528 = vector.extract_strided_slice %522 {offsets = [0, 0, 0], sizes = [2, 7, 8], strides = [1, 1, 1]} : vector<2x7x32xf32> to vector<2x7x8xf32>
    %529 = vector.extract_strided_slice %524 {offsets = [0, 0, 0], sizes = [2, 7, 8], strides = [1, 1, 1]} : vector<2x7x32xf32> to vector<2x7x8xf32>
    %cst_163 = arith.constant dense<0.000000e+00> : vector<2x8x7xf32>
    %530 = tpu.matmul %527, %528, %cst_163 {dimension_numbers = #tpu.dot_dimension_numbers<[2], [2], [1], [1], [0, 0, 0, 1, 1, 1], [0], [0]>} : vector<2x8x8xf32>, vector<2x7x8xf32>, vector<2x8x7xf32> -> vector<2x8x7xf32>
    %cst_164 = arith.constant 0.353553385 : f32
    %531 = vector.broadcast %cst_164 : f32 to vector<2x8x7xf32>
    %532 = arith.mulf %530, %531 : vector<2x8x7xf32>
    %cst_165 = arith.constant dense<0xFF800000> : vector<2x8xf32>
    %533 = vector.multi_reduction <maximumf>, %532, %cst_165 [2] : vector<2x8x7xf32> to vector<2x8xf32>
    %534 = vector.shape_cast %533 : vector<2x8xf32> to vector<2x8x1xf32>
    %535 = vector.broadcast %534 : vector<2x8x1xf32> to vector<2x8x7xf32>
    %536 = arith.subf %532, %535 : vector<2x8x7xf32>
    %537 = math.exp %536 : vector<2x8x7xf32>
    %cst_166 = arith.constant dense<0.000000e+00> : vector<2x8xf32>
    %538 = vector.multi_reduction <add>, %537, %cst_166 [2] : vector<2x8x7xf32> to vector<2x8xf32>
    %539 = vector.shape_cast %538 : vector<2x8xf32> to vector<2x8x1xf32>
    %540 = vector.broadcast %539 : vector<2x8x1xf32> to vector<2x8x7xf32>
    %541 = arith.divf %537, %540 : vector<2x8x7xf32>
    %cst_167 = arith.constant dense<0.000000e+00> : vector<2x8x8xf32>
    %542 = tpu.matmul %541, %529, %cst_167 {dimension_numbers = #tpu.dot_dimension_numbers<[2], [1], [1], [2], [0, 0, 0, 1, 1, 2], [0], [0]>} : vector<2x8x7xf32>, vector<2x7x8xf32>, vector<2x8x8xf32> -> vector<2x8x8xf32>
    %543 = vector.shape_cast %542 : vector<2x8x8xf32> to vector<16x8xf32>
    %544 = vector.extract_strided_slice %387 {offsets = [0, 0], sizes = [8, 32], strides = [1, 1]} : vector<32x32xf32> to vector<8x32xf32>
    %cst_168 = arith.constant dense<0.000000e+00> : vector<16x32xf32>
    %545 = tpu.matmul %543, %544, %cst_168 {dimension_numbers = #tpu.dot_dimension_numbers<[1], [0], [0], [1], [0, 0, 1, 1], [], []>} : vector<16x8xf32>, vector<8x32xf32>, vector<16x32xf32> -> vector<16x32xf32>
    %546 = arith.addf %526, %545 : vector<16x32xf32>
    %547 = vector.extract_strided_slice %517 {offsets = [0, 0, 8], sizes = [2, 8, 8], strides = [1, 1, 1]} : vector<2x8x32xf32> to vector<2x8x8xf32>
    %548 = vector.extract_strided_slice %522 {offsets = [0, 0, 8], sizes = [2, 7, 8], strides = [1, 1, 1]} : vector<2x7x32xf32> to vector<2x7x8xf32>
    %549 = vector.extract_strided_slice %524 {offsets = [0, 0, 8], sizes = [2, 7, 8], strides = [1, 1, 1]} : vector<2x7x32xf32> to vector<2x7x8xf32>
    %cst_169 = arith.constant dense<0.000000e+00> : vector<2x8x7xf32>
    %550 = tpu.matmul %547, %548, %cst_169 {dimension_numbers = #tpu.dot_dimension_numbers<[2], [2], [1], [1], [0, 0, 0, 1, 1, 1], [0], [0]>} : vector<2x8x8xf32>, vector<2x7x8xf32>, vector<2x8x7xf32> -> vector<2x8x7xf32>
    %cst_170 = arith.constant 0.353553385 : f32
    %551 = vector.broadcast %cst_170 : f32 to vector<2x8x7xf32>
    %552 = arith.mulf %550, %551 : vector<2x8x7xf32>
    %cst_171 = arith.constant dense<0xFF800000> : vector<2x8xf32>
    %553 = vector.multi_reduction <maximumf>, %552, %cst_171 [2] : vector<2x8x7xf32> to vector<2x8xf32>
    %554 = vector.shape_cast %553 : vector<2x8xf32> to vector<2x8x1xf32>
    %555 = vector.broadcast %554 : vector<2x8x1xf32> to vector<2x8x7xf32>
    %556 = arith.subf %552, %555 : vector<2x8x7xf32>
    %557 = math.exp %556 : vector<2x8x7xf32>
    %cst_172 = arith.constant dense<0.000000e+00> : vector<2x8xf32>
    %558 = vector.multi_reduction <add>, %557, %cst_172 [2] : vector<2x8x7xf32> to vector<2x8xf32>
    %559 = vector.shape_cast %558 : vector<2x8xf32> to vector<2x8x1xf32>
    %560 = vector.broadcast %559 : vector<2x8x1xf32> to vector<2x8x7xf32>
    %561 = arith.divf %557, %560 : vector<2x8x7xf32>
    %cst_173 = arith.constant dense<0.000000e+00> : vector<2x8x8xf32>
    %562 = tpu.matmul %561, %549, %cst_173 {dimension_numbers = #tpu.dot_dimension_numbers<[2], [1], [1], [2], [0, 0, 0, 1, 1, 2], [0], [0]>} : vector<2x8x7xf32>, vector<2x7x8xf32>, vector<2x8x8xf32> -> vector<2x8x8xf32>
    %563 = vector.shape_cast %562 : vector<2x8x8xf32> to vector<16x8xf32>
    %564 = vector.extract_strided_slice %387 {offsets = [8, 0], sizes = [8, 32], strides = [1, 1]} : vector<32x32xf32> to vector<8x32xf32>
    %cst_174 = arith.constant dense<0.000000e+00> : vector<16x32xf32>
    %565 = tpu.matmul %563, %564, %cst_174 {dimension_numbers = #tpu.dot_dimension_numbers<[1], [0], [0], [1], [0, 0, 1, 1], [], []>} : vector<16x8xf32>, vector<8x32xf32>, vector<16x32xf32> -> vector<16x32xf32>
    %566 = arith.addf %546, %565 : vector<16x32xf32>
    %567 = vector.extract_strided_slice %517 {offsets = [0, 0, 16], sizes = [2, 8, 8], strides = [1, 1, 1]} : vector<2x8x32xf32> to vector<2x8x8xf32>
    %568 = vector.extract_strided_slice %522 {offsets = [0, 0, 16], sizes = [2, 7, 8], strides = [1, 1, 1]} : vector<2x7x32xf32> to vector<2x7x8xf32>
    %569 = vector.extract_strided_slice %524 {offsets = [0, 0, 16], sizes = [2, 7, 8], strides = [1, 1, 1]} : vector<2x7x32xf32> to vector<2x7x8xf32>
    %cst_175 = arith.constant dense<0.000000e+00> : vector<2x8x7xf32>
    %570 = tpu.matmul %567, %568, %cst_175 {dimension_numbers = #tpu.dot_dimension_numbers<[2], [2], [1], [1], [0, 0, 0, 1, 1, 1], [0], [0]>} : vector<2x8x8xf32>, vector<2x7x8xf32>, vector<2x8x7xf32> -> vector<2x8x7xf32>
    %cst_176 = arith.constant 0.353553385 : f32
    %571 = vector.broadcast %cst_176 : f32 to vector<2x8x7xf32>
    %572 = arith.mulf %570, %571 : vector<2x8x7xf32>
    %cst_177 = arith.constant dense<0xFF800000> : vector<2x8xf32>
    %573 = vector.multi_reduction <maximumf>, %572, %cst_177 [2] : vector<2x8x7xf32> to vector<2x8xf32>
    %574 = vector.shape_cast %573 : vector<2x8xf32> to vector<2x8x1xf32>
    %575 = vector.broadcast %574 : vector<2x8x1xf32> to vector<2x8x7xf32>
    %576 = arith.subf %572, %575 : vector<2x8x7xf32>
    %577 = math.exp %576 : vector<2x8x7xf32>
    %cst_178 = arith.constant dense<0.000000e+00> : vector<2x8xf32>
    %578 = vector.multi_reduction <add>, %577, %cst_178 [2] : vector<2x8x7xf32> to vector<2x8xf32>
    %579 = vector.shape_cast %578 : vector<2x8xf32> to vector<2x8x1xf32>
    %580 = vector.broadcast %579 : vector<2x8x1xf32> to vector<2x8x7xf32>
    %581 = arith.divf %577, %580 : vector<2x8x7xf32>
    %cst_179 = arith.constant dense<0.000000e+00> : vector<2x8x8xf32>
    %582 = tpu.matmul %581, %569, %cst_179 {dimension_numbers = #tpu.dot_dimension_numbers<[2], [1], [1], [2], [0, 0, 0, 1, 1, 2], [0], [0]>} : vector<2x8x7xf32>, vector<2x7x8xf32>, vector<2x8x8xf32> -> vector<2x8x8xf32>
    %583 = vector.shape_cast %582 : vector<2x8x8xf32> to vector<16x8xf32>
    %584 = vector.extract_strided_slice %387 {offsets = [16, 0], sizes = [8, 32], strides = [1, 1]} : vector<32x32xf32> to vector<8x32xf32>
    %cst_180 = arith.constant dense<0.000000e+00> : vector<16x32xf32>
    %585 = tpu.matmul %583, %584, %cst_180 {dimension_numbers = #tpu.dot_dimension_numbers<[1], [0], [0], [1], [0, 0, 1, 1], [], []>} : vector<16x8xf32>, vector<8x32xf32>, vector<16x32xf32> -> vector<16x32xf32>
    %586 = arith.addf %566, %585 : vector<16x32xf32>
    %587 = vector.extract_strided_slice %517 {offsets = [0, 0, 24], sizes = [2, 8, 8], strides = [1, 1, 1]} : vector<2x8x32xf32> to vector<2x8x8xf32>
    %588 = vector.extract_strided_slice %522 {offsets = [0, 0, 24], sizes = [2, 7, 8], strides = [1, 1, 1]} : vector<2x7x32xf32> to vector<2x7x8xf32>
    %589 = vector.extract_strided_slice %524 {offsets = [0, 0, 24], sizes = [2, 7, 8], strides = [1, 1, 1]} : vector<2x7x32xf32> to vector<2x7x8xf32>
    %cst_181 = arith.constant dense<0.000000e+00> : vector<2x8x7xf32>
    %590 = tpu.matmul %587, %588, %cst_181 {dimension_numbers = #tpu.dot_dimension_numbers<[2], [2], [1], [1], [0, 0, 0, 1, 1, 1], [0], [0]>} : vector<2x8x8xf32>, vector<2x7x8xf32>, vector<2x8x7xf32> -> vector<2x8x7xf32>
    %cst_182 = arith.constant 0.353553385 : f32
    %591 = vector.broadcast %cst_182 : f32 to vector<2x8x7xf32>
    %592 = arith.mulf %590, %591 : vector<2x8x7xf32>
    %cst_183 = arith.constant dense<0xFF800000> : vector<2x8xf32>
    %593 = vector.multi_reduction <maximumf>, %592, %cst_183 [2] : vector<2x8x7xf32> to vector<2x8xf32>
    %594 = vector.shape_cast %593 : vector<2x8xf32> to vector<2x8x1xf32>
    %595 = vector.broadcast %594 : vector<2x8x1xf32> to vector<2x8x7xf32>
    %596 = arith.subf %592, %595 : vector<2x8x7xf32>
    %597 = math.exp %596 : vector<2x8x7xf32>
    %cst_184 = arith.constant dense<0.000000e+00> : vector<2x8xf32>
    %598 = vector.multi_reduction <add>, %597, %cst_184 [2] : vector<2x8x7xf32> to vector<2x8xf32>
    %599 = vector.shape_cast %598 : vector<2x8xf32> to vector<2x8x1xf32>
    %600 = vector.broadcast %599 : vector<2x8x1xf32> to vector<2x8x7xf32>
    %601 = arith.divf %597, %600 : vector<2x8x7xf32>
    %cst_185 = arith.constant dense<0.000000e+00> : vector<2x8x8xf32>
    %602 = tpu.matmul %601, %589, %cst_185 {dimension_numbers = #tpu.dot_dimension_numbers<[2], [1], [1], [2], [0, 0, 0, 1, 1, 2], [0], [0]>} : vector<2x8x7xf32>, vector<2x7x8xf32>, vector<2x8x8xf32> -> vector<2x8x8xf32>
    %603 = vector.shape_cast %602 : vector<2x8x8xf32> to vector<16x8xf32>
    %604 = vector.extract_strided_slice %387 {offsets = [24, 0], sizes = [8, 32], strides = [1, 1]} : vector<32x32xf32> to vector<8x32xf32>
    %cst_186 = arith.constant dense<0.000000e+00> : vector<16x32xf32>
    %605 = tpu.matmul %603, %604, %cst_186 {dimension_numbers = #tpu.dot_dimension_numbers<[1], [0], [0], [1], [0, 0, 1, 1], [], []>} : vector<16x8xf32>, vector<8x32xf32>, vector<16x32xf32> -> vector<16x32xf32>
    %606 = arith.addf %586, %605 : vector<16x32xf32>
    %607 = arith.addf %513, %606 : vector<16x32xf32>
    %cst_187 = arith.constant dense<0.000000e+00> : vector<16xf32>
    %608 = vector.multi_reduction <add>, %607, %cst_187 [1] : vector<16x32xf32> to vector<16xf32>
    %609 = vector.shape_cast %608 : vector<16xf32> to vector<16x1xf32>
    %cst_188 = arith.constant 3.200000e+01 : f32
    %610 = vector.broadcast %cst_188 : f32 to vector<16x1xf32>
    %611 = arith.divf %609, %610 : vector<16x1xf32>
    %612 = vector.broadcast %611 : vector<16x1xf32> to vector<16x32xf32>
    %613 = arith.subf %607, %612 : vector<16x32xf32>
    %614 = arith.mulf %613, %613 : vector<16x32xf32>
    %cst_189 = arith.constant dense<0.000000e+00> : vector<16xf32>
    %615 = vector.multi_reduction <add>, %614, %cst_189 [1] : vector<16x32xf32> to vector<16xf32>
    %616 = vector.shape_cast %615 : vector<16xf32> to vector<16x1xf32>
    %cst_190 = arith.constant 3.200000e+01 : f32
    %617 = vector.broadcast %cst_190 : f32 to vector<16x1xf32>
    %618 = arith.divf %616, %617 : vector<16x1xf32>
    %cst_191 = arith.constant 9.99999974E-6 : f32
    %619 = vector.broadcast %cst_191 : f32 to vector<16x1xf32>
    %620 = arith.addf %618, %619 : vector<16x1xf32>
    %621 = math.rsqrt %620 : vector<16x1xf32>
    %622 = vector.broadcast %621 : vector<16x1xf32> to vector<16x32xf32>
    %623 = arith.mulf %613, %622 : vector<16x32xf32>
    %624 = vector.broadcast %398 : vector<1x32xf32> to vector<16x32xf32>
    %625 = arith.mulf %623, %624 : vector<16x32xf32>
    %626 = vector.broadcast %399 : vector<1x32xf32> to vector<16x32xf32>
    %627 = arith.addf %625, %626 : vector<16x32xf32>
    %cst_192 = arith.constant dense<0.000000e+00> : vector<16x64xf32>
    %628 = tpu.matmul %627, %388, %cst_192 {dimension_numbers = #tpu.dot_dimension_numbers<[1], [0], [0], [1], [0, 0, 1, 1], [], []>} : vector<16x32xf32>, vector<32x64xf32>, vector<16x64xf32> -> vector<16x64xf32>
    %629 = vector.broadcast %394 : vector<1x64xf32> to vector<16x64xf32>
    %630 = arith.addf %628, %629 : vector<16x64xf32>
    %cst_193 = arith.constant 5.000000e-01 : f32
    %631 = vector.broadcast %cst_193 : f32 to vector<16x64xf32>
    %632 = arith.mulf %631, %630 : vector<16x64xf32>
    %cst_194 = arith.constant 0.707106769 : f32
    %633 = vector.broadcast %cst_194 : f32 to vector<16x64xf32>
    %634 = arith.mulf %630, %633 : vector<16x64xf32>
    %635 = math.erf %634 : vector<16x64xf32>
    %cst_195 = arith.constant 1.000000e+00 : f32
    %636 = vector.broadcast %cst_195 : f32 to vector<16x64xf32>
    %637 = arith.addf %636, %635 : vector<16x64xf32>
    %638 = arith.mulf %632, %637 : vector<16x64xf32>
    %cst_196 = arith.constant dense<0.000000e+00> : vector<16x32xf32>
    %639 = tpu.matmul %638, %382, %cst_196 {dimension_numbers = #tpu.dot_dimension_numbers<[1], [0], [0], [1], [0, 0, 1, 1], [], []>} : vector<16x64xf32>, vector<64x32xf32>, vector<16x32xf32> -> vector<16x32xf32>
    %640 = vector.broadcast %395 : vector<1x32xf32> to vector<16x32xf32>
    %641 = arith.addf %639, %640 : vector<16x32xf32>
    %642 = arith.addf %627, %641 : vector<16x32xf32>
    %cst_197 = arith.constant dense<0.000000e+00> : vector<16xf32>
    %643 = vector.multi_reduction <add>, %642, %cst_197 [1] : vector<16x32xf32> to vector<16xf32>
    %644 = vector.shape_cast %643 : vector<16xf32> to vector<16x1xf32>
    %cst_198 = arith.constant 3.200000e+01 : f32
    %645 = vector.broadcast %cst_198 : f32 to vector<16x1xf32>
    %646 = arith.divf %644, %645 : vector<16x1xf32>
    %647 = vector.broadcast %646 : vector<16x1xf32> to vector<16x32xf32>
    %648 = arith.subf %642, %647 : vector<16x32xf32>
    %649 = arith.mulf %648, %648 : vector<16x32xf32>
    %cst_199 = arith.constant dense<0.000000e+00> : vector<16xf32>
    %650 = vector.multi_reduction <add>, %649, %cst_199 [1] : vector<16x32xf32> to vector<16xf32>
    %651 = vector.shape_cast %650 : vector<16xf32> to vector<16x1xf32>
    %cst_200 = arith.constant 3.200000e+01 : f32
    %652 = vector.broadcast %cst_200 : f32 to vector<16x1xf32>
    %653 = arith.divf %651, %652 : vector<16x1xf32>
    %cst_201 = arith.constant 9.99999974E-6 : f32
    %654 = vector.broadcast %cst_201 : f32 to vector<16x1xf32>
    %655 = arith.addf %653, %654 : vector<16x1xf32>
    %656 = math.rsqrt %655 : vector<16x1xf32>
    %657 = vector.broadcast %656 : vector<16x1xf32> to vector<16x32xf32>
    %658 = arith.mulf %648, %657 : vector<16x32xf32>
    %659 = vector.broadcast %400 : vector<1x32xf32> to vector<16x32xf32>
    %660 = arith.mulf %658, %659 : vector<16x32xf32>
    %661 = vector.broadcast %401 : vector<1x32xf32> to vector<16x32xf32>
    %662 = arith.addf %660, %661 : vector<16x32xf32>
    %c1_202 = arith.constant 1 : index
    %c0_203 = arith.constant 0 : index
    %c0_204 = arith.constant 0 : index
    %663 = vector.load %arg7[%c1_202, %c0_203, %c0_204] : memref<2x32x320xf32, #tpu.memory_space<vmem>>, vector<1x32x320xf32>
    %664 = vector.shape_cast %663 : vector<1x32x320xf32> to vector<32x320xf32>
    %c1_205 = arith.constant 1 : index
    %c0_206 = arith.constant 0 : index
    %c0_207 = arith.constant 0 : index
    %665 = vector.load %arg9[%c1_205, %c0_206, %c0_207] : memref<2x13x96xf32, #tpu.memory_space<vmem>>, vector<1x13x96xf32>
    %666 = vector.shape_cast %665 : vector<1x13x96xf32> to vector<13x96xf32>
    %c1_208 = arith.constant 1 : index
    %c0_209 = arith.constant 0 : index
    %c0_210 = arith.constant 0 : index
    %667 = vector.load %arg8[%c1_208, %c0_209, %c0_210] : memref<2x64x32xf32, #tpu.memory_space<vmem>>, vector<1x64x32xf32>
    %668 = vector.shape_cast %667 : vector<1x64x32xf32> to vector<64x32xf32>
    %669 = vector.extract_strided_slice %664 {offsets = [0, 0], sizes = [32, 96], strides = [1, 1]} : vector<32x320xf32> to vector<32x96xf32>
    %670 = vector.extract_strided_slice %664 {offsets = [0, 96], sizes = [32, 32], strides = [1, 1]} : vector<32x320xf32> to vector<32x32xf32>
    %671 = vector.extract_strided_slice %664 {offsets = [0, 128], sizes = [32, 32], strides = [1, 1]} : vector<32x320xf32> to vector<32x32xf32>
    %672 = vector.extract_strided_slice %664 {offsets = [0, 160], sizes = [32, 64], strides = [1, 1]} : vector<32x320xf32> to vector<32x64xf32>
    %673 = vector.extract_strided_slice %664 {offsets = [0, 224], sizes = [32, 32], strides = [1, 1]} : vector<32x320xf32> to vector<32x32xf32>
    %674 = vector.extract_strided_slice %664 {offsets = [0, 256], sizes = [32, 64], strides = [1, 1]} : vector<32x320xf32> to vector<32x64xf32>
    %675 = vector.extract_strided_slice %666 {offsets = [0, 0], sizes = [1, 96], strides = [1, 1]} : vector<13x96xf32> to vector<1x96xf32>
    %676 = vector.extract_strided_slice %666 {offsets = [1, 0], sizes = [1, 32], strides = [1, 1]} : vector<13x96xf32> to vector<1x32xf32>
    %677 = vector.extract_strided_slice %666 {offsets = [2, 0], sizes = [1, 32], strides = [1, 1]} : vector<13x96xf32> to vector<1x32xf32>
    %678 = vector.extract_strided_slice %666 {offsets = [3, 0], sizes = [1, 64], strides = [1, 1]} : vector<13x96xf32> to vector<1x64xf32>
    %679 = vector.extract_strided_slice %666 {offsets = [4, 0], sizes = [1, 32], strides = [1, 1]} : vector<13x96xf32> to vector<1x32xf32>
    %680 = vector.extract_strided_slice %666 {offsets = [5, 0], sizes = [1, 64], strides = [1, 1]} : vector<13x96xf32> to vector<1x64xf32>
    %681 = vector.extract_strided_slice %666 {offsets = [6, 0], sizes = [1, 32], strides = [1, 1]} : vector<13x96xf32> to vector<1x32xf32>
    %682 = vector.extract_strided_slice %666 {offsets = [7, 0], sizes = [1, 32], strides = [1, 1]} : vector<13x96xf32> to vector<1x32xf32>
    %683 = vector.extract_strided_slice %666 {offsets = [8, 0], sizes = [1, 32], strides = [1, 1]} : vector<13x96xf32> to vector<1x32xf32>
    %684 = vector.extract_strided_slice %666 {offsets = [9, 0], sizes = [1, 32], strides = [1, 1]} : vector<13x96xf32> to vector<1x32xf32>
    %685 = vector.extract_strided_slice %666 {offsets = [10, 0], sizes = [1, 32], strides = [1, 1]} : vector<13x96xf32> to vector<1x32xf32>
    %686 = vector.extract_strided_slice %666 {offsets = [11, 0], sizes = [1, 32], strides = [1, 1]} : vector<13x96xf32> to vector<1x32xf32>
    %687 = vector.extract_strided_slice %666 {offsets = [12, 0], sizes = [1, 32], strides = [1, 1]} : vector<13x96xf32> to vector<1x32xf32>
    %cst_211 = arith.constant dense<0.000000e+00> : vector<16x96xf32>
    %688 = tpu.matmul %662, %669, %cst_211 {dimension_numbers = #tpu.dot_dimension_numbers<[1], [0], [0], [1], [0, 0, 1, 1], [], []>} : vector<16x32xf32>, vector<32x96xf32>, vector<16x96xf32> -> vector<16x96xf32>
    %689 = vector.broadcast %675 : vector<1x96xf32> to vector<16x96xf32>
    %690 = arith.addf %688, %689 : vector<16x96xf32>
    %691 = vector.extract_strided_slice %690 {offsets = [0, 0], sizes = [16, 32], strides = [1, 1]} : vector<16x96xf32> to vector<16x32xf32>
    %692 = vector.shape_cast %691 : vector<16x32xf32> to vector<2x8x32xf32>
    %693 = vector.extract_strided_slice %690 {offsets = [0, 32], sizes = [16, 32], strides = [1, 1]} : vector<16x96xf32> to vector<16x32xf32>
    %694 = vector.shape_cast %693 : vector<16x32xf32> to vector<2x8x32xf32>
    %695 = vector.extract_strided_slice %690 {offsets = [0, 64], sizes = [16, 32], strides = [1, 1]} : vector<16x96xf32> to vector<16x32xf32>
    %696 = vector.shape_cast %695 : vector<16x32xf32> to vector<2x8x32xf32>
    %697 = vector.shape_cast %676 : vector<1x32xf32> to vector<1x32xf32>
    %698 = vector.broadcast %697 : vector<1x32xf32> to vector<16x32xf32>
    %699 = vector.extract_strided_slice %692 {offsets = [0, 0, 0], sizes = [2, 8, 8], strides = [1, 1, 1]} : vector<2x8x32xf32> to vector<2x8x8xf32>
    %700 = vector.extract_strided_slice %694 {offsets = [0, 0, 0], sizes = [2, 8, 8], strides = [1, 1, 1]} : vector<2x8x32xf32> to vector<2x8x8xf32>
    %701 = vector.extract_strided_slice %696 {offsets = [0, 0, 0], sizes = [2, 8, 8], strides = [1, 1, 1]} : vector<2x8x32xf32> to vector<2x8x8xf32>
    %cst_212 = arith.constant dense<0.000000e+00> : vector<2x8x8xf32>
    %702 = tpu.matmul %699, %700, %cst_212 {dimension_numbers = #tpu.dot_dimension_numbers<[2], [2], [1], [1], [0, 0, 0, 1, 1, 1], [0], [0]>} : vector<2x8x8xf32>, vector<2x8x8xf32>, vector<2x8x8xf32> -> vector<2x8x8xf32>
    %cst_213 = arith.constant 0.353553385 : f32
    %703 = vector.broadcast %cst_213 : f32 to vector<2x8x8xf32>
    %704 = arith.mulf %702, %703 : vector<2x8x8xf32>
    %cst_214 = arith.constant dense<0xFF800000> : vector<2x8xf32>
    %705 = vector.multi_reduction <maximumf>, %704, %cst_214 [2] : vector<2x8x8xf32> to vector<2x8xf32>
    %706 = vector.shape_cast %705 : vector<2x8xf32> to vector<2x8x1xf32>
    %707 = vector.broadcast %706 : vector<2x8x1xf32> to vector<2x8x8xf32>
    %708 = arith.subf %704, %707 : vector<2x8x8xf32>
    %709 = math.exp %708 : vector<2x8x8xf32>
    %cst_215 = arith.constant dense<0.000000e+00> : vector<2x8xf32>
    %710 = vector.multi_reduction <add>, %709, %cst_215 [2] : vector<2x8x8xf32> to vector<2x8xf32>
    %711 = vector.shape_cast %710 : vector<2x8xf32> to vector<2x8x1xf32>
    %712 = vector.broadcast %711 : vector<2x8x1xf32> to vector<2x8x8xf32>
    %713 = arith.divf %709, %712 : vector<2x8x8xf32>
    %cst_216 = arith.constant dense<0.000000e+00> : vector<2x8x8xf32>
    %714 = tpu.matmul %713, %701, %cst_216 {dimension_numbers = #tpu.dot_dimension_numbers<[2], [1], [1], [2], [0, 0, 0, 1, 1, 2], [0], [0]>} : vector<2x8x8xf32>, vector<2x8x8xf32>, vector<2x8x8xf32> -> vector<2x8x8xf32>
    %715 = vector.shape_cast %714 : vector<2x8x8xf32> to vector<16x8xf32>
    %716 = vector.extract_strided_slice %670 {offsets = [0, 0], sizes = [8, 32], strides = [1, 1]} : vector<32x32xf32> to vector<8x32xf32>
    %cst_217 = arith.constant dense<0.000000e+00> : vector<16x32xf32>
    %717 = tpu.matmul %715, %716, %cst_217 {dimension_numbers = #tpu.dot_dimension_numbers<[1], [0], [0], [1], [0, 0, 1, 1], [], []>} : vector<16x8xf32>, vector<8x32xf32>, vector<16x32xf32> -> vector<16x32xf32>
    %718 = arith.addf %698, %717 : vector<16x32xf32>
    %719 = vector.extract_strided_slice %692 {offsets = [0, 0, 8], sizes = [2, 8, 8], strides = [1, 1, 1]} : vector<2x8x32xf32> to vector<2x8x8xf32>
    %720 = vector.extract_strided_slice %694 {offsets = [0, 0, 8], sizes = [2, 8, 8], strides = [1, 1, 1]} : vector<2x8x32xf32> to vector<2x8x8xf32>
    %721 = vector.extract_strided_slice %696 {offsets = [0, 0, 8], sizes = [2, 8, 8], strides = [1, 1, 1]} : vector<2x8x32xf32> to vector<2x8x8xf32>
    %cst_218 = arith.constant dense<0.000000e+00> : vector<2x8x8xf32>
    %722 = tpu.matmul %719, %720, %cst_218 {dimension_numbers = #tpu.dot_dimension_numbers<[2], [2], [1], [1], [0, 0, 0, 1, 1, 1], [0], [0]>} : vector<2x8x8xf32>, vector<2x8x8xf32>, vector<2x8x8xf32> -> vector<2x8x8xf32>
    %cst_219 = arith.constant 0.353553385 : f32
    %723 = vector.broadcast %cst_219 : f32 to vector<2x8x8xf32>
    %724 = arith.mulf %722, %723 : vector<2x8x8xf32>
    %cst_220 = arith.constant dense<0xFF800000> : vector<2x8xf32>
    %725 = vector.multi_reduction <maximumf>, %724, %cst_220 [2] : vector<2x8x8xf32> to vector<2x8xf32>
    %726 = vector.shape_cast %725 : vector<2x8xf32> to vector<2x8x1xf32>
    %727 = vector.broadcast %726 : vector<2x8x1xf32> to vector<2x8x8xf32>
    %728 = arith.subf %724, %727 : vector<2x8x8xf32>
    %729 = math.exp %728 : vector<2x8x8xf32>
    %cst_221 = arith.constant dense<0.000000e+00> : vector<2x8xf32>
    %730 = vector.multi_reduction <add>, %729, %cst_221 [2] : vector<2x8x8xf32> to vector<2x8xf32>
    %731 = vector.shape_cast %730 : vector<2x8xf32> to vector<2x8x1xf32>
    %732 = vector.broadcast %731 : vector<2x8x1xf32> to vector<2x8x8xf32>
    %733 = arith.divf %729, %732 : vector<2x8x8xf32>
    %cst_222 = arith.constant dense<0.000000e+00> : vector<2x8x8xf32>
    %734 = tpu.matmul %733, %721, %cst_222 {dimension_numbers = #tpu.dot_dimension_numbers<[2], [1], [1], [2], [0, 0, 0, 1, 1, 2], [0], [0]>} : vector<2x8x8xf32>, vector<2x8x8xf32>, vector<2x8x8xf32> -> vector<2x8x8xf32>
    %735 = vector.shape_cast %734 : vector<2x8x8xf32> to vector<16x8xf32>
    %736 = vector.extract_strided_slice %670 {offsets = [8, 0], sizes = [8, 32], strides = [1, 1]} : vector<32x32xf32> to vector<8x32xf32>
    %cst_223 = arith.constant dense<0.000000e+00> : vector<16x32xf32>
    %737 = tpu.matmul %735, %736, %cst_223 {dimension_numbers = #tpu.dot_dimension_numbers<[1], [0], [0], [1], [0, 0, 1, 1], [], []>} : vector<16x8xf32>, vector<8x32xf32>, vector<16x32xf32> -> vector<16x32xf32>
    %738 = arith.addf %718, %737 : vector<16x32xf32>
    %739 = vector.extract_strided_slice %692 {offsets = [0, 0, 16], sizes = [2, 8, 8], strides = [1, 1, 1]} : vector<2x8x32xf32> to vector<2x8x8xf32>
    %740 = vector.extract_strided_slice %694 {offsets = [0, 0, 16], sizes = [2, 8, 8], strides = [1, 1, 1]} : vector<2x8x32xf32> to vector<2x8x8xf32>
    %741 = vector.extract_strided_slice %696 {offsets = [0, 0, 16], sizes = [2, 8, 8], strides = [1, 1, 1]} : vector<2x8x32xf32> to vector<2x8x8xf32>
    %cst_224 = arith.constant dense<0.000000e+00> : vector<2x8x8xf32>
    %742 = tpu.matmul %739, %740, %cst_224 {dimension_numbers = #tpu.dot_dimension_numbers<[2], [2], [1], [1], [0, 0, 0, 1, 1, 1], [0], [0]>} : vector<2x8x8xf32>, vector<2x8x8xf32>, vector<2x8x8xf32> -> vector<2x8x8xf32>
    %cst_225 = arith.constant 0.353553385 : f32
    %743 = vector.broadcast %cst_225 : f32 to vector<2x8x8xf32>
    %744 = arith.mulf %742, %743 : vector<2x8x8xf32>
    %cst_226 = arith.constant dense<0xFF800000> : vector<2x8xf32>
    %745 = vector.multi_reduction <maximumf>, %744, %cst_226 [2] : vector<2x8x8xf32> to vector<2x8xf32>
    %746 = vector.shape_cast %745 : vector<2x8xf32> to vector<2x8x1xf32>
    %747 = vector.broadcast %746 : vector<2x8x1xf32> to vector<2x8x8xf32>
    %748 = arith.subf %744, %747 : vector<2x8x8xf32>
    %749 = math.exp %748 : vector<2x8x8xf32>
    %cst_227 = arith.constant dense<0.000000e+00> : vector<2x8xf32>
    %750 = vector.multi_reduction <add>, %749, %cst_227 [2] : vector<2x8x8xf32> to vector<2x8xf32>
    %751 = vector.shape_cast %750 : vector<2x8xf32> to vector<2x8x1xf32>
    %752 = vector.broadcast %751 : vector<2x8x1xf32> to vector<2x8x8xf32>
    %753 = arith.divf %749, %752 : vector<2x8x8xf32>
    %cst_228 = arith.constant dense<0.000000e+00> : vector<2x8x8xf32>
    %754 = tpu.matmul %753, %741, %cst_228 {dimension_numbers = #tpu.dot_dimension_numbers<[2], [1], [1], [2], [0, 0, 0, 1, 1, 2], [0], [0]>} : vector<2x8x8xf32>, vector<2x8x8xf32>, vector<2x8x8xf32> -> vector<2x8x8xf32>
    %755 = vector.shape_cast %754 : vector<2x8x8xf32> to vector<16x8xf32>
    %756 = vector.extract_strided_slice %670 {offsets = [16, 0], sizes = [8, 32], strides = [1, 1]} : vector<32x32xf32> to vector<8x32xf32>
    %cst_229 = arith.constant dense<0.000000e+00> : vector<16x32xf32>
    %757 = tpu.matmul %755, %756, %cst_229 {dimension_numbers = #tpu.dot_dimension_numbers<[1], [0], [0], [1], [0, 0, 1, 1], [], []>} : vector<16x8xf32>, vector<8x32xf32>, vector<16x32xf32> -> vector<16x32xf32>
    %758 = arith.addf %738, %757 : vector<16x32xf32>
    %759 = vector.extract_strided_slice %692 {offsets = [0, 0, 24], sizes = [2, 8, 8], strides = [1, 1, 1]} : vector<2x8x32xf32> to vector<2x8x8xf32>
    %760 = vector.extract_strided_slice %694 {offsets = [0, 0, 24], sizes = [2, 8, 8], strides = [1, 1, 1]} : vector<2x8x32xf32> to vector<2x8x8xf32>
    %761 = vector.extract_strided_slice %696 {offsets = [0, 0, 24], sizes = [2, 8, 8], strides = [1, 1, 1]} : vector<2x8x32xf32> to vector<2x8x8xf32>
    %cst_230 = arith.constant dense<0.000000e+00> : vector<2x8x8xf32>
    %762 = tpu.matmul %759, %760, %cst_230 {dimension_numbers = #tpu.dot_dimension_numbers<[2], [2], [1], [1], [0, 0, 0, 1, 1, 1], [0], [0]>} : vector<2x8x8xf32>, vector<2x8x8xf32>, vector<2x8x8xf32> -> vector<2x8x8xf32>
    %cst_231 = arith.constant 0.353553385 : f32
    %763 = vector.broadcast %cst_231 : f32 to vector<2x8x8xf32>
    %764 = arith.mulf %762, %763 : vector<2x8x8xf32>
    %cst_232 = arith.constant dense<0xFF800000> : vector<2x8xf32>
    %765 = vector.multi_reduction <maximumf>, %764, %cst_232 [2] : vector<2x8x8xf32> to vector<2x8xf32>
    %766 = vector.shape_cast %765 : vector<2x8xf32> to vector<2x8x1xf32>
    %767 = vector.broadcast %766 : vector<2x8x1xf32> to vector<2x8x8xf32>
    %768 = arith.subf %764, %767 : vector<2x8x8xf32>
    %769 = math.exp %768 : vector<2x8x8xf32>
    %cst_233 = arith.constant dense<0.000000e+00> : vector<2x8xf32>
    %770 = vector.multi_reduction <add>, %769, %cst_233 [2] : vector<2x8x8xf32> to vector<2x8xf32>
    %771 = vector.shape_cast %770 : vector<2x8xf32> to vector<2x8x1xf32>
    %772 = vector.broadcast %771 : vector<2x8x1xf32> to vector<2x8x8xf32>
    %773 = arith.divf %769, %772 : vector<2x8x8xf32>
    %cst_234 = arith.constant dense<0.000000e+00> : vector<2x8x8xf32>
    %774 = tpu.matmul %773, %761, %cst_234 {dimension_numbers = #tpu.dot_dimension_numbers<[2], [1], [1], [2], [0, 0, 0, 1, 1, 2], [0], [0]>} : vector<2x8x8xf32>, vector<2x8x8xf32>, vector<2x8x8xf32> -> vector<2x8x8xf32>
    %775 = vector.shape_cast %774 : vector<2x8x8xf32> to vector<16x8xf32>
    %776 = vector.extract_strided_slice %670 {offsets = [24, 0], sizes = [8, 32], strides = [1, 1]} : vector<32x32xf32> to vector<8x32xf32>
    %cst_235 = arith.constant dense<0.000000e+00> : vector<16x32xf32>
    %777 = tpu.matmul %775, %776, %cst_235 {dimension_numbers = #tpu.dot_dimension_numbers<[1], [0], [0], [1], [0, 0, 1, 1], [], []>} : vector<16x8xf32>, vector<8x32xf32>, vector<16x32xf32> -> vector<16x32xf32>
    %778 = arith.addf %758, %777 : vector<16x32xf32>
    %779 = arith.addf %662, %778 : vector<16x32xf32>
    %cst_236 = arith.constant dense<0.000000e+00> : vector<16xf32>
    %780 = vector.multi_reduction <add>, %779, %cst_236 [1] : vector<16x32xf32> to vector<16xf32>
    %781 = vector.shape_cast %780 : vector<16xf32> to vector<16x1xf32>
    %cst_237 = arith.constant 3.200000e+01 : f32
    %782 = vector.broadcast %cst_237 : f32 to vector<16x1xf32>
    %783 = arith.divf %781, %782 : vector<16x1xf32>
    %784 = vector.broadcast %783 : vector<16x1xf32> to vector<16x32xf32>
    %785 = arith.subf %779, %784 : vector<16x32xf32>
    %786 = arith.mulf %785, %785 : vector<16x32xf32>
    %cst_238 = arith.constant dense<0.000000e+00> : vector<16xf32>
    %787 = vector.multi_reduction <add>, %786, %cst_238 [1] : vector<16x32xf32> to vector<16xf32>
    %788 = vector.shape_cast %787 : vector<16xf32> to vector<16x1xf32>
    %cst_239 = arith.constant 3.200000e+01 : f32
    %789 = vector.broadcast %cst_239 : f32 to vector<16x1xf32>
    %790 = arith.divf %788, %789 : vector<16x1xf32>
    %cst_240 = arith.constant 9.99999974E-6 : f32
    %791 = vector.broadcast %cst_240 : f32 to vector<16x1xf32>
    %792 = arith.addf %790, %791 : vector<16x1xf32>
    %793 = math.rsqrt %792 : vector<16x1xf32>
    %794 = vector.broadcast %793 : vector<16x1xf32> to vector<16x32xf32>
    %795 = arith.mulf %785, %794 : vector<16x32xf32>
    %796 = vector.broadcast %682 : vector<1x32xf32> to vector<16x32xf32>
    %797 = arith.mulf %795, %796 : vector<16x32xf32>
    %798 = vector.broadcast %683 : vector<1x32xf32> to vector<16x32xf32>
    %799 = arith.addf %797, %798 : vector<16x32xf32>
    %cst_241 = arith.constant dense<0.000000e+00> : vector<16x32xf32>
    %800 = tpu.matmul %799, %671, %cst_241 {dimension_numbers = #tpu.dot_dimension_numbers<[1], [0], [0], [1], [0, 0, 1, 1], [], []>} : vector<16x32xf32>, vector<32x32xf32>, vector<16x32xf32> -> vector<16x32xf32>
    %801 = vector.broadcast %677 : vector<1x32xf32> to vector<16x32xf32>
    %802 = arith.addf %800, %801 : vector<16x32xf32>
    %803 = vector.shape_cast %802 : vector<16x32xf32> to vector<2x8x32xf32>
    %cst_242 = arith.constant dense<0.000000e+00> : vector<14x64xf32>
    %804 = tpu.matmul %376, %672, %cst_242 {dimension_numbers = #tpu.dot_dimension_numbers<[1], [0], [0], [1], [0, 0, 1, 1], [], []>} : vector<14x32xf32>, vector<32x64xf32>, vector<14x64xf32> -> vector<14x64xf32>
    %805 = vector.broadcast %678 : vector<1x64xf32> to vector<14x64xf32>
    %806 = arith.addf %804, %805 : vector<14x64xf32>
    %807 = vector.extract_strided_slice %806 {offsets = [0, 0], sizes = [14, 32], strides = [1, 1]} : vector<14x64xf32> to vector<14x32xf32>
    %808 = vector.shape_cast %807 : vector<14x32xf32> to vector<2x7x32xf32>
    %809 = vector.extract_strided_slice %806 {offsets = [0, 32], sizes = [14, 32], strides = [1, 1]} : vector<14x64xf32> to vector<14x32xf32>
    %810 = vector.shape_cast %809 : vector<14x32xf32> to vector<2x7x32xf32>
    %811 = vector.shape_cast %679 : vector<1x32xf32> to vector<1x32xf32>
    %812 = vector.broadcast %811 : vector<1x32xf32> to vector<16x32xf32>
    %813 = vector.extract_strided_slice %803 {offsets = [0, 0, 0], sizes = [2, 8, 8], strides = [1, 1, 1]} : vector<2x8x32xf32> to vector<2x8x8xf32>
    %814 = vector.extract_strided_slice %808 {offsets = [0, 0, 0], sizes = [2, 7, 8], strides = [1, 1, 1]} : vector<2x7x32xf32> to vector<2x7x8xf32>
    %815 = vector.extract_strided_slice %810 {offsets = [0, 0, 0], sizes = [2, 7, 8], strides = [1, 1, 1]} : vector<2x7x32xf32> to vector<2x7x8xf32>
    %cst_243 = arith.constant dense<0.000000e+00> : vector<2x8x7xf32>
    %816 = tpu.matmul %813, %814, %cst_243 {dimension_numbers = #tpu.dot_dimension_numbers<[2], [2], [1], [1], [0, 0, 0, 1, 1, 1], [0], [0]>} : vector<2x8x8xf32>, vector<2x7x8xf32>, vector<2x8x7xf32> -> vector<2x8x7xf32>
    %cst_244 = arith.constant 0.353553385 : f32
    %817 = vector.broadcast %cst_244 : f32 to vector<2x8x7xf32>
    %818 = arith.mulf %816, %817 : vector<2x8x7xf32>
    %cst_245 = arith.constant dense<0xFF800000> : vector<2x8xf32>
    %819 = vector.multi_reduction <maximumf>, %818, %cst_245 [2] : vector<2x8x7xf32> to vector<2x8xf32>
    %820 = vector.shape_cast %819 : vector<2x8xf32> to vector<2x8x1xf32>
    %821 = vector.broadcast %820 : vector<2x8x1xf32> to vector<2x8x7xf32>
    %822 = arith.subf %818, %821 : vector<2x8x7xf32>
    %823 = math.exp %822 : vector<2x8x7xf32>
    %cst_246 = arith.constant dense<0.000000e+00> : vector<2x8xf32>
    %824 = vector.multi_reduction <add>, %823, %cst_246 [2] : vector<2x8x7xf32> to vector<2x8xf32>
    %825 = vector.shape_cast %824 : vector<2x8xf32> to vector<2x8x1xf32>
    %826 = vector.broadcast %825 : vector<2x8x1xf32> to vector<2x8x7xf32>
    %827 = arith.divf %823, %826 : vector<2x8x7xf32>
    %cst_247 = arith.constant dense<0.000000e+00> : vector<2x8x8xf32>
    %828 = tpu.matmul %827, %815, %cst_247 {dimension_numbers = #tpu.dot_dimension_numbers<[2], [1], [1], [2], [0, 0, 0, 1, 1, 2], [0], [0]>} : vector<2x8x7xf32>, vector<2x7x8xf32>, vector<2x8x8xf32> -> vector<2x8x8xf32>
    %829 = vector.shape_cast %828 : vector<2x8x8xf32> to vector<16x8xf32>
    %830 = vector.extract_strided_slice %673 {offsets = [0, 0], sizes = [8, 32], strides = [1, 1]} : vector<32x32xf32> to vector<8x32xf32>
    %cst_248 = arith.constant dense<0.000000e+00> : vector<16x32xf32>
    %831 = tpu.matmul %829, %830, %cst_248 {dimension_numbers = #tpu.dot_dimension_numbers<[1], [0], [0], [1], [0, 0, 1, 1], [], []>} : vector<16x8xf32>, vector<8x32xf32>, vector<16x32xf32> -> vector<16x32xf32>
    %832 = arith.addf %812, %831 : vector<16x32xf32>
    %833 = vector.extract_strided_slice %803 {offsets = [0, 0, 8], sizes = [2, 8, 8], strides = [1, 1, 1]} : vector<2x8x32xf32> to vector<2x8x8xf32>
    %834 = vector.extract_strided_slice %808 {offsets = [0, 0, 8], sizes = [2, 7, 8], strides = [1, 1, 1]} : vector<2x7x32xf32> to vector<2x7x8xf32>
    %835 = vector.extract_strided_slice %810 {offsets = [0, 0, 8], sizes = [2, 7, 8], strides = [1, 1, 1]} : vector<2x7x32xf32> to vector<2x7x8xf32>
    %cst_249 = arith.constant dense<0.000000e+00> : vector<2x8x7xf32>
    %836 = tpu.matmul %833, %834, %cst_249 {dimension_numbers = #tpu.dot_dimension_numbers<[2], [2], [1], [1], [0, 0, 0, 1, 1, 1], [0], [0]>} : vector<2x8x8xf32>, vector<2x7x8xf32>, vector<2x8x7xf32> -> vector<2x8x7xf32>
    %cst_250 = arith.constant 0.353553385 : f32
    %837 = vector.broadcast %cst_250 : f32 to vector<2x8x7xf32>
    %838 = arith.mulf %836, %837 : vector<2x8x7xf32>
    %cst_251 = arith.constant dense<0xFF800000> : vector<2x8xf32>
    %839 = vector.multi_reduction <maximumf>, %838, %cst_251 [2] : vector<2x8x7xf32> to vector<2x8xf32>
    %840 = vector.shape_cast %839 : vector<2x8xf32> to vector<2x8x1xf32>
    %841 = vector.broadcast %840 : vector<2x8x1xf32> to vector<2x8x7xf32>
    %842 = arith.subf %838, %841 : vector<2x8x7xf32>
    %843 = math.exp %842 : vector<2x8x7xf32>
    %cst_252 = arith.constant dense<0.000000e+00> : vector<2x8xf32>
    %844 = vector.multi_reduction <add>, %843, %cst_252 [2] : vector<2x8x7xf32> to vector<2x8xf32>
    %845 = vector.shape_cast %844 : vector<2x8xf32> to vector<2x8x1xf32>
    %846 = vector.broadcast %845 : vector<2x8x1xf32> to vector<2x8x7xf32>
    %847 = arith.divf %843, %846 : vector<2x8x7xf32>
    %cst_253 = arith.constant dense<0.000000e+00> : vector<2x8x8xf32>
    %848 = tpu.matmul %847, %835, %cst_253 {dimension_numbers = #tpu.dot_dimension_numbers<[2], [1], [1], [2], [0, 0, 0, 1, 1, 2], [0], [0]>} : vector<2x8x7xf32>, vector<2x7x8xf32>, vector<2x8x8xf32> -> vector<2x8x8xf32>
    %849 = vector.shape_cast %848 : vector<2x8x8xf32> to vector<16x8xf32>
    %850 = vector.extract_strided_slice %673 {offsets = [8, 0], sizes = [8, 32], strides = [1, 1]} : vector<32x32xf32> to vector<8x32xf32>
    %cst_254 = arith.constant dense<0.000000e+00> : vector<16x32xf32>
    %851 = tpu.matmul %849, %850, %cst_254 {dimension_numbers = #tpu.dot_dimension_numbers<[1], [0], [0], [1], [0, 0, 1, 1], [], []>} : vector<16x8xf32>, vector<8x32xf32>, vector<16x32xf32> -> vector<16x32xf32>
    %852 = arith.addf %832, %851 : vector<16x32xf32>
    %853 = vector.extract_strided_slice %803 {offsets = [0, 0, 16], sizes = [2, 8, 8], strides = [1, 1, 1]} : vector<2x8x32xf32> to vector<2x8x8xf32>
    %854 = vector.extract_strided_slice %808 {offsets = [0, 0, 16], sizes = [2, 7, 8], strides = [1, 1, 1]} : vector<2x7x32xf32> to vector<2x7x8xf32>
    %855 = vector.extract_strided_slice %810 {offsets = [0, 0, 16], sizes = [2, 7, 8], strides = [1, 1, 1]} : vector<2x7x32xf32> to vector<2x7x8xf32>
    %cst_255 = arith.constant dense<0.000000e+00> : vector<2x8x7xf32>
    %856 = tpu.matmul %853, %854, %cst_255 {dimension_numbers = #tpu.dot_dimension_numbers<[2], [2], [1], [1], [0, 0, 0, 1, 1, 1], [0], [0]>} : vector<2x8x8xf32>, vector<2x7x8xf32>, vector<2x8x7xf32> -> vector<2x8x7xf32>
    %cst_256 = arith.constant 0.353553385 : f32
    %857 = vector.broadcast %cst_256 : f32 to vector<2x8x7xf32>
    %858 = arith.mulf %856, %857 : vector<2x8x7xf32>
    %cst_257 = arith.constant dense<0xFF800000> : vector<2x8xf32>
    %859 = vector.multi_reduction <maximumf>, %858, %cst_257 [2] : vector<2x8x7xf32> to vector<2x8xf32>
    %860 = vector.shape_cast %859 : vector<2x8xf32> to vector<2x8x1xf32>
    %861 = vector.broadcast %860 : vector<2x8x1xf32> to vector<2x8x7xf32>
    %862 = arith.subf %858, %861 : vector<2x8x7xf32>
    %863 = math.exp %862 : vector<2x8x7xf32>
    %cst_258 = arith.constant dense<0.000000e+00> : vector<2x8xf32>
    %864 = vector.multi_reduction <add>, %863, %cst_258 [2] : vector<2x8x7xf32> to vector<2x8xf32>
    %865 = vector.shape_cast %864 : vector<2x8xf32> to vector<2x8x1xf32>
    %866 = vector.broadcast %865 : vector<2x8x1xf32> to vector<2x8x7xf32>
    %867 = arith.divf %863, %866 : vector<2x8x7xf32>
    %cst_259 = arith.constant dense<0.000000e+00> : vector<2x8x8xf32>
    %868 = tpu.matmul %867, %855, %cst_259 {dimension_numbers = #tpu.dot_dimension_numbers<[2], [1], [1], [2], [0, 0, 0, 1, 1, 2], [0], [0]>} : vector<2x8x7xf32>, vector<2x7x8xf32>, vector<2x8x8xf32> -> vector<2x8x8xf32>
    %869 = vector.shape_cast %868 : vector<2x8x8xf32> to vector<16x8xf32>
    %870 = vector.extract_strided_slice %673 {offsets = [16, 0], sizes = [8, 32], strides = [1, 1]} : vector<32x32xf32> to vector<8x32xf32>
    %cst_260 = arith.constant dense<0.000000e+00> : vector<16x32xf32>
    %871 = tpu.matmul %869, %870, %cst_260 {dimension_numbers = #tpu.dot_dimension_numbers<[1], [0], [0], [1], [0, 0, 1, 1], [], []>} : vector<16x8xf32>, vector<8x32xf32>, vector<16x32xf32> -> vector<16x32xf32>
    %872 = arith.addf %852, %871 : vector<16x32xf32>
    %873 = vector.extract_strided_slice %803 {offsets = [0, 0, 24], sizes = [2, 8, 8], strides = [1, 1, 1]} : vector<2x8x32xf32> to vector<2x8x8xf32>
    %874 = vector.extract_strided_slice %808 {offsets = [0, 0, 24], sizes = [2, 7, 8], strides = [1, 1, 1]} : vector<2x7x32xf32> to vector<2x7x8xf32>
    %875 = vector.extract_strided_slice %810 {offsets = [0, 0, 24], sizes = [2, 7, 8], strides = [1, 1, 1]} : vector<2x7x32xf32> to vector<2x7x8xf32>
    %cst_261 = arith.constant dense<0.000000e+00> : vector<2x8x7xf32>
    %876 = tpu.matmul %873, %874, %cst_261 {dimension_numbers = #tpu.dot_dimension_numbers<[2], [2], [1], [1], [0, 0, 0, 1, 1, 1], [0], [0]>} : vector<2x8x8xf32>, vector<2x7x8xf32>, vector<2x8x7xf32> -> vector<2x8x7xf32>
    %cst_262 = arith.constant 0.353553385 : f32
    %877 = vector.broadcast %cst_262 : f32 to vector<2x8x7xf32>
    %878 = arith.mulf %876, %877 : vector<2x8x7xf32>
    %cst_263 = arith.constant dense<0xFF800000> : vector<2x8xf32>
    %879 = vector.multi_reduction <maximumf>, %878, %cst_263 [2] : vector<2x8x7xf32> to vector<2x8xf32>
    %880 = vector.shape_cast %879 : vector<2x8xf32> to vector<2x8x1xf32>
    %881 = vector.broadcast %880 : vector<2x8x1xf32> to vector<2x8x7xf32>
    %882 = arith.subf %878, %881 : vector<2x8x7xf32>
    %883 = math.exp %882 : vector<2x8x7xf32>
    %cst_264 = arith.constant dense<0.000000e+00> : vector<2x8xf32>
    %884 = vector.multi_reduction <add>, %883, %cst_264 [2] : vector<2x8x7xf32> to vector<2x8xf32>
    %885 = vector.shape_cast %884 : vector<2x8xf32> to vector<2x8x1xf32>
    %886 = vector.broadcast %885 : vector<2x8x1xf32> to vector<2x8x7xf32>
    %887 = arith.divf %883, %886 : vector<2x8x7xf32>
    %cst_265 = arith.constant dense<0.000000e+00> : vector<2x8x8xf32>
    %888 = tpu.matmul %887, %875, %cst_265 {dimension_numbers = #tpu.dot_dimension_numbers<[2], [1], [1], [2], [0, 0, 0, 1, 1, 2], [0], [0]>} : vector<2x8x7xf32>, vector<2x7x8xf32>, vector<2x8x8xf32> -> vector<2x8x8xf32>
    %889 = vector.shape_cast %888 : vector<2x8x8xf32> to vector<16x8xf32>
    %890 = vector.extract_strided_slice %673 {offsets = [24, 0], sizes = [8, 32], strides = [1, 1]} : vector<32x32xf32> to vector<8x32xf32>
    %cst_266 = arith.constant dense<0.000000e+00> : vector<16x32xf32>
    %891 = tpu.matmul %889, %890, %cst_266 {dimension_numbers = #tpu.dot_dimension_numbers<[1], [0], [0], [1], [0, 0, 1, 1], [], []>} : vector<16x8xf32>, vector<8x32xf32>, vector<16x32xf32> -> vector<16x32xf32>
    %892 = arith.addf %872, %891 : vector<16x32xf32>
    %893 = arith.addf %799, %892 : vector<16x32xf32>
    %cst_267 = arith.constant dense<0.000000e+00> : vector<16xf32>
    %894 = vector.multi_reduction <add>, %893, %cst_267 [1] : vector<16x32xf32> to vector<16xf32>
    %895 = vector.shape_cast %894 : vector<16xf32> to vector<16x1xf32>
    %cst_268 = arith.constant 3.200000e+01 : f32
    %896 = vector.broadcast %cst_268 : f32 to vector<16x1xf32>
    %897 = arith.divf %895, %896 : vector<16x1xf32>
    %898 = vector.broadcast %897 : vector<16x1xf32> to vector<16x32xf32>
    %899 = arith.subf %893, %898 : vector<16x32xf32>
    %900 = arith.mulf %899, %899 : vector<16x32xf32>
    %cst_269 = arith.constant dense<0.000000e+00> : vector<16xf32>
    %901 = vector.multi_reduction <add>, %900, %cst_269 [1] : vector<16x32xf32> to vector<16xf32>
    %902 = vector.shape_cast %901 : vector<16xf32> to vector<16x1xf32>
    %cst_270 = arith.constant 3.200000e+01 : f32
    %903 = vector.broadcast %cst_270 : f32 to vector<16x1xf32>
    %904 = arith.divf %902, %903 : vector<16x1xf32>
    %cst_271 = arith.constant 9.99999974E-6 : f32
    %905 = vector.broadcast %cst_271 : f32 to vector<16x1xf32>
    %906 = arith.addf %904, %905 : vector<16x1xf32>
    %907 = math.rsqrt %906 : vector<16x1xf32>
    %908 = vector.broadcast %907 : vector<16x1xf32> to vector<16x32xf32>
    %909 = arith.mulf %899, %908 : vector<16x32xf32>
    %910 = vector.broadcast %684 : vector<1x32xf32> to vector<16x32xf32>
    %911 = arith.mulf %909, %910 : vector<16x32xf32>
    %912 = vector.broadcast %685 : vector<1x32xf32> to vector<16x32xf32>
    %913 = arith.addf %911, %912 : vector<16x32xf32>
    %cst_272 = arith.constant dense<0.000000e+00> : vector<16x64xf32>
    %914 = tpu.matmul %913, %674, %cst_272 {dimension_numbers = #tpu.dot_dimension_numbers<[1], [0], [0], [1], [0, 0, 1, 1], [], []>} : vector<16x32xf32>, vector<32x64xf32>, vector<16x64xf32> -> vector<16x64xf32>
    %915 = vector.broadcast %680 : vector<1x64xf32> to vector<16x64xf32>
    %916 = arith.addf %914, %915 : vector<16x64xf32>
    %cst_273 = arith.constant 5.000000e-01 : f32
    %917 = vector.broadcast %cst_273 : f32 to vector<16x64xf32>
    %918 = arith.mulf %917, %916 : vector<16x64xf32>
    %cst_274 = arith.constant 0.707106769 : f32
    %919 = vector.broadcast %cst_274 : f32 to vector<16x64xf32>
    %920 = arith.mulf %916, %919 : vector<16x64xf32>
    %921 = math.erf %920 : vector<16x64xf32>
    %cst_275 = arith.constant 1.000000e+00 : f32
    %922 = vector.broadcast %cst_275 : f32 to vector<16x64xf32>
    %923 = arith.addf %922, %921 : vector<16x64xf32>
    %924 = arith.mulf %918, %923 : vector<16x64xf32>
    %cst_276 = arith.constant dense<0.000000e+00> : vector<16x32xf32>
    %925 = tpu.matmul %924, %668, %cst_276 {dimension_numbers = #tpu.dot_dimension_numbers<[1], [0], [0], [1], [0, 0, 1, 1], [], []>} : vector<16x64xf32>, vector<64x32xf32>, vector<16x32xf32> -> vector<16x32xf32>
    %926 = vector.broadcast %681 : vector<1x32xf32> to vector<16x32xf32>
    %927 = arith.addf %925, %926 : vector<16x32xf32>
    %928 = arith.addf %913, %927 : vector<16x32xf32>
    %cst_277 = arith.constant dense<0.000000e+00> : vector<16xf32>
    %929 = vector.multi_reduction <add>, %928, %cst_277 [1] : vector<16x32xf32> to vector<16xf32>
    %930 = vector.shape_cast %929 : vector<16xf32> to vector<16x1xf32>
    %cst_278 = arith.constant 3.200000e+01 : f32
    %931 = vector.broadcast %cst_278 : f32 to vector<16x1xf32>
    %932 = arith.divf %930, %931 : vector<16x1xf32>
    %933 = vector.broadcast %932 : vector<16x1xf32> to vector<16x32xf32>
    %934 = arith.subf %928, %933 : vector<16x32xf32>
    %935 = arith.mulf %934, %934 : vector<16x32xf32>
    %cst_279 = arith.constant dense<0.000000e+00> : vector<16xf32>
    %936 = vector.multi_reduction <add>, %935, %cst_279 [1] : vector<16x32xf32> to vector<16xf32>
    %937 = vector.shape_cast %936 : vector<16xf32> to vector<16x1xf32>
    %cst_280 = arith.constant 3.200000e+01 : f32
    %938 = vector.broadcast %cst_280 : f32 to vector<16x1xf32>
    %939 = arith.divf %937, %938 : vector<16x1xf32>
    %cst_281 = arith.constant 9.99999974E-6 : f32
    %940 = vector.broadcast %cst_281 : f32 to vector<16x1xf32>
    %941 = arith.addf %939, %940 : vector<16x1xf32>
    %942 = math.rsqrt %941 : vector<16x1xf32>
    %943 = vector.broadcast %942 : vector<16x1xf32> to vector<16x32xf32>
    %944 = arith.mulf %934, %943 : vector<16x32xf32>
    %945 = vector.broadcast %686 : vector<1x32xf32> to vector<16x32xf32>
    %946 = arith.mulf %944, %945 : vector<16x32xf32>
    %947 = vector.broadcast %687 : vector<1x32xf32> to vector<16x32xf32>
    %948 = arith.addf %946, %947 : vector<16x32xf32>
    %cst_282 = arith.constant dense<0.000000e+00> : vector<16xf32>
    %949 = vector.multi_reduction <add>, %948, %cst_282 [1] : vector<16x32xf32> to vector<16xf32>
    %950 = vector.shape_cast %949 : vector<16xf32> to vector<16x1xf32>
    %cst_283 = arith.constant 3.200000e+01 : f32
    %951 = vector.broadcast %cst_283 : f32 to vector<16x1xf32>
    %952 = arith.divf %950, %951 : vector<16x1xf32>
    %953 = vector.broadcast %952 : vector<16x1xf32> to vector<16x32xf32>
    %954 = arith.subf %948, %953 : vector<16x32xf32>
    %955 = arith.mulf %954, %954 : vector<16x32xf32>
    %cst_284 = arith.constant dense<0.000000e+00> : vector<16xf32>
    %956 = vector.multi_reduction <add>, %955, %cst_284 [1] : vector<16x32xf32> to vector<16xf32>
    %957 = vector.shape_cast %956 : vector<16xf32> to vector<16x1xf32>
    %cst_285 = arith.constant 3.200000e+01 : f32
    %958 = vector.broadcast %cst_285 : f32 to vector<16x1xf32>
    %959 = arith.divf %957, %958 : vector<16x1xf32>
    %cst_286 = arith.constant 9.99999974E-6 : f32
    %960 = vector.broadcast %cst_286 : f32 to vector<16x1xf32>
    %961 = arith.addf %959, %960 : vector<16x1xf32>
    %962 = math.rsqrt %961 : vector<16x1xf32>
    %963 = vector.broadcast %962 : vector<16x1xf32> to vector<16x32xf32>
    %964 = arith.mulf %954, %963 : vector<16x32xf32>
    %965 = vector.broadcast %7 : vector<1x32xf32> to vector<16x32xf32>
    %966 = arith.mulf %964, %965 : vector<16x32xf32>
    %967 = vector.broadcast %8 : vector<1x32xf32> to vector<16x32xf32>
    %968 = arith.addf %966, %967 : vector<16x32xf32>
    %969 = vector.shape_cast %968 : vector<16x32xf32> to vector<2x8x32xf32>
    %970 = vector.shape_cast %9 : vector<1x32xf32> to vector<1x1x32xf32>
    %971 = vector.broadcast %970 : vector<1x1x32xf32> to vector<2x8x32xf32>
    %972 = arith.mulf %969, %971 : vector<2x8x32xf32>
    %cst_287 = arith.constant dense<0.000000e+00> : vector<2x8xf32>
    %973 = vector.multi_reduction <add>, %972, %cst_287 [2] : vector<2x8x32xf32> to vector<2x8xf32>
    %974 = vector.broadcast %10 : vector<1x1xf32> to vector<2x8xf32>
    %975 = arith.addf %973, %974 : vector<2x8xf32>
    %c0_288 = arith.constant 0 : index
    %c0_289 = arith.constant 0 : index
    %976 = vector.load %arg10[%c0_288, %c0_289] : memref<2x8xf32, #tpu.memory_space<vmem>>, vector<2x8xf32>
    tpu.vector_store %arg10[%c0_288, %c0_289], %975 {strides = array<i32>} : memref<2x8xf32, #tpu.memory_space<vmem>>, vector<2x8xf32>,
    return
  }
}

</mosaic_0001>

<bundles_post_ra>
// kernel: pm_candidate_forward.1
= control target key start
LH: loop header
LB: loop body
LE: loop exit
PB: predicated region body
PF: predicated region fallthrough
CT: control target
= control target key end

     0   :  { %15 = vsyncpa [#allocation4], 0  ;;  %s23919_s0 = inlined_call_operand.vmem [shape: f32[2,1,1], index: 0, kind: input, shape index: {}]   ;;  %s23920_s1 = inlined_call_operand.vmem [shape: f32[2,6,8], index: 1, kind: input, shape index: {}]   ;;  %s23921_s2 = inlined_call_operand.hbm [shape: f32[2,8,8], index: 2, kind: input, shape index: {}]   ;;  %s23922_s3 = inlined_call_operand.vmem [shape: f32[24,32], index: 3, kind: input, shape index: {}]   ;;  %s23923_s4 = inlined_call_operand.vmem [shape: f32[2,32,192], index: 4, kind: input, shape index: {}]   ;;  %s23924_s5 = inlined_call_operand.vmem [shape: f32[2,64,32], index: 5, kind: input, shape index: {}]   ;;  %s23925_s6 = inlined_call_operand.hbm [shape: f32[2,8,96], index: 6, kind: input, shape index: {}]   ;;  %s23926_s7 = inlined_call_operand.vmem [shape: f32[2,32,320], index: 7, kind: input, shape index: {}]   ;;  %s23927_s8 = inlined_call_operand.vmem [shape: f32[2,64,32], index: 8, kind: input, shape index: {}]   ;;  %s23928_s9 = inlined_call_operand.vmem [shape: f32[2,13,96], index: 9, kind: input, shape index: {}]   ;;  %s23929_s10 = inlined_call_operand.hbm [shape: f32[2,8], index: 10, kind: output, shape index: {}]  }
   0x1   :  { %16 = vsyncpa [#allocation7], 0 }
   0x2   :  { %17 = vsyncpa [#allocation5], 0  ;;  %s20395_s13 = smov [#allocation3]  }
   0x3   :  { %s27_s14 = sshll.u32 %s20395_s13, 4  ;;  %s28_s14 = int_to_ptr.vmem [resolvable:$true] %s27_s14 }
   0x4   :  { %s20337_s15 = scalar_lea.vmem %s28_s14, 256  ;;  %p20342_p1 = scmp.lt.s32.totalorder %s28_s14, %s28_s14 }
   0x5   :  { %p20338_p0 = scmp.ne.s32.totalorder %s28_s14, %s20337_s15  ;;  %p20343_p2 = scmp.lt.s32.totalorder %s20337_s15, %s20337_s15 }
   0x7   :  { %p20344_p3 = por %p20343_p2, %p20342_p1 }
   0x9   :  { %p20345_p4 = pnand %p20344_p3, %p20338_p0 }
   0xb   :  { %20348 = shalt.err (!%p20345_p4)
}
   0xc   :  { %s20396_s16 = smov 128   ;;  %s20397_s17 = smov 8  }
   0xd   :  { %33 = dma.hbm_to_vmem [thread:$0]  %s23921_s2, 256, %s28_s14, [#allocation4], %s20396_s16, %s20396_s16, %s20397_s17  }
   0xe   :  { %s20398_s20 = smov [#allocation6]  }
   0xf   :  { %s45_s21 = sshll.u32 %s20398_s20, 4  ;;  %s46_s21 = int_to_ptr.vmem [resolvable:$true] %s45_s21 }
  0x10   :  { %s20357_s22 = scalar_lea.vmem %s46_s21, 256  ;;  %p20362_p6 = scmp.lt.s32.totalorder %s46_s21, %s46_s21 }
  0x11   :  { %p20358_p5 = scmp.ne.s32.totalorder %s46_s21, %s20357_s22  ;;  %p20363_p7 = scmp.lt.s32.totalorder %s20357_s22, %s20357_s22 }
  0x13   :  { %p20364_p8 = por %p20363_p7, %p20362_p6 }
  0x15   :  { %p20365_p9 = pnand %p20364_p8, %p20358_p5 }
  0x17   :  { %20368 = shalt.err (!%p20365_p9)
}
  0x18   :  { %51 = dma.hbm_to_vmem [thread:$0]  %s23925_s6, 256, %s46_s21, [#allocation7], %s20396_s16, %s20396_s16, %s20397_s17  }
  0x19   :  { %20389 = dma.done.wait [#allocation4], 256  }
  0x1a   :  { %20390 = vsyncadd [#allocation4], 4294967040 }
  0x1b   :  { %20391 = dma.done.wait [#allocation7], 256  }
  0x1c   :  { %20392 = vsyncadd [#allocation7], 4294967040  ;;  %v23930_v0 = vlaneseq  ;;  %v20399_v1 = vmov 1983009808   ;;  %v20400_v3 = vmov 0   ;;  %v64_v7 = vld [vmem:[%s23922_s3] sm:$0xff] }
  0x1d   :  { %v96_v2 = vunpack.c.l.s4 %v20399_v1  ;;  %20057 = vset.pattern.permute.xlu0 %v20400_v3  ;;  %v90_v8 = vld [vmem:[%s23920_s1] sm:$0x3f]  ;;  %v91_v9 = vld [vmem:[%s23920_s1 + $0x8] sm:$0x3f]  ;;  %19215 = vmatprep.subr.mxu0 %v64_v7  ;;  %vm155_vm0 = vcmask 64512   ;;  %v513_v27 = vld [vmem:[%s23923_s4 + $0x30] sm:$0xff] }
  0x1e   :  { %v20479_v4 = vshrl.u32 %v23930_v0, 7  ;;  %v94_v10 = vcombine.high %v90_v8, %v90_v8  ;;  %v110_v12 = vcombine.high %v91_v9, %v91_v9  ;;  %v67_v14 = vld [vmem:[%s23919_s0] sm:$0x1]  ;;  %19216 = vmatpush3.msra.mxu0 %v64_v7  ;;  %v68_v19 = vld [vmem:[%s23919_s0 + $0x1] sm:$0x1]  ;;  %v20519_v29 = vld [vmem:[%s23923_s4 + $0x10] sm:$0xff] }
  0x1f   :  { %v97_v5 = vunpack.c.0.s8 %v96_v2  ;;  %71 = vperm.xlu0 %20057, %v67_v14   ;;  %v20514_v28 = vld [vmem:[%s23923_s4 + $0x20] sm:$0xff]  ;;  %19225 = vmatprep.subr.mxu0 %v513_v27  ;;  %vm87_vm1 = vcmask 253952   ;;  %v20540_v36 = vld [vmem:[%s23922_s3 + $0x8] sm:$0xff]  ;;  %v20401_v50 = vmov 1966171168   ;;  %vm296_vm2 = vcmask 259072  }
  0x20   :  { %23934 = vst [vmem:[#allocation12_spill] sm:$0xff] %v20479_v4  ;;  %v20526_v30 = vld [vmem:[%s23923_s4] sm:$0xff]  ;;  %v20533_v31 = vsub.s32 0, %v20479_v4  ;;  %v305_v51 = vunpack.c.l.s4 %v20401_v50  ;;  %vm617_vm3 = vcmask 261120   ;;  %vm421_vm4 = vcmask 1046528   ;;  %s20404_s23 = smov 96  }
  0x21   :  { %v20482_v6 = vsub.s32 %v97_v5, %v20479_v4  ;;  %vm20403_vm5 = vmmov 0   ;;  %vm1049_vm6 = vcmask 55296   ;;  %s20405_s24 = smov 64   ;;  %s20406_s2 = smov 32   ;;  %vm1074_vm7 = vcmask 56320  }
  0x22   :  { %v129_v37 = vrot.slane %v20540_v36, %v20533_v31  ;;  %v306_v58 = vunpack.c.0.s8 %v305_v51  ;;  %v422_v51 = vrot.slane %v20540_v36, 1  ;;  %s20407_s25 = smov 88   ;;  %s20408_s6 = smov 120   ;;  %vm4212_vm8 = vcmask 523264  }
  0x23   :  { %v101_v11 = vrot.slane %v90_v8, %v20482_v6  ;;  %v117_v13 = vrot.slane %v91_v9, %v20482_v6  ;;  %v108_v15 = vrot.slane %v94_v10, %v20482_v6  ;;  %v124_v18 = vrot.slane %v110_v12, %v20482_v6  ;;  %80 = vperm.xlu0 %20057, %v68_v19   ;;  %s20409_s26 = smov 56   ;;  %s20410_s27 = smov 80  }
  0x24   :  { %v20554_v60 = vsub.s32 %v306_v58, %v20479_v4  ;;  %s20411_s28 = smov 112   ;;  %s20412_s29 = smov 48   ;;  %vm18501_vm9 = vcmask 1041409   ;;  %vm18504_vm10 = vcmask 58368  }
  0x25   :  { %v109_v16 = vcombine.high %v101_v11, %v101_v11  ;;  %v125_v17 = vcombine.high %v117_v13, %v117_v13  ;;  %v131_v21 = vcombine.low %v108_v15, %v117_v13  ;;  %s20413_s30 = smov 72   ;;  %s20414_s1 = smov 104  }
  0x26   :  { %s20415_s11 = smov 40   ;;  %s20416_s20 = smov [#allocation8]  }
  0x27   :  { %v130_v20 = vcombine.low %v101_v11, %v109_v16  ;;  %v147_v22 = vcombine.low %v125_v17, %v124_v18  ;;  %v145_v24 = vrot.slane %v131_v21, %v20482_v6 }
  0x29   :  { %v138_v23 = vrot.slane %v130_v20, %v20482_v6  ;;  %v154_v25 = vrot.slane %v147_v22, %v20482_v6 }
  0x2b   :  { %v146_v26 = vcombine.low %v138_v23, %v145_v24 }
  0x2d   :  { %19217 = vmatprep.mubr.msk.f32.mxu0 %vm155_vm0, %v146_v26 }
  0x2e   :  { %19218 = vmatmul.mubr.msk.f32.vlgmr.msra.gmra.mxu0 %vm155_vm0, %v154_v25 }
  0x2f   :  { %19226 = vmatpush3.msra.mxu0 %v513_v27 }
  0x30   :  { %19227 = vmatprep.subr.mxu0 %v20514_v28 }
  0x31   :  { %19228 = vmatpush3.msra.mxu0 %v20514_v28 }
  0x32   :  { %19229 = vmatprep.subr.mxu0 %v20519_v29 }
  0x33   :  { %19230 = vmatpush3.msra.mxu0 %v20519_v29 }
  0x34   :  { %19231 = vmatprep.subr.mxu0 %v20526_v30 }
  0x35   :  { %19232 = vmatpush3.msra.mxu0 %v20526_v30 }
  0x9a   :  { %v72_v32 = vpop.permute.xlu0 %71 }
  0x9b   :  { %v77_v33 = vrot.slane %v72_v32, %v20533_v31 }
  0x9d   :  { %88 = vst.msk [vmem:[#allocation2] sm:$0x1] %vm87_vm1, %v77_v33 }
  0x9e   :  { %v81_v34 = vpop.permute.xlu0 %80 }
  0x9f   :  { %v86_v35 = vrot.slane %v81_v34, %v20533_v31 }
  0xa1   :  { %89 = vst.msk [vmem:[#allocation2 + $0x8] sm:$0x1] %vm87_vm1, %v86_v35 }
  0xee   :  { %v19219_v38 = vpop.f32.mrf.mxu0 }
  0xef   :  { %v232_v39 = vadd.f32 %v19219_v38, %v129_v37 }
  0xf0   :  { %v226_v40 = vpop.f32.mrf.mxu0 }
  0xf1   :  { %v227_v41 = vadd.f32 %v226_v40, %v129_v37  ;;  %v260_v42 = vrot.slane %v232_v39, %v20482_v6 }
  0xf3   :  { %v237_v43 = vcombine.high %v227_v41, %v227_v41  ;;  %v244_v44 = vrot.slane %v227_v41, %v20482_v6  ;;  %v261_v47 = vcombine.high %v260_v42, %v260_v42 }
  0xf5   :  { %v251_v45 = vrot.slane %v237_v43, %v20482_v6  ;;  %v252_v46 = vcombine.high %v244_v44, %v244_v44  ;;  %v292_v55 = vrot.slane %v261_v47, %v20482_v6 }
  0xf7   :  { %v253_v48 = vcombine.high %v251_v45, %v251_v45  ;;  %v262_v49 = vcombine.low %v244_v44, %v252_v46  ;;  %v276_v53 = vrot.slane %v251_v45, %v20482_v6 }
  0xf9   :  { %v269_v52 = vrot.slane %v262_v49, %v20482_v6  ;;  %v278_v54 = vcombine.low %v253_v48, %v260_v42 }
  0xfb   :  { %v277_v56 = vcombine.low %v269_v52, %v276_v53  ;;  %v285_v57 = vrot.slane %v278_v54, %v20482_v6  ;;  %v66_v52 = vld [vmem:[%s23922_s3 + $0x10] sm:$0xff]  ;;  %v23931_v54 = vmov 0.0  }
  0xfc   :  { %v423_v53 = vrot.slane %v66_v52, 1  ;;  %19236 = vmatprep.subr.mxu0 %v23931_v54 }
  0xfd   :  { %v293_v59 = vcombine.low %v285_v57, %v292_v55  ;;  %297 = vst.msk [vmem:[#allocation2 + $0x1] sm:$0x3f] %vm296_vm2, %v277_v56  ;;  %v20634_v56 = vld [vmem:[#allocation6] sm:$0xff] }
  0xfe   :  { %v424_v55 = vsel %vm421_vm4, %v422_v51, %v423_v53  ;;  %v527_v36 = vrot.slane %v20634_v56, %v20533_v31 }
  0xff   :  { %298 = vst.msk [vmem:[#allocation2 + $0x9] sm:$0x3f] %vm296_vm2, %v293_v59  ;;  %19220 = vmatprep.subr.mxu1 %v424_v55 }
 0x100   :  { %19221 = vmatpush3.msra.mxu1 %v424_v55 }
 0x101   :  { %19241 = vmatprep.subr.mxu1 %v23931_v54 }
 0x104   :  { %v299_v61 = vld [vmem:[#allocation2] sm:$0x7f] }
 0x105   :  { %v303_v62 = vcombine.high %v299_v61, %v299_v61  ;;  %v310_v63 = vrot.slane %v299_v61, %v20554_v60 }
 0x106   :  { %v300_v1 = vld [vmem:[#allocation2 + $0x8] sm:$0x7f] }
 0x107   :  { %v317_v2 = vrot.slane %v303_v62, %v20554_v60  ;;  %v318_v3 = vcombine.high %v310_v63, %v310_v63  ;;  %v351_v5 = vcombine.high %v300_v1, %v300_v1  ;;  %v20559_v6 = vrot.slane %v310_v63, %v20554_v60 }
 0x108   :  { %v358_v7 = vrot.slane %v300_v1, %v20554_v60 }
 0x109   :  { %v319_v8 = vcombine.high %v317_v2, %v317_v2  ;;  %v20563_v9 = vrot.slane %v317_v2, %v20554_v60  ;;  %v20566_v10 = vrot.slane %v318_v3, %v20554_v60  ;;  %v365_v11 = vrot.slane %v351_v5, %v20554_v60 }
 0x10a   :  { %v366_v12 = vcombine.high %v358_v7, %v358_v7  ;;  %v20570_v13 = vrot.slane %v358_v7, %v20554_v60 }
 0x10b   :  { %v20573_v14 = vrot.slane %v319_v8, %v20554_v60  ;;  %v20577_v15 = vcombine.high %v20563_v9, %v20563_v9  ;;  %v528_v16 = vcombine.low %v20559_v6, %v20566_v10  ;;  %v18526_v17 = vcombine.high %v20559_v6, %v20566_v10 }
 0x10c   :  { %v367_v18 = vcombine.high %v365_v11, %v365_v11  ;;  %v20584_v19 = vrot.slane %v365_v11, %v20554_v60  ;;  %v20587_v20 = vrot.slane %v366_v12, %v20554_v60  ;;  %v20591_v21 = vcombine.high %v20570_v13, %v20570_v13 }
 0x10d   :  { %v530_v22 = vcombine.low %v20563_v9, %v20573_v14  ;;  %v531_v23 = vcombine.low %v20577_v15, %v20570_v13  ;;  %v538_v24 = vrot.slane %v528_v16, %v20554_v60  ;;  %v545_v25 = vrot.slane %v18526_v17, %v20554_v60 }
 0x10e   :  { %v20600_v26 = vrot.slane %v367_v18, %v20554_v60  ;;  %v20604_v27 = vcombine.high %v20584_v19, %v20584_v19  ;;  %v20608_v32 = vcombine.high %v20587_v20, %v20587_v20  ;;  %v577_v33 = vcombine.low %v20587_v20, %v20591_v21 }
 0x10f   :  { %v552_v34 = vrot.slane %v530_v22, %v20554_v60  ;;  %v559_v35 = vrot.slane %v531_v23, %v20554_v60  ;;  %v560_v37 = vcombine.low %v538_v24, %v545_v25 }
 0x110   :  { %v578_v38 = vcombine.low %v20608_v32, %v20584_v19  ;;  %v579_v39 = vcombine.low %v20600_v26, %v20604_v27  ;;  %v586_v41 = vrot.slane %v577_v33, %v20554_v60 }
 0x111   :  { %v561_v40 = vcombine.low %v552_v34, %v559_v35  ;;  %v568_v44 = vrot.slane %v560_v37, %v20554_v60  ;;  %v413_v34 = vld [vmem:[#allocation3] sm:$0xff]  ;;  %v414_v37 = vld [vmem:[#allocation3 + $0x8] sm:$0xff] }
 0x112   :  { %v593_v42 = vrot.slane %v578_v38, %v20554_v60  ;;  %v600_v43 = vrot.slane %v579_v39, %v20554_v60  ;;  %19222 = vmatprep.mubr.msk.f32.mxu1 %vm155_vm0, %v413_v34 }
 0x113   :  { %v575_v45 = vrot.slane %v561_v40, %v20554_v60  ;;  %19223 = vmatmul.mubr.msk.f32.vlgmr.msra.gmra.mxu1 %vm155_vm0, %v414_v37 }
 0x114   :  { %v601_v46 = vcombine.low %v586_v41, %v593_v42  ;;  %v615_v49 = vrot.slane %v600_v43, %v20554_v60  ;;  %19243 = vmatprep.mubr.msk.f32.mxu1 %vm20403_vm5, %v23931_v54 }
 0x115   :  { %v576_v47 = vcombine.low %v568_v44, %v575_v45 }
 0x116   :  { %v608_v48 = vrot.slane %v601_v46, %v20554_v60 }
 0x117   :  { %19233 = vmatprep.mubr.msk.f32.mxu0 %vm617_vm3, %v576_v47 }
 0x118   :  { %v616_v50 = vcombine.low %v608_v48, %v615_v49 }
 0x11a   :  { %19234 = vmatmul.mubr.msk.f32.vlgmr.msra.gmra.mxu0 %vm617_vm3, %v616_v50 }
 0x11b   :  { %19238 = vmatprep.mubr.msk.f32.mxu0 %vm20403_vm5, %v23931_v54 }
 0x1da   :  { %v19235_v57 = vpop.f32.mrf.mxu0 }
 0x1db   :  { %v694_v58 = vadd.f32 %v19235_v57, %v527_v36 }
 0x1dc   :  { %v688_v59 = vpop.f32.mrf.mxu0 }
 0x1dd   :  { %v748_v61 = vcombine.high %v694_v58, %v694_v58  ;;  %v755_v62 = vrot.slane %v694_v58, %v20554_v60  ;;  %v689_v63 = vadd.f32 %v688_v59, %v527_v36 }
 0x1df   :  { %v762_v1 = vrot.slane %v748_v61, %v20554_v60  ;;  %v763_v2 = vcombine.high %v755_v62, %v755_v62  ;;  %v771_v3 = vrot.slane %v755_v62, %v20554_v60  ;;  %v699_v5 = vcombine.high %v689_v63, %v689_v63 }
 0x1e0   :  { %v706_v7 = vrot.slane %v689_v63, %v20554_v60 }
 0x1e1   :  { %v785_v8 = vrot.slane %v763_v2, %v20554_v60  ;;  %v713_v11 = vrot.slane %v699_v5, %v20554_v60  ;;  %v764_v16 = vcombine.high %v762_v1, %v762_v1  ;;  %v778_v17 = vrot.slane %v762_v1, %v20554_v60 }
 0x1e2   :  { %v714_v12 = vcombine.high %v706_v7, %v706_v7  ;;  %v793_v18 = vcombine.high %v771_v3, %v771_v3  ;;  %v722_v24 = vrot.slane %v706_v7, %v20554_v60 }
 0x1e3   :  { %v794_v22 = vcombine.high %v785_v8, %v785_v8  ;;  %v715_v23 = vcombine.high %v713_v11, %v713_v11  ;;  %v729_v25 = vrot.slane %v713_v11, %v20554_v60  ;;  %v792_v42 = vrot.slane %v764_v16, %v20554_v60 }
 0x1e4   :  { %v736_v33 = vrot.slane %v714_v12, %v20554_v60  ;;  %v924_v43 = vcombine.low %v785_v8, %v793_v18  ;;  %v20688_v8 = vpop.f32.mrf.mxu1 }
 0x1e5   :  { %v925_v35 = vcombine.low %v794_v22, %v778_v17  ;;  %v743_v38 = vrot.slane %v715_v23, %v20554_v60  ;;  %v745_v39 = vcombine.high %v729_v25, %v729_v25  ;;  %v953_v55 = vrot.slane %v792_v42, %v20554_v60  ;;  %23935 = vst [vmem:[#allocation13_spill] sm:$0xff] %v20688_v8 }
 0x1e6   :  { %v799_v40 = vcombine.low %v722_v24, %v736_v33  ;;  %v18529_v41 = vcombine.high %v722_v24, %v736_v33  ;;  %v939_v53 = vrot.slane %v924_v43, %v20554_v60  ;;  %v20690_v16 = vpop.f32.mrf.mxu1 }
 0x1e7   :  { %v747_v44 = vcombine.high %v743_v38, %v743_v38  ;;  %v801_v45 = vcombine.low %v729_v25, %v743_v38  ;;  %v946_v48 = vrot.slane %v925_v35, %v20554_v60  ;;  %v829_v50 = vrot.slane %v745_v39, %v20554_v60  ;;  %23936 = vst [vmem:[#allocation14_spill] sm:$0xff] %v20690_v16 }
 0x1e8   :  { %v808_v46 = vrot.slane %v799_v40, %v20554_v60  ;;  %v815_v47 = vrot.slane %v18529_v41, %v20554_v60 }
 0x1e9   :  { %v822_v49 = vrot.slane %v801_v45, %v20554_v60  ;;  %v923_v52 = vcombine.low %v747_v44, %v771_v3  ;;  %v955_v58 = vcombine.low %v946_v48, %v953_v55 }
 0x1ea   :  { %v830_v51 = vcombine.low %v808_v46, %v815_v47 }
 0x1eb   :  { %v831_v36 = vcombine.low %v822_v49, %v829_v50  ;;  %v932_v57 = vrot.slane %v923_v52, %v20554_v60  ;;  %v969_v2 = vrot.slane %v955_v58, %v20554_v60 }
 0x1ec   :  { %v838_v59 = vrot.slane %v830_v51, %v20554_v60 }
 0x1ed   :  { %v845_v61 = vrot.slane %v831_v36, %v20554_v60  ;;  %v954_v62 = vcombine.low %v932_v57, %v939_v53 }
 0x1ef   :  { %v20666_v63 = vcombine.low %v838_v59, %v845_v61  ;;  %v962_v1 = vrot.slane %v954_v62, %v20554_v60 }
 0x1f1   :  { %847 = vrot.lane.b32.xlu1 %v20666_v63, %s20404_s23  ;;  %v20672_v3 = vcombine.low %v962_v1, %v969_v2 }
 0x1f5   :  { %971 = vrot.lane.b32.xlu1 %v20672_v3, %s20404_s23 }
 0x263   :  { %v848_v5 = vpop.permute.xlu1 %847 }
 0x264   :  { %19237 = vmatpush3.xpose.msk.msra.mxu0 %vm155_vm0, %v848_v5 }
 0x265   :  { %19246 = vmatprep.subr.mxu0 %v23931_v54 }
 0x267   :  { %19239 = vmatmul.mubr.msk.f32.vlgmr.msra.gmra.mxu0 %vm155_vm0, %v20666_v63  ;;  %v972_v7 = vpop.permute.xlu1 %971 }
 0x268   :  { %19242 = vmatpush3.xpose.msk.msra.mxu1 %vm155_vm0, %v972_v7  ;;  %19248 = vmatprep.mubr.msk.f32.mxu0 %vm20403_vm5, %v23931_v54 }
 0x269   :  { %19251 = vmatprep.subr.mxu1 %v23931_v54 }
 0x26b   :  { %19244 = vmatmul.mubr.msk.f32.vlgmr.msra.gmra.mxu1 %vm155_vm0, %v20672_v3 }
 0x26c   :  { %19253 = vmatprep.mubr.msk.f32.mxu1 %vm20403_vm5, %v23931_v54 }
 0x327   :  { %v919_v11 = vpop.f32.mrf.mxu0 }
 0x328   :  { %v1047_v12 = vmul.f32 0.35355338, %v919_v11 }
 0x329   :  { %v19240_v17 = vpop.f32.mrf.mxu0 }
 0x32a   :  { %v1050_v18 = vsel %vm1049_vm6, %v1047_v12, -inf }
 0x32b   :  { %1051 = vmax.xlane.f32.xlu0 %v1050_v18  ;;  %v1043_v22 = vpop.f32.mrf.mxu1 }
 0x32c   :  { %v1048_v23 = vmul.f32 0.35355338, %v1043_v22 }
 0x32d   :  { %v19245_v24 = vpop.f32.mrf.mxu1 }
 0x32e   :  { %v1053_v25 = vsel %vm1049_vm6, %v1048_v23, -inf }
 0x32f   :  { %1054 = vmax.xlane.f32.xlu1 %v1053_v25 }
 0x340   :  { %1072 = vrot.lane.b32.xlu1 %v20666_v63, %s20405_s24 }
 0x344   :  { %1415 = vrot.lane.b32.xlu1 %v20526_v30, %s20406_s2 }
 0x348   :  { %1501 = vrot.lane.b32.xlu1 %v20666_v63, %s20407_s25 }
 0x34c   :  { %1499 = vrot.lane.b32.xlu1 %v20666_v63, %s20408_s6 }
 0x3b4   :  { %v1052_v33 = vpop.xlane.xlu0 %1051 }
 0x3b5   :  { %v1056_v34 = vsub.f32 %v1047_v12, %v1052_v33 }
 0x3b7   :  { %v1058_v35 = vmul.f32 1.442695, %v1056_v34 }
 0x3b8   :  { %v1055_v37 = vpop.xlane.xlu1 %1054 }
 0x3b9   :  { %20062 = vpow2.f32 %v1058_v35  ;;  %v1057_v38 = vsub.f32 %v1048_v23, %v1055_v37 }
 0x3bb   :  { %v1060_v39 = vmul.f32 1.442695, %v1057_v38 }
 0x3bc   :  { %v1073_v40 = vpop.permute.xlu1 %1072 }
 0x3bd   :  { %20064 = vpow2.f32 %v1060_v39  ;;  %19247 = vmatpush3.msk.msra.mxu0 %vm421_vm4, %v1073_v40 }
 0x3c0   :  { %v1416_v30 = vpop.permute.xlu1 %1415 }
 0x3c1   :  { %19256 = vmatprep.subr.mxu0 %v1416_v30 }
 0x3c4   :  { %v1502_v51 = vpop.permute.xlu1 %1501 }
 0x3c6   :  { %v20063_v41 = vpop.eup %20062 }
 0x3c7   :  { %v1062_v42 = vsel %vm1049_vm6, %v20063_v41, 0.0 }
 0x3c8   :  { %1063 = vadd.xlane.f32.xlu0 %v1062_v42  ;;  %v1500_v53 = vpop.permute.xlu1 %1499 }
 0x3ca   :  { %v20065_v43 = vpop.eup %20064 }
 0x3cb   :  { %v1065_v44 = vsel %vm1049_vm6, %v20065_v43, 0.0 }
 0x3cc   :  { %1066 = vadd.xlane.f32.xlu0 %v1065_v44 }
 0x3e2   :  { %1150 = vrot.lane.b32.xlu0 %v20672_v3, %s20405_s24 }
 0x3e6   :  { %1579 = vrot.lane.b32.xlu0 %v20672_v3, %s20407_s25 }
 0x3ea   :  { %1577 = vrot.lane.b32.xlu0 %v20672_v3, %s20408_s6 }
 0x451   :  { %v1064_v45 = vpop.xlane.xlu0 %1063 }
 0x452   :  { %20066 = vrcp.f32 %v1064_v45 }
 0x455   :  { %v1067_v46 = vpop.xlane.xlu0 %1066 }
 0x456   :  { %20068 = vrcp.f32 %v1067_v46 }
 0x459   :  { %v1151_v47 = vpop.permute.xlu0 %1150 }
 0x45a   :  { %19252 = vmatpush3.msk.msra.mxu1 %vm421_vm4, %v1151_v47 }
 0x45b   :  { %19261 = vmatprep.subr.mxu1 %v23931_v54 }
 0x45f   :  { %v20067_v48 = vpop.eup %20066 }
 0x460   :  { %v1069_v49 = vmul.f32 %v20067_v48, %v20063_v41 }
 0x462   :  { %19249 = vmatmul.mubr.msk.f32.vlgmr.msra.gmra.mxu0 %vm1074_vm7, %v1069_v49 }
 0x463   :  { %v20069_v50 = vpop.eup %20068  ;;  %19257 = vmatpush3.msra.mxu0 %v1416_v30 }
 0x464   :  { %v1071_v52 = vmul.f32 %v20069_v50, %v20065_v43  ;;  %19266 = vmatprep.subr.mxu0 %v23931_v54 }
 0x466   :  { %19254 = vmatmul.mubr.msk.f32.vlgmr.msra.gmra.mxu1 %vm1074_vm7, %v1071_v52 }
 0x467   :  { %19262 = vmatpush3.xpose.msk.msra.mxu1 %vm155_vm0, %v1502_v51  ;;  %19263 = vmatprep.mubr.msk.f32.mxu1 %vm20403_vm5, %v23931_v54 }
 0x468   :  { %19271 = vmatprep.subr.mxu1 %v23931_v54 }
 0x46a   :  { %19264 = vmatmul.mubr.msk.f32.vlgmr.msra.gmra.mxu1 %vm155_vm0, %v1500_v53 }
 0x46b   :  { %19273 = vmatprep.mubr.msk.f32.mxu1 %vm20403_vm5, %v23931_v54 }
 0x522   :  { %v1146_v55 = vpop.f32.mrf.mxu0 }
 0x523   :  { %v1229_v36 = vcombine.high %v1146_v55, %v1146_v55  ;;  %v1236_v57 = vrot.slane %v1146_v55, %v20554_v60 }
 0x524   :  { %v19250_v58 = vpop.f32.mrf.mxu0 }
 0x525   :  { %v1243_v59 = vrot.slane %v1229_v36, %v20554_v60  ;;  %v1244_v61 = vcombine.high %v1236_v57, %v1236_v57  ;;  %v1252_v62 = vrot.slane %v1236_v57, %v20554_v60 }
 0x526   :  { %v1223_v1 = vpop.f32.mrf.mxu1 }
 0x527   :  { %v1245_v2 = vcombine.high %v1243_v59, %v1243_v59  ;;  %v1259_v5 = vrot.slane %v1243_v59, %v20554_v60  ;;  %v1266_v7 = vrot.slane %v1244_v61, %v20554_v60  ;;  %v1277_v11 = vcombine.high %v1223_v1, %v1223_v1 }
 0x528   :  { %v1284_v12 = vrot.slane %v1223_v1, %v20554_v60  ;;  %v19255_v17 = vpop.f32.mrf.mxu1 }
 0x529   :  { %v1273_v18 = vrot.slane %v1245_v2, %v20554_v60  ;;  %v1325_v22 = vcombine.low %v1252_v62, %v1266_v7  ;;  %v18538_v23 = vcombine.high %v1252_v62, %v1266_v7  ;;  %v1275_v24 = vcombine.high %v1259_v5, %v1259_v5 }
 0x52a   :  { %v1291_v25 = vrot.slane %v1277_v11, %v20554_v60  ;;  %v1292_v33 = vcombine.high %v1284_v12, %v1284_v12  ;;  %v1300_v34 = vrot.slane %v1284_v12, %v20554_v60  ;;  %v1573_v35 = vpop.f32.mrf.mxu1  ;;  %v1580_v12 = vpop.permute.xlu0 %1579 }
 0x52b   :  { %v1327_v37 = vcombine.low %v1259_v5, %v1273_v18  ;;  %v1335_v38 = vrot.slane %v1325_v22, %v20554_v60  ;;  %v1342_v39 = vrot.slane %v18538_v23, %v20554_v60  ;;  %v1655_v40 = vmul.f32 0.35355338, %v1573_v35 }
 0x52c   :  { %v1293_v30 = vcombine.high %v1291_v25, %v1291_v25  ;;  %v1307_v41 = vrot.slane %v1291_v25, %v20554_v60  ;;  %v1314_v42 = vrot.slane %v1292_v33, %v20554_v60  ;;  %v1322_v43 = vcombine.high %v1300_v34, %v1300_v34  ;;  %v19265_v44 = vpop.f32.mrf.mxu1 }
 0x52d   :  { %v1349_v45 = vrot.slane %v1327_v37, %v20554_v60  ;;  %v1328_v46 = vcombine.low %v1275_v24, %v1300_v34  ;;  %v1657_v47 = vsel %vm1049_vm6, %v1655_v40, -inf  ;;  %v1357_v52 = vcombine.low %v1335_v38, %v1342_v39 }
 0x52e   :  { %v1321_v48 = vrot.slane %v1293_v30, %v20554_v60  ;;  %v1323_v49 = vcombine.high %v1307_v41, %v1307_v41  ;;  %v1324_v50 = vcombine.high %v1314_v42, %v1314_v42  ;;  %v1374_v51 = vcombine.low %v1314_v42, %v1322_v43  ;;  %1658 = vmax.xlane.f32.xlu1 %v1657_v47  ;;  %v1578_v18 = vpop.permute.xlu0 %1577 }
 0x52f   :  { %v1356_v53 = vrot.slane %v1328_v46, %v20554_v60  ;;  %v1365_v62 = vrot.slane %v1357_v52, %v20554_v60 }
 0x530   :  { %v1375_v55 = vcombine.low %v1324_v50, %v1307_v41  ;;  %v1376_v36 = vcombine.low %v1321_v48, %v1323_v49  ;;  %v1383_v58 = vrot.slane %v1374_v51, %v20554_v60 }
 0x531   :  { %v1358_v57 = vcombine.low %v1349_v45, %v1356_v53 }
 0x532   :  { %v1390_v59 = vrot.slane %v1375_v55, %v20554_v60  ;;  %v1397_v61 = vrot.slane %v1376_v36, %v20554_v60 }
 0x533   :  { %v1372_v1 = vrot.slane %v1358_v57, %v20554_v60 }
 0x534   :  { %v1398_v2 = vcombine.low %v1383_v58, %v1390_v59  ;;  %v1412_v11 = vrot.slane %v1397_v61, %v20554_v60 }
 0x535   :  { %v1373_v5 = vcombine.low %v1365_v62, %v1372_v1 }
 0x536   :  { %v1405_v7 = vrot.slane %v1398_v2, %v20554_v60 }
 0x537   :  { %19258 = vmatprep.mubr.msk.f32.mxu0 %vm155_vm0, %v1373_v5 }
 0x538   :  { %v1413_v17 = vcombine.low %v1405_v7, %v1412_v11 }
 0x53a   :  { %19259 = vmatmul.mubr.msk.f32.vlgmr.msra.gmra.mxu0 %vm155_vm0, %v1413_v17 }
 0x53b   :  { %19267 = vmatpush3.xpose.msk.msra.mxu0 %vm155_vm0, %v1580_v12  ;;  %19268 = vmatprep.mubr.msk.f32.mxu0 %vm20403_vm5, %v23931_v54 }
 0x53c   :  { %19276 = vmatprep.subr.mxu0 %v23931_v54 }
 0x53e   :  { %19269 = vmatmul.mubr.msk.f32.vlgmr.msra.gmra.mxu0 %vm155_vm0, %v1578_v18 }
 0x53f   :  { %19278 = vmatprep.mubr.msk.f32.mxu0 %vm20403_vm5, %v23931_v54 }
 0x5b7   :  { %v1659_v22 = vpop.xlane.xlu1 %1658 }
 0x5b8   :  { %v1663_v23 = vsub.f32 %v1655_v40, %v1659_v22 }
 0x5ba   :  { %v1665_v24 = vmul.f32 1.442695, %v1663_v23 }
 0x5bc   :  { %20070 = vpow2.f32 %v1665_v24 }
 0x5c9   :  { %v20071_v39 = vpop.eup %20070 }
 0x5ca   :  { %v1669_v30 = vsel %vm1049_vm6, %v20071_v39, 0.0 }
 0x5fa   :  { %v20756_v25 = vpop.f32.mrf.mxu0 }
 0x5fc   :  { %v20758_v33 = vpop.f32.mrf.mxu0 }
 0x5fe   :  { %v1651_v34 = vpop.f32.mrf.mxu0 }
 0x5ff   :  { %v1656_v35 = vmul.f32 0.35355338, %v1651_v34 }
 0x600   :  { %v19270_v37 = vpop.f32.mrf.mxu0 }
 0x601   :  { %v1660_v38 = vsel %vm1049_vm6, %v1656_v35, -inf }
 0x602   :  { %1661 = vmax.xlane.f32.xlu0 %v1660_v38 }
 0x606   :  { %1670 = vadd.xlane.f32.xlu0 %v1669_v30 }
 0x61c   :  { %1679 = vrot.lane.b32.xlu0 %v20666_v63, %s20409_s26 }
 0x620   :  { %2107 = vrot.lane.b32.xlu0 %v20666_v63, %s20410_s27 }
 0x624   :  { %2105 = vrot.lane.b32.xlu0 %v20666_v63, %s20411_s28 }
 0x68b   :  { %v1662_v40 = vpop.xlane.xlu0 %1661 }
 0x68c   :  { %v1664_v41 = vsub.f32 %v1656_v35, %v1662_v40 }
 0x68e   :  { %v1667_v42 = vmul.f32 1.442695, %v1664_v41 }
 0x68f   :  { %v1671_v43 = vpop.xlane.xlu0 %1670 }
 0x690   :  { %20072 = vpow2.f32 %v1667_v42 }
 0x691   :  { %20074 = vrcp.f32 %v1671_v43 }
 0x693   :  { %v1680_v44 = vpop.permute.xlu0 %1679 }
 0x694   :  { %19272 = vmatpush3.msk.msra.mxu1 %vm421_vm4, %v1680_v44 }
 0x69d   :  { %v20073_v45 = vpop.eup %20072 }
 0x69e   :  { %v20075_v46 = vpop.eup %20074  ;;  %v1672_v47 = vsel %vm1049_vm6, %v20073_v45, 0.0 }
 0x69f   :  { %1673 = vadd.xlane.f32.xlu1 %v1672_v47  ;;  %v1676_v48 = vmul.f32 %v20075_v46, %v20071_v39 }
 0x6a1   :  { %19274 = vmatmul.mubr.msk.f32.vlgmr.msra.gmra.mxu1 %vm1074_vm7, %v1676_v48 }
 0x6b0   :  { %1756 = vrot.lane.b32.xlu1 %v20672_v3, %s20409_s26 }
 0x6b4   :  { %2021 = vrot.lane.b32.xlu1 %v20519_v29, %s20406_s2  ;;  %v2108_v29 = vpop.permute.xlu0 %2107 }
 0x6b8   :  { %2185 = vrot.lane.b32.xlu1 %v20672_v3, %s20410_s27  ;;  %v2106_v55 = vpop.permute.xlu0 %2105 }
 0x6bc   :  { %2183 = vrot.lane.b32.xlu1 %v20672_v3, %s20411_s28 }
 0x728   :  { %v1674_v49 = vpop.xlane.xlu1 %1673 }
 0x729   :  { %20076 = vrcp.f32 %v1674_v49 }
 0x72c   :  { %v1757_v50 = vpop.permute.xlu1 %1756 }
 0x72d   :  { %19277 = vmatpush3.msk.msra.mxu0 %vm421_vm4, %v1757_v50 }
 0x72e   :  { %19286 = vmatprep.subr.mxu0 %v23931_v54 }
 0x730   :  { %v2022_v51 = vpop.permute.xlu1 %2021 }
 0x731   :  { %19281 = vmatprep.subr.mxu1 %v2022_v51 }
 0x732   :  { %19282 = vmatpush3.msra.mxu1 %v2022_v51 }
 0x733   :  { %19291 = vmatprep.subr.mxu1 %v23931_v54 }
 0x736   :  { %v20077_v52 = vpop.eup %20076 }
 0x737   :  { %v1678_v53 = vmul.f32 %v20077_v52, %v20073_v45 }
 0x739   :  { %19279 = vmatmul.mubr.msk.f32.vlgmr.msra.gmra.mxu0 %vm1074_vm7, %v1678_v53 }
 0x73a   :  { %19287 = vmatpush3.xpose.msk.msra.mxu0 %vm155_vm0, %v2108_v29  ;;  %19288 = vmatprep.mubr.msk.f32.mxu0 %vm20403_vm5, %v23931_v54 }
 0x73b   :  { %19296 = vmatprep.subr.mxu0 %v23931_v54 }
 0x73d   :  { %19289 = vmatmul.mubr.msk.f32.vlgmr.msra.gmra.mxu0 %vm155_vm0, %v2106_v55 }
 0x73e   :  { %19298 = vmatprep.mubr.msk.f32.mxu0 %vm20403_vm5, %v23931_v54 }
 0x761   :  { %v1752_v36 = vpop.f32.mrf.mxu1 }
 0x762   :  { %v1835_v58 = vcombine.high %v1752_v36, %v1752_v36  ;;  %v1842_v59 = vrot.slane %v1752_v36, %v20554_v60 }
 0x763   :  { %v19275_v57 = vpop.f32.mrf.mxu1 }
 0x764   :  { %v1849_v61 = vrot.slane %v1835_v58, %v20554_v60  ;;  %v1850_v62 = vcombine.high %v1842_v59, %v1842_v59  ;;  %v1858_v5 = vrot.slane %v1842_v59, %v20554_v60 }
 0x766   :  { %v1851_v1 = vcombine.high %v1849_v61, %v1849_v61  ;;  %v1872_v2 = vrot.slane %v1850_v62, %v20554_v60  ;;  %v1865_v7 = vrot.slane %v1849_v61, %v20554_v60 }
 0x768   :  { %v1879_v11 = vrot.slane %v1851_v1, %v20554_v60  ;;  %v1931_v12 = vcombine.low %v1858_v5, %v1872_v2  ;;  %v18549_v17 = vcombine.high %v1858_v5, %v1872_v2  ;;  %v1881_v40 = vcombine.high %v1865_v7, %v1865_v7 }
 0x76a   :  { %v1933_v38 = vcombine.low %v1865_v7, %v1879_v11  ;;  %v1941_v39 = vrot.slane %v1931_v12, %v20554_v60  ;;  %v1948_v30 = vrot.slane %v18549_v17, %v20554_v60 }
 0x76c   :  { %v1955_v29 = vrot.slane %v1933_v38, %v20554_v60  ;;  %v1963_v53 = vcombine.low %v1941_v39, %v1948_v30  ;;  %v20825_v39 = vsub.s32 1, %v20479_v4 }
 0x76e   :  { %v1971_v2 = vrot.slane %v1963_v53, %v20554_v60  ;;  %v20829_v30 = vrot.slane %v20634_v56, %v20825_v39 }
 0x7f9   :  { %v1829_v18 = vpop.f32.mrf.mxu0 }
 0x7fa   :  { %v1883_v22 = vcombine.high %v1829_v18, %v1829_v18  ;;  %v1890_v23 = vrot.slane %v1829_v18, %v20554_v60  ;;  %v2186_v18 = vpop.permute.xlu1 %2185 }
 0x7fb   :  { %v19280_v24 = vpop.f32.mrf.mxu0 }
 0x7fc   :  { %v1897_v34 = vrot.slane %v1883_v22, %v20554_v60  ;;  %v1898_v35 = vcombine.high %v1890_v23, %v1890_v23  ;;  %v1906_v37 = vrot.slane %v1890_v23, %v20554_v60 }
 0x7fd   :  { %v2179_v41 = vpop.f32.mrf.mxu0 }
 0x7fe   :  { %v1899_v42 = vcombine.high %v1897_v34, %v1897_v34  ;;  %v1913_v43 = vrot.slane %v1897_v34, %v20554_v60  ;;  %v1920_v44 = vrot.slane %v1898_v35, %v20554_v60  ;;  %v1928_v45 = vcombine.high %v1906_v37, %v1906_v37  ;;  %v2184_v23 = vpop.permute.xlu1 %2183 }
 0x7ff   :  { %v1934_v46 = vcombine.low %v1881_v40, %v1906_v37  ;;  %v2261_v47 = vmul.f32 0.35355338, %v2179_v41  ;;  %v19290_v48 = vpop.f32.mrf.mxu0  ;;  %v1498_v40 = vadd.f32 %v20756_v25, %v20829_v30 }
 0x800   :  { %v1927_v49 = vrot.slane %v1899_v42, %v20554_v60  ;;  %v1929_v50 = vcombine.high %v1913_v43, %v1913_v43  ;;  %v1930_v51 = vcombine.high %v1920_v44, %v1920_v44  ;;  %v1980_v52 = vcombine.low %v1920_v44, %v1928_v45 }
 0x801   :  { %v1962_v55 = vrot.slane %v1934_v46, %v20554_v60  ;;  %v2263_v36 = vsel %vm1049_vm6, %v2261_v47, -inf }
 0x802   :  { %v1981_v57 = vcombine.low %v1930_v51, %v1913_v43  ;;  %v1982_v58 = vcombine.low %v1927_v49, %v1929_v50  ;;  %2264 = vmax.xlane.f32.xlu0 %v2263_v36  ;;  %v1989_v61 = vrot.slane %v1980_v52, %v20554_v60 }
 0x803   :  { %v1964_v59 = vcombine.low %v1955_v29, %v1962_v55 }
 0x804   :  { %v1996_v62 = vrot.slane %v1981_v57, %v20554_v60  ;;  %v2003_v1 = vrot.slane %v1982_v58, %v20554_v60 }
 0x805   :  { %v1978_v5 = vrot.slane %v1964_v59, %v20554_v60 }
 0x806   :  { %v2004_v7 = vcombine.low %v1989_v61, %v1996_v62  ;;  %v2018_v17 = vrot.slane %v2003_v1, %v20554_v60 }
 0x807   :  { %v1979_v11 = vcombine.low %v1971_v2, %v1978_v5 }
 0x808   :  { %v2011_v12 = vrot.slane %v2004_v7, %v20554_v60 }
 0x809   :  { %19283 = vmatprep.mubr.msk.f32.mxu1 %vm155_vm0, %v1979_v11 }
 0x80a   :  { %v2019_v22 = vcombine.low %v2011_v12, %v2018_v17 }
 0x80c   :  { %19284 = vmatmul.mubr.msk.f32.vlgmr.msra.gmra.mxu1 %vm155_vm0, %v2019_v22 }
 0x80d   :  { %19292 = vmatpush3.xpose.msk.msra.mxu1 %vm155_vm0, %v2186_v18  ;;  %19293 = vmatprep.mubr.msk.f32.mxu1 %vm20403_vm5, %v23931_v54 }
 0x80e   :  { %19301 = vmatprep.subr.mxu1 %v23931_v54 }
 0x810   :  { %19294 = vmatmul.mubr.msk.f32.vlgmr.msra.gmra.mxu1 %vm155_vm0, %v2184_v23 }
 0x811   :  { %19303 = vmatprep.mubr.msk.f32.mxu1 %vm20403_vm5, %v23931_v54 }
 0x88b   :  { %v2265_v24 = vpop.xlane.xlu0 %2264 }
 0x88c   :  { %v2269_v34 = vsub.f32 %v2261_v47, %v2265_v24 }
 0x88e   :  { %v2271_v35 = vmul.f32 1.442695, %v2269_v34 }
 0x890   :  { %20078 = vpow2.f32 %v2271_v35 }
 0x89d   :  { %v20079_v37 = vpop.eup %20078 }
 0x89e   :  { %v2275_v38 = vsel %vm1049_vm6, %v20079_v37, 0.0 }
 0x89f   :  { %2276 = vadd.xlane.f32.xlu0 %v2275_v38 }
 0x8cc   :  { %v19285_v41 = vpop.f32.mrf.mxu1 }
 0x8cd   :  { %v20833_v42 = vadd.f32 %v19285_v41, %v1498_v40 }
 0x8ce   :  { %v20835_v43 = vpop.f32.mrf.mxu1 }
 0x8d0   :  { %v2257_v44 = vpop.f32.mrf.mxu1 }
 0x8d1   :  { %v2262_v45 = vmul.f32 0.35355338, %v2257_v44 }
 0x8d2   :  { %v19295_v46 = vpop.f32.mrf.mxu1 }
 0x8d3   :  { %v2266_v47 = vsel %vm1049_vm6, %v2262_v45, -inf }
 0x8d4   :  { %2267 = vmax.xlane.f32.xlu1 %v2266_v47 }
 0x8e5   :  { %2285 = vrot.lane.b32.xlu1 %v20666_v63, %s20412_s29 }
 0x8e9   :  { %2627 = vrot.lane.b32.xlu1 %v20514_v28, %s20406_s2 }
 0x8ed   :  { %2713 = vrot.lane.b32.xlu1 %v20666_v63, %s20413_s30 }
 0x8f1   :  { %2711 = vrot.lane.b32.xlu1 %v20666_v63, %s20414_s1 }
 0x928   :  { %v2277_v56 = vpop.xlane.xlu0 %2276 }
 0x929   :  { %20080 = vrcp.f32 %v2277_v56 }
 0x936   :  { %v20081_v48 = vpop.eup %20080 }
 0x937   :  { %v2282_v52 = vmul.f32 %v20081_v48, %v20079_v37 }
 0x95d   :  { %v2268_v25 = vpop.xlane.xlu1 %2267 }
 0x95e   :  { %v2270_v49 = vsub.f32 %v2262_v45, %v2268_v25 }
 0x960   :  { %v2273_v50 = vmul.f32 1.442695, %v2270_v49 }
 0x961   :  { %v2286_v51 = vpop.permute.xlu1 %2285 }
 0x962   :  { %20082 = vpow2.f32 %v2273_v50  ;;  %19297 = vmatpush3.msk.msra.mxu0 %vm421_vm4, %v2286_v51 }
 0x963   :  { %19299 = vmatmul.mubr.msk.f32.vlgmr.msra.gmra.mxu0 %vm1074_vm7, %v2282_v52 }
 0x965   :  { %v2628_v28 = vpop.permute.xlu1 %2627 }
 0x966   :  { %19306 = vmatprep.subr.mxu0 %v2628_v28 }
 0x967   :  { %19307 = vmatpush3.msra.mxu0 %v2628_v28 }
 0x968   :  { %19316 = vmatprep.subr.mxu0 %v23931_v54 }
 0x969   :  { %v2714_v58 = vpop.permute.xlu1 %2713 }
 0x96d   :  { %v2712_v61 = vpop.permute.xlu1 %2711 }
 0x96f   :  { %v20083_v29 = vpop.eup %20082 }
 0x970   :  { %v2278_v53 = vsel %vm1049_vm6, %v20083_v29, 0.0 }
 0x971   :  { %2279 = vadd.xlane.f32.xlu0 %v2278_v53 }
 0x987   :  { %2362 = vrot.lane.b32.xlu0 %v20672_v3, %s20412_s29 }
 0x98b   :  { %2791 = vrot.lane.b32.xlu0 %v20672_v3, %s20413_s30 }
 0x98f   :  { %2789 = vrot.lane.b32.xlu0 %v20672_v3, %s20414_s1 }
 0x9fa   :  { %v2280_v55 = vpop.xlane.xlu0 %2279 }
 0x9fb   :  { %20084 = vrcp.f32 %v2280_v55 }
 0x9fe   :  { %v2363_v36 = vpop.permute.xlu0 %2362 }
 0x9ff   :  { %19302 = vmatpush3.msk.msra.mxu1 %vm421_vm4, %v2363_v36 }
 0xa00   :  { %19311 = vmatprep.subr.mxu1 %v23931_v54 }
 0xa08   :  { %v20085_v57 = vpop.eup %20084 }
 0xa09   :  { %v2284_v59 = vmul.f32 %v20085_v57, %v20083_v29 }
 0xa0b   :  { %19304 = vmatmul.mubr.msk.f32.vlgmr.msra.gmra.mxu1 %vm1074_vm7, %v2284_v59 }
 0xa0c   :  { %19312 = vmatpush3.xpose.msk.msra.mxu1 %vm155_vm0, %v2714_v58  ;;  %19313 = vmatprep.mubr.msk.f32.mxu1 %vm20403_vm5, %v23931_v54 }
 0xa0d   :  { %19321 = vmatprep.subr.mxu1 %v23931_v54 }
 0xa0f   :  { %19314 = vmatmul.mubr.msk.f32.vlgmr.msra.gmra.mxu1 %vm155_vm0, %v2712_v61 }
 0xa10   :  { %19323 = vmatprep.mubr.msk.f32.mxu1 %vm20403_vm5, %v23931_v54 }
 0xa23   :  { %v2358_v62 = vpop.f32.mrf.mxu0 }
 0xa24   :  { %v2441_v2 = vcombine.high %v2358_v62, %v2358_v62  ;;  %v2448_v5 = vrot.slane %v2358_v62, %v20554_v60 }
 0xa25   :  { %v19300_v1 = vpop.f32.mrf.mxu0 }
 0xa26   :  { %v2455_v7 = vrot.slane %v2441_v2, %v20554_v60  ;;  %v2456_v11 = vcombine.high %v2448_v5, %v2448_v5  ;;  %v2464_v18 = vrot.slane %v2448_v5, %v20554_v60 }
 0xa28   :  { %v2457_v12 = vcombine.high %v2455_v7, %v2455_v7  ;;  %v2478_v17 = vrot.slane %v2456_v11, %v20554_v60  ;;  %v2471_v22 = vrot.slane %v2455_v7, %v20554_v60 }
 0xa2a   :  { %v2485_v23 = vrot.slane %v2457_v12, %v20554_v60  ;;  %v2537_v24 = vcombine.low %v2464_v18, %v2478_v17  ;;  %v18560_v34 = vcombine.high %v2464_v18, %v2478_v17  ;;  %v2487_v25 = vcombine.high %v2471_v22, %v2471_v22 }
 0xa2c   :  { %v2539_v46 = vcombine.low %v2471_v22, %v2485_v23  ;;  %v2547_v47 = vrot.slane %v2537_v24, %v20554_v60  ;;  %v2554_v56 = vrot.slane %v18560_v34, %v20554_v60 }
 0xa2e   :  { %v2561_v59 = vrot.slane %v2539_v46, %v20554_v60  ;;  %v2569_v61 = vcombine.low %v2547_v47, %v2554_v56 }
 0xa30   :  { %v2577_v18 = vrot.slane %v2569_v61, %v20554_v60 }
 0xacb   :  { %v2435_v35 = vpop.f32.mrf.mxu1 }
 0xacc   :  { %v2489_v37 = vcombine.high %v2435_v35, %v2435_v35  ;;  %v2496_v38 = vrot.slane %v2435_v35, %v20554_v60 }
 0xacd   :  { %v19305_v40 = vpop.f32.mrf.mxu1 }
 0xace   :  { %v2503_v41 = vrot.slane %v2489_v37, %v20554_v60  ;;  %v2504_v44 = vcombine.high %v2496_v38, %v2496_v38  ;;  %v2512_v45 = vrot.slane %v2496_v38, %v20554_v60  ;;  %v2792_v37 = vpop.permute.xlu0 %2791 }
 0xacf   :  { %v2785_v48 = vpop.f32.mrf.mxu1 }
 0xad0   :  { %v2505_v49 = vcombine.high %v2503_v41, %v2503_v41  ;;  %v2519_v50 = vrot.slane %v2503_v41, %v20554_v60  ;;  %v2526_v51 = vrot.slane %v2504_v44, %v20554_v60  ;;  %v2534_v52 = vcombine.high %v2512_v45, %v2512_v45 }
 0xad1   :  { %v2540_v28 = vcombine.low %v2487_v25, %v2512_v45  ;;  %v2867_v29 = vmul.f32 0.35355338, %v2785_v48  ;;  %v19315_v53 = vpop.f32.mrf.mxu1 }
 0xad2   :  { %v2533_v55 = vrot.slane %v2505_v49, %v20554_v60  ;;  %v2535_v36 = vcombine.high %v2519_v50, %v2519_v50  ;;  %v2536_v57 = vcombine.high %v2526_v51, %v2526_v51  ;;  %v2586_v58 = vcombine.low %v2526_v51, %v2534_v52  ;;  %v2790_v40 = vpop.permute.xlu0 %2789 }
 0xad3   :  { %v2568_v62 = vrot.slane %v2540_v28, %v20554_v60  ;;  %v2869_v1 = vsel %vm1049_vm6, %v2867_v29, -inf }
 0xad4   :  { %v2587_v2 = vcombine.low %v2536_v57, %v2519_v50  ;;  %v2588_v5 = vcombine.low %v2533_v55, %v2535_v36  ;;  %2870 = vmax.xlane.f32.xlu1 %v2869_v1  ;;  %v2595_v11 = vrot.slane %v2586_v58, %v20554_v60 }
 0xad5   :  { %v2570_v7 = vcombine.low %v2561_v59, %v2568_v62 }
 0xad6   :  { %v2602_v12 = vrot.slane %v2587_v2, %v20554_v60  ;;  %v2609_v17 = vrot.slane %v2588_v5, %v20554_v60 }
 0xad7   :  { %v2584_v22 = vrot.slane %v2570_v7, %v20554_v60 }
 0xad8   :  { %v2610_v23 = vcombine.low %v2595_v11, %v2602_v12  ;;  %v2624_v35 = vrot.slane %v2609_v17, %v20554_v60 }
 0xad9   :  { %v2585_v24 = vcombine.low %v2577_v18, %v2584_v22 }
 0xada   :  { %v2617_v34 = vrot.slane %v2610_v23, %v20554_v60 }
 0xadb   :  { %19308 = vmatprep.mubr.msk.f32.mxu0 %vm155_vm0, %v2585_v24 }
 0xadc   :  { %v2625_v38 = vcombine.low %v2617_v34, %v2624_v35 }
 0xade   :  { %19309 = vmatmul.mubr.msk.f32.vlgmr.msra.gmra.mxu0 %vm155_vm0, %v2625_v38 }
 0xadf   :  { %19317 = vmatpush3.xpose.msk.msra.mxu0 %vm155_vm0, %v2792_v37  ;;  %19318 = vmatprep.mubr.msk.f32.mxu0 %vm20403_vm5, %v23931_v54 }
 0xae0   :  { %19326 = vmatprep.subr.mxu0 %v23931_v54 }
 0xae2   :  { %19319 = vmatmul.mubr.msk.f32.vlgmr.msra.gmra.mxu0 %vm155_vm0, %v2790_v40 }
 0xae3   :  { %19328 = vmatprep.mubr.msk.f32.mxu0 %vm20403_vm5, %v23931_v54 }
 0xb5d   :  { %v2871_v41 = vpop.xlane.xlu1 %2870 }
 0xb5e   :  { %v2875_v44 = vsub.f32 %v2867_v29, %v2871_v41 }
 0xb60   :  { %v2877_v45 = vmul.f32 1.442695, %v2875_v44 }
 0xb62   :  { %20086 = vpow2.f32 %v2877_v45 }
 0xb6f   :  { %v20087_v51 = vpop.eup %20086 }
 0xb70   :  { %v2881_v52 = vsel %vm1049_vm6, %v20087_v51, 0.0 }
 0xb9e   :  { %v19310_v46 = vpop.f32.mrf.mxu0 }
 0xb9f   :  { %v20900_v47 = vadd.f32 %v19310_v46, %v20833_v42 }
 0xba0   :  { %v20902_v56 = vpop.f32.mrf.mxu0 }
 0xba2   :  { %v2863_v25 = vpop.f32.mrf.mxu0 }
 0xba3   :  { %v2868_v48 = vmul.f32 0.35355338, %v2863_v25 }
 0xba4   :  { %v19320_v49 = vpop.f32.mrf.mxu0 }
 0xba5   :  { %v2872_v50 = vsel %vm1049_vm6, %v2868_v48, -inf }
 0xba6   :  { %2873 = vmax.xlane.f32.xlu0 %v2872_v50 }
 0xbaa   :  { %2882 = vadd.xlane.f32.xlu0 %v2881_v52 }
 0xbc0   :  { %2891 = vrot.lane.b32.xlu0 %v20666_v63, %s20415_s11  ;;  %v20318_v63 = vld [vmem:[%s23923_s4 + $0x30] sm:$0xff] }
 0xc2f   :  { %v2874_v28 = vpop.xlane.xlu0 %2873 }
 0xc30   :  { %v2876_v29 = vsub.f32 %v2868_v48, %v2874_v28 }
 0xc32   :  { %v2879_v42 = vmul.f32 1.442695, %v2876_v29 }
 0xc33   :  { %v2883_v53 = vpop.xlane.xlu0 %2882 }
 0xc34   :  { %20088 = vpow2.f32 %v2879_v42 }
 0xc35   :  { %20090 = vrcp.f32 %v2883_v53 }
 0xc37   :  { %v2892_v55 = vpop.permute.xlu0 %2891 }
 0xc38   :  { %19322 = vmatpush3.msk.msra.mxu1 %vm421_vm4, %v2892_v55 }
 0xc41   :  { %v20089_v36 = vpop.eup %20088 }
 0xc42   :  { %v20091_v57 = vpop.eup %20090  ;;  %v2884_v58 = vsel %vm1049_vm6, %v20089_v36, 0.0 }
 0xc43   :  { %2885 = vadd.xlane.f32.xlu1 %v2884_v58  ;;  %v2888_v59 = vmul.f32 %v20091_v57, %v20087_v51 }
 0xc45   :  { %19324 = vmatmul.mubr.msk.f32.vlgmr.msra.gmra.mxu1 %vm1074_vm7, %v2888_v59 }
 0xc54   :  { %2968 = vrot.lane.b32.xlu1 %v20672_v3, %s20415_s11 }
 0xc58   :  { %3233 = vrot.lane.b32.xlu1 %v20318_v63, %s20406_s2 }
 0xccc   :  { %v2886_v61 = vpop.xlane.xlu1 %2885 }
 0xccd   :  { %20092 = vrcp.f32 %v2886_v61 }
 0xcd0   :  { %v2969_v62 = vpop.permute.xlu1 %2968 }
 0xcd1   :  { %19327 = vmatpush3.msk.msra.mxu0 %vm421_vm4, %v2969_v62 }
 0xcd4   :  { %v3234_v11 = vpop.permute.xlu1 %3233 }
 0xcd5   :  { %19331 = vmatprep.subr.mxu1 %v3234_v11 }
 0xcd6   :  { %19332 = vmatpush3.msra.mxu1 %v3234_v11 }
 0xcda   :  { %v20093_v1 = vpop.eup %20092 }
 0xcdb   :  { %v2890_v2 = vmul.f32 %v20093_v1, %v20089_v36 }
 0xcdd   :  { %19329 = vmatmul.mubr.msk.f32.vlgmr.msra.gmra.mxu0 %vm1074_vm7, %v2890_v2 }
 0xd05   :  { %v2964_v5 = vpop.f32.mrf.mxu1 }
 0xd06   :  { %v3047_v3 = vcombine.high %v2964_v5, %v2964_v5  ;;  %v3054_v12 = vrot.slane %v2964_v5, %v20554_v60 }
 0xd07   :  { %v19325_v7 = vpop.f32.mrf.mxu1 }
 0xd08   :  { %v3061_v17 = vrot.slane %v3047_v3, %v20554_v60  ;;  %v3062_v18 = vcombine.high %v3054_v12, %v3054_v12  ;;  %v3070_v24 = vrot.slane %v3054_v12, %v20554_v60 }
 0xd0a   :  { %v3063_v22 = vcombine.high %v3061_v17, %v3061_v17  ;;  %v3084_v23 = vrot.slane %v3062_v18, %v20554_v60  ;;  %v3077_v34 = vrot.slane %v3061_v17, %v20554_v60 }
 0xd0c   :  { %v3091_v35 = vrot.slane %v3063_v22, %v20554_v60  ;;  %v3143_v37 = vcombine.low %v3070_v24, %v3084_v23  ;;  %v18571_v38 = vcombine.high %v3070_v24, %v3084_v23  ;;  %v3093_v52 = vcombine.high %v3077_v34, %v3077_v34 }
 0xd0e   :  { %v3145_v49 = vcombine.low %v3077_v34, %v3091_v35  ;;  %v3153_v50 = vrot.slane %v3143_v37, %v20554_v60  ;;  %v3160_v51 = vrot.slane %v18571_v38, %v20554_v60  ;;  %v1497_v35 = vadd.f32 %v20758_v33, %v20829_v30 }
 0xd0f   :  { %v348_v33 = vcombine.high %v20559_v6, %v20559_v6 }
 0xd10   :  { %v3167_v63 = vrot.slane %v3145_v49, %v20554_v60  ;;  %v3175_v61 = vcombine.low %v3153_v50, %v3160_v51  ;;  %v2103_v37 = vadd.f32 %v20835_v43, %v1497_v35 }
 0xd12   :  { %v3183_v12 = vrot.slane %v3175_v61, %v20554_v60 }
 0xd9d   :  { %v3041_v40 = vpop.f32.mrf.mxu0 }
 0xd9e   :  { %v3095_v41 = vcombine.high %v3041_v40, %v3041_v40  ;;  %v3102_v44 = vrot.slane %v3041_v40, %v20554_v60  ;;  %v2709_v40 = vadd.f32 %v20902_v56, %v2103_v37 }
 0xd9f   :  { %v19330_v45 = vpop.f32.mrf.mxu0 }
 0xda0   :  { %v3109_v46 = vrot.slane %v3095_v41, %v20554_v60  ;;  %v3110_v25 = vcombine.high %v3102_v44, %v3102_v44  ;;  %v3118_v48 = vrot.slane %v3102_v44, %v20554_v60 }
 0xda2   :  { %v3111_v28 = vcombine.high %v3109_v46, %v3109_v46  ;;  %v3125_v29 = vrot.slane %v3109_v46, %v20554_v60  ;;  %v3132_v42 = vrot.slane %v3110_v25, %v20554_v60  ;;  %v3140_v53 = vcombine.high %v3118_v48, %v3118_v48 }
 0xda3   :  { %v3146_v55 = vcombine.low %v3093_v52, %v3118_v48 }
 0xda4   :  { %v3139_v36 = vrot.slane %v3111_v28, %v20554_v60  ;;  %v3141_v57 = vcombine.high %v3125_v29, %v3125_v29  ;;  %v3142_v58 = vcombine.high %v3132_v42, %v3132_v42  ;;  %v3192_v59 = vcombine.low %v3132_v42, %v3140_v53 }
 0xda5   :  { %v3174_v62 = vrot.slane %v3146_v55, %v20554_v60  ;;  %v350_v28 = vcombine.high %v20566_v10, %v20566_v10 }
 0xda6   :  { %v3193_v1 = vcombine.low %v3142_v58, %v3125_v29  ;;  %v3194_v2 = vcombine.low %v3139_v36, %v3141_v57  ;;  %v3201_v7 = vrot.slane %v3192_v59, %v20554_v60 }
 0xda7   :  { %v3176_v5 = vcombine.low %v3167_v63, %v3174_v62 }
 0xda8   :  { %v3208_v11 = vrot.slane %v3193_v1, %v20554_v60  ;;  %v3215_v3 = vrot.slane %v3194_v2, %v20554_v60 }
 0xda9   :  { %v3190_v17 = vrot.slane %v3176_v5, %v20554_v60 }
 0xdaa   :  { %v3216_v18 = vcombine.low %v3201_v7, %v3208_v11  ;;  %v3230_v24 = vrot.slane %v3215_v3, %v20554_v60 }
 0xdab   :  { %v3191_v22 = vcombine.low %v3183_v12, %v3190_v17 }
 0xdac   :  { %v3223_v23 = vrot.slane %v3216_v18, %v20554_v60 }
 0xdad   :  { %19333 = vmatprep.mubr.msk.f32.mxu1 %vm155_vm0, %v3191_v22 }
 0xdae   :  { %v3231_v34 = vcombine.low %v3223_v23, %v3230_v24 }
 0xdb0   :  { %19334 = vmatmul.mubr.msk.f32.vlgmr.msra.gmra.mxu1 %vm155_vm0, %v3231_v34 }
 0xe70   :  { %v19335_v38 = vpop.f32.mrf.mxu1 }
 0xe71   :  { %v3316_v41 = vadd.f32 %v19335_v38, %v20900_v47 }
 0xe72   :  { %v3306_v44 = vpop.f32.mrf.mxu1 }
 0xe73   :  { %v3368_v45 = vcombine.high %v3316_v41, %v3316_v41  ;;  %v3375_v46 = vrot.slane %v3316_v41, %v20554_v60  ;;  %v3315_v25 = vadd.f32 %v3306_v44, %v2709_v40 }
 0xe75   :  { %v3382_v48 = vrot.slane %v3368_v45, %v20554_v60  ;;  %v3383_v49 = vcombine.high %v3375_v46, %v3375_v46  ;;  %v3391_v50 = vrot.slane %v3375_v46, %v20554_v60  ;;  %v3319_v51 = vcombine.high %v3315_v25, %v3315_v25 }
 0xe76   :  { %v3326_v30 = vrot.slane %v3315_v25, %v20554_v60 }
 0xe77   :  { %v3384_v43 = vcombine.high %v3382_v48, %v3382_v48  ;;  %v3398_v56 = vrot.slane %v3382_v48, %v20554_v60  ;;  %v3405_v47 = vrot.slane %v3383_v49, %v20554_v60  ;;  %v3413_v52 = vcombine.high %v3391_v50, %v3391_v50 }
 0xe78   :  { %v3333_v29 = vrot.slane %v3319_v51, %v20554_v60  ;;  %v3334_v42 = vcombine.high %v3326_v30, %v3326_v30  ;;  %v3342_v53 = vrot.slane %v3326_v30, %v20554_v60  ;;  %v20963_v57 = vadd.f32 %v3391_v50, %v20587_v20 }
 0xe79   :  { %v3412_v55 = vrot.slane %v3384_v43, %v20554_v60  ;;  %v3414_v36 = vcombine.high %v3405_v47, %v3405_v47  ;;  %v20966_v58 = vadd.f32 %v3405_v47, %v20591_v21  ;;  %v20969_v59 = vadd.f32 %v3413_v52, %v20608_v32 }
 0xe7a   :  { %v3335_v63 = vcombine.high %v3333_v29, %v3333_v29  ;;  %v3349_v61 = vrot.slane %v3333_v29, %v20554_v60  ;;  %v3356_v62 = vrot.slane %v3334_v42, %v20554_v60  ;;  %v3441_v2 = vadd.f32 %v3398_v56, %v20600_v26 }
 0xe7b   :  { %v3440_v1 = vadd.f32 %v3414_v36, %v20584_v19  ;;  %v3506_v5 = vcombine.low %v20963_v57, %v20966_v58  ;;  %v3364_v20 = vcombine.high %v3342_v53, %v3342_v53  ;;  %v20982_v3 = vadd.f32 %v3342_v53, %v20559_v6 }
 0xe7c   :  { %v3363_v7 = vrot.slane %v3335_v63, %v20554_v60  ;;  %v3365_v21 = vcombine.high %v3349_v61, %v3349_v61  ;;  %v3366_v11 = vcombine.high %v3356_v62, %v3356_v62  ;;  %v20979_v32 = vadd.f32 %v3356_v62, %v20566_v10 }
 0xe7d   :  { %v20984_v12 = vadd.f32 %v3364_v20, %v348_v33  ;;  %v3442_v19 = vadd.f32 %v3412_v55, %v20604_v27  ;;  %v3507_v26 = vcombine.low %v20969_v59, %v3440_v1  ;;  %v20991_v22 = vadd.f32 %v3349_v61, %v20563_v9 }
 0xe7e   :  { %v3367_v17 = vcombine.high %v3363_v7, %v3363_v7  ;;  %v20988_v18 = vadd.f32 %v3366_v11, %v350_v28  ;;  %v20994_v23 = vadd.f32 %v3363_v7, %v20573_v14  ;;  %v3457_v10 = vcombine.low %v20982_v3, %v20979_v32 }
 0xe7f   :  { %v3508_v6 = vcombine.low %v3441_v2, %v3442_v19  ;;  %v3515_v24 = vrot.slane %v3506_v5, %v20554_v60  ;;  %v3522_v34 = vrot.slane %v3507_v26, %v20554_v60  ;;  %v21001_v27 = vadd.f32 %v3365_v21, %v20577_v15 }
 0xe80   :  { %v21004_v35 = vadd.f32 %v3367_v17, %v20570_v13  ;;  %v3458_v9 = vcombine.low %v20984_v12, %v20988_v18  ;;  %v3459_v14 = vcombine.low %v20991_v22, %v20994_v23  ;;  %v3467_v41 = vrot.slane %v3457_v10, %v20554_v60 }
 0xe81   :  { %v3529_v37 = vrot.slane %v3508_v6, %v20554_v60  ;;  %v3530_v38 = vcombine.low %v3515_v24, %v3522_v34  ;;  %v21024_v56 = vsub.s32 2, %v20479_v4  ;;  %v21027_v47 = vsub.s32 3, %v20479_v4 }
 0xe82   :  { %v3460_v40 = vcombine.low %v21001_v27, %v21004_v35  ;;  %v3474_v15 = vrot.slane %v3458_v9, %v20554_v60  ;;  %v3481_v45 = vrot.slane %v3459_v14, %v20554_v60  ;;  %v21030_v52 = vsub.s32 4, %v20479_v4 }
 0xe83   :  { %v3537_v44 = vrot.slane %v3530_v38, %v20554_v60  ;;  %v3544_v13 = vrot.slane %v3529_v37, %v20554_v60  ;;  %v21033_v28 = vsub.s32 5, %v20479_v4  ;;  %v21040_v61 = vsub.s32 6, %v20479_v4 }
 0xe84   :  { %v3488_v46 = vrot.slane %v3460_v40, %v20554_v60  ;;  %v3489_v25 = vcombine.low %v3467_v41, %v3474_v15  ;;  %v21043_v62 = vsub.s32 7, %v20479_v4 }
 0xe85   :  { %v3545_v48 = vcombine.low %v3537_v44, %v3544_v13 }
 0xe86   :  { %v3490_v49 = vcombine.low %v3481_v45, %v3488_v46  ;;  %v3497_v51 = vrot.slane %v3489_v25, %v20554_v60 }
 0xe87   :  { %v3551_v50 = vsel %vm296_vm2, %v3545_v48, 0.0 }
 0xe88   :  { %3552 = vadd.xlane.f32.xlu1 %v3551_v50  ;;  %v3504_v33 = vrot.slane %v3490_v49, %v20554_v60 }
 0xe8a   :  { %v3505_v30 = vcombine.low %v3497_v51, %v3504_v33 }
 0xe8c   :  { %v3548_v43 = vsel %vm617_vm3, %v3505_v30, 0.0 }
 0xe8d   :  { %3549 = vadd.xlane.f32.xlu0 %v3548_v43 }
 0xf11   :  { %v3553_v29 = vpop.xlane.xlu1 %3552 }
 0xf12   :  { %v3556_v42 = vmul.f32 0.03125, %v3553_v29 }
 0xf14   :  { %v3594_v53 = vrot.slane %v3556_v42, %v20533_v31  ;;  %v3598_v55 = vrot.slane %v3556_v42, %v20825_v39  ;;  %v3602_v36 = vrot.slane %v3556_v42, %v21024_v56  ;;  %v3606_v63 = vrot.slane %v3556_v42, %v21027_v47 }
 0xf15   :  { %v3610_v5 = vrot.slane %v3556_v42, %v21030_v52  ;;  %v3614_v20 = vrot.slane %v3556_v42, %v21033_v28 }
 0xf16   :  { %v3550_v7 = vpop.xlane.xlu0 %3549  ;;  %v21048_v21 = vsub.f32 %v20963_v57, %v3594_v53  ;;  %v21051_v11 = vsub.f32 %v20966_v58, %v3598_v55  ;;  %v21054_v26 = vsub.f32 %v20969_v59, %v3602_v36  ;;  %v21056_v17 = vsub.f32 %v3440_v1, %v3606_v63 }
 0xf17   :  { %v3555_v10 = vmul.f32 0.03125, %v3550_v7  ;;  %v21058_v6 = vsub.f32 %v3441_v2, %v3610_v5  ;;  %v21060_v24 = vsub.f32 %v3442_v19, %v3614_v20 }
 0xf18   :  { %v3651_v34 = vmul.f32 %v21048_v21, %v21048_v21  ;;  %v3652_v57 = vmul.f32 %v21051_v11, %v21051_v11  ;;  %v3653_v58 = vmul.f32 %v21054_v26, %v21054_v26  ;;  %v3654_v59 = vmul.f32 %v21056_v17, %v21056_v17 }
 0xf19   :  { %v3562_v1 = vrot.slane %v3555_v10, %v20533_v31  ;;  %v3566_v9 = vrot.slane %v3555_v10, %v20825_v39  ;;  %v3570_v2 = vrot.slane %v3555_v10, %v21024_v56  ;;  %v3574_v19 = vrot.slane %v3555_v10, %v21027_v47 }
 0xf1a   :  { %v3578_v14 = vrot.slane %v3555_v10, %v21030_v52  ;;  %v3582_v37 = vrot.slane %v3555_v10, %v21033_v28  ;;  %v3586_v38 = vrot.slane %v3555_v10, %v21040_v61  ;;  %v3590_v40 = vrot.slane %v3555_v10, %v21043_v62 }
 0xf1b   :  { %v21079_v41 = vsub.f32 %v20982_v3, %v3562_v1  ;;  %v21082_v15 = vsub.f32 %v20979_v32, %v3566_v9  ;;  %v21085_v44 = vsub.f32 %v20984_v12, %v3570_v2  ;;  %v21088_v13 = vsub.f32 %v20988_v18, %v3574_v19 }
 0xf1c   :  { %v21091_v45 = vsub.f32 %v20991_v22, %v3578_v14  ;;  %v21094_v46 = vsub.f32 %v20994_v23, %v3582_v37  ;;  %v21097_v25 = vsub.f32 %v21001_v27, %v3586_v38  ;;  %v21100_v3 = vsub.f32 %v21004_v35, %v3590_v40  ;;  %v514_v40 = vld [vmem:[%s23923_s4 + $0x38] sm:$0xff] }
 0xf1d   :  { %v3643_v32 = vmul.f32 %v21079_v41, %v21079_v41  ;;  %v3644_v12 = vmul.f32 %v21082_v15, %v21082_v15  ;;  %v3645_v18 = vmul.f32 %v21085_v44, %v21085_v44  ;;  %v3646_v22 = vmul.f32 %v21088_v13, %v21088_v13  ;;  %19336 = vmatprep.subr.mxu0 %v514_v40 }
 0xf1e   :  { %v3647_v23 = vmul.f32 %v21091_v45, %v21091_v45  ;;  %v3648_v27 = vmul.f32 %v21094_v46, %v21094_v46  ;;  %v3649_v35 = vmul.f32 %v21097_v25, %v21097_v25  ;;  %v3650_v48 = vmul.f32 %v21100_v3, %v21100_v3  ;;  %19337 = vmatpush3.msra.mxu0 %v514_v40 }
 0xf1f   :  { %v3671_v49 = vcombine.low %v3643_v32, %v3644_v12  ;;  %v3672_v50 = vcombine.low %v3645_v18, %v3646_v22  ;;  %v3655_v51 = vmul.f32 %v21058_v6, %v21058_v6  ;;  %v3656_v33 = vmul.f32 %v21060_v24, %v21060_v24  ;;  %v512_v32 = vld [vmem:[%s23923_s4 + $0x28] sm:$0xff]  ;;  %v510_v12 = vld [vmem:[%s23923_s4 + $0x18] sm:$0xff]  ;;  %v21147_v22 = vld [vmem:[#allocation6] sm:$0xff] }
 0xf20   :  { %v3673_v30 = vcombine.low %v3647_v23, %v3648_v27  ;;  %v3674_v43 = vcombine.low %v3649_v35, %v3650_v48  ;;  %v3720_v29 = vcombine.low %v3651_v34, %v3652_v57  ;;  %v3721_v42 = vcombine.low %v3653_v58, %v3654_v59  ;;  %19338 = vmatprep.subr.mxu0 %v512_v32  ;;  %v508_v18 = vld [vmem:[%s23923_s4 + $0x8] sm:$0xff] }
 0xf21   :  { %v3681_v53 = vrot.slane %v3671_v49, %v20554_v60  ;;  %v3688_v55 = vrot.slane %v3672_v50, %v20554_v60  ;;  %v3722_v36 = vcombine.low %v3655_v51, %v3656_v33  ;;  %19339 = vmatpush3.msra.mxu0 %v512_v32  ;;  %v3863_v23 = vrot.slane %v21147_v22, %v21030_v52 }
 0xf22   :  { %v3695_v63 = vrot.slane %v3673_v30, %v20554_v60  ;;  %v3702_v5 = vrot.slane %v3674_v43, %v20554_v60  ;;  %v3729_v20 = vrot.slane %v3720_v29, %v20554_v60  ;;  %v3736_v7 = vrot.slane %v3721_v42, %v20554_v60  ;;  %19340 = vmatprep.subr.mxu0 %v510_v12 }
 0xf23   :  { %v3703_v10 = vcombine.low %v3681_v53, %v3688_v55  ;;  %v3743_v9 = vrot.slane %v3722_v36, %v20554_v60  ;;  %19341 = vmatpush3.msra.mxu0 %v510_v12  ;;  %v3939_v27 = vrot.slane %v21147_v22, %v21033_v28  ;;  %v3865_v49 = vcombine.high %v3863_v23, %v3863_v23 }
 0xf24   :  { %v3704_v1 = vcombine.low %v3695_v63, %v3702_v5  ;;  %v3744_v2 = vcombine.low %v3729_v20, %v3736_v7  ;;  %19342 = vmatprep.subr.mxu0 %v508_v18  ;;  %v3872_v43 = vrot.slane %v3863_v23, %v20554_v60 }
 0xf25   :  { %v3711_v34 = vrot.slane %v3703_v10, %v20554_v60  ;;  %v3758_v19 = vrot.slane %v3743_v9, %v20554_v60  ;;  %19343 = vmatpush3.msra.mxu0 %v508_v18  ;;  %v3941_v50 = vcombine.high %v3939_v27, %v3939_v27  ;;  %v3879_v29 = vrot.slane %v3865_v49, %v20554_v60 }
 0xf26   :  { %v3718_v57 = vrot.slane %v3704_v1, %v20554_v60  ;;  %v3751_v58 = vrot.slane %v3744_v2, %v20554_v60  ;;  %v3948_v42 = vrot.slane %v3939_v27, %v20554_v60  ;;  %v3880_v36 = vcombine.high %v3872_v43, %v3872_v43 }
 0xf27   :  { %v3955_v53 = vrot.slane %v3941_v50, %v20554_v60  ;;  %v3881_v63 = vcombine.high %v3879_v29, %v3879_v29  ;;  %v21158_v7 = vrot.slane %v3872_v43, %v20554_v60  ;;  %v21161_v10 = vrot.slane %v3879_v29, %v20554_v60 }
 0xf28   :  { %v3719_v59 = vcombine.low %v3711_v34, %v3718_v57  ;;  %v3759_v37 = vcombine.low %v3751_v58, %v3758_v19  ;;  %v3956_v5 = vcombine.high %v3948_v42, %v3948_v42  ;;  %v21164_v1 = vrot.slane %v3880_v36, %v20554_v60 }
 0xf29   :  { %v3957_v20 = vcombine.high %v3955_v53, %v3955_v53  ;;  %v21167_v9 = vrot.slane %v3881_v63, %v20554_v60  ;;  %v21170_v2 = vrot.slane %v3948_v42, %v20554_v60  ;;  %v21173_v34 = vrot.slane %v3955_v53, %v20554_v60 }
 0xf2a   :  { %v3762_v14 = vsel %vm617_vm3, %v3719_v59, 0.0  ;;  %v3765_v38 = vsel %vm296_vm2, %v3759_v37, 0.0  ;;  %v21176_v57 = vrot.slane %v3956_v5, %v20554_v60  ;;  %v3910_v59 = vcombine.high %v21158_v7, %v21158_v7 }
 0xf2b   :  { %3763 = vadd.xlane.f32.xlu0 %v3762_v14  ;;  %v21179_v58 = vrot.slane %v3957_v20, %v20554_v60  ;;  %v3911_v19 = vcombine.high %v21161_v10, %v21161_v10  ;;  %v3912_v14 = vcombine.high %v21164_v1, %v21164_v1  ;;  %v3913_v37 = vcombine.high %v21167_v9, %v21167_v9 }
 0xf2c   :  { %v3986_v40 = vcombine.high %v21170_v2, %v21170_v2  ;;  %v3987_v32 = vcombine.high %v21173_v34, %v21173_v34  ;;  %v3988_v12 = vcombine.high %v21176_v57, %v21176_v57 }
 0xf2d   :  { %v3989_v18 = vcombine.high %v21179_v58, %v21179_v58 }
 0xf2f   :  { %3766 = vadd.xlane.f32.xlu0 %v3765_v38 }
 0xfb4   :  { %v3764_v35 = vpop.xlane.xlu0 %3763 }
 0xfb5   :  { %v3768_v48 = vmul.f32 0.03125, %v3764_v35 }
 0xfb7   :  { %v3770_v51 = vadd.f32 1e-05, %v3768_v48 }
 0xfb8   :  { %v3767_v33 = vpop.xlane.xlu0 %3766 }
 0xfb9   :  { %20094 = vrsqrt.f32 %v3770_v51  ;;  %v3769_v30 = vmul.f32 0.03125, %v3767_v33 }
 0xfbb   :  { %v3771_v55 = vadd.f32 1e-05, %v3769_v30 }
 0xfbd   :  { %20096 = vrsqrt.f32 %v3771_v55 }
 0xfc6   :  { %v20095_v38 = vpop.eup %20094 }
 0xfc7   :  { %v3779_v23 = vrot.slane %v20095_v38, %v20533_v31  ;;  %v3783_v27 = vrot.slane %v20095_v38, %v20825_v39  ;;  %v3787_v35 = vrot.slane %v20095_v38, %v21024_v56  ;;  %v3791_v48 = vrot.slane %v20095_v38, %v21027_v47 }
 0xfc8   :  { %v3795_v49 = vrot.slane %v20095_v38, %v21030_v52  ;;  %v3799_v50 = vrot.slane %v20095_v38, %v21033_v28  ;;  %v3803_v51 = vrot.slane %v20095_v38, %v21040_v61  ;;  %v3807_v33 = vrot.slane %v20095_v38, %v21043_v62 }
 0xfc9   :  { %v3846_v30 = vmul.f32 %v3779_v23, %v21079_v41  ;;  %v3847_v43 = vmul.f32 %v3783_v27, %v21082_v15  ;;  %v3848_v29 = vmul.f32 %v3787_v35, %v21085_v44  ;;  %v3849_v42 = vmul.f32 %v3791_v48, %v21088_v13 }
 0xfca   :  { %v20097_v53 = vpop.eup %20096  ;;  %v3850_v55 = vmul.f32 %v3795_v49, %v21091_v45  ;;  %v3851_v36 = vmul.f32 %v3799_v50, %v21094_v46  ;;  %v3852_v63 = vmul.f32 %v3803_v51, %v21097_v25  ;;  %v3853_v5 = vmul.f32 %v3807_v33, %v21100_v3 }
 0xfcb   :  { %v3819_v20 = vrot.slane %v20097_v53, %v21024_v56  ;;  %v3823_v38 = vrot.slane %v20097_v53, %v21027_v47  ;;  %v3922_v41 = vmul.f32 %v21158_v7, %v3846_v30  ;;  %v3923_v15 = vmul.f32 %v21164_v1, %v3847_v43 }
 0xfcc   :  { %v3924_v44 = vmul.f32 %v3910_v59, %v3848_v29  ;;  %v3925_v23 = vmul.f32 %v3912_v14, %v3849_v42  ;;  %v3926_v13 = vmul.f32 %v21161_v10, %v3850_v55  ;;  %v3927_v45 = vmul.f32 %v21167_v9, %v3851_v36 }
 0xfcd   :  { %v3856_v46 = vmul.f32 %v3819_v20, %v21054_v26  ;;  %v3857_v25 = vmul.f32 %v3823_v38, %v21056_v17  ;;  %v3928_v27 = vmul.f32 %v3911_v19, %v3852_v63  ;;  %v3929_v3 = vmul.f32 %v3913_v37, %v3853_v5 }
 0xfce   :  { %v21222_v35 = vadd.f32 %v21170_v2, %v3922_v41  ;;  %v21225_v48 = vadd.f32 %v21176_v57, %v3923_v15  ;;  %v21227_v49 = vadd.f32 %v3986_v40, %v3924_v44  ;;  %v21229_v50 = vadd.f32 %v3988_v12, %v3925_v23 }
 0xfcf   :  { %v3932_v51 = vmul.f32 %v3910_v59, %v3856_v46  ;;  %v3933_v33 = vmul.f32 %v3912_v14, %v3857_v25  ;;  %v21232_v30 = vadd.f32 %v21173_v34, %v3926_v13  ;;  %v21235_v26 = vadd.f32 %v21179_v58, %v3927_v45 }
 0xfd0   :  { %v21237_v17 = vadd.f32 %v3987_v32, %v3928_v27  ;;  %v21239_v19 = vadd.f32 %v3989_v18, %v3929_v3  ;;  %v4030_v37 = vcombine.low %v21222_v35, %v21225_v48  ;;  %v4031_v43 = vcombine.low %v21227_v49, %v21229_v50 }
 0xfd1   :  { %v21245_v29 = vadd.f32 %v3986_v40, %v3932_v51  ;;  %v21247_v59 = vadd.f32 %v3988_v12, %v3933_v33  ;;  %v4032_v14 = vcombine.low %v21232_v30, %v21235_v26  ;;  %v3811_v42 = vrot.slane %v20097_v53, %v20533_v31 }
 0xfd2   :  { %v4033_v32 = vcombine.low %v21237_v17, %v21239_v19  ;;  %v4040_v18 = vrot.slane %v4030_v37, %v20554_v60  ;;  %v4047_v55 = vrot.slane %v4031_v43, %v20554_v60  ;;  %v3815_v36 = vrot.slane %v20097_v53, %v20825_v39  ;;  %v523_v37 = vld [vmem:[%s23924_s5 + $0x38] sm:$0xff]  ;;  %v522_v43 = vld [vmem:[%s23924_s5 + $0x30] sm:$0xff] }
 0xfd3   :  { %v4054_v63 = vrot.slane %v4032_v14, %v20554_v60  ;;  %v3827_v40 = vrot.slane %v20097_v53, %v21030_v52  ;;  %v3831_v12 = vrot.slane %v20097_v53, %v21033_v28  ;;  %v3854_v5 = vmul.f32 %v3811_v42, %v21048_v21  ;;  %19347 = vmatprep.subr.mxu1 %v523_v37  ;;  %v521_v14 = vld [vmem:[%s23924_s5 + $0x28] sm:$0xff]  ;;  %v520_v42 = vld [vmem:[%s23924_s5 + $0x20] sm:$0xff] }
 0xfd4   :  { %v4061_v20 = vrot.slane %v4033_v32, %v20554_v60  ;;  %v4062_v38 = vcombine.low %v4040_v18, %v4047_v55  ;;  %v3855_v41 = vmul.f32 %v3815_v36, %v21051_v11  ;;  %v4080_v53 = vcombine.low %v21245_v29, %v21247_v59  ;;  %19348 = vmatpush3.msra.mxu1 %v523_v37  ;;  %v519_v32 = vld [vmem:[%s23924_s5 + $0x18] sm:$0xff]  ;;  %v518_v18 = vld [vmem:[%s23924_s5 + $0x10] sm:$0xff]  ;;  %v517_v55 = vld [vmem:[%s23924_s5 + $0x8] sm:$0xff] }
 0xfd5   :  { %v3858_v15 = vmul.f32 %v3827_v40, %v21058_v6  ;;  %v3859_v44 = vmul.f32 %v3831_v12, %v21060_v24  ;;  %v3930_v23 = vmul.f32 %v21158_v7, %v3854_v5  ;;  %19349 = vmatprep.subr.mxu1 %v522_v43  ;;  %v516_v36 = vld [vmem:[%s23924_s5] sm:$0xff] }
 0xfd6   :  { %v4063_v13 = vcombine.low %v4054_v63, %v4061_v20  ;;  %v4070_v45 = vrot.slane %v4062_v38, %v20554_v60  ;;  %v3931_v46 = vmul.f32 %v21164_v1, %v3855_v41  ;;  %19350 = vmatpush3.msra.mxu1 %v522_v43  ;;  %v4015_v63 = vrot.slane %v21147_v22, %v21024_v56 }
 0xfd7   :  { %v3934_v21 = vmul.f32 %v21161_v10, %v3858_v15  ;;  %v3935_v25 = vmul.f32 %v21167_v9, %v3859_v44  ;;  %v21273_v11 = vadd.f32 %v21170_v2, %v3930_v23  ;;  %v4095_v9 = vrot.slane %v4080_v53, %v20554_v60  ;;  %19351 = vmatprep.subr.mxu1 %v521_v14 }
 0xfd8   :  { %v4077_v6 = vrot.slane %v4063_v13, %v20554_v60  ;;  %v21277_v24 = vadd.f32 %v21176_v57, %v3931_v46  ;;  %19352 = vmatpush3.msra.mxu1 %v521_v14 }
 0xfd9   :  { %v21280_v7 = vadd.f32 %v21173_v34, %v3934_v21  ;;  %v21283_v1 = vadd.f32 %v21179_v58, %v3935_v25  ;;  %19353 = vmatprep.subr.mxu1 %v520_v42  ;;  %v4211_v25 = vrot.slane %v21147_v22, %v21027_v47 }
 0xfda   :  { %v4078_v27 = vcombine.low %v4070_v45, %v4077_v6  ;;  %v4079_v10 = vcombine.low %v21273_v11, %v21277_v24  ;;  %19354 = vmatpush3.msra.mxu1 %v520_v42 }
 0xfdb   :  { %v4081_v2 = vcombine.low %v21280_v7, %v21283_v1  ;;  %19355 = vmatprep.subr.mxu1 %v519_v32 }
 0xfdc   :  { %19344 = vmatprep.mubr.msk.f32.mxu0 %vm617_vm3, %v4078_v27  ;;  %v4088_v57 = vrot.slane %v4079_v10, %v20554_v60  ;;  %19356 = vmatpush3.msra.mxu1 %v519_v32 }
 0xfdd   :  { %v4102_v3 = vrot.slane %v4081_v2, %v20554_v60  ;;  %19357 = vmatprep.subr.mxu1 %v518_v18 }
 0xfde   :  { %v4103_v34 = vcombine.low %v4088_v57, %v4095_v9  ;;  %19358 = vmatpush3.msra.mxu1 %v518_v18 }
 0xfdf   :  { %v4117_v58 = vrot.slane %v4102_v3, %v20554_v60  ;;  %19359 = vmatprep.subr.mxu1 %v517_v55 }
 0xfe0   :  { %v4110_v51 = vrot.slane %v4103_v34, %v20554_v60  ;;  %19360 = vmatpush3.msra.mxu1 %v517_v55 }
 0xfe1   :  { %19361 = vmatprep.subr.mxu1 %v516_v36 }
 0xfe2   :  { %v4118_v33 = vcombine.low %v4110_v51, %v4117_v58  ;;  %19362 = vmatpush3.msra.mxu1 %v516_v36 }
 0xfe3   :  { %19382 = vmatprep.subr.mxu1 %v23931_v54 }
 0xfe4   :  { %19345 = vmatmul.mubr.msk.f32.vlgmr.msra.gmra.mxu0 %vm617_vm3, %v4118_v33 }
0x10a4   :  { %v19346_v40 = vpop.f32.mrf.mxu0 }
0x10a5   :  { %v4195_v12 = vadd.f32 %v19346_v40, %v4015_v63 }
0x10a6   :  { %v4189_v5 = vpop.f32.mrf.mxu0 }
0x10a7   :  { %v4201_v20 = vmul.f32 0.70710677, %v4195_v12  ;;  %v4190_v38 = vadd.f32 %v4189_v5, %v4015_v63  ;;  %v4199_v46 = vmul.f32 0.5, %v4195_v12 }
0x10a9   :  { %20098 = verf.f32 %v4201_v20  ;;  %v4200_v41 = vmul.f32 0.70710677, %v4190_v38  ;;  %v4198_v13 = vmul.f32 0.5, %v4190_v38 }
0x10ab   :  { %20100 = verf.f32 %v4200_v41 }
0x10b6   :  { %v20099_v15 = vpop.eup %20098 }
0x10b7   :  { %v4205_v23 = vadd.f32 1.0, %v20099_v15 }
0x10b8   :  { %v20101_v44 = vpop.eup %20100 }
0x10b9   :  { %v4204_v45 = vadd.f32 1.0, %v20101_v44  ;;  %v4207_v21 = vmul.f32 %v4205_v23, %v4199_v46 }
0x10bb   :  { %v4206_v53 = vmul.f32 %v4204_v45, %v4198_v13 }
0x10bd   :  { %19363 = vmatprep.mubr.msk.f32.mxu1 %vm4212_vm8, %v4206_v53 }
0x10be   :  { %19364 = vmatmul.mubr.msk.f32.vlgmr.msra.gmra.mxu1 %vm4212_vm8, %v4207_v21 }
0x10bf   :  { %19384 = vmatprep.mubr.msk.f32.mxu1 %vm20403_vm5, %v23931_v54 }
0x117e   :  { %v19365_v6 = vpop.f32.mrf.mxu1 }
0x117f   :  { %v4291_v27 = vadd.f32 %v19365_v6, %v4211_v25 }
0x1180   :  { %v4285_v10 = vpop.f32.mrf.mxu1 }
0x1181   :  { %v4345_v9 = vcombine.high %v4291_v27, %v4291_v27  ;;  %v4352_v2 = vrot.slane %v4291_v27, %v20554_v60  ;;  %v4286_v57 = vadd.f32 %v4285_v10, %v4211_v25 }
0x1183   :  { %v4359_v3 = vrot.slane %v4345_v9, %v20554_v60  ;;  %v4360_v34 = vcombine.high %v4352_v2, %v4352_v2  ;;  %v4368_v51 = vrot.slane %v4352_v2, %v20554_v60  ;;  %v4296_v58 = vcombine.high %v4286_v57, %v4286_v57 }
0x1184   :  { %v4303_v33 = vrot.slane %v4286_v57, %v20554_v60 }
0x1185   :  { %v4361_v37 = vcombine.high %v4359_v3, %v4359_v3  ;;  %v4375_v43 = vrot.slane %v4359_v3, %v20554_v60  ;;  %v4382_v14 = vrot.slane %v4360_v34, %v20554_v60  ;;  %v4390_v42 = vcombine.high %v4368_v51, %v4368_v51 }
0x1186   :  { %v4310_v32 = vrot.slane %v4296_v58, %v20554_v60  ;;  %v4311_v18 = vcombine.high %v4303_v33, %v4303_v33  ;;  %v4319_v55 = vrot.slane %v4303_v33, %v20554_v60  ;;  %v4414_v40 = vadd.f32 %v4368_v51, %v21273_v11 }
0x1187   :  { %v4389_v36 = vrot.slane %v4361_v37, %v20554_v60  ;;  %v4391_v63 = vcombine.high %v4382_v14, %v4382_v14  ;;  %v4415_v12 = vadd.f32 %v4382_v14, %v21277_v24  ;;  %v4416_v5 = vadd.f32 %v4390_v42, %v21245_v29 }
0x1188   :  { %v4312_v20 = vcombine.high %v4310_v32, %v4310_v32  ;;  %v4326_v38 = vrot.slane %v4310_v32, %v20554_v60  ;;  %v4333_v41 = vrot.slane %v4311_v18, %v20554_v60  ;;  %v4418_v44 = vadd.f32 %v4375_v43, %v21280_v7 }
0x1189   :  { %v4417_v15 = vadd.f32 %v4391_v63, %v21247_v59  ;;  %v4483_v23 = vcombine.low %v4414_v40, %v4415_v12  ;;  %v4341_v13 = vcombine.high %v4319_v55, %v4319_v55  ;;  %v21350_v29 = vadd.f32 %v4319_v55, %v21222_v35 }
0x118a   :  { %v4340_v45 = vrot.slane %v4312_v20, %v20554_v60  ;;  %v4342_v46 = vcombine.high %v4326_v38, %v4326_v38  ;;  %v4343_v53 = vcombine.high %v4333_v41, %v4333_v41  ;;  %v21347_v11 = vadd.f32 %v4333_v41, %v21225_v48 }
0x118b   :  { %v21353_v24 = vadd.f32 %v4341_v13, %v21227_v49  ;;  %v4419_v21 = vadd.f32 %v4389_v36, %v21283_v1  ;;  %v4484_v59 = vcombine.low %v4416_v5, %v4417_v15  ;;  %v21360_v6 = vadd.f32 %v4326_v38, %v21232_v30 }
0x118c   :  { %v4344_v25 = vcombine.high %v4340_v45, %v4340_v45  ;;  %v21357_v7 = vadd.f32 %v4343_v53, %v21229_v50  ;;  %v21363_v27 = vadd.f32 %v4340_v45, %v21235_v26  ;;  %v4434_v35 = vcombine.low %v21350_v29, %v21347_v11 }
0x118d   :  { %v4485_v48 = vcombine.low %v4418_v44, %v4419_v21  ;;  %v4492_v49 = vrot.slane %v4483_v23, %v20554_v60  ;;  %v4499_v10 = vrot.slane %v4484_v59, %v20554_v60  ;;  %v21370_v1 = vadd.f32 %v4342_v46, %v21237_v17 }
0x118e   :  { %v21373_v50 = vadd.f32 %v4344_v25, %v21239_v19  ;;  %v4435_v30 = vcombine.low %v21353_v24, %v21357_v7  ;;  %v4436_v26 = vcombine.low %v21360_v6, %v21363_v27  ;;  %v4444_v3 = vrot.slane %v4434_v35, %v20554_v60 }
0x118f   :  { %v4506_v9 = vrot.slane %v4485_v48, %v20554_v60  ;;  %v4507_v2 = vcombine.low %v4492_v49, %v4499_v10 }
0x1190   :  { %v4437_v57 = vcombine.low %v21370_v1, %v21373_v50  ;;  %v4451_v17 = vrot.slane %v4435_v30, %v20554_v60  ;;  %v4458_v51 = vrot.slane %v4436_v26, %v20554_v60 }
0x1191   :  { %v4514_v34 = vrot.slane %v4507_v2, %v20554_v60  ;;  %v4521_v19 = vrot.slane %v4506_v9, %v20554_v60 }
0x1192   :  { %v4465_v58 = vrot.slane %v4437_v57, %v20554_v60  ;;  %v4466_v33 = vcombine.low %v4444_v3, %v4451_v17 }
0x1193   :  { %v4522_v37 = vcombine.low %v4514_v34, %v4521_v19 }
0x1194   :  { %v4467_v43 = vcombine.low %v4458_v51, %v4465_v58  ;;  %v4474_v42 = vrot.slane %v4466_v33, %v20554_v60 }
0x1195   :  { %v4528_v14 = vsel %vm296_vm2, %v4522_v37, 0.0 }
0x1196   :  { %4529 = vadd.xlane.f32.xlu0 %v4528_v14  ;;  %v4481_v32 = vrot.slane %v4467_v43, %v20554_v60 }
0x1198   :  { %v4482_v18 = vcombine.low %v4474_v42, %v4481_v32 }
0x119a   :  { %v4525_v55 = vsel %vm617_vm3, %v4482_v18, 0.0 }
0x119b   :  { %4526 = vadd.xlane.f32.xlu1 %v4525_v55 }
0x121f   :  { %v4530_v36 = vpop.xlane.xlu0 %4529 }
0x1220   :  { %v4532_v63 = vmul.f32 0.03125, %v4530_v36 }
0x1222   :  { %v4570_v20 = vrot.slane %v4532_v63, %v20533_v31  ;;  %v4574_v38 = vrot.slane %v4532_v63, %v20825_v39  ;;  %v4578_v41 = vrot.slane %v4532_v63, %v21024_v56  ;;  %v4582_v23 = vrot.slane %v4532_v63, %v21027_v47 }
0x1223   :  { %v4586_v13 = vrot.slane %v4532_v63, %v21030_v52  ;;  %v4590_v45 = vrot.slane %v4532_v63, %v21033_v28 }
0x1224   :  { %v4527_v46 = vpop.xlane.xlu1 %4526  ;;  %v21398_v53 = vsub.f32 %v4414_v40, %v4570_v20  ;;  %v21400_v59 = vsub.f32 %v4415_v12, %v4574_v38  ;;  %v21402_v25 = vsub.f32 %v4416_v5, %v4578_v41  ;;  %v21404_v35 = vsub.f32 %v4417_v15, %v4582_v23 }
0x1225   :  { %v4531_v48 = vmul.f32 0.03125, %v4527_v46  ;;  %v21406_v49 = vsub.f32 %v4418_v44, %v4586_v13  ;;  %v21408_v10 = vsub.f32 %v4419_v21, %v4590_v45 }
0x1226   :  { %v4627_v30 = vmul.f32 %v21398_v53, %v21398_v53  ;;  %v4628_v26 = vmul.f32 %v21400_v59, %v21400_v59  ;;  %v4629_v40 = vmul.f32 %v21402_v25, %v21402_v25  ;;  %v4630_v12 = vmul.f32 %v21404_v35, %v21404_v35 }
0x1227   :  { %v4631_v5 = vmul.f32 %v21406_v49, %v21406_v49  ;;  %v4632_v15 = vmul.f32 %v21408_v10, %v21408_v10  ;;  %v4538_v44 = vrot.slane %v4531_v48, %v20533_v31  ;;  %v4542_v21 = vrot.slane %v4531_v48, %v20825_v39 }
0x1228   :  { %v4696_v9 = vcombine.low %v4627_v30, %v4628_v26  ;;  %v4697_v2 = vcombine.low %v4629_v40, %v4630_v12  ;;  %v4546_v57 = vrot.slane %v4531_v48, %v21024_v56  ;;  %v4550_v3 = vrot.slane %v4531_v48, %v21027_v47 }
0x1229   :  { %v4698_v17 = vcombine.low %v4631_v5, %v4632_v15  ;;  %v4554_v34 = vrot.slane %v4531_v48, %v21030_v52  ;;  %v4558_v19 = vrot.slane %v4531_v48, %v21033_v28  ;;  %v4562_v51 = vrot.slane %v4531_v48, %v21040_v61 }
0x122a   :  { %v4705_v58 = vrot.slane %v4696_v9, %v20554_v60  ;;  %v4712_v33 = vrot.slane %v4697_v2, %v20554_v60  ;;  %v4566_v37 = vrot.slane %v4531_v48, %v21043_v62  ;;  %v21433_v43 = vsub.f32 %v21350_v29, %v4538_v44 }
0x122b   :  { %v4719_v14 = vrot.slane %v4698_v17, %v20554_v60  ;;  %v21437_v42 = vsub.f32 %v21347_v11, %v4542_v21  ;;  %v21440_v32 = vsub.f32 %v21353_v24, %v4546_v57  ;;  %v21443_v18 = vsub.f32 %v21357_v7, %v4550_v3  ;;  %v18584_v17 = vld [vmem:[%s23923_s4 + $0x70] sm:$0xff] }
0x122c   :  { %v4720_v55 = vcombine.low %v4705_v58, %v4712_v33  ;;  %v21446_v36 = vsub.f32 %v21360_v6, %v4554_v34  ;;  %v21449_v63 = vsub.f32 %v21363_v27, %v4558_v19  ;;  %v21452_v29 = vsub.f32 %v21370_v1, %v4562_v51  ;;  %v21489_v34 = vld [vmem:[%s23923_s4 + $0x60] sm:$0xff]  ;;  %19366 = vmatprep.subr.mxu0 %v18584_v17  ;;  %v21494_v19 = vld [vmem:[%s23923_s4 + $0x50] sm:$0xff] }
0x122d   :  { %v4734_v20 = vrot.slane %v4719_v14, %v20554_v60  ;;  %v21456_v11 = vsub.f32 %v21373_v50, %v4566_v37  ;;  %v4619_v24 = vmul.f32 %v21433_v43, %v21433_v43  ;;  %v4620_v7 = vmul.f32 %v21437_v42, %v21437_v42  ;;  %19367 = vmatpush3.msra.mxu0 %v18584_v17  ;;  %v21501_v51 = vld [vmem:[%s23923_s4 + $0x40] sm:$0xff] }
0x122e   :  { %v4727_v6 = vrot.slane %v4720_v55, %v20554_v60  ;;  %v4621_v27 = vmul.f32 %v21440_v32, %v21440_v32  ;;  %v4622_v1 = vmul.f32 %v21443_v18, %v21443_v18  ;;  %v4623_v38 = vmul.f32 %v21446_v36, %v21446_v36  ;;  %19368 = vmatprep.subr.mxu0 %v21489_v34 }
0x122f   :  { %v4624_v50 = vmul.f32 %v21449_v63, %v21449_v63  ;;  %v4625_v41 = vmul.f32 %v21452_v29, %v21452_v29  ;;  %v4626_v23 = vmul.f32 %v21456_v11, %v21456_v11  ;;  %v4647_v13 = vcombine.low %v4619_v24, %v4620_v7  ;;  %19369 = vmatpush3.msra.mxu0 %v21489_v34 }
0x1230   :  { %v4735_v45 = vcombine.low %v4727_v6, %v4734_v20  ;;  %v4648_v46 = vcombine.low %v4621_v27, %v4622_v1  ;;  %19370 = vmatprep.subr.mxu0 %v21494_v19  ;;  %v4839_v37 = vrot.slane %v21147_v22, %v21040_v61  ;;  %v4915_v55 = vrot.slane %v21147_v22, %v21043_v62 }
0x1231   :  { %v4649_v48 = vcombine.low %v4623_v38, %v4624_v50  ;;  %v4650_v30 = vcombine.low %v4625_v41, %v4626_v23  ;;  %v4657_v26 = vrot.slane %v4647_v13, %v20554_v60  ;;  %19371 = vmatpush3.msra.mxu0 %v21494_v19 }
0x1232   :  { %v4741_v40 = vsel %vm296_vm2, %v4735_v45, 0.0  ;;  %v4664_v12 = vrot.slane %v4648_v46, %v20554_v60  ;;  %19372 = vmatprep.subr.mxu0 %v21501_v51  ;;  %v4841_v20 = vcombine.high %v4839_v37, %v4839_v37  ;;  %v4848_v24 = vrot.slane %v4839_v37, %v20554_v60 }
0x1233   :  { %4742 = vadd.xlane.f32.xlu0 %v4741_v40  ;;  %v4671_v5 = vrot.slane %v4649_v48, %v20554_v60  ;;  %v4678_v15 = vrot.slane %v4650_v30, %v20554_v60  ;;  %19373 = vmatpush3.msra.mxu0 %v21501_v51  ;;  %v4924_v7 = vrot.slane %v4915_v55, %v20554_v60 }
0x1234   :  { %v4679_v44 = vcombine.low %v4657_v26, %v4664_v12  ;;  %19377 = vmatprep.subr.mxu0 %v23931_v54  ;;  %v4855_v27 = vrot.slane %v4841_v20, %v20554_v60  ;;  %v4856_v38 = vcombine.high %v4848_v24, %v4848_v24  ;;  %v4917_v50 = vcombine.high %v4915_v55, %v4915_v55 }
0x1235   :  { %v4680_v21 = vcombine.low %v4671_v5, %v4678_v15  ;;  %v4932_v23 = vcombine.high %v4924_v7, %v4924_v7  ;;  %v4864_v45 = vrot.slane %v4848_v24, %v20554_v60  ;;  %v21519_v48 = vrot.slane %v4924_v7, %v20554_v60 }
0x1236   :  { %v4687_v9 = vrot.slane %v4679_v44, %v20554_v60  ;;  %v4857_v13 = vcombine.high %v4855_v27, %v4855_v27  ;;  %v4878_v22 = vrot.slane %v4856_v38, %v20554_v60  ;;  %v4931_v46 = vrot.slane %v4917_v50, %v20554_v60 }
0x1237   :  { %v4694_v2 = vrot.slane %v4680_v21, %v20554_v60  ;;  %v21522_v30 = vrot.slane %v4932_v23, %v20554_v60  ;;  %v21525_v26 = vrot.slane %v4855_v27, %v20554_v60  ;;  %v4886_v5 = vcombine.high %v4864_v45, %v4864_v45 }
0x1238   :  { %v21528_v12 = vrot.slane %v4857_v13, %v20554_v60  ;;  %v4888_v15 = vcombine.high %v4878_v22, %v4878_v22  ;;  %v4933_v44 = vcombine.high %v4931_v46, %v4931_v46  ;;  %v4947_v24 = vrot.slane %v4931_v46, %v20554_v60 }
0x1239   :  { %v4695_v57 = vcombine.low %v4687_v9, %v4694_v2  ;;  %v4964_v17 = vcombine.high %v21522_v30, %v21522_v30 }
0x123a   :  { %v4961_v7 = vrot.slane %v4933_v44, %v20554_v60  ;;  %v4963_v46 = vcombine.high %v4947_v24, %v4947_v24 }
0x123b   :  { %v4738_v3 = vsel %vm617_vm3, %v4695_v57, 0.0 }
0x123c   :  { %4739 = vadd.xlane.f32.xlu1 %v4738_v3  ;;  %v4962_v3 = vcombine.high %v21519_v48, %v21519_v48 }
0x12bc   :  { %v4743_v58 = vpop.xlane.xlu0 %4742 }
0x12bd   :  { %v4745_v33 = vmul.f32 0.03125, %v4743_v58 }
0x12bf   :  { %v4747_v14 = vadd.f32 1e-05, %v4745_v33 }
0x12c1   :  { %20102 = vrsqrt.f32 %v4747_v14 }
0x12c5   :  { %v4740_v6 = vpop.xlane.xlu1 %4739 }
0x12c6   :  { %v4744_v1 = vmul.f32 0.03125, %v4740_v6 }
0x12c8   :  { %v4746_v41 = vadd.f32 1e-05, %v4744_v1 }
0x12ca   :  { %20104 = vrsqrt.f32 %v4746_v41 }
0x12ce   :  { %v20103_v40 = vpop.eup %20102 }
0x12cf   :  { %v4795_v21 = vrot.slane %v20103_v40, %v21024_v56  ;;  %v4799_v9 = vrot.slane %v20103_v40, %v21027_v47  ;;  %v4787_v2 = vrot.slane %v20103_v40, %v20533_v31  ;;  %v4791_v57 = vrot.slane %v20103_v40, %v20825_v39 }
0x12d0   :  { %v4803_v58 = vrot.slane %v20103_v40, %v21030_v52  ;;  %v4807_v33 = vrot.slane %v20103_v40, %v21033_v28  ;;  %v4965_v40 = vcombine.high %v4961_v7, %v4961_v7 }
0x12d1   :  { %v4832_v37 = vmul.f32 %v4795_v21, %v21402_v25  ;;  %v4833_v14 = vmul.f32 %v4799_v9, %v21404_v35  ;;  %v4830_v55 = vmul.f32 %v4787_v2, %v21398_v53  ;;  %v4831_v20 = vmul.f32 %v4791_v57, %v21400_v59 }
0x12d2   :  { %v4834_v6 = vmul.f32 %v4803_v58, %v21406_v49  ;;  %v4835_v27 = vmul.f32 %v4807_v33, %v21408_v10  ;;  %v4887_v49 = vcombine.high %v21525_v26, %v21525_v26  ;;  %v4889_v10 = vcombine.high %v21528_v12, %v21528_v12 }
0x12d3   :  { %v4908_v1 = vmul.f32 %v4886_v5, %v4832_v37  ;;  %v4909_v38 = vmul.f32 %v4888_v15, %v4833_v14  ;;  %v4906_v50 = vmul.f32 %v4864_v45, %v4830_v55  ;;  %v4907_v41 = vmul.f32 %v4878_v22, %v4831_v20 }
0x12d4   :  { %v4910_v25 = vmul.f32 %v21525_v26, %v4834_v6  ;;  %v4911_v35 = vmul.f32 %v21528_v12, %v4835_v27 }
0x12d5   :  { %v21550_v23 = vadd.f32 %v4962_v3, %v4908_v1  ;;  %v21552_v53 = vadd.f32 %v4964_v17, %v4909_v38  ;;  %v21555_v59 = vadd.f32 %v21519_v48, %v4906_v50  ;;  %v21558_v13 = vadd.f32 %v21522_v30, %v4907_v41 }
0x12d6   :  { %v21564_v21 = vadd.f32 %v4947_v24, %v4910_v25  ;;  %v21566_v9 = vadd.f32 %v4961_v7, %v4911_v35 }
0x12d7   :  { %v20105_v44 = vpop.eup %20104  ;;  %v5075_v2 = vcombine.low %v21555_v59, %v21558_v13  ;;  %v5076_v57 = vcombine.low %v21550_v23, %v21552_v53 }
0x12d8   :  { %v4755_v58 = vrot.slane %v20105_v44, %v20533_v31  ;;  %v4759_v33 = vrot.slane %v20105_v44, %v20825_v39  ;;  %v4763_v37 = vrot.slane %v20105_v44, %v21024_v56  ;;  %v4767_v14 = vrot.slane %v20105_v44, %v21027_v47 }
0x12d9   :  { %v4771_v55 = vrot.slane %v20105_v44, %v21030_v52  ;;  %v4775_v20 = vrot.slane %v20105_v44, %v21033_v28  ;;  %v4779_v6 = vrot.slane %v20105_v44, %v21040_v61  ;;  %v4783_v27 = vrot.slane %v20105_v44, %v21043_v62 }
0x12da   :  { %v4822_v1 = vmul.f32 %v4755_v58, %v21433_v43  ;;  %v4823_v38 = vmul.f32 %v4759_v33, %v21437_v42  ;;  %v4824_v50 = vmul.f32 %v4763_v37, %v21440_v32  ;;  %v4825_v41 = vmul.f32 %v4767_v14, %v21443_v18  ;;  %v21633_v14 = vld [vmem:[#allocation6 + $0x8] sm:$0xff] }
0x12db   :  { %v4826_v25 = vmul.f32 %v4771_v55, %v21446_v36  ;;  %v4827_v35 = vmul.f32 %v4775_v20, %v21449_v63  ;;  %v4828_v0 = vmul.f32 %v4779_v6, %v21452_v29  ;;  %v4829_v54 = vmul.f32 %v4783_v27, %v21456_v11 }
0x12dc   :  { %v4898_v4 = vmul.f32 %v4864_v45, %v4822_v1  ;;  %v4899_v8 = vmul.f32 %v4878_v22, %v4823_v38  ;;  %v4900_v16 = vmul.f32 %v4886_v5, %v4824_v50  ;;  %v4901_v44 = vmul.f32 %v4888_v15, %v4825_v41 }
0x12dd   :  { %v4902_v43 = vmul.f32 %v21525_v26, %v4826_v25  ;;  %v4903_v42 = vmul.f32 %v21528_v12, %v4827_v35  ;;  %v4904_v58 = vmul.f32 %v4887_v49, %v4828_v0  ;;  %v4905_v32 = vmul.f32 %v4889_v10, %v4829_v54 }
0x12de   :  { %v21591_v18 = vadd.f32 %v21519_v48, %v4898_v4  ;;  %v21594_v36 = vadd.f32 %v21522_v30, %v4899_v8  ;;  %v21596_v63 = vadd.f32 %v4962_v3, %v4900_v16  ;;  %v21598_v29 = vadd.f32 %v4964_v17, %v4901_v44 }
0x12df   :  { %v21600_v11 = vadd.f32 %v4947_v24, %v4902_v43  ;;  %v21602_v45 = vadd.f32 %v4961_v7, %v4903_v42  ;;  %v21604_v22 = vadd.f32 %v4963_v46, %v4904_v58  ;;  %v21606_v26 = vadd.f32 %v4965_v40, %v4905_v32 }
0x12e0   :  { %v5026_v0 = vcombine.low %v21591_v18, %v21594_v36  ;;  %v5027_v4 = vcombine.low %v21596_v63, %v21598_v29  ;;  %v5077_v54 = vcombine.low %v21564_v21, %v21566_v9  ;;  %v5084_v8 = vrot.slane %v5075_v2, %v20554_v60 }
0x12e1   :  { %v5028_v16 = vcombine.low %v21600_v11, %v21602_v45  ;;  %v5029_v48 = vcombine.low %v21604_v22, %v21606_v26  ;;  %v5091_v30 = vrot.slane %v5076_v57, %v20554_v60  ;;  %v23937_v37 = vmov 0.0  }
0x12e2   :  { %v5036_v12 = vrot.slane %v5026_v0, %v20554_v60  ;;  %v5043_v5 = vrot.slane %v5027_v4, %v20554_v60  ;;  %v5098_v7 = vrot.slane %v5077_v54, %v20554_v60  ;;  %v5011_v55 = vrot.slane %v21633_v14, %v20533_v31 }
0x12e3   :  { %v5050_v15 = vrot.slane %v5028_v16, %v20554_v60  ;;  %v5057_v3 = vrot.slane %v5029_v48, %v20554_v60  ;;  %v5099_v17 = vcombine.low %v5084_v8, %v5091_v30 }
0x12e4   :  { %v5058_v24 = vcombine.low %v5036_v12, %v5043_v5  ;;  %v5113_v2 = vrot.slane %v5098_v7, %v20554_v60 }
0x12e5   :  { %v5059_v49 = vcombine.low %v5050_v15, %v5057_v3  ;;  %v5106_v46 = vrot.slane %v5099_v17, %v20554_v60 }
0x12e6   :  { %v5066_v10 = vrot.slane %v5058_v24, %v20554_v60 }
0x12e7   :  { %v5073_v40 = vrot.slane %v5059_v49, %v20554_v60  ;;  %v5114_v33 = vcombine.low %v5106_v46, %v5113_v2 }
0x12e9   :  { %v5074_v57 = vcombine.low %v5066_v10, %v5073_v40 }
0x12eb   :  { %19374 = vmatprep.mubr.msk.f32.mxu0 %vm617_vm3, %v5074_v57 }
0x12ec   :  { %19375 = vmatmul.mubr.msk.f32.vlgmr.msra.gmra.mxu0 %vm617_vm3, %v5114_v33 }
0x12ed   :  { %19379 = vmatprep.mubr.msk.f32.mxu0 %vm20403_vm5, %v23937_v37 }
0x13ac   :  { %v19376_v20 = vpop.f32.mrf.mxu0 }
0x13ad   :  { %v5191_v6 = vadd.f32 %v19376_v20, %v5011_v55 }
0x13ae   :  { %v5185_v27 = vpop.f32.mrf.mxu0 }
0x13af   :  { %v5245_v1 = vcombine.high %v5191_v6, %v5191_v6  ;;  %v5252_v38 = vrot.slane %v5191_v6, %v20554_v60  ;;  %v5186_v50 = vadd.f32 %v5185_v27, %v5011_v55 }
0x13b1   :  { %v5259_v41 = vrot.slane %v5245_v1, %v20554_v60  ;;  %v5260_v25 = vcombine.high %v5252_v38, %v5252_v38  ;;  %v5268_v35 = vrot.slane %v5252_v38, %v20554_v60  ;;  %v5196_v44 = vcombine.high %v5186_v50, %v5186_v50 }
0x13b2   :  { %v5203_v43 = vrot.slane %v5186_v50, %v20554_v60 }
0x13b3   :  { %v5261_v42 = vcombine.high %v5259_v41, %v5259_v41  ;;  %v5282_v58 = vrot.slane %v5260_v25, %v20554_v60  ;;  %v5210_v32 = vrot.slane %v5196_v44, %v20554_v60  ;;  %v5275_v4 = vrot.slane %v5259_v41, %v20554_v60 }
0x13b4   :  { %v5211_v0 = vcombine.high %v5203_v43, %v5203_v43  ;;  %v5290_v54 = vcombine.high %v5268_v35, %v5268_v35  ;;  %v5219_v48 = vrot.slane %v5203_v43, %v20554_v60 }
0x13b5   :  { %v5291_v8 = vcombine.high %v5282_v58, %v5282_v58  ;;  %v5212_v16 = vcombine.high %v5210_v32, %v5210_v32  ;;  %v5226_v30 = vrot.slane %v5210_v32, %v20554_v60  ;;  %v5289_v5 = vrot.slane %v5261_v42, %v20554_v60 }
0x13b6   :  { %v5233_v12 = vrot.slane %v5211_v0, %v20554_v60  ;;  %v5421_v49 = vcombine.low %v5282_v58, %v5290_v54 }
0x13b7   :  { %v5422_v15 = vcombine.low %v5291_v8, %v5275_v4  ;;  %v5240_v3 = vrot.slane %v5212_v16, %v20554_v60  ;;  %v5242_v17 = vcombine.high %v5226_v30, %v5226_v30  ;;  %v5450_v33 = vrot.slane %v5289_v5, %v20554_v60 }
0x13b8   :  { %v5296_v24 = vcombine.low %v5219_v48, %v5233_v12  ;;  %v18596_v7 = vcombine.high %v5219_v48, %v5233_v12  ;;  %v5436_v1 = vrot.slane %v5421_v49, %v20554_v60 }
0x13b9   :  { %v5443_v10 = vrot.slane %v5422_v15, %v20554_v60  ;;  %v5244_v46 = vcombine.high %v5240_v3, %v5240_v3  ;;  %v5298_v40 = vcombine.low %v5226_v30, %v5240_v3  ;;  %v5326_v20 = vrot.slane %v5242_v17, %v20554_v60 }
0x13ba   :  { %v5305_v2 = vrot.slane %v5296_v24, %v20554_v60  ;;  %v5312_v57 = vrot.slane %v18596_v7, %v20554_v60 }
0x13bb   :  { %v5319_v55 = vrot.slane %v5298_v40, %v20554_v60  ;;  %v5420_v27 = vcombine.low %v5244_v46, %v5268_v35  ;;  %v5452_v38 = vcombine.low %v5443_v10, %v5450_v33 }
0x13bc   :  { %v5327_v6 = vcombine.low %v5305_v2, %v5312_v57 }
0x13bd   :  { %v5328_v50 = vcombine.low %v5319_v55, %v5326_v20  ;;  %v5429_v41 = vrot.slane %v5420_v27, %v20554_v60  ;;  %v5466_v42 = vrot.slane %v5452_v38, %v20554_v60 }
0x13be   :  { %v5335_v25 = vrot.slane %v5327_v6, %v20554_v60 }
0x13bf   :  { %v5342_v44 = vrot.slane %v5328_v50, %v20554_v60  ;;  %v5451_v43 = vcombine.low %v5429_v41, %v5436_v1 }
0x13c1   :  { %v21660_v58 = vcombine.low %v5335_v25, %v5342_v44  ;;  %v5459_v32 = vrot.slane %v5451_v43, %v20554_v60 }
0x13c3   :  { %v21663_v0 = vcombine.low %v5459_v32, %v5466_v42  ;;  %5344 = vrot.lane.b32.xlu1 %v21660_v58, %s20404_s23 }
0x13c5   :  { %5468 = vrot.lane.b32.xlu0 %v21663_v0, %s20404_s23 }
0x1435   :  { %v5345_v35 = vpop.permute.xlu1 %5344 }
0x1436   :  { %19378 = vmatpush3.xpose.msk.msra.mxu0 %vm155_vm0, %v5345_v35 }
0x1437   :  { %v5469_v4 = vpop.permute.xlu0 %5468  ;;  %19387 = vmatprep.subr.mxu0 %v23937_v37 }
0x1438   :  { %19383 = vmatpush3.xpose.msk.msra.mxu1 %vm155_vm0, %v5469_v4 }
0x1439   :  { %19380 = vmatmul.mubr.msk.f32.vlgmr.msra.gmra.mxu0 %vm155_vm0, %v21660_v58  ;;  %19392 = vmatprep.subr.mxu1 %v23937_v37 }
0x143a   :  { %19389 = vmatprep.mubr.msk.f32.mxu0 %vm20403_vm5, %v23937_v37 }
0x143b   :  { %19385 = vmatmul.mubr.msk.f32.vlgmr.msra.gmra.mxu1 %vm155_vm0, %v21663_v0 }
0x143c   :  { %19394 = vmatprep.mubr.msk.f32.mxu1 %vm20403_vm5, %v23937_v37 }
0x14f9   :  { %v5416_v54 = vpop.f32.mrf.mxu0 }
0x14fa   :  { %v5544_v8 = vmul.f32 0.35355338, %v5416_v54 }
0x14fb   :  { %v19381_v16 = vpop.f32.mrf.mxu0  ;;  %v5540_v48 = vpop.f32.mrf.mxu1 }
0x14fc   :  { %v5545_v30 = vmul.f32 0.35355338, %v5540_v48  ;;  %v5546_v12 = vsel %vm1049_vm6, %v5544_v8, -inf }
0x14fd   :  { %5547 = vmax.xlane.f32.xlu1 %v5546_v12  ;;  %v19386_v5 = vpop.f32.mrf.mxu1 }
0x14fe   :  { %v5549_v15 = vsel %vm1049_vm6, %v5545_v30, -inf }
0x14ff   :  { %5550 = vmax.xlane.f32.xlu0 %v5549_v15 }
0x1586   :  { %v5548_v3 = vpop.xlane.xlu1 %5547 }
0x1587   :  { %v5552_v17 = vsub.f32 %v5544_v8, %v5548_v3 }
0x1588   :  { %v5551_v24 = vpop.xlane.xlu0 %5550 }
0x1589   :  { %v5554_v7 = vmul.f32 1.442695, %v5552_v17  ;;  %v5553_v49 = vsub.f32 %v5545_v30, %v5551_v24 }
0x158b   :  { %20106 = vpow2.f32 %v5554_v7  ;;  %v5556_v10 = vmul.f32 1.442695, %v5553_v49 }
0x158d   :  { %20108 = vpow2.f32 %v5556_v10 }
0x1598   :  { %v20107_v46 = vpop.eup %20106 }
0x1599   :  { %v5558_v40 = vsel %vm1049_vm6, %v20107_v46, 0.0 }
0x159a   :  { %v20109_v2 = vpop.eup %20108  ;;  %5559 = vadd.xlane.f32.xlu1 %v5558_v40 }
0x159b   :  { %v5561_v57 = vsel %vm1049_vm6, %v20109_v2, 0.0 }
0x159c   :  { %5562 = vadd.xlane.f32.xlu0 %v5561_v57 }
0x15ab   :  { %5568 = vrot.lane.b32.xlu1 %v21660_v58, %s20405_s24 }
0x15af   :  { %5910 = vrot.lane.b32.xlu1 %v21501_v51, %s20406_s2 }
0x15b2   :  { %5645 = vrot.lane.b32.xlu0 %v21663_v0, %s20405_s24 }
0x15b3   :  { %5996 = vrot.lane.b32.xlu1 %v21660_v58, %s20407_s25 }
0x15b6   :  { %6074 = vrot.lane.b32.xlu0 %v21663_v0, %s20407_s25 }
0x15b7   :  { %5994 = vrot.lane.b32.xlu1 %v21660_v58, %s20408_s6 }
0x15ba   :  { %6072 = vrot.lane.b32.xlu0 %v21663_v0, %s20408_s6 }
0x1623   :  { %v5560_v33 = vpop.xlane.xlu1 %5559 }
0x1624   :  { %20110 = vrcp.f32 %v5560_v33 }
0x1625   :  { %v5563_v55 = vpop.xlane.xlu0 %5562 }
0x1626   :  { %20112 = vrcp.f32 %v5563_v55 }
0x1627   :  { %v5569_v51 = vpop.permute.xlu1 %5568 }
0x1628   :  { %19388 = vmatpush3.msk.msra.mxu0 %vm421_vm4, %v5569_v51 }
0x1629   :  { %v5646_v20 = vpop.permute.xlu0 %5645 }
0x162a   :  { %19393 = vmatpush3.msk.msra.mxu1 %vm421_vm4, %v5646_v20 }
0x162b   :  { %v5911_v6 = vpop.permute.xlu1 %5910  ;;  %19402 = vmatprep.subr.mxu1 %v23937_v37 }
0x162c   :  { %19397 = vmatprep.subr.mxu0 %v5911_v6 }
0x162f   :  { %v5997_v50 = vpop.permute.xlu1 %5996 }
0x1631   :  { %v20111_v27 = vpop.eup %20110 }
0x1632   :  { %v5565_v1 = vmul.f32 %v20111_v27, %v20107_v46 }
0x1633   :  { %v20113_v38 = vpop.eup %20112  ;;  %v5995_v25 = vpop.permute.xlu1 %5994 }
0x1634   :  { %19390 = vmatmul.mubr.msk.f32.vlgmr.msra.gmra.mxu0 %vm1074_vm7, %v5565_v1  ;;  %v5567_v41 = vmul.f32 %v20113_v38, %v20109_v2 }
0x1635   :  { %19398 = vmatpush3.msra.mxu0 %v5911_v6 }
0x1636   :  { %19395 = vmatmul.mubr.msk.f32.vlgmr.msra.gmra.mxu1 %vm1074_vm7, %v5567_v41  ;;  %19407 = vmatprep.subr.mxu0 %v23937_v37 }
0x1637   :  { %19403 = vmatpush3.xpose.msk.msra.mxu1 %vm155_vm0, %v5997_v50  ;;  %19404 = vmatprep.mubr.msk.f32.mxu1 %vm20403_vm5, %v23937_v37 }
0x1638   :  { %19412 = vmatprep.subr.mxu1 %v23937_v37 }
0x163a   :  { %19405 = vmatmul.mubr.msk.f32.vlgmr.msra.gmra.mxu1 %vm155_vm0, %v5995_v25 }
0x163b   :  { %19414 = vmatprep.mubr.msk.f32.mxu1 %vm20403_vm5, %v23937_v37 }
0x16f4   :  { %v5641_v44 = vpop.f32.mrf.mxu0 }
0x16f5   :  { %v5724_v43 = vcombine.high %v5641_v44, %v5641_v44  ;;  %v5731_v42 = vrot.slane %v5641_v44, %v20554_v60 }
0x16f6   :  { %v19391_v32 = vpop.f32.mrf.mxu0  ;;  %v5718_v35 = vpop.f32.mrf.mxu1 }
0x16f7   :  { %v5738_v4 = vrot.slane %v5724_v43, %v20554_v60  ;;  %v5739_v54 = vcombine.high %v5731_v42, %v5731_v42  ;;  %v5772_v8 = vcombine.high %v5718_v35, %v5718_v35  ;;  %v5747_v16 = vrot.slane %v5731_v42, %v20554_v60 }
0x16f8   :  { %v5779_v48 = vrot.slane %v5718_v35, %v20554_v60  ;;  %v19396_v30 = vpop.f32.mrf.mxu1 }
0x16f9   :  { %v5740_v12 = vcombine.high %v5738_v4, %v5738_v4  ;;  %v5754_v5 = vrot.slane %v5738_v4, %v20554_v60  ;;  %v5761_v15 = vrot.slane %v5739_v54, %v20554_v60  ;;  %v5786_v3 = vrot.slane %v5772_v8, %v20554_v60 }
0x16fa   :  { %v5787_v17 = vcombine.high %v5779_v48, %v5779_v48  ;;  %v5795_v24 = vrot.slane %v5779_v48, %v20554_v60  ;;  %v6068_v7 = vpop.f32.mrf.mxu1 }
0x16fb   :  { %v5768_v49 = vrot.slane %v5740_v12, %v20554_v60  ;;  %v5820_v10 = vcombine.low %v5747_v16, %v5761_v15  ;;  %v18605_v46 = vcombine.high %v5747_v16, %v5761_v15  ;;  %v5770_v40 = vcombine.high %v5754_v5, %v5754_v5 }
0x16fc   :  { %v5788_v2 = vcombine.high %v5786_v3, %v5786_v3  ;;  %v5802_v57 = vrot.slane %v5786_v3, %v20554_v60  ;;  %v5809_v33 = vrot.slane %v5787_v17, %v20554_v60  ;;  %v5817_v55 = vcombine.high %v5795_v24, %v5795_v24  ;;  %v19406_v51 = vpop.f32.mrf.mxu1 }
0x16fd   :  { %v5822_v20 = vcombine.low %v5754_v5, %v5768_v49  ;;  %v5830_v6 = vrot.slane %v5820_v10, %v20554_v60  ;;  %v5837_v27 = vrot.slane %v18605_v46, %v20554_v60  ;;  %v5823_v1 = vcombine.low %v5770_v40, %v5795_v24 }
0x16fe   :  { %v5816_v38 = vrot.slane %v5788_v2, %v20554_v60  ;;  %v5818_v50 = vcombine.high %v5802_v57, %v5802_v57  ;;  %v5819_v41 = vcombine.high %v5809_v33, %v5809_v33  ;;  %v5869_v25 = vcombine.low %v5809_v33, %v5817_v55 }
0x16ff   :  { %v5844_v44 = vrot.slane %v5822_v20, %v20554_v60  ;;  %v5852_v43 = vcombine.low %v5830_v6, %v5837_v27  ;;  %v5851_v42 = vrot.slane %v5823_v1, %v20554_v60  ;;  %v6150_v32 = vmul.f32 0.35355338, %v6068_v7  ;;  %v6075_v7 = vpop.permute.xlu0 %6074 }
0x1700   :  { %v5870_v35 = vcombine.low %v5819_v41, %v5802_v57  ;;  %v5871_v4 = vcombine.low %v5816_v38, %v5818_v50  ;;  %v5878_v16 = vrot.slane %v5869_v25, %v20554_v60 }
0x1701   :  { %v5853_v54 = vcombine.low %v5844_v44, %v5851_v42  ;;  %v6152_v8 = vsel %vm1049_vm6, %v6150_v32, -inf  ;;  %v5860_v12 = vrot.slane %v5852_v43, %v20554_v60 }
0x1702   :  { %v5885_v48 = vrot.slane %v5870_v35, %v20554_v60  ;;  %v5892_v30 = vrot.slane %v5871_v4, %v20554_v60  ;;  %6153 = vmax.xlane.f32.xlu1 %v6152_v8 }
0x1703   :  { %v5867_v5 = vrot.slane %v5853_v54, %v20554_v60  ;;  %v6073_v10 = vpop.permute.xlu0 %6072 }
0x1704   :  { %v5893_v15 = vcombine.low %v5878_v16, %v5885_v48  ;;  %v5907_v24 = vrot.slane %v5892_v30, %v20554_v60 }
0x1705   :  { %v5868_v3 = vcombine.low %v5860_v12, %v5867_v5 }
0x1706   :  { %v5900_v17 = vrot.slane %v5893_v15, %v20554_v60 }
0x1707   :  { %19399 = vmatprep.mubr.msk.f32.mxu0 %vm155_vm0, %v5868_v3 }
0x1708   :  { %v5908_v49 = vcombine.low %v5900_v17, %v5907_v24 }
0x170a   :  { %19400 = vmatmul.mubr.msk.f32.vlgmr.msra.gmra.mxu0 %vm155_vm0, %v5908_v49 }
0x170b   :  { %19408 = vmatpush3.xpose.msk.msra.mxu0 %vm155_vm0, %v6075_v7  ;;  %19409 = vmatprep.mubr.msk.f32.mxu0 %vm20403_vm5, %v23937_v37 }
0x170c   :  { %19417 = vmatprep.subr.mxu0 %v23937_v37 }
0x170e   :  { %19410 = vmatmul.mubr.msk.f32.vlgmr.msra.gmra.mxu0 %vm155_vm0, %v6073_v10 }
0x170f   :  { %19419 = vmatprep.mubr.msk.f32.mxu0 %vm20403_vm5, %v23937_v37 }
0x178b   :  { %v6154_v46 = vpop.xlane.xlu1 %6153 }
0x178c   :  { %v6158_v40 = vsub.f32 %v6150_v32, %v6154_v46 }
0x178e   :  { %v6160_v2 = vmul.f32 1.442695, %v6158_v40 }
0x1790   :  { %20114 = vpow2.f32 %v6160_v2 }
0x179d   :  { %v20115_v27 = vpop.eup %20114 }
0x179e   :  { %v6164_v1 = vsel %vm1049_vm6, %v20115_v27, 0.0 }
0x17ca   :  { %v21745_v57 = vpop.f32.mrf.mxu0 }
0x17cc   :  { %v21747_v33 = vpop.f32.mrf.mxu0 }
0x17ce   :  { %v6146_v55 = vpop.f32.mrf.mxu0 }
0x17cf   :  { %v6151_v51 = vmul.f32 0.35355338, %v6146_v55 }
0x17d0   :  { %v19411_v20 = vpop.f32.mrf.mxu0 }
0x17d1   :  { %v6155_v6 = vsel %vm1049_vm6, %v6151_v51, -inf }
0x17d2   :  { %6156 = vmax.xlane.f32.xlu0 %v6155_v6 }
0x17d6   :  { %6165 = vadd.xlane.f32.xlu0 %v6164_v1 }
0x17ec   :  { %6174 = vrot.lane.b32.xlu0 %v21660_v58, %s20409_s26 }
0x17f0   :  { %6602 = vrot.lane.b32.xlu0 %v21660_v58, %s20410_s27 }
0x17f4   :  { %6600 = vrot.lane.b32.xlu0 %v21660_v58, %s20411_s28 }
0x185b   :  { %v6157_v38 = vpop.xlane.xlu0 %6156 }
0x185c   :  { %v6159_v50 = vsub.f32 %v6151_v51, %v6157_v38 }
0x185e   :  { %v6162_v41 = vmul.f32 1.442695, %v6159_v50 }
0x185f   :  { %v6166_v25 = vpop.xlane.xlu0 %6165 }
0x1860   :  { %20116 = vpow2.f32 %v6162_v41 }
0x1861   :  { %20118 = vrcp.f32 %v6166_v25 }
0x1863   :  { %v6175_v44 = vpop.permute.xlu0 %6174 }
0x1864   :  { %19413 = vmatpush3.msk.msra.mxu1 %vm421_vm4, %v6175_v44 }
0x186d   :  { %v20117_v43 = vpop.eup %20116 }
0x186e   :  { %v20119_v42 = vpop.eup %20118  ;;  %v6167_v32 = vsel %vm1049_vm6, %v20117_v43, 0.0 }
0x186f   :  { %6168 = vadd.xlane.f32.xlu1 %v6167_v32  ;;  %v6171_v35 = vmul.f32 %v20119_v42, %v20115_v27 }
0x1871   :  { %19415 = vmatmul.mubr.msk.f32.vlgmr.msra.gmra.mxu1 %vm1074_vm7, %v6171_v35 }
0x1880   :  { %6251 = vrot.lane.b32.xlu1 %v21663_v0, %s20409_s26 }
0x1884   :  { %6516 = vrot.lane.b32.xlu1 %v21494_v19, %s20406_s2  ;;  %v6603_v19 = vpop.permute.xlu0 %6602 }
0x1888   :  { %6680 = vrot.lane.b32.xlu1 %v21663_v0, %s20410_s27  ;;  %v6601_v30 = vpop.permute.xlu0 %6600 }
0x188c   :  { %6678 = vrot.lane.b32.xlu1 %v21663_v0, %s20411_s28 }
0x18f8   :  { %v6169_v4 = vpop.xlane.xlu1 %6168 }
0x18f9   :  { %20120 = vrcp.f32 %v6169_v4 }
0x18fc   :  { %v6252_v54 = vpop.permute.xlu1 %6251 }
0x18fd   :  { %19418 = vmatpush3.msk.msra.mxu0 %vm421_vm4, %v6252_v54 }
0x18fe   :  { %19427 = vmatprep.subr.mxu0 %v23937_v37 }
0x1900   :  { %v6517_v8 = vpop.permute.xlu1 %6516 }
0x1901   :  { %19422 = vmatprep.subr.mxu1 %v6517_v8 }
0x1902   :  { %19423 = vmatpush3.msra.mxu1 %v6517_v8 }
0x1903   :  { %19432 = vmatprep.subr.mxu1 %v23937_v37 }
0x1906   :  { %v20121_v16 = vpop.eup %20120 }
0x1907   :  { %v6173_v48 = vmul.f32 %v20121_v16, %v20117_v43 }
0x1909   :  { %19420 = vmatmul.mubr.msk.f32.vlgmr.msra.gmra.mxu0 %vm1074_vm7, %v6173_v48 }
0x190a   :  { %19428 = vmatpush3.xpose.msk.msra.mxu0 %vm155_vm0, %v6603_v19  ;;  %19429 = vmatprep.mubr.msk.f32.mxu0 %vm20403_vm5, %v23937_v37 }
0x190b   :  { %19437 = vmatprep.subr.mxu0 %v23937_v37 }
0x190d   :  { %19430 = vmatmul.mubr.msk.f32.vlgmr.msra.gmra.mxu0 %vm155_vm0, %v6601_v30 }
0x190e   :  { %19439 = vmatprep.mubr.msk.f32.mxu0 %vm20403_vm5, %v23937_v37 }
0x1931   :  { %v6247_v12 = vpop.f32.mrf.mxu1 }
0x1932   :  { %v6330_v15 = vcombine.high %v6247_v12, %v6247_v12  ;;  %v6337_v3 = vrot.slane %v6247_v12, %v20554_v60 }
0x1933   :  { %v19416_v5 = vpop.f32.mrf.mxu1 }
0x1934   :  { %v6344_v17 = vrot.slane %v6330_v15, %v20554_v60  ;;  %v6345_v24 = vcombine.high %v6337_v3, %v6337_v3  ;;  %v6353_v10 = vrot.slane %v6337_v3, %v20554_v60 }
0x1936   :  { %v6346_v7 = vcombine.high %v6344_v17, %v6344_v17  ;;  %v6367_v49 = vrot.slane %v6345_v24, %v20554_v60  ;;  %v6360_v46 = vrot.slane %v6344_v17, %v20554_v60 }
0x1938   :  { %v6374_v40 = vrot.slane %v6346_v7, %v20554_v60  ;;  %v6426_v2 = vcombine.low %v6353_v10, %v6367_v49  ;;  %v18616_v55 = vcombine.high %v6353_v10, %v6367_v49  ;;  %v6376_v43 = vcombine.high %v6360_v46, %v6360_v46 }
0x193a   :  { %v6428_v41 = vcombine.low %v6360_v46, %v6374_v40  ;;  %v6436_v25 = vrot.slane %v6426_v2, %v20554_v60  ;;  %v6443_v44 = vrot.slane %v18616_v55, %v20554_v60 }
0x193c   :  { %v6450_v15 = vrot.slane %v6428_v41, %v20554_v60  ;;  %v6458_v3 = vcombine.low %v6436_v25, %v6443_v44 }
0x193e   :  { %v6466_v55 = vrot.slane %v6458_v3, %v20554_v60 }
0x19c9   :  { %v6324_v51 = vpop.f32.mrf.mxu0 }
0x19ca   :  { %v6378_v20 = vcombine.high %v6324_v51, %v6324_v51  ;;  %v6385_v6 = vrot.slane %v6324_v51, %v20554_v60 }
0x19cb   :  { %v19421_v27 = vpop.f32.mrf.mxu0 }
0x19cc   :  { %v6392_v1 = vrot.slane %v6378_v20, %v20554_v60  ;;  %v6393_v38 = vcombine.high %v6385_v6, %v6385_v6  ;;  %v6401_v50 = vrot.slane %v6385_v6, %v20554_v60 }
0x19cd   :  { %v6674_v42 = vpop.f32.mrf.mxu0 }
0x19ce   :  { %v6394_v32 = vcombine.high %v6392_v1, %v6392_v1  ;;  %v6408_v35 = vrot.slane %v6392_v1, %v20554_v60  ;;  %v6415_v4 = vrot.slane %v6393_v38, %v20554_v60  ;;  %v6423_v54 = vcombine.high %v6401_v50, %v6401_v50  ;;  %v6681_v38 = vpop.permute.xlu1 %6680 }
0x19cf   :  { %v6429_v8 = vcombine.low %v6376_v43, %v6401_v50  ;;  %v6756_v16 = vmul.f32 0.35355338, %v6674_v42  ;;  %v19431_v19 = vpop.f32.mrf.mxu0 }
0x19d0   :  { %v6422_v48 = vrot.slane %v6394_v32, %v20554_v60  ;;  %v6424_v30 = vcombine.high %v6408_v35, %v6408_v35  ;;  %v6425_v12 = vcombine.high %v6415_v4, %v6415_v4  ;;  %v6475_v5 = vcombine.low %v6415_v4, %v6423_v54 }
0x19d1   :  { %v6457_v17 = vrot.slane %v6429_v8, %v20554_v60  ;;  %v6758_v24 = vsel %vm1049_vm6, %v6756_v16, -inf }
0x19d2   :  { %v6476_v7 = vcombine.low %v6425_v12, %v6408_v35  ;;  %v6477_v49 = vcombine.low %v6422_v48, %v6424_v30  ;;  %6759 = vmax.xlane.f32.xlu0 %v6758_v24  ;;  %v6484_v46 = vrot.slane %v6475_v5, %v20554_v60  ;;  %v6679_v41 = vpop.permute.xlu1 %6678  ;;  %v5295_v35 = vrot.slane %v21633_v14, %v20825_v39 }
0x19d3   :  { %v6459_v10 = vcombine.low %v6450_v15, %v6457_v17 }
0x19d4   :  { %v6491_v40 = vrot.slane %v6476_v7, %v20554_v60  ;;  %v6498_v2 = vrot.slane %v6477_v49, %v20554_v60  ;;  %v5993_v4 = vadd.f32 %v21745_v57, %v5295_v35  ;;  %v5992_v8 = vadd.f32 %v21747_v33, %v5295_v35 }
0x19d5   :  { %v6473_v51 = vrot.slane %v6459_v10, %v20554_v60 }
0x19d6   :  { %v6499_v20 = vcombine.low %v6484_v46, %v6491_v40  ;;  %v6513_v1 = vrot.slane %v6498_v2, %v20554_v60 }
0x19d7   :  { %v6474_v6 = vcombine.low %v6466_v55, %v6473_v51 }
0x19d8   :  { %v6506_v27 = vrot.slane %v6499_v20, %v20554_v60 }
0x19d9   :  { %19424 = vmatprep.mubr.msk.f32.mxu1 %vm155_vm0, %v6474_v6 }
0x19da   :  { %v6514_v50 = vcombine.low %v6506_v27, %v6513_v1 }
0x19dc   :  { %19425 = vmatmul.mubr.msk.f32.vlgmr.msra.gmra.mxu1 %vm155_vm0, %v6514_v50 }
0x19dd   :  { %19433 = vmatpush3.xpose.msk.msra.mxu1 %vm155_vm0, %v6681_v38  ;;  %19434 = vmatprep.mubr.msk.f32.mxu1 %vm20403_vm5, %v23937_v37 }
0x19de   :  { %19442 = vmatprep.subr.mxu1 %v23937_v37 }
0x19e0   :  { %19435 = vmatmul.mubr.msk.f32.vlgmr.msra.gmra.mxu1 %vm155_vm0, %v6679_v41 }
0x19e1   :  { %19444 = vmatprep.mubr.msk.f32.mxu1 %vm20403_vm5, %v23937_v37 }
0x1a5b   :  { %v6760_v25 = vpop.xlane.xlu0 %6759 }
0x1a5c   :  { %v6764_v44 = vsub.f32 %v6756_v16, %v6760_v25 }
0x1a5e   :  { %v6766_v43 = vmul.f32 1.442695, %v6764_v44 }
0x1a60   :  { %20122 = vpow2.f32 %v6766_v43 }
0x1a6d   :  { %v20123_v42 = vpop.eup %20122 }
0x1a6e   :  { %v6770_v32 = vsel %vm1049_vm6, %v20123_v42, 0.0 }
0x1a6f   :  { %6771 = vadd.xlane.f32.xlu0 %v6770_v32 }
0x1a9c   :  { %v19426_v54 = vpop.f32.mrf.mxu1 }
0x1a9d   :  { %v21817_v19 = vadd.f32 %v19426_v54, %v5993_v4 }
0x1a9e   :  { %v6589_v48 = vpop.f32.mrf.mxu1 }
0x1a9f   :  { %v21819_v30 = vadd.f32 %v6589_v48, %v5992_v8 }
0x1aa0   :  { %v6752_v16 = vpop.f32.mrf.mxu1 }
0x1aa1   :  { %v6757_v12 = vmul.f32 0.35355338, %v6752_v16 }
0x1aa2   :  { %v19436_v5 = vpop.f32.mrf.mxu1 }
0x1aa3   :  { %v6761_v15 = vsel %vm1049_vm6, %v6757_v12, -inf }
0x1aa4   :  { %6762 = vmax.xlane.f32.xlu1 %v6761_v15 }
0x1ab5   :  { %6780 = vrot.lane.b32.xlu1 %v21660_v58, %s20412_s29 }
0x1ab9   :  { %7122 = vrot.lane.b32.xlu1 %v21489_v34, %s20406_s2 }
0x1abd   :  { %7208 = vrot.lane.b32.xlu1 %v21660_v58, %s20413_s30 }
0x1ac1   :  { %7206 = vrot.lane.b32.xlu1 %v21660_v58, %s20414_s1 }
0x1af8   :  { %v6772_v14 = vpop.xlane.xlu0 %6771 }
0x1af9   :  { %20124 = vrcp.f32 %v6772_v14 }
0x1b06   :  { %v20125_v33 = vpop.eup %20124 }
0x1b07   :  { %v6777_v7 = vmul.f32 %v20125_v33, %v20123_v42 }
0x1b2d   :  { %v6763_v57 = vpop.xlane.xlu1 %6762 }
0x1b2e   :  { %v6765_v3 = vsub.f32 %v6757_v12, %v6763_v57 }
0x1b30   :  { %v6768_v17 = vmul.f32 1.442695, %v6765_v3 }
0x1b31   :  { %v6781_v24 = vpop.permute.xlu1 %6780 }
0x1b32   :  { %20126 = vpow2.f32 %v6768_v17  ;;  %19438 = vmatpush3.msk.msra.mxu0 %vm421_vm4, %v6781_v24 }
0x1b33   :  { %19440 = vmatmul.mubr.msk.f32.vlgmr.msra.gmra.mxu0 %vm1074_vm7, %v6777_v7 }
0x1b35   :  { %v7123_v34 = vpop.permute.xlu1 %7122 }
0x1b36   :  { %19447 = vmatprep.subr.mxu0 %v7123_v34 }
0x1b37   :  { %19448 = vmatpush3.msra.mxu0 %v7123_v34 }
0x1b38   :  { %19457 = vmatprep.subr.mxu0 %v23937_v37 }
0x1b39   :  { %v7209_v55 = vpop.permute.xlu1 %7208 }
0x1b3d   :  { %v7207_v20 = vpop.permute.xlu1 %7206 }
0x1b3f   :  { %v20127_v49 = vpop.eup %20126 }
0x1b40   :  { %v6773_v10 = vsel %vm1049_vm6, %v20127_v49, 0.0 }
0x1b41   :  { %6774 = vadd.xlane.f32.xlu0 %v6773_v10 }
0x1b57   :  { %6857 = vrot.lane.b32.xlu0 %v21663_v0, %s20412_s29 }
0x1b5b   :  { %7286 = vrot.lane.b32.xlu0 %v21663_v0, %s20413_s30 }
0x1b5f   :  { %7284 = vrot.lane.b32.xlu0 %v21663_v0, %s20414_s1 }
0x1bca   :  { %v6775_v46 = vpop.xlane.xlu0 %6774 }
0x1bcb   :  { %20128 = vrcp.f32 %v6775_v46 }
0x1bce   :  { %v6858_v40 = vpop.permute.xlu0 %6857 }
0x1bcf   :  { %19443 = vmatpush3.msk.msra.mxu1 %vm421_vm4, %v6858_v40 }
0x1bd0   :  { %19452 = vmatprep.subr.mxu1 %v23937_v37 }
0x1bd8   :  { %v20129_v2 = vpop.eup %20128 }
0x1bd9   :  { %v6779_v51 = vmul.f32 %v20129_v2, %v20127_v49 }
0x1bdb   :  { %19445 = vmatmul.mubr.msk.f32.vlgmr.msra.gmra.mxu1 %vm1074_vm7, %v6779_v51 }
0x1bdc   :  { %19453 = vmatpush3.xpose.msk.msra.mxu1 %vm155_vm0, %v7209_v55  ;;  %19454 = vmatprep.mubr.msk.f32.mxu1 %vm20403_vm5, %v23937_v37 }
0x1bdd   :  { %19462 = vmatprep.subr.mxu1 %v23937_v37 }
0x1bdf   :  { %19455 = vmatmul.mubr.msk.f32.vlgmr.msra.gmra.mxu1 %vm155_vm0, %v7207_v20 }
0x1be0   :  { %19464 = vmatprep.mubr.msk.f32.mxu1 %vm20403_vm5, %v23937_v37 }
0x1bf3   :  { %v6853_v6 = vpop.f32.mrf.mxu0 }
0x1bf4   :  { %v6936_v1 = vcombine.high %v6853_v6, %v6853_v6  ;;  %v6943_v38 = vrot.slane %v6853_v6, %v20554_v60 }
0x1bf5   :  { %v19441_v27 = vpop.f32.mrf.mxu0 }
0x1bf6   :  { %v6950_v50 = vrot.slane %v6936_v1, %v20554_v60  ;;  %v6951_v41 = vcombine.high %v6943_v38, %v6943_v38  ;;  %v6959_v43 = vrot.slane %v6943_v38, %v20554_v60 }
0x1bf8   :  { %v6952_v25 = vcombine.high %v6950_v50, %v6950_v50  ;;  %v6973_v44 = vrot.slane %v6951_v41, %v20554_v60  ;;  %v6966_v42 = vrot.slane %v6950_v50, %v20554_v60 }
0x1bfa   :  { %v6980_v32 = vrot.slane %v6952_v25, %v20554_v60  ;;  %v7032_v35 = vcombine.low %v6959_v43, %v6973_v44  ;;  %v18627_v4 = vcombine.high %v6959_v43, %v6973_v44  ;;  %v6982_v3 = vcombine.high %v6966_v42, %v6966_v42 }
0x1bfc   :  { %v7034_v14 = vcombine.low %v6966_v42, %v6980_v32  ;;  %v7042_v57 = vrot.slane %v7032_v35, %v20554_v60  ;;  %v7049_v33 = vrot.slane %v18627_v4, %v20554_v60 }
0x1bfe   :  { %v7056_v6 = vrot.slane %v7034_v14, %v20554_v60  ;;  %v7064_v27 = vcombine.low %v7042_v57, %v7049_v33 }
0x1c00   :  { %v7072_v32 = vrot.slane %v7064_v27, %v20554_v60 }
0x1c9b   :  { %v6930_v54 = vpop.f32.mrf.mxu1 }
0x1c9c   :  { %v6984_v8 = vcombine.high %v6930_v54, %v6930_v54  ;;  %v6991_v48 = vrot.slane %v6930_v54, %v20554_v60 }
0x1c9d   :  { %v19446_v16 = vpop.f32.mrf.mxu1 }
0x1c9e   :  { %v6998_v12 = vrot.slane %v6984_v8, %v20554_v60  ;;  %v6999_v5 = vcombine.high %v6991_v48, %v6991_v48  ;;  %v7007_v15 = vrot.slane %v6991_v48, %v20554_v60  ;;  %v7287_v16 = vpop.permute.xlu0 %7286 }
0x1c9f   :  { %v7280_v17 = vpop.f32.mrf.mxu1 }
0x1ca0   :  { %v7000_v24 = vcombine.high %v6998_v12, %v6998_v12  ;;  %v7014_v7 = vrot.slane %v6998_v12, %v20554_v60  ;;  %v7021_v34 = vrot.slane %v6999_v5, %v20554_v60  ;;  %v7029_v49 = vcombine.high %v7007_v15, %v7007_v15 }
0x1ca1   :  { %v7035_v10 = vcombine.low %v6982_v3, %v7007_v15  ;;  %v7362_v46 = vmul.f32 0.35355338, %v7280_v17  ;;  %v19456_v40 = vpop.f32.mrf.mxu1 }
0x1ca2   :  { %v7028_v2 = vrot.slane %v7000_v24, %v20554_v60  ;;  %v7030_v55 = vcombine.high %v7014_v7, %v7014_v7  ;;  %v7031_v51 = vcombine.high %v7021_v34, %v7021_v34  ;;  %v7081_v20 = vcombine.low %v7021_v34, %v7029_v49  ;;  %v7285_v5 = vpop.permute.xlu0 %7284 }
0x1ca3   :  { %v7063_v1 = vrot.slane %v7035_v10, %v20554_v60  ;;  %v7364_v38 = vsel %vm1049_vm6, %v7362_v46, -inf }
0x1ca4   :  { %v7082_v50 = vcombine.low %v7031_v51, %v7014_v7  ;;  %v7083_v41 = vcombine.low %v7028_v2, %v7030_v55  ;;  %7365 = vmax.xlane.f32.xlu1 %v7364_v38  ;;  %v7090_v44 = vrot.slane %v7081_v20, %v20554_v60 }
0x1ca5   :  { %v7065_v25 = vcombine.low %v7056_v6, %v7063_v1 }
0x1ca6   :  { %v7097_v43 = vrot.slane %v7082_v50, %v20554_v60  ;;  %v7104_v42 = vrot.slane %v7083_v41, %v20554_v60 }
0x1ca7   :  { %v7079_v35 = vrot.slane %v7065_v25, %v20554_v60 }
0x1ca8   :  { %v7105_v4 = vcombine.low %v7090_v44, %v7097_v43  ;;  %v7119_v48 = vrot.slane %v7104_v42, %v20554_v60 }
0x1ca9   :  { %v7080_v54 = vcombine.low %v7072_v32, %v7079_v35 }
0x1caa   :  { %v7112_v8 = vrot.slane %v7105_v4, %v20554_v60 }
0x1cab   :  { %19449 = vmatprep.mubr.msk.f32.mxu0 %vm155_vm0, %v7080_v54 }
0x1cac   :  { %v7120_v12 = vcombine.low %v7112_v8, %v7119_v48 }
0x1cae   :  { %19450 = vmatmul.mubr.msk.f32.vlgmr.msra.gmra.mxu0 %vm155_vm0, %v7120_v12 }
0x1caf   :  { %19458 = vmatpush3.xpose.msk.msra.mxu0 %vm155_vm0, %v7287_v16  ;;  %19459 = vmatprep.mubr.msk.f32.mxu0 %vm20403_vm5, %v23937_v37 }
0x1cb0   :  { %19467 = vmatprep.subr.mxu0 %v23937_v37 }
0x1cb2   :  { %19460 = vmatmul.mubr.msk.f32.vlgmr.msra.gmra.mxu0 %vm155_vm0, %v7285_v5 }
0x1cb3   :  { %19469 = vmatprep.mubr.msk.f32.mxu0 %vm20403_vm5, %v23937_v37 }
0x1d2d   :  { %v7366_v15 = vpop.xlane.xlu1 %7365 }
0x1d2e   :  { %v7370_v14 = vsub.f32 %v7362_v46, %v7366_v15 }
0x1d30   :  { %v7372_v57 = vmul.f32 1.442695, %v7370_v14 }
0x1d32   :  { %20130 = vpow2.f32 %v7372_v57 }
0x1d3f   :  { %v20131_v40 = vpop.eup %20130 }
0x1d40   :  { %v7376_v2 = vsel %vm1049_vm6, %v20131_v40, 0.0 }
0x1d6e   :  { %v19451_v33 = vpop.f32.mrf.mxu0 }
0x1d6f   :  { %v21884_v3 = vadd.f32 %v19451_v33, %v21817_v19 }
0x1d70   :  { %v7195_v17 = vpop.f32.mrf.mxu0 }
0x1d71   :  { %v21887_v24 = vadd.f32 %v7195_v17, %v21819_v30 }
0x1d72   :  { %v7358_v7 = vpop.f32.mrf.mxu0 }
0x1d73   :  { %v7363_v34 = vmul.f32 0.35355338, %v7358_v7 }
0x1d74   :  { %v19461_v49 = vpop.f32.mrf.mxu0 }
0x1d75   :  { %v7367_v10 = vsel %vm1049_vm6, %v7363_v34, -inf }
0x1d76   :  { %7368 = vmax.xlane.f32.xlu0 %v7367_v10 }
0x1d7a   :  { %7377 = vadd.xlane.f32.xlu0 %v7376_v2 }
0x1d90   :  { %7386 = vrot.lane.b32.xlu0 %v21660_v58, %s20415_s11  ;;  %v20320_v58 = vld [vmem:[%s23923_s4 + $0x70] sm:$0xff] }
0x1dff   :  { %v7369_v46 = vpop.xlane.xlu0 %7368 }
0x1e00   :  { %v7371_v19 = vsub.f32 %v7363_v34, %v7369_v46 }
0x1e02   :  { %v7374_v55 = vmul.f32 1.442695, %v7371_v19 }
0x1e03   :  { %v7378_v51 = vpop.xlane.xlu0 %7377 }
0x1e04   :  { %20132 = vpow2.f32 %v7374_v55 }
0x1e05   :  { %20134 = vrcp.f32 %v7378_v51 }
0x1e07   :  { %v7387_v30 = vpop.permute.xlu0 %7386 }
0x1e08   :  { %19463 = vmatpush3.msk.msra.mxu1 %vm421_vm4, %v7387_v30 }
0x1e11   :  { %v20133_v20 = vpop.eup %20132 }
0x1e12   :  { %v20135_v6 = vpop.eup %20134  ;;  %v7379_v27 = vsel %vm1049_vm6, %v20133_v20, 0.0 }
0x1e13   :  { %7380 = vadd.xlane.f32.xlu1 %v7379_v27  ;;  %v7383_v1 = vmul.f32 %v20135_v6, %v20131_v40 }
0x1e15   :  { %19465 = vmatmul.mubr.msk.f32.vlgmr.msra.gmra.mxu1 %vm1074_vm7, %v7383_v1 }
0x1e24   :  { %7463 = vrot.lane.b32.xlu1 %v21663_v0, %s20415_s11 }
0x1e28   :  { %7728 = vrot.lane.b32.xlu1 %v20320_v58, %s20406_s2 }
0x1e9c   :  { %v7381_v38 = vpop.xlane.xlu1 %7380 }
0x1e9d   :  { %20136 = vrcp.f32 %v7381_v38 }
0x1ea0   :  { %v7464_v50 = vpop.permute.xlu1 %7463 }
0x1ea1   :  { %19468 = vmatpush3.msk.msra.mxu0 %vm421_vm4, %v7464_v50 }
0x1ea4   :  { %v7729_v42 = vpop.permute.xlu1 %7728 }
0x1ea5   :  { %19472 = vmatprep.subr.mxu1 %v7729_v42 }
0x1ea6   :  { %19473 = vmatpush3.msra.mxu1 %v7729_v42 }
0x1eaa   :  { %v20137_v41 = vpop.eup %20136 }
0x1eab   :  { %v7385_v25 = vmul.f32 %v20137_v41, %v20133_v20 }
0x1ead   :  { %19470 = vmatmul.mubr.msk.f32.vlgmr.msra.gmra.mxu0 %vm1074_vm7, %v7385_v25 }
0x1ed5   :  { %v7459_v44 = vpop.f32.mrf.mxu1 }
0x1ed6   :  { %v7542_v0 = vcombine.high %v7459_v44, %v7459_v44  ;;  %v7549_v32 = vrot.slane %v7459_v44, %v20554_v60 }
0x1ed7   :  { %v19466_v43 = vpop.f32.mrf.mxu1 }
0x1ed8   :  { %v7556_v35 = vrot.slane %v7542_v0, %v20554_v60  ;;  %v7557_v4 = vcombine.high %v7549_v32, %v7549_v32  ;;  %v7565_v48 = vrot.slane %v7549_v32, %v20554_v60 }
0x1eda   :  { %v7558_v54 = vcombine.high %v7556_v35, %v7556_v35  ;;  %v7579_v8 = vrot.slane %v7557_v4, %v20554_v60  ;;  %v7572_v16 = vrot.slane %v7556_v35, %v20554_v60 }
0x1edc   :  { %v7586_v12 = vrot.slane %v7558_v54, %v20554_v60  ;;  %v7638_v5 = vcombine.low %v7565_v48, %v7579_v8  ;;  %v18638_v15 = vcombine.high %v7565_v48, %v7579_v8  ;;  %v7588_v46 = vcombine.high %v7572_v16, %v7572_v16 }
0x1ede   :  { %v7640_v10 = vcombine.low %v7572_v16, %v7586_v12  ;;  %v7648_v40 = vrot.slane %v7638_v5, %v20554_v60  ;;  %v7655_v2 = vrot.slane %v18638_v15, %v20554_v60 }
0x1ee0   :  { %v7662_v38 = vrot.slane %v7640_v10, %v20554_v60  ;;  %v7670_v50 = vcombine.low %v7648_v40, %v7655_v2 }
0x1ee2   :  { %v7678_v35 = vrot.slane %v7670_v50, %v20554_v60 }
0x1f6d   :  { %v7536_v14 = vpop.f32.mrf.mxu0 }
0x1f6e   :  { %v7590_v57 = vcombine.high %v7536_v14, %v7536_v14  ;;  %v7597_v33 = vrot.slane %v7536_v14, %v20554_v60 }
0x1f6f   :  { %v19471_v17 = vpop.f32.mrf.mxu0 }
0x1f70   :  { %v7604_v7 = vrot.slane %v7590_v57, %v20554_v60  ;;  %v7605_v34 = vcombine.high %v7597_v33, %v7597_v33  ;;  %v7613_v49 = vrot.slane %v7597_v33, %v20554_v60 }
0x1f72   :  { %v7606_v19 = vcombine.high %v7604_v7, %v7604_v7  ;;  %v7620_v55 = vrot.slane %v7604_v7, %v20554_v60  ;;  %v7627_v51 = vrot.slane %v7605_v34, %v20554_v60  ;;  %v7635_v30 = vcombine.high %v7613_v49, %v7613_v49 }
0x1f73   :  { %v7641_v20 = vcombine.low %v7588_v46, %v7613_v49 }
0x1f74   :  { %v7634_v6 = vrot.slane %v7606_v19, %v20554_v60  ;;  %v7636_v27 = vcombine.high %v7620_v55, %v7620_v55  ;;  %v7637_v1 = vcombine.high %v7627_v51, %v7627_v51  ;;  %v7687_v58 = vcombine.low %v7627_v51, %v7635_v30 }
0x1f75   :  { %v7669_v41 = vrot.slane %v7641_v20, %v20554_v60 }
0x1f76   :  { %v7688_v25 = vcombine.low %v7637_v1, %v7620_v55  ;;  %v7689_v44 = vcombine.low %v7634_v6, %v7636_v27  ;;  %v7696_v42 = vrot.slane %v7687_v58, %v20554_v60 }
0x1f77   :  { %v7671_v43 = vcombine.low %v7662_v38, %v7669_v41 }
0x1f78   :  { %v7703_v0 = vrot.slane %v7688_v25, %v20554_v60  ;;  %v7710_v32 = vrot.slane %v7689_v44, %v20554_v60 }
0x1f79   :  { %v7685_v4 = vrot.slane %v7671_v43, %v20554_v60 }
0x1f7a   :  { %v7711_v54 = vcombine.low %v7696_v42, %v7703_v0  ;;  %v7725_v16 = vrot.slane %v7710_v32, %v20554_v60 }
0x1f7b   :  { %v7686_v8 = vcombine.low %v7678_v35, %v7685_v4 }
0x1f7c   :  { %v7718_v48 = vrot.slane %v7711_v54, %v20554_v60 }
0x1f7d   :  { %19474 = vmatprep.mubr.msk.f32.mxu1 %vm155_vm0, %v7686_v8 }
0x1f7e   :  { %v7726_v12 = vcombine.low %v7718_v48, %v7725_v16 }
0x1f80   :  { %19475 = vmatmul.mubr.msk.f32.vlgmr.msra.gmra.mxu1 %vm155_vm0, %v7726_v12 }
0x2040   :  { %v19476_v5 = vpop.f32.mrf.mxu1 }
0x2041   :  { %v7811_v15 = vadd.f32 %v19476_v5, %v21884_v3 }
0x2042   :  { %v7801_v14 = vpop.f32.mrf.mxu1 }
0x2043   :  { %v7863_v57 = vcombine.high %v7811_v15, %v7811_v15  ;;  %v7870_v33 = vrot.slane %v7811_v15, %v20554_v60  ;;  %v7810_v17 = vadd.f32 %v7801_v14, %v21887_v24 }
0x2045   :  { %v7877_v7 = vrot.slane %v7863_v57, %v20554_v60  ;;  %v7878_v34 = vcombine.high %v7870_v33, %v7870_v33  ;;  %v7886_v49 = vrot.slane %v7870_v33, %v20554_v60  ;;  %v7814_v10 = vcombine.high %v7810_v17, %v7810_v17 }
0x2046   :  { %v7821_v40 = vrot.slane %v7810_v17, %v20554_v60 }
0x2047   :  { %v7879_v2 = vcombine.high %v7877_v7, %v7877_v7  ;;  %v7893_v46 = vrot.slane %v7877_v7, %v20554_v60  ;;  %v7900_v19 = vrot.slane %v7878_v34, %v20554_v60  ;;  %v7908_v3 = vcombine.high %v7886_v49, %v7886_v49 }
0x2048   :  { %v7828_v55 = vrot.slane %v7814_v10, %v20554_v60  ;;  %v7829_v51 = vcombine.high %v7821_v40, %v7821_v40  ;;  %v7837_v30 = vrot.slane %v7821_v40, %v20554_v60  ;;  %v7932_v6 = vadd.f32 %v7886_v49, %v21555_v59 }
0x2049   :  { %v7907_v24 = vrot.slane %v7879_v2, %v20554_v60  ;;  %v7909_v20 = vcombine.high %v7900_v19, %v7900_v19  ;;  %v7933_v27 = vadd.f32 %v7900_v19, %v21558_v13  ;;  %v7934_v1 = vadd.f32 %v7908_v3, %v21550_v23 }
0x204a   :  { %v7830_v58 = vcombine.high %v7828_v55, %v7828_v55  ;;  %v7844_v38 = vrot.slane %v7828_v55, %v20554_v60  ;;  %v7851_v50 = vrot.slane %v7829_v51, %v20554_v60  ;;  %v7936_v25 = vadd.f32 %v7893_v46, %v21564_v21 }
0x204b   :  { %v7935_v41 = vadd.f32 %v7909_v20, %v21552_v53  ;;  %v8001_v44 = vcombine.low %v7932_v6, %v7933_v27  ;;  %v7859_v43 = vcombine.high %v7837_v30, %v7837_v30  ;;  %v21952_v23 = vadd.f32 %v7837_v30, %v21591_v18 }
0x204c   :  { %v7858_v42 = vrot.slane %v7830_v58, %v20554_v60  ;;  %v7860_v0 = vcombine.high %v7844_v38, %v7844_v38  ;;  %v7861_v32 = vcombine.high %v7851_v50, %v7851_v50  ;;  %v21949_v59 = vadd.f32 %v7851_v50, %v21594_v36 }
0x204d   :  { %v21955_v13 = vadd.f32 %v7859_v43, %v21596_v63  ;;  %v7937_v35 = vadd.f32 %v7907_v24, %v21566_v9  ;;  %v8002_v53 = vcombine.low %v7934_v1, %v7935_v41  ;;  %v7928_v54 = vadd.f32 %v7844_v38, %v21600_v11 }
0x204e   :  { %v7862_v4 = vcombine.high %v7858_v42, %v7858_v42  ;;  %v7927_v21 = vadd.f32 %v7861_v32, %v21598_v29  ;;  %v7929_v8 = vadd.f32 %v7858_v42, %v21602_v45  ;;  %v7952_v36 = vcombine.low %v21952_v23, %v21949_v59 }
0x204f   :  { %v8003_v48 = vcombine.low %v7936_v25, %v7937_v35  ;;  %v8010_v18 = vrot.slane %v8001_v44, %v20554_v60  ;;  %v8017_v16 = vrot.slane %v8002_v53, %v20554_v60  ;;  %v7930_v63 = vadd.f32 %v7860_v0, %v21604_v22 }
0x2050   :  { %v7931_v9 = vadd.f32 %v7862_v4, %v21606_v26  ;;  %v7953_v12 = vcombine.low %v21955_v13, %v7927_v21  ;;  %v7954_v5 = vcombine.low %v7928_v54, %v7929_v8  ;;  %v7962_v45 = vrot.slane %v7952_v36, %v20554_v60 }
0x2051   :  { %v8024_v29 = vrot.slane %v8003_v48, %v20554_v60  ;;  %v8025_v11 = vcombine.low %v8010_v18, %v8017_v16 }
0x2052   :  { %v7955_v15 = vcombine.low %v7930_v63, %v7931_v9  ;;  %v7969_v14 = vrot.slane %v7953_v12, %v20554_v60  ;;  %v7976_v17 = vrot.slane %v7954_v5, %v20554_v60 }
0x2053   :  { %v8032_v57 = vrot.slane %v8025_v11, %v20554_v60  ;;  %v8039_v33 = vrot.slane %v8024_v29, %v20554_v60 }
0x2054   :  { %v7983_v22 = vrot.slane %v7955_v15, %v20554_v60  ;;  %v7984_v26 = vcombine.low %v7962_v45, %v7969_v14 }
0x2055   :  { %v8040_v7 = vcombine.low %v8032_v57, %v8039_v33 }
0x2056   :  { %v7985_v34 = vcombine.low %v7976_v17, %v7983_v22  ;;  %v7992_v10 = vrot.slane %v7984_v26, %v20554_v60 }
0x2057   :  { %v8046_v49 = vsel %vm296_vm2, %v8040_v7, 0.0 }
0x2058   :  { %8047 = vadd.xlane.f32.xlu1 %v8046_v49  ;;  %v7999_v40 = vrot.slane %v7985_v34, %v20554_v60 }
0x205a   :  { %v8000_v2 = vcombine.low %v7992_v10, %v7999_v40 }
0x205c   :  { %v8043_v46 = vsel %vm617_vm3, %v8000_v2, 0.0 }
0x205d   :  { %8044 = vadd.xlane.f32.xlu0 %v8043_v46 }
0x20e1   :  { %v8048_v19 = vpop.xlane.xlu1 %8047 }
0x20e2   :  { %v8050_v3 = vmul.f32 0.03125, %v8048_v19 }
0x20e4   :  { %v8088_v55 = vrot.slane %v8050_v3, %v20533_v31  ;;  %v8092_v51 = vrot.slane %v8050_v3, %v20825_v39  ;;  %v8096_v30 = vrot.slane %v8050_v3, %v21024_v56  ;;  %v8100_v24 = vrot.slane %v8050_v3, %v21027_v47 }
0x20e5   :  { %v8104_v20 = vrot.slane %v8050_v3, %v21030_v52  ;;  %v8108_v58 = vrot.slane %v8050_v3, %v21033_v28 }
0x20e6   :  { %v8045_v38 = vpop.xlane.xlu0 %8044  ;;  %v21985_v50 = vsub.f32 %v7932_v6, %v8088_v55  ;;  %v21987_v44 = vsub.f32 %v7933_v27, %v8092_v51  ;;  %v21989_v43 = vsub.f32 %v7934_v1, %v8096_v30  ;;  %v21991_v42 = vsub.f32 %v7935_v41, %v8100_v24 }
0x20e7   :  { %v8049_v0 = vmul.f32 0.03125, %v8045_v38  ;;  %v21993_v32 = vsub.f32 %v7936_v25, %v8104_v20  ;;  %v21995_v53 = vsub.f32 %v7937_v35, %v8108_v58 }
0x20e8   :  { %v8145_v4 = vmul.f32 %v21985_v50, %v21985_v50  ;;  %v8146_v36 = vmul.f32 %v21987_v44, %v21987_v44  ;;  %v8147_v6 = vmul.f32 %v21989_v43, %v21989_v43  ;;  %v8148_v27 = vmul.f32 %v21991_v42, %v21991_v42 }
0x20e9   :  { %v8056_v1 = vrot.slane %v8049_v0, %v20533_v31  ;;  %v8060_v41 = vrot.slane %v8049_v0, %v20825_v39  ;;  %v8064_v25 = vrot.slane %v8049_v0, %v21024_v56  ;;  %v8068_v35 = vrot.slane %v8049_v0, %v21027_v47 }
0x20ea   :  { %v8072_v48 = vrot.slane %v8049_v0, %v21030_v52  ;;  %v8076_v18 = vrot.slane %v8049_v0, %v21033_v28  ;;  %v8080_v16 = vrot.slane %v8049_v0, %v21040_v61  ;;  %v8084_v12 = vrot.slane %v8049_v0, %v21043_v62 }
0x20eb   :  { %v22014_v5 = vsub.f32 %v21952_v23, %v8056_v1  ;;  %v22017_v29 = vsub.f32 %v21949_v59, %v8060_v41  ;;  %v22020_v11 = vsub.f32 %v21955_v13, %v8064_v25  ;;  %v22022_v15 = vsub.f32 %v7927_v21, %v8068_v35  ;;  %v18585_v35 = vld [vmem:[%s23923_s4 + $0x78] sm:$0xff] }
0x20ec   :  { %v22024_v45 = vsub.f32 %v7928_v54, %v8072_v48  ;;  %v22026_v14 = vsub.f32 %v7929_v8, %v8076_v18  ;;  %v22028_v57 = vsub.f32 %v7930_v63, %v8080_v16  ;;  %v22030_v33 = vsub.f32 %v7931_v9, %v8084_v12  ;;  %v18583_v48 = vld [vmem:[%s23923_s4 + $0x68] sm:$0xff]  ;;  %19477 = vmatprep.subr.mxu0 %v18585_v35  ;;  %v18581_v18 = vld [vmem:[%s23923_s4 + $0x58] sm:$0xff] }
0x20ed   :  { %v8137_v23 = vmul.f32 %v22014_v5, %v22014_v5  ;;  %v8138_v59 = vmul.f32 %v22017_v29, %v22017_v29  ;;  %v8139_v13 = vmul.f32 %v22020_v11, %v22020_v11  ;;  %v8140_v21 = vmul.f32 %v22022_v15, %v22022_v15  ;;  %19478 = vmatpush3.msra.mxu0 %v18585_v35  ;;  %v18579_v16 = vld [vmem:[%s23923_s4 + $0x48] sm:$0xff] }
0x20ee   :  { %v8141_v54 = vmul.f32 %v22024_v45, %v22024_v45  ;;  %v8142_v8 = vmul.f32 %v22026_v14, %v22026_v14  ;;  %v8143_v63 = vmul.f32 %v22028_v57, %v22028_v57  ;;  %v8144_v9 = vmul.f32 %v22030_v33, %v22030_v33  ;;  %19479 = vmatprep.subr.mxu0 %v18583_v48  ;;  %v22080_v12 = vld [vmem:[%s23926_s7 + $0x48] sm:$0xff] }
0x20ef   :  { %v8165_v17 = vcombine.low %v8137_v23, %v8138_v59  ;;  %v8166_v22 = vcombine.low %v8139_v13, %v8140_v21  ;;  %v8149_v26 = vmul.f32 %v21993_v32, %v21993_v32  ;;  %v8150_v7 = vmul.f32 %v21995_v53, %v21995_v53  ;;  %19480 = vmatpush3.msra.mxu0 %v18583_v48  ;;  %v22083_v23 = vld [vmem:[#allocation6 + $0x8] sm:$0xff] }
0x20f0   :  { %v8167_v34 = vcombine.low %v8141_v54, %v8142_v8  ;;  %v8168_v49 = vcombine.low %v8143_v63, %v8144_v9  ;;  %v8214_v10 = vcombine.low %v8145_v4, %v8146_v36  ;;  %v8215_v40 = vcombine.low %v8147_v6, %v8148_v27  ;;  %19481 = vmatprep.subr.mxu0 %v18581_v18 }
0x20f1   :  { %v8175_v2 = vrot.slane %v8165_v17, %v20554_v60  ;;  %v8182_v46 = vrot.slane %v8166_v22, %v20554_v60  ;;  %v8216_v19 = vcombine.low %v8149_v26, %v8150_v7  ;;  %19482 = vmatpush3.msra.mxu0 %v18581_v18  ;;  %v8357_v59 = vrot.slane %v22083_v23, %v21030_v52 }
0x20f2   :  { %v8189_v3 = vrot.slane %v8167_v34, %v20554_v60  ;;  %v8196_v55 = vrot.slane %v8168_v49, %v20554_v60  ;;  %v8223_v51 = vrot.slane %v8214_v10, %v20554_v60  ;;  %v8230_v30 = vrot.slane %v8215_v40, %v20554_v60  ;;  %19483 = vmatprep.subr.mxu0 %v18579_v16 }
0x20f3   :  { %v8197_v24 = vcombine.low %v8175_v2, %v8182_v46  ;;  %v8237_v58 = vrot.slane %v8216_v19, %v20554_v60  ;;  %19484 = vmatpush3.msra.mxu0 %v18579_v16  ;;  %v8433_v13 = vrot.slane %v22083_v23, %v21033_v28  ;;  %v8359_v8 = vcombine.high %v8357_v59, %v8357_v59 }
0x20f4   :  { %v8198_v20 = vcombine.low %v8189_v3, %v8196_v55  ;;  %v8238_v38 = vcombine.low %v8223_v51, %v8230_v30  ;;  %19507 = vmatprep.subr.mxu0 %v22080_v12  ;;  %v8366_v26 = vrot.slane %v8357_v59, %v20554_v60 }
0x20f5   :  { %v8205_v0 = vrot.slane %v8197_v24, %v20554_v60  ;;  %v8252_v27 = vrot.slane %v8237_v58, %v20554_v60  ;;  %v8435_v63 = vcombine.high %v8433_v13, %v8433_v13  ;;  %v8373_v7 = vrot.slane %v8359_v8, %v20554_v60 }
0x20f6   :  { %v8212_v4 = vrot.slane %v8198_v20, %v20554_v60  ;;  %v8245_v36 = vrot.slane %v8238_v38, %v20554_v60  ;;  %v8442_v34 = vrot.slane %v8433_v13, %v20554_v60  ;;  %v8374_v40 = vcombine.high %v8366_v26, %v8366_v26 }
0x20f7   :  { %v8449_v49 = vrot.slane %v8435_v63, %v20554_v60  ;;  %v8375_v2 = vcombine.high %v8373_v7, %v8373_v7  ;;  %v22094_v3 = vrot.slane %v8366_v26, %v20554_v60  ;;  %v22097_v55 = vrot.slane %v8373_v7, %v20554_v60 }
0x20f8   :  { %v8213_v6 = vcombine.low %v8205_v0, %v8212_v4  ;;  %v8253_v41 = vcombine.low %v8245_v36, %v8252_v27  ;;  %v8450_v46 = vcombine.high %v8442_v34, %v8442_v34  ;;  %v22100_v51 = vrot.slane %v8374_v40, %v20554_v60 }
0x20f9   :  { %v8451_v19 = vcombine.high %v8449_v49, %v8449_v49  ;;  %v22103_v30 = vrot.slane %v8375_v2, %v20554_v60  ;;  %v22106_v24 = vrot.slane %v8442_v34, %v20554_v60  ;;  %v22109_v20 = vrot.slane %v8449_v49, %v20554_v60 }
0x20fa   :  { %v8256_v1 = vsel %vm617_vm3, %v8213_v6, 0.0  ;;  %v8259_v25 = vsel %vm296_vm2, %v8253_v41, 0.0  ;;  %v22112_v58 = vrot.slane %v8450_v46, %v20554_v60  ;;  %v8404_v0 = vcombine.high %v22094_v3, %v22094_v3 }
0x20fb   :  { %8257 = vadd.xlane.f32.xlu0 %v8256_v1  ;;  %v22115_v38 = vrot.slane %v8451_v19, %v20554_v60  ;;  %v8405_v4 = vcombine.high %v22097_v55, %v22097_v55  ;;  %v8406_v36 = vcombine.high %v22100_v51, %v22100_v51  ;;  %v8407_v6 = vcombine.high %v22103_v30, %v22103_v30 }
0x20fc   :  { %v8480_v1 = vcombine.high %v22106_v24, %v22106_v24  ;;  %v8481_v41 = vcombine.high %v22109_v20, %v22109_v20 }
0x20fd   :  { %v8483_v35 = vcombine.high %v22115_v38, %v22115_v38 }
0x20ff   :  { %8260 = vadd.xlane.f32.xlu0 %v8259_v25  ;;  %v8482_v25 = vcombine.high %v22112_v58, %v22112_v58 }
0x2184   :  { %v8258_v21 = vpop.xlane.xlu0 %8257 }
0x2185   :  { %v8262_v54 = vmul.f32 0.03125, %v8258_v21 }
0x2187   :  { %v8264_v9 = vadd.f32 1e-05, %v8262_v54 }
0x2188   :  { %v8261_v17 = vpop.xlane.xlu0 %8260 }
0x2189   :  { %20138 = vrsqrt.f32 %v8264_v9  ;;  %v8263_v22 = vmul.f32 0.03125, %v8261_v17 }
0x218b   :  { %v8265_v10 = vadd.f32 1e-05, %v8263_v22 }
0x218d   :  { %20140 = vrsqrt.f32 %v8265_v10 }
0x2196   :  { %v20139_v27 = vpop.eup %20138 }
0x2197   :  { %v8273_v48 = vrot.slane %v20139_v27, %v20533_v31  ;;  %v8277_v18 = vrot.slane %v20139_v27, %v20825_v39  ;;  %v8281_v16 = vrot.slane %v20139_v27, %v21024_v56  ;;  %v8285_v59 = vrot.slane %v20139_v27, %v21027_v47 }
0x2198   :  { %v8289_v13 = vrot.slane %v20139_v27, %v21030_v52  ;;  %v8293_v21 = vrot.slane %v20139_v27, %v21033_v28  ;;  %v8297_v54 = vrot.slane %v20139_v27, %v21040_v61  ;;  %v8301_v8 = vrot.slane %v20139_v27, %v21043_v62 }
0x2199   :  { %v8340_v63 = vmul.f32 %v8273_v48, %v22014_v5  ;;  %v8341_v9 = vmul.f32 %v8277_v18, %v22017_v29  ;;  %v8342_v17 = vmul.f32 %v8281_v16, %v22020_v11  ;;  %v8343_v22 = vmul.f32 %v8285_v59, %v22022_v15 }
0x219a   :  { %v20141_v26 = vpop.eup %20140  ;;  %v8344_v7 = vmul.f32 %v8289_v13, %v22024_v45  ;;  %v8345_v34 = vmul.f32 %v8293_v21, %v22026_v14  ;;  %v8346_v49 = vmul.f32 %v8297_v54, %v22028_v57  ;;  %v8347_v10 = vmul.f32 %v8301_v8, %v22030_v33 }
0x219b   :  { %v8313_v40 = vrot.slane %v20141_v26, %v21024_v56  ;;  %v8317_v2 = vrot.slane %v20141_v26, %v21027_v47  ;;  %v8416_v5 = vmul.f32 %v22094_v3, %v8340_v63  ;;  %v8417_v29 = vmul.f32 %v22100_v51, %v8341_v9 }
0x219c   :  { %v8418_v11 = vmul.f32 %v8404_v0, %v8342_v17  ;;  %v8419_v46 = vmul.f32 %v8406_v36, %v8343_v22  ;;  %v8420_v15 = vmul.f32 %v22097_v55, %v8344_v7  ;;  %v8421_v45 = vmul.f32 %v22103_v30, %v8345_v34 }
0x219d   :  { %v8350_v14 = vmul.f32 %v8313_v40, %v21989_v43  ;;  %v8351_v57 = vmul.f32 %v8317_v2, %v21991_v42  ;;  %v8422_v19 = vmul.f32 %v8405_v4, %v8346_v49  ;;  %v8423_v33 = vmul.f32 %v8407_v6, %v8347_v10 }
0x219e   :  { %v22158_v27 = vadd.f32 %v22106_v24, %v8416_v5  ;;  %v22161_v48 = vadd.f32 %v22112_v58, %v8417_v29  ;;  %v22163_v18 = vadd.f32 %v8480_v1, %v8418_v11  ;;  %v22165_v16 = vadd.f32 %v8482_v25, %v8419_v46 }
0x219f   :  { %v8426_v59 = vmul.f32 %v8404_v0, %v8350_v14  ;;  %v8427_v13 = vmul.f32 %v8406_v36, %v8351_v57  ;;  %v22168_v21 = vadd.f32 %v22109_v20, %v8420_v15  ;;  %v22171_v43 = vadd.f32 %v22115_v38, %v8421_v45 }
0x21a0   :  { %v22173_v42 = vadd.f32 %v8481_v41, %v8422_v19  ;;  %v22175_v4 = vadd.f32 %v8483_v35, %v8423_v33  ;;  %v8524_v6 = vcombine.low %v22158_v27, %v22161_v48  ;;  %v8525_v54 = vcombine.low %v22163_v18, %v22165_v16 }
0x21a1   :  { %v22181_v8 = vadd.f32 %v8480_v1, %v8426_v59  ;;  %v22183_v0 = vadd.f32 %v8482_v25, %v8427_v13  ;;  %v8526_v36 = vcombine.low %v22168_v21, %v22171_v43  ;;  %v8305_v63 = vrot.slane %v20141_v26, %v20533_v31  ;;  %v23938_v13 = vld [vmem:[#allocation14_spill] sm:$0xff] }
0x21a2   :  { %v8527_v41 = vcombine.low %v22173_v42, %v22175_v4  ;;  %v8534_v35 = vrot.slane %v8524_v6, %v20554_v60  ;;  %v8541_v9 = vrot.slane %v8525_v54, %v20554_v60  ;;  %v8309_v17 = vrot.slane %v20141_v26, %v20825_v39  ;;  %v22241_v54 = vld [vmem:[%s23926_s7 + $0x30] sm:$0xff] }
0x21a3   :  { %v8548_v22 = vrot.slane %v8526_v36, %v20554_v60  ;;  %v8321_v1 = vrot.slane %v20141_v26, %v21030_v52  ;;  %v8325_v25 = vrot.slane %v20141_v26, %v21033_v28  ;;  %v8348_v7 = vmul.f32 %v8305_v63, %v21985_v50  ;;  %v22250_v36 = vld [vmem:[%s23926_s7 + $0x18] sm:$0xff]  ;;  %v22257_v63 = vld [vmem:[%s23926_s7] sm:$0xff] }
0x21a4   :  { %v8555_v34 = vrot.slane %v8527_v41, %v20554_v60  ;;  %v8556_v49 = vcombine.low %v8534_v35, %v8541_v9  ;;  %v8349_v10 = vmul.f32 %v8309_v17, %v21987_v44  ;;  %v8574_v26 = vcombine.low %v22181_v8, %v22183_v0  ;;  %v23939_v41 = vld [vmem:[#allocation13_spill] sm:$0xff]  ;;  %v18592_v17 = vld [vmem:[%s23924_s5 + $0x70] sm:$0xff] }
0x21a5   :  { %v8352_v40 = vmul.f32 %v8321_v1, %v21993_v32  ;;  %v8353_v2 = vmul.f32 %v8325_v25, %v21995_v53  ;;  %v8424_v5 = vmul.f32 %v22094_v3, %v8348_v7  ;;  %v18593_v9 = vld [vmem:[%s23924_s5 + $0x78] sm:$0xff]  ;;  %v18590_v1 = vld [vmem:[%s23924_s5 + $0x60] sm:$0xff]  ;;  %v18588_v7 = vld [vmem:[%s23924_s5 + $0x50] sm:$0xff] }
0x21a6   :  { %v8557_v29 = vcombine.low %v8548_v22, %v8555_v34  ;;  %v8564_v11 = vrot.slane %v8556_v49, %v20554_v60  ;;  %v8425_v46 = vmul.f32 %v22100_v51, %v8349_v10  ;;  %19488 = vmatprep.subr.mxu1 %v18593_v9  ;;  %v18591_v22 = vld [vmem:[%s23924_s5 + $0x68] sm:$0xff]  ;;  %v18589_v25 = vld [vmem:[%s23924_s5 + $0x58] sm:$0xff]  ;;  %v18586_v49 = vld [vmem:[%s23924_s5 + $0x40] sm:$0xff]  ;;  %v8509_v10 = vrot.slane %v22083_v23, %v21024_v56 }
0x21a7   :  { %v8428_v50 = vmul.f32 %v22097_v55, %v8352_v40  ;;  %v8429_v15 = vmul.f32 %v22103_v30, %v8353_v2  ;;  %v22209_v44 = vadd.f32 %v22106_v24, %v8424_v5  ;;  %v8589_v30 = vrot.slane %v8574_v26, %v20554_v60  ;;  %19489 = vmatpush3.msra.mxu1 %v18593_v9  ;;  %v18587_v34 = vld [vmem:[%s23924_s5 + $0x48] sm:$0xff] }
0x21a8   :  { %v8571_v32 = vrot.slane %v8557_v29, %v20554_v60  ;;  %v22213_v53 = vadd.f32 %v22112_v58, %v8425_v46  ;;  %19490 = vmatprep.subr.mxu1 %v18592_v17  ;;  %v22301_v29 = vld [vmem:[%s23928_s9] sm:$0xff] }
0x21a9   :  { %v22216_v3 = vadd.f32 %v22109_v20, %v8428_v50  ;;  %v22219_v51 = vadd.f32 %v22115_v38, %v8429_v15  ;;  %v20322_v38 = vld [vmem:[%s23922_s3 + $0x10] sm:$0xff]  ;;  %19491 = vmatpush3.msra.mxu1 %v18592_v17  ;;  %v10074_v50 = vrot.slane %v22301_v29, %v20533_v31 }
0x21aa   :  { %v8572_v45 = vcombine.low %v8564_v11, %v8571_v32  ;;  %v8573_v55 = vcombine.low %v22209_v44, %v22213_v53  ;;  %v418_v57 = vrot.slane %v20322_v38, %v20825_v39  ;;  %19492 = vmatprep.subr.mxu1 %v18591_v22 }
0x21ab   :  { %v8575_v24 = vcombine.low %v22216_v3, %v22219_v51  ;;  %19493 = vmatpush3.msra.mxu1 %v18591_v22 }
0x21ac   :  { %19485 = vmatprep.mubr.msk.f32.mxu0 %vm617_vm3, %v8572_v45  ;;  %v8582_v58 = vrot.slane %v8573_v55, %v20554_v60  ;;  %v22236_v6 = vadd.f32 %v23938_v13, %v418_v57  ;;  %v22262_v35 = vadd.f32 %v23939_v41, %v418_v57  ;;  %19494 = vmatprep.subr.mxu1 %v18590_v1 }
0x21ad   :  { %v8596_v14 = vrot.slane %v8575_v24, %v20554_v60  ;;  %19495 = vmatpush3.msra.mxu1 %v18590_v1  ;;  %v22331_v13 = vrot.slane %v22083_v23, %v21027_v47 }
0x21ae   :  { %v8597_v20 = vcombine.low %v8582_v58, %v8589_v30  ;;  %19496 = vmatprep.subr.mxu1 %v18589_v25 }
0x21af   :  { %v8611_v33 = vrot.slane %v8596_v14, %v20554_v60  ;;  %19497 = vmatpush3.msra.mxu1 %v18589_v25 }
0x21b0   :  { %v8604_v19 = vrot.slane %v8597_v20, %v20554_v60  ;;  %19498 = vmatprep.subr.mxu1 %v18588_v7 }
0x21b1   :  { %19499 = vmatpush3.msra.mxu1 %v18588_v7 }
0x21b2   :  { %v8612_v59 = vcombine.low %v8604_v19, %v8611_v33  ;;  %19500 = vmatprep.subr.mxu1 %v18587_v34 }
0x21b3   :  { %19501 = vmatpush3.msra.mxu1 %v18587_v34 }
0x21b4   :  { %19486 = vmatmul.mubr.msk.f32.vlgmr.msra.gmra.mxu0 %vm617_vm3, %v8612_v59  ;;  %19502 = vmatprep.subr.mxu1 %v18586_v49 }
0x21b5   :  { %19508 = vmatpush3.msra.mxu0 %v22080_v12  ;;  %19515 = vmatprep.mubr.msk.f32.mxu0 %vm617_vm3, %v22236_v6 }
0x21b6   :  { %19509 = vmatprep.subr.mxu0 %v22241_v54  ;;  %19503 = vmatpush3.msra.mxu1 %v18586_v49 }
0x21b7   :  { %19510 = vmatpush3.msra.mxu0 %v22241_v54  ;;  %19523 = vmatprep.subr.mxu1 %v23937_v37 }
0x21b8   :  { %19511 = vmatprep.subr.mxu0 %v22250_v36 }
0x21b9   :  { %19512 = vmatpush3.msra.mxu0 %v22250_v36 }
0x21ba   :  { %19513 = vmatprep.subr.mxu0 %v22257_v63 }
0x21bb   :  { %19514 = vmatpush3.msra.mxu0 %v22257_v63 }
0x21bc   :  { %19516 = vmatmul.mubr.msk.f32.vlgmr.msra.gmra.mxu0 %vm617_vm3, %v22262_v35  ;;  %19518 = vmatprep.subr.mxu0 %v23937_v37 }
0x21bd   :  { %19520 = vmatprep.mubr.msk.f32.mxu0 %vm20403_vm5, %v23937_v37 }
0x2274   :  { %v19487_v40 = vpop.f32.mrf.mxu0 }
0x2275   :  { %v8689_v2 = vadd.f32 %v19487_v40, %v8509_v10 }
0x2276   :  { %v8683_v5 = vpop.f32.mrf.mxu0 }
0x2277   :  { %v8695_v11 = vmul.f32 0.70710677, %v8689_v2  ;;  %v8684_v46 = vadd.f32 %v8683_v5, %v8509_v10  ;;  %v8693_v38 = vmul.f32 0.5, %v8689_v2 }
0x2279   :  { %20142 = verf.f32 %v8695_v11  ;;  %v8694_v26 = vmul.f32 0.70710677, %v8684_v46  ;;  %v8692_v14 = vmul.f32 0.5, %v8684_v46 }
0x227b   :  { %20144 = verf.f32 %v8694_v26 }
0x227c   :  { %v19517_v15 = vpop.f32.mrf.mxu0 }
0x227d   :  { %v22305_v32 = vadd.f32 %v19517_v15, %v10074_v50 }
0x227e   :  { %v10147_v45 = vpop.f32.mrf.mxu0 }
0x227f   :  { %v22307_v55 = vadd.f32 %v10147_v45, %v10074_v50  ;;  %10238 = vrot.lane.b32.xlu0 %v22305_v32, %s20404_s23 }
0x2281   :  { %10161 = vrot.lane.b32.xlu1 %v22307_v55, %s20404_s23 }
0x2286   :  { %v20143_v30 = vpop.eup %20142 }
0x2287   :  { %v8699_v58 = vadd.f32 1.0, %v20143_v30 }
0x2288   :  { %v20145_v24 = vpop.eup %20144 }
0x2289   :  { %v8698_v20 = vadd.f32 1.0, %v20145_v24  ;;  %v8701_v19 = vmul.f32 %v8699_v58, %v8693_v38 }
0x228b   :  { %v8700_v57 = vmul.f32 %v8698_v20, %v8692_v14 }
0x228d   :  { %19504 = vmatprep.mubr.msk.f32.mxu1 %vm4212_vm8, %v8700_v57 }
0x228e   :  { %19505 = vmatmul.mubr.msk.f32.vlgmr.msra.gmra.mxu1 %vm4212_vm8, %v8701_v19 }
0x228f   :  { %19525 = vmatprep.mubr.msk.f32.mxu1 %vm20403_vm5, %v23937_v37 }
0x22f1   :  { %v10239_v33 = vpop.permute.xlu0 %10238 }
0x22f2   :  { %19524 = vmatpush3.xpose.msk.msra.mxu1 %vm155_vm0, %v10239_v33 }
0x22f3   :  { %v10162_v59 = vpop.permute.xlu1 %10161  ;;  %19533 = vmatprep.subr.mxu1 %v23937_v37 }
0x22f4   :  { %19519 = vmatpush3.xpose.msk.msra.mxu0 %vm155_vm0, %v10162_v59 }
0x22f5   :  { %19526 = vmatmul.mubr.msk.f32.vlgmr.msra.gmra.mxu1 %vm155_vm0, %v22305_v32  ;;  %19528 = vmatprep.subr.mxu0 %v23937_v37 }
0x22f6   :  { %19535 = vmatprep.mubr.msk.f32.mxu1 %vm20403_vm5, %v23937_v37 }
0x22f7   :  { %19521 = vmatmul.mubr.msk.f32.vlgmr.msra.gmra.mxu0 %vm155_vm0, %v22307_v55 }
0x22f8   :  { %19530 = vmatprep.mubr.msk.f32.mxu0 %vm20403_vm5, %v23937_v37 }
0x234e   :  { %v19506_v41 = vpop.f32.mrf.mxu1 }
0x234f   :  { %v22334_v9 = vadd.f32 %v19506_v41, %v22331_v13 }
0x2350   :  { %v22336_v17 = vpop.f32.mrf.mxu1 }
0x23b5   :  { %v10310_v22 = vpop.f32.mrf.mxu1 }
0x23b6   :  { %v10315_v1 = vmul.f32 0.35355338, %v10310_v22 }
0x23b7   :  { %v10233_v25 = vpop.f32.mrf.mxu0  ;;  %v19527_v7 = vpop.f32.mrf.mxu1 }
0x23b8   :  { %v10314_v34 = vmul.f32 0.35355338, %v10233_v25  ;;  %v10319_v49 = vsel %vm155_vm0, %v10315_v1, -inf }
0x23b9   :  { %v19522_v10 = vpop.f32.mrf.mxu0  ;;  %10320 = vmax.xlane.f32.xlu0 %v10319_v49 }
0x23ba   :  { %v10316_v40 = vsel %vm155_vm0, %v10314_v34, -inf }
0x23bb   :  { %10317 = vmax.xlane.f32.xlu1 %v10316_v40 }
0x2442   :  { %v10321_v23 = vpop.xlane.xlu0 %10320 }
0x2443   :  { %v10323_v2 = vsub.f32 %v10315_v1, %v10321_v23 }
0x2444   :  { %v10318_v5 = vpop.xlane.xlu1 %10317 }
0x2445   :  { %v10326_v11 = vmul.f32 1.442695, %v10323_v2  ;;  %v10322_v46 = vsub.f32 %v10314_v34, %v10318_v5 }
0x2447   :  { %20146 = vpow2.f32 %v10326_v11  ;;  %v10324_v26 = vmul.f32 1.442695, %v10322_v46 }
0x2449   :  { %20148 = vpow2.f32 %v10324_v26 }
0x2454   :  { %v20147_v50 = vpop.eup %20146 }
0x2455   :  { %v10331_v15 = vsel %vm155_vm0, %v20147_v50, 0.0 }
0x2456   :  { %v20149_v45 = vpop.eup %20148  ;;  %10332 = vadd.xlane.f32.xlu0 %v10331_v15 }
0x2457   :  { %v10328_v30 = vsel %vm155_vm0, %v20149_v45, 0.0 }
0x2458   :  { %10329 = vadd.xlane.f32.xlu1 %v10328_v30 }
0x2469   :  { %10338 = vrot.lane.b32.xlu1 %v22307_v55, %s20405_s24 }
0x246c   :  { %10414 = vrot.lane.b32.xlu0 %v22305_v32, %s20405_s24 }
0x246d   :  { %10491 = vrot.lane.b32.xlu1 %v22257_v63, %s20406_s2 }
0x2470   :  { %10657 = vrot.lane.b32.xlu0 %v22305_v32, %s20407_s25 }
0x2471   :  { %10579 = vrot.lane.b32.xlu1 %v22307_v55, %s20407_s25 }
0x2474   :  { %10655 = vrot.lane.b32.xlu0 %v22305_v32, %s20408_s6 }
0x2475   :  { %10577 = vrot.lane.b32.xlu1 %v22307_v55, %s20408_s6 }
0x24df   :  { %v10333_v24 = vpop.xlane.xlu0 %10332 }
0x24e0   :  { %20150 = vrcp.f32 %v10333_v24 }
0x24e1   :  { %v10330_v58 = vpop.xlane.xlu1 %10329 }
0x24e2   :  { %20152 = vrcp.f32 %v10330_v58 }
0x24e3   :  { %v10415_v14 = vpop.permute.xlu0 %10414 }
0x24e4   :  { %19534 = vmatpush3.msra.mxu1 %v10415_v14 }
0x24e5   :  { %v10339_v20 = vpop.permute.xlu1 %10338  ;;  %19543 = vmatprep.subr.mxu1 %v23937_v37 }
0x24e6   :  { %19529 = vmatpush3.msra.mxu0 %v10339_v20 }
0x24e7   :  { %v10658_v1 = vpop.permute.xlu0 %10657 }
0x24e9   :  { %v10492_v63 = vpop.permute.xlu1 %10491 }
0x24ea   :  { %19538 = vmatprep.subr.mxu0 %v10492_v63 }
0x24eb   :  { %v10656_v23 = vpop.permute.xlu0 %10655 }
0x24ed   :  { %v20151_v38 = vpop.eup %20150  ;;  %v10580_v57 = vpop.permute.xlu1 %10579 }
0x24ee   :  { %v10337_v19 = vmul.f32 %v20151_v38, %v20147_v50 }
0x24ef   :  { %v20153_v33 = vpop.eup %20152 }
0x24f0   :  { %19536 = vmatmul.mubr.msk.f32.vlgmr.msra.gmra.mxu1 %vm155_vm0, %v10337_v19  ;;  %v10335_v59 = vmul.f32 %v20153_v33, %v20149_v45 }
0x24f1   :  { %19544 = vmatpush3.xpose.msk.msra.mxu1 %vm155_vm0, %v10580_v57  ;;  %19545 = vmatprep.mubr.msk.f32.mxu1 %vm20403_vm5, %v23937_v37  ;;  %v10578_v41 = vpop.permute.xlu1 %10577 }
0x24f2   :  { %19531 = vmatmul.mubr.msk.f32.vlgmr.msra.gmra.mxu0 %vm155_vm0, %v10335_v59  ;;  %19553 = vmatprep.subr.mxu1 %v23937_v37 }
0x24f3   :  { %19539 = vmatpush3.msra.mxu0 %v10492_v63 }
0x24f4   :  { %19546 = vmatmul.mubr.msk.f32.vlgmr.msra.gmra.mxu1 %vm155_vm0, %v10578_v41  ;;  %19548 = vmatprep.subr.mxu0 %v23937_v37 }
0x24f5   :  { %19555 = vmatprep.mubr.msk.f32.mxu1 %vm20403_vm5, %v23937_v37 }
0x25b0   :  { %v10486_v22 = vpop.f32.mrf.mxu1 }
0x25b2   :  { %v10410_v25 = vpop.f32.mrf.mxu0  ;;  %v19537_v7 = vpop.f32.mrf.mxu1 }
0x25b3   :  { %19540 = vmatprep.mubr.msk.f32.mxu0 %vm155_vm0, %v10410_v25 }
0x25b4   :  { %v19532_v34 = vpop.f32.mrf.mxu0  ;;  %19541 = vmatmul.mubr.msk.f32.vlgmr.msra.gmra.mxu0 %vm155_vm0, %v10486_v22  ;;  %v10651_v49 = vpop.f32.mrf.mxu1 }
0x25b5   :  { %v10733_v10 = vmul.f32 0.35355338, %v10651_v49  ;;  %19549 = vmatpush3.xpose.msk.msra.mxu0 %vm155_vm0, %v10658_v1  ;;  %19550 = vmatprep.mubr.msk.f32.mxu0 %vm20403_vm5, %v23937_v37 }
0x25b6   :  { %v19547_v40 = vpop.f32.mrf.mxu1  ;;  %19558 = vmatprep.subr.mxu0 %v23937_v37 }
0x25b7   :  { %v10735_v2 = vsel %vm155_vm0, %v10733_v10, -inf }
0x25b8   :  { %19551 = vmatmul.mubr.msk.f32.vlgmr.msra.gmra.mxu0 %vm155_vm0, %v10656_v23  ;;  %10736 = vmax.xlane.f32.xlu1 %v10735_v2 }
0x25b9   :  { %19560 = vmatprep.mubr.msk.f32.mxu0 %vm20403_vm5, %v23937_v37 }
0x2641   :  { %v10737_v5 = vpop.xlane.xlu1 %10736 }
0x2642   :  { %v10741_v11 = vsub.f32 %v10733_v10, %v10737_v5 }
0x2644   :  { %v10743_v46 = vmul.f32 1.442695, %v10741_v11 }
0x2646   :  { %20154 = vpow2.f32 %v10743_v46 }
0x2653   :  { %v20155_v58 = vpop.eup %20154 }
0x2654   :  { %v10747_v14 = vsel %vm155_vm0, %v20155_v58, 0.0 }
0x2674   :  { %v22377_v26 = vpop.f32.mrf.mxu0 }
0x2676   :  { %v22379_v50 = vpop.f32.mrf.mxu0 }
0x2678   :  { %v10729_v15 = vpop.f32.mrf.mxu0 }
0x2679   :  { %v10734_v45 = vmul.f32 0.35355338, %v10729_v15 }
0x267a   :  { %v19552_v30 = vpop.f32.mrf.mxu0 }
0x267b   :  { %v10738_v24 = vsel %vm155_vm0, %v10734_v45, -inf }
0x267c   :  { %10739 = vmax.xlane.f32.xlu0 %v10738_v24 }
0x2680   :  { %10748 = vadd.xlane.f32.xlu0 %v10747_v14 }
0x2696   :  { %10757 = vrot.lane.b32.xlu0 %v22307_v55, %s20409_s26 }
0x269a   :  { %10998 = vrot.lane.b32.xlu0 %v22307_v55, %s20410_s27 }
0x269e   :  { %10996 = vrot.lane.b32.xlu0 %v22307_v55, %s20411_s28 }
0x2705   :  { %v10740_v20 = vpop.xlane.xlu0 %10739 }
0x2706   :  { %v10742_v63 = vsub.f32 %v10734_v45, %v10740_v20 }
0x2708   :  { %v10745_v38 = vmul.f32 1.442695, %v10742_v63 }
0x2709   :  { %v10749_v57 = vpop.xlane.xlu0 %10748 }
0x270a   :  { %20156 = vpow2.f32 %v10745_v38 }
0x270b   :  { %20158 = vrcp.f32 %v10749_v57  ;;  %v10159_v57 = vrot.slane %v22301_v29, %v20825_v39 }
0x270d   :  { %v10758_v19 = vpop.permute.xlu0 %10757 }
0x270e   :  { %19554 = vmatpush3.msra.mxu1 %v10758_v19  ;;  %v10576_v19 = vadd.f32 %v22377_v26, %v10159_v57 }
0x2711   :  { %v10999_v49 = vpop.permute.xlu0 %10998 }
0x2715   :  { %v10997_v10 = vpop.permute.xlu0 %10996 }
0x2717   :  { %v20157_v33 = vpop.eup %20156 }
0x2718   :  { %v20159_v59 = vpop.eup %20158  ;;  %v10750_v41 = vsel %vm155_vm0, %v20157_v33, 0.0 }
0x2719   :  { %10751 = vadd.xlane.f32.xlu1 %v10750_v41  ;;  %v10754_v22 = vmul.f32 %v20159_v59, %v20155_v58  ;;  %v10575_v59 = vadd.f32 %v22379_v50, %v10159_v57 }
0x271b   :  { %19556 = vmatmul.mubr.msk.f32.vlgmr.msra.gmra.mxu1 %vm155_vm0, %v10754_v22 }
0x272a   :  { %10833 = vrot.lane.b32.xlu1 %v22305_v32, %s20409_s26 }
0x272e   :  { %10910 = vrot.lane.b32.xlu1 %v22250_v36, %s20406_s2 }
0x2732   :  { %11076 = vrot.lane.b32.xlu1 %v22305_v32, %s20410_s27 }
0x2736   :  { %11074 = vrot.lane.b32.xlu1 %v22305_v32, %s20411_s28 }
0x27a2   :  { %v10752_v1 = vpop.xlane.xlu1 %10751 }
0x27a3   :  { %20160 = vrcp.f32 %v10752_v1 }
0x27a6   :  { %v10834_v25 = vpop.permute.xlu1 %10833 }
0x27a7   :  { %19559 = vmatpush3.msra.mxu0 %v10834_v25 }
0x27a8   :  { %19568 = vmatprep.subr.mxu0 %v23937_v37 }
0x27aa   :  { %v10911_v7 = vpop.permute.xlu1 %10910 }
0x27ab   :  { %19563 = vmatprep.subr.mxu1 %v10911_v7 }
0x27ac   :  { %19564 = vmatpush3.msra.mxu1 %v10911_v7 }
0x27ad   :  { %19573 = vmatprep.subr.mxu1 %v23937_v37 }
0x27ae   :  { %v11077_v2 = vpop.permute.xlu1 %11076 }
0x27b0   :  { %v20161_v34 = vpop.eup %20160 }
0x27b1   :  { %v10756_v36 = vmul.f32 %v20161_v34, %v20157_v33 }
0x27b2   :  { %v11075_v46 = vpop.permute.xlu1 %11074 }
0x27b3   :  { %19561 = vmatmul.mubr.msk.f32.vlgmr.msra.gmra.mxu0 %vm155_vm0, %v10756_v36 }
0x27b4   :  { %19569 = vmatpush3.xpose.msk.msra.mxu0 %vm155_vm0, %v10999_v49  ;;  %19570 = vmatprep.mubr.msk.f32.mxu0 %vm20403_vm5, %v23937_v37 }
0x27b5   :  { %19578 = vmatprep.subr.mxu0 %v23937_v37 }
0x27b7   :  { %19571 = vmatmul.mubr.msk.f32.vlgmr.msra.gmra.mxu0 %vm155_vm0, %v10997_v10 }
0x27b8   :  { %19580 = vmatprep.mubr.msk.f32.mxu0 %vm20403_vm5, %v23937_v37 }
0x27db   :  { %v10829_v40 = vpop.f32.mrf.mxu1 }
0x27dc   :  { %19565 = vmatprep.mubr.msk.f32.mxu1 %vm155_vm0, %v10829_v40 }
0x27dd   :  { %v19557_v23 = vpop.f32.mrf.mxu1 }
0x2873   :  { %v10905_v5 = vpop.f32.mrf.mxu0 }
0x2874   :  { %19566 = vmatmul.mubr.msk.f32.vlgmr.msra.gmra.mxu1 %vm155_vm0, %v10905_v5 }
0x2875   :  { %19574 = vmatpush3.xpose.msk.msra.mxu1 %vm155_vm0, %v11077_v2  ;;  %v19562_v11 = vpop.f32.mrf.mxu0  ;;  %19575 = vmatprep.mubr.msk.f32.mxu1 %vm20403_vm5, %v23937_v37 }
0x2876   :  { %19583 = vmatprep.subr.mxu1 %v23937_v37 }
0x2877   :  { %v11070_v15 = vpop.f32.mrf.mxu0 }
0x2878   :  { %v11152_v45 = vmul.f32 0.35355338, %v11070_v15  ;;  %19576 = vmatmul.mubr.msk.f32.vlgmr.msra.gmra.mxu1 %vm155_vm0, %v11075_v46 }
0x2879   :  { %v19572_v30 = vpop.f32.mrf.mxu0  ;;  %19585 = vmatprep.mubr.msk.f32.mxu1 %vm20403_vm5, %v23937_v37 }
0x287a   :  { %v11154_v24 = vsel %vm155_vm0, %v11152_v45, -inf }
0x287b   :  { %11155 = vmax.xlane.f32.xlu0 %v11154_v24 }
0x2904   :  { %v11156_v58 = vpop.xlane.xlu0 %11155 }
0x2905   :  { %v11160_v14 = vsub.f32 %v11152_v45, %v11156_v58 }
0x2907   :  { %v11162_v20 = vmul.f32 1.442695, %v11160_v14 }
0x2909   :  { %20162 = vpow2.f32 %v11162_v20 }
0x2916   :  { %v20163_v63 = vpop.eup %20162 }
0x2917   :  { %v11166_v38 = vsel %vm155_vm0, %v20163_v63, 0.0 }
0x2918   :  { %11167 = vadd.xlane.f32.xlu0 %v11166_v38 }
0x2934   :  { %v19567_v33 = vpop.f32.mrf.mxu1 }
0x2935   :  { %v22424_v41 = vadd.f32 %v19567_v33, %v10576_v19 }
0x2936   :  { %v10985_v22 = vpop.f32.mrf.mxu1 }
0x2937   :  { %v22426_v1 = vadd.f32 %v10985_v22, %v10575_v59 }
0x2938   :  { %v11148_v25 = vpop.f32.mrf.mxu1 }
0x2939   :  { %v11153_v7 = vmul.f32 0.35355338, %v11148_v25 }
0x293a   :  { %v19577_v34 = vpop.f32.mrf.mxu1 }
0x293b   :  { %v11157_v49 = vsel %vm155_vm0, %v11153_v7, -inf }
0x293c   :  { %11158 = vmax.xlane.f32.xlu1 %v11157_v49 }
0x294d   :  { %11176 = vrot.lane.b32.xlu1 %v22307_v55, %s20412_s29 }
0x2951   :  { %11329 = vrot.lane.b32.xlu1 %v22241_v54, %s20406_s2 }
0x2955   :  { %11417 = vrot.lane.b32.xlu1 %v22307_v55, %s20413_s30 }
0x2959   :  { %11415 = vrot.lane.b32.xlu1 %v22307_v55, %s20414_s1 }
0x29a1   :  { %v11168_v29 = vpop.xlane.xlu0 %11167 }
0x29a2   :  { %20164 = vrcp.f32 %v11168_v29 }
0x29af   :  { %v20165_v50 = vpop.eup %20164 }
0x29b0   :  { %v11173_v23 = vmul.f32 %v20165_v50, %v20163_v63 }
0x29c5   :  { %v11159_v26 = vpop.xlane.xlu1 %11158 }
0x29c6   :  { %v11161_v36 = vsub.f32 %v11153_v7, %v11159_v26 }
0x29c8   :  { %v11164_v10 = vmul.f32 1.442695, %v11161_v36 }
0x29c9   :  { %v11177_v40 = vpop.permute.xlu1 %11176 }
0x29ca   :  { %20166 = vpow2.f32 %v11164_v10  ;;  %19579 = vmatpush3.msra.mxu0 %v11177_v40 }
0x29cb   :  { %19581 = vmatmul.mubr.msk.f32.vlgmr.msra.gmra.mxu0 %vm155_vm0, %v11173_v23 }
0x29cd   :  { %v11330_v2 = vpop.permute.xlu1 %11329 }
0x29ce   :  { %19588 = vmatprep.subr.mxu0 %v11330_v2 }
0x29cf   :  { %19589 = vmatpush3.msra.mxu0 %v11330_v2 }
0x29d0   :  { %19598 = vmatprep.subr.mxu0 %v23937_v37 }
0x29d1   :  { %v11418_v45 = vpop.permute.xlu1 %11417 }
0x29d5   :  { %v11416_v24 = vpop.permute.xlu1 %11415 }
0x29d7   :  { %v20167_v54 = vpop.eup %20166 }
0x29d8   :  { %v11169_v5 = vsel %vm155_vm0, %v20167_v54, 0.0 }
0x29d9   :  { %11170 = vadd.xlane.f32.xlu0 %v11169_v5  ;;  %v8779_v5 = vadd.f32 %v22336_v17, %v22331_v13 }
0x29ef   :  { %11252 = vrot.lane.b32.xlu0 %v22305_v32, %s20412_s29 }
0x29f3   :  { %11495 = vrot.lane.b32.xlu0 %v22305_v32, %s20413_s30 }
0x29f7   :  { %11493 = vrot.lane.b32.xlu0 %v22305_v32, %s20414_s1 }
0x2a62   :  { %v11171_v11 = vpop.xlane.xlu0 %11170 }
0x2a63   :  { %20168 = vrcp.f32 %v11171_v11  ;;  %v8789_v11 = vcombine.high %v8779_v5, %v8779_v5 }
0x2a66   :  { %v11253_v46 = vpop.permute.xlu0 %11252 }
0x2a67   :  { %19584 = vmatpush3.msra.mxu1 %v11253_v46  ;;  %v8796_v46 = vrot.slane %v8779_v5, %v20554_v60 }
0x2a68   :  { %19593 = vmatprep.subr.mxu1 %v23937_v37 }
0x2a6a   :  { %v11496_v20 = vpop.permute.xlu0 %11495 }
0x2a6e   :  { %v11494_v57 = vpop.permute.xlu0 %11493 }
0x2a70   :  { %v20169_v15 = vpop.eup %20168 }
0x2a71   :  { %v11175_v30 = vmul.f32 %v20169_v15, %v20167_v54  ;;  %v8804_v15 = vcombine.high %v8796_v46, %v8796_v46 }
0x2a73   :  { %19586 = vmatmul.mubr.msk.f32.vlgmr.msra.gmra.mxu1 %vm155_vm0, %v11175_v30 }
0x2a74   :  { %19594 = vmatpush3.xpose.msk.msra.mxu1 %vm155_vm0, %v11418_v45  ;;  %19595 = vmatprep.mubr.msk.f32.mxu1 %vm20403_vm5, %v23937_v37 }
0x2a75   :  { %19603 = vmatprep.subr.mxu1 %v23937_v37 }
0x2a77   :  { %19596 = vmatmul.mubr.msk.f32.vlgmr.msra.gmra.mxu1 %vm155_vm0, %v11416_v24  ;;  %v8826_v24 = vrot.slane %v8804_v15, %v20554_v60 }
0x2a78   :  { %19605 = vmatprep.mubr.msk.f32.mxu1 %vm20403_vm5, %v23937_v37 }
0x2a79   :  { %v8836_v17 = vcombine.high %v8826_v24, %v8826_v24 }
0x2a8b   :  { %v11248_v58 = vpop.f32.mrf.mxu0 }
0x2a8c   :  { %19590 = vmatprep.mubr.msk.f32.mxu0 %vm155_vm0, %v11248_v58  ;;  %v8812_v58 = vrot.slane %v8796_v46, %v20554_v60 }
0x2a8d   :  { %v19582_v14 = vpop.f32.mrf.mxu0 }
0x2b33   :  { %v11324_v63 = vpop.f32.mrf.mxu1 }
0x2b34   :  { %19591 = vmatmul.mubr.msk.f32.vlgmr.msra.gmra.mxu0 %vm155_vm0, %v11324_v63 }
0x2b35   :  { %19599 = vmatpush3.xpose.msk.msra.mxu0 %vm155_vm0, %v11496_v20  ;;  %v19587_v38 = vpop.f32.mrf.mxu1  ;;  %19600 = vmatprep.mubr.msk.f32.mxu0 %vm20403_vm5, %v23937_v37  ;;  %v8834_v20 = vcombine.high %v8812_v58, %v8812_v58 }
0x2b36   :  { %19608 = vmatprep.subr.mxu0 %v23937_v37  ;;  %v22487_v38 = vadd.f32 %v8836_v17, %v22165_v16  ;;  %v22507_v16 = vadd.f32 %v8812_v58, %v22158_v27 }
0x2b37   :  { %v11489_v19 = vpop.f32.mrf.mxu1 }
0x2b38   :  { %v11571_v33 = vmul.f32 0.35355338, %v11489_v19  ;;  %19601 = vmatmul.mubr.msk.f32.vlgmr.msra.gmra.mxu0 %vm155_vm0, %v11494_v57 }
0x2b39   :  { %v19597_v59 = vpop.f32.mrf.mxu1  ;;  %19610 = vmatprep.mubr.msk.f32.mxu0 %vm20403_vm5, %v23937_v37 }
0x2b3a   :  { %v11573_v22 = vsel %vm155_vm0, %v11571_v33, -inf }
0x2b3b   :  { %11574 = vmax.xlane.f32.xlu1 %v11573_v22 }
0x2bc4   :  { %v11575_v25 = vpop.xlane.xlu1 %11574 }
0x2bc5   :  { %v11579_v7 = vsub.f32 %v11571_v33, %v11575_v25  ;;  %v22499_v33 = vadd.f32 %v8834_v20, %v22163_v18 }
0x2bc7   :  { %v11581_v34 = vmul.f32 1.442695, %v11579_v7 }
0x2bc9   :  { %20170 = vpow2.f32 %v11581_v34 }
0x2bd6   :  { %v20171_v2 = vpop.eup %20170 }
0x2bd7   :  { %v11585_v54 = vsel %vm155_vm0, %v20171_v2, 0.0 }
0x2bf4   :  { %v19592_v49 = vpop.f32.mrf.mxu0 }
0x2bf5   :  { %v22466_v29 = vadd.f32 %v19592_v49, %v22424_v41  ;;  %v8803_v41 = vrot.slane %v8789_v11, %v20554_v60 }
0x2bf6   :  { %v11404_v26 = vpop.f32.mrf.mxu0 }
0x2bf7   :  { %v22469_v50 = vadd.f32 %v11404_v26, %v22426_v1  ;;  %v8805_v1 = vcombine.high %v8803_v41, %v8803_v41  ;;  %v8819_v30 = vrot.slane %v8803_v41, %v20554_v60 }
0x2bf8   :  { %v11567_v36 = vpop.f32.mrf.mxu0 }
0x2bf9   :  { %v11572_v10 = vmul.f32 0.35355338, %v11567_v36  ;;  %v8833_v45 = vrot.slane %v8805_v1, %v20554_v60  ;;  %v8835_v13 = vcombine.high %v8819_v30, %v8819_v30  ;;  %v22502_v59 = vadd.f32 %v8819_v30, %v22168_v21 }
0x2bfa   :  { %v19602_v40 = vpop.f32.mrf.mxu0  ;;  %v8838_v30 = vcombine.high %v22334_v9, %v22334_v9 }
0x2bfb   :  { %v11576_v23 = vsel %vm155_vm0, %v11572_v10, -inf  ;;  %v8837_v14 = vcombine.high %v8833_v45, %v8833_v45  ;;  %v22490_v57 = vadd.f32 %v8833_v45, %v22171_v43  ;;  %v22493_v19 = vadd.f32 %v8835_v13, %v22173_v42 }
0x2bfc   :  { %11577 = vmax.xlane.f32.xlu0 %v11576_v23  ;;  %v8928_v43 = vcombine.low %v22499_v33, %v22487_v38  ;;  %v8845_v45 = vrot.slane %v22334_v9, %v20554_v60 }
0x2bfd   :  { %v22484_v63 = vadd.f32 %v8837_v14, %v22175_v4  ;;  %v8929_v42 = vcombine.low %v22502_v59, %v22490_v57 }
0x2bfe   :  { %v8944_v21 = vrot.slane %v8928_v43, %v20554_v60  ;;  %v8861_v58 = vrot.slane %v8845_v45, %v20554_v60 }
0x2bff   :  { %v8930_v4 = vcombine.low %v22493_v19, %v22484_v63  ;;  %v8951_v22 = vrot.slane %v8929_v42, %v20554_v60 }
0x2c00   :  { %11586 = vadd.xlane.f32.xlu0 %v11585_v54  ;;  %v8883_v13 = vcombine.high %v8861_v58, %v8861_v58  ;;  %v22549_v43 = vadd.f32 %v8861_v58, %v22209_v44 }
0x2c01   :  { %v8958_v18 = vrot.slane %v8930_v4, %v20554_v60 }
0x2c02   :  { %v22545_v9 = vadd.f32 %v8883_v13, %v22181_v8 }
0x2c03   :  { %v8960_v7 = vcombine.low %v8951_v22, %v8958_v18 }
0x2c05   :  { %v8974_v34 = vrot.slane %v8960_v7, %v20554_v60 }
0x2c16   :  { %11595 = vrot.lane.b32.xlu0 %v22307_v55, %s20415_s11  ;;  %v22496_v55 = vadd.f32 %v8826_v24, %v22161_v48 }
0x2c18   :  { %v8927_v48 = vcombine.low %v22507_v16, %v22496_v55 }
0x2c1a   :  { %v8937_v25 = vrot.slane %v8927_v48, %v20554_v60 }
0x2c1c   :  { %v8959_v27 = vcombine.low %v8937_v25, %v8944_v21 }
0x2c1e   :  { %v8967_v49 = vrot.slane %v8959_v27, %v20554_v60 }
0x2c20   :  { %v8975_v26 = vcombine.low %v8967_v49, %v8974_v34 }
0x2c22   :  { %v9018_v36 = vsel %vm617_vm3, %v8975_v26, 0.0 }
0x2c35   :  { %9019 = vadd.xlane.f32.xlu0 %v9018_v36 }
0x2c85   :  { %v11578_v40 = vpop.xlane.xlu0 %11577 }
0x2c86   :  { %v11580_v23 = vsub.f32 %v11572_v10, %v11578_v40  ;;  %v8853_v10 = vcombine.high %v8845_v45, %v8845_v45 }
0x2c88   :  { %v11583_v54 = vmul.f32 1.442695, %v11580_v23  ;;  %v8875_v24 = vrot.slane %v8853_v10, %v20554_v60 }
0x2c89   :  { %v11587_v5 = vpop.xlane.xlu0 %11586 }
0x2c8a   :  { %20172 = vpow2.f32 %v11583_v54  ;;  %v8884_v14 = vcombine.high %v8875_v24, %v8875_v24 }
0x2c8b   :  { %20174 = vrcp.f32 %v11587_v5 }
0x2c8c   :  { %v22539_v20 = vadd.f32 %v8884_v14, %v22183_v0 }
0x2c8d   :  { %v11596_v11 = vpop.permute.xlu0 %11595 }
0x2c8e   :  { %19604 = vmatpush3.msra.mxu1 %v11596_v11 }
0x2c97   :  { %v22522_v41 = vpop.eup %20172 }
0x2c98   :  { %v20175_v46 = vpop.eup %20174  ;;  %v11588_v1 = vsel %vm155_vm0, %v22522_v41, 0.0 }
0x2c99   :  { %11589 = vadd.xlane.f32.xlu1 %v11588_v1  ;;  %v11592_v15 = vmul.f32 %v20175_v46, %v20171_v2  ;;  %v8852_v2 = vrot.slane %v8838_v30, %v20554_v60 }
0x2c9b   :  { %19606 = vmatmul.mubr.msk.f32.vlgmr.msra.gmra.mxu1 %vm155_vm0, %v11592_v15  ;;  %v8854_v17 = vcombine.high %v8852_v2, %v8852_v2  ;;  %v8868_v42 = vrot.slane %v8852_v2, %v20554_v60 }
0x2c9d   :  { %v8882_v4 = vrot.slane %v8854_v17, %v20554_v60  ;;  %v22561_v8 = vadd.f32 %v8868_v42, %v22216_v3 }
0x2c9f   :  { %v22557_v48 = vadd.f32 %v8882_v4, %v22219_v51 }
0x2ca1   :  { %v8978_v22 = vcombine.low %v22561_v8, %v22557_v48 }
0x2ca3   :  { %v8999_v45 = vrot.slane %v8978_v22, %v20554_v60 }
0x2caa   :  { %11671 = vrot.lane.b32.xlu1 %v22305_v32, %s20415_s11  ;;  %v22542_v32 = vadd.f32 %v8875_v24, %v22213_v53 }
0x2cac   :  { %v8976_v0 = vcombine.low %v22549_v43, %v22542_v32 }
0x2cae   :  { %11748 = vrot.lane.b32.xlu1 %v22080_v12, %s20406_s2  ;;  %v8977_v12 = vcombine.low %v22545_v9, %v22539_v20  ;;  %v8985_v44 = vrot.slane %v8976_v0, %v20554_v60 }
0x2cb0   :  { %v8992_v53 = vrot.slane %v8977_v12, %v20554_v60  ;;  %v9014_v12 = vrot.slane %v8999_v45, %v20554_v60 }
0x2cb2   :  { %v9000_v25 = vcombine.low %v8985_v44, %v8992_v53 }
0x2cb4   :  { %v9007_v2 = vrot.slane %v9000_v25, %v20554_v60 }
0x2cb6   :  { %v9015_v53 = vcombine.low %v9007_v2, %v9014_v12 }
0x2cb8   :  { %v9021_v22 = vsel %vm296_vm2, %v9015_v53, 0.0 }
0x2cbe   :  { %v9020_v18 = vpop.xlane.xlu0 %9019 }
0x2cbf   :  { %v9024_v21 = vmul.f32 0.03125, %v9020_v18 }
0x2cc1   :  { %v9031_v7 = vrot.slane %v9024_v21, %v20533_v31  ;;  %v9035_v27 = vrot.slane %v9024_v21, %v20825_v39  ;;  %v9039_v51 = vrot.slane %v9024_v21, %v21024_v56  ;;  %v9043_v34 = vrot.slane %v9024_v21, %v21027_v47 }
0x2cc2   :  { %v9047_v49 = vrot.slane %v9024_v21, %v21030_v52  ;;  %v9051_v3 = vrot.slane %v9024_v21, %v21033_v28  ;;  %v9055_v26 = vrot.slane %v9024_v21, %v21040_v61  ;;  %v9059_v36 = vrot.slane %v9024_v21, %v21043_v62 }
0x2cc3   :  { %v22575_v40 = vsub.f32 %v22507_v16, %v9031_v7  ;;  %v22578_v23 = vsub.f32 %v22496_v55, %v9035_v27  ;;  %v22581_v54 = vsub.f32 %v22499_v33, %v9039_v51  ;;  %v22584_v5 = vsub.f32 %v22487_v38, %v9043_v34 }
0x2cc4   :  { %v22587_v11 = vsub.f32 %v22502_v59, %v9047_v49  ;;  %v22590_v46 = vsub.f32 %v22490_v57, %v9051_v3  ;;  %v22593_v1 = vsub.f32 %v22493_v19, %v9055_v26  ;;  %v22596_v16 = vsub.f32 %v22484_v63, %v9059_v36  ;;  %v20323_v3 = vld [vmem:[#allocation6 + $0x8] sm:$0xff] }
0x2cc5   :  { %v9112_v55 = vmul.f32 %v22575_v40, %v22575_v40  ;;  %v9113_v33 = vmul.f32 %v22578_v23, %v22578_v23  ;;  %v9114_v38 = vmul.f32 %v22581_v54, %v22581_v54  ;;  %v9115_v59 = vmul.f32 %v22584_v5, %v22584_v5 }
0x2cc6   :  { %v9116_v57 = vmul.f32 %v22587_v11, %v22587_v11  ;;  %v9117_v19 = vmul.f32 %v22590_v46, %v22590_v46  ;;  %v9118_v63 = vmul.f32 %v22593_v1, %v22593_v1  ;;  %v9119_v15 = vmul.f32 %v22596_v16, %v22596_v16 }
0x2cc7   :  { %v9140_v10 = vcombine.low %v9112_v55, %v9113_v33  ;;  %v9141_v30 = vcombine.low %v9114_v38, %v9115_v59  ;;  %v9332_v26 = vrot.slane %v20323_v3, %v21040_v61  ;;  %v9408_v55 = vrot.slane %v20323_v3, %v21043_v62 }
0x2cc8   :  { %v9142_v24 = vcombine.low %v9116_v57, %v9117_v19  ;;  %v9143_v58 = vcombine.low %v9118_v63, %v9119_v15 }
0x2cc9   :  { %v9150_v14 = vrot.slane %v9140_v10, %v20554_v60  ;;  %v9157_v13 = vrot.slane %v9141_v30, %v20554_v60  ;;  %v9334_v36 = vcombine.high %v9332_v26, %v9332_v26  ;;  %v9341_v15 = vrot.slane %v9332_v26, %v20554_v60 }
0x2cca   :  { %v9164_v17 = vrot.slane %v9142_v24, %v20554_v60  ;;  %v9171_v4 = vrot.slane %v9143_v58, %v20554_v60  ;;  %v9410_v45 = vcombine.high %v9408_v55, %v9408_v55 }
0x2ccb   :  { %v9172_v42 = vcombine.low %v9150_v14, %v9157_v13 }
0x2ccc   :  { %v9173_v0 = vcombine.low %v9164_v17, %v9171_v4  ;;  %v9417_v17 = vrot.slane %v9408_v55, %v20554_v60  ;;  %v22674_v55 = vrot.slane %v9341_v15, %v20554_v60 }
0x2ccd   :  { %v9180_v18 = vrot.slane %v9172_v42, %v20554_v60 }
0x2cce   :  { %v9187_v44 = vrot.slane %v9173_v0, %v20554_v60 }
0x2cd0   :  { %v9188_v21 = vcombine.low %v9180_v18, %v9187_v44  ;;  %v9424_v44 = vrot.slane %v9410_v45, %v20554_v60 }
0x2cd2   :  { %9022 = vadd.xlane.f32.xlu1 %v9021_v22  ;;  %v9231_v25 = vsel %vm617_vm3, %v9188_v21, 0.0  ;;  %v9426_v3 = vcombine.high %v9424_v44, %v9424_v44 }
0x2cd3   :  { %9232 = vadd.xlane.f32.xlu0 %v9231_v25 }
0x2d22   :  { %v11590_v7 = vpop.xlane.xlu1 %11589 }
0x2d23   :  { %20176 = vrcp.f32 %v11590_v7  ;;  %v9349_v7 = vcombine.high %v9341_v15, %v9341_v15 }
0x2d26   :  { %v11672_v27 = vpop.permute.xlu1 %11671 }
0x2d27   :  { %19609 = vmatpush3.msra.mxu0 %v11672_v27 }
0x2d2a   :  { %v11749_v51 = vpop.permute.xlu1 %11748 }
0x2d2b   :  { %19613 = vmatprep.subr.mxu1 %v11749_v51 }
0x2d2c   :  { %19614 = vmatpush3.msra.mxu1 %v11749_v51 }
0x2d30   :  { %v20177_v34 = vpop.eup %20176 }
0x2d31   :  { %v11594_v49 = vmul.f32 %v20177_v34, %v22522_v41  ;;  %v9348_v41 = vrot.slane %v9334_v36, %v20554_v60 }
0x2d33   :  { %19611 = vmatmul.mubr.msk.f32.vlgmr.msra.gmra.mxu0 %vm155_vm0, %v11594_v49  ;;  %v9350_v27 = vcombine.high %v9348_v41, %v9348_v41  ;;  %v9425_v49 = vcombine.high %v9417_v17, %v9417_v17 }
0x2d35   :  { %v22694_v45 = vrot.slane %v9425_v49, %v20554_v60 }
0x2d5b   :  { %v11667_v33 = vpop.f32.mrf.mxu1  ;;  %v9023_v38 = vpop.xlane.xlu1 %9022 }
0x2d5c   :  { %v9025_v59 = vmul.f32 0.03125, %v9023_v38  ;;  %19615 = vmatprep.mubr.msk.f32.mxu1 %vm155_vm0, %v11667_v33  ;;  %v9233_v57 = vpop.xlane.xlu0 %9232  ;;  %v22677_v33 = vrot.slane %v9348_v41, %v20554_v60  ;;  %v22680_v38 = vrot.slane %v9349_v7, %v20554_v60  ;;  %v22697_v41 = vrot.slane %v9426_v3, %v20554_v60 }
0x2d5d   :  { %v9237_v19 = vmul.f32 0.03125, %v9233_v57  ;;  %v19607_v63 = vpop.f32.mrf.mxu1  ;;  %v22686_v57 = vrot.slane %v9417_v17, %v20554_v60 }
0x2d5e   :  { %v9063_v10 = vrot.slane %v9025_v59, %v20533_v31  ;;  %v9067_v30 = vrot.slane %v9025_v59, %v20825_v39  ;;  %v9071_v24 = vrot.slane %v9025_v59, %v21024_v56  ;;  %v9075_v58 = vrot.slane %v9025_v59, %v21027_v47 }
0x2d5f   :  { %v9239_v2 = vadd.f32 1e-05, %v9237_v19  ;;  %v9079_v14 = vrot.slane %v9025_v59, %v21030_v52  ;;  %v9083_v13 = vrot.slane %v9025_v59, %v21033_v28  ;;  %v22683_v59 = vrot.slane %v9350_v27, %v20554_v60 }
0x2d60   :  { %v22640_v4 = vsub.f32 %v22549_v43, %v9063_v10  ;;  %v22643_v12 = vsub.f32 %v22542_v32, %v9067_v30  ;;  %v22646_v42 = vsub.f32 %v22545_v9, %v9071_v24  ;;  %v22649_v0 = vsub.f32 %v22539_v20, %v9075_v58 }
0x2d61   :  { %20178 = vrsqrt.f32 %v9239_v2  ;;  %v22652_v53 = vsub.f32 %v22561_v8, %v9079_v14  ;;  %v22655_v18 = vsub.f32 %v22557_v48, %v9083_v13  ;;  %v22689_v19 = vrot.slane %v9424_v44, %v20554_v60 }
0x2d62   :  { %v9120_v43 = vmul.f32 %v22640_v4, %v22640_v4  ;;  %v9121_v32 = vmul.f32 %v22643_v12, %v22643_v12  ;;  %v9122_v9 = vmul.f32 %v22646_v42, %v22646_v42  ;;  %v9123_v20 = vmul.f32 %v22649_v0, %v22649_v0 }
0x2d63   :  { %v9124_v8 = vmul.f32 %v22652_v53, %v22652_v53  ;;  %v9125_v48 = vmul.f32 %v22655_v18, %v22655_v18  ;;  %v22701_v30 = vcombine.high %v22674_v55, %v22674_v55  ;;  %v9380_v24 = vcombine.high %v22677_v33, %v22677_v33 }
0x2d64   :  { %v9189_v21 = vcombine.low %v9120_v43, %v9121_v32  ;;  %v9190_v22 = vcombine.low %v9122_v9, %v9123_v20  ;;  %v22707_v58 = vcombine.high %v22680_v38, %v22680_v38  ;;  %v9382_v2 = vcombine.high %v22683_v59, %v22683_v59 }
0x2d65   :  { %v9191_v25 = vcombine.low %v9124_v8, %v9125_v48  ;;  %v22713_v14 = vcombine.high %v22686_v57, %v22686_v57  ;;  %v9456_v44 = vcombine.high %v22689_v19, %v22689_v19  ;;  %v22720_v43 = vcombine.high %v22694_v45, %v22694_v45 }
0x2d66   :  { %v9198_v51 = vrot.slane %v9189_v21, %v20554_v60  ;;  %v9205_v34 = vrot.slane %v9190_v22, %v20554_v60  ;;  %v9458_v32 = vcombine.high %v22697_v41, %v22697_v41 }
0x2d67   :  { %v9212_v26 = vrot.slane %v9191_v25, %v20554_v60 }
0x2d68   :  { %v9213_v36 = vcombine.low %v9198_v51, %v9205_v34 }
0x2d69   :  { %v9227_v15 = vrot.slane %v9212_v26, %v20554_v60 }
0x2d6a   :  { %v9220_v63 = vrot.slane %v9213_v36, %v20554_v60 }
0x2d6c   :  { %v9228_v10 = vcombine.low %v9220_v63, %v9227_v15 }
0x2d6e   :  { %v20179_v13 = vpop.eup %20178  ;;  %v9234_v17 = vsel %vm296_vm2, %v9228_v10, 0.0 }
0x2d6f   :  { %9235 = vadd.xlane.f32.xlu0 %v9234_v17  ;;  %v9248_v9 = vrot.slane %v20179_v13, %v20533_v31  ;;  %v9252_v20 = vrot.slane %v20179_v13, %v20825_v39  ;;  %v9256_v8 = vrot.slane %v20179_v13, %v21024_v56  ;;  %v9260_v48 = vrot.slane %v20179_v13, %v21027_v47 }
0x2d70   :  { %v9264_v21 = vrot.slane %v20179_v13, %v21030_v52  ;;  %v9268_v22 = vrot.slane %v20179_v13, %v21033_v28  ;;  %v9272_v25 = vrot.slane %v20179_v13, %v21040_v61  ;;  %v9276_v7 = vrot.slane %v20179_v13, %v21043_v62 }
0x2d71   :  { %v9315_v27 = vmul.f32 %v9248_v9, %v22575_v40  ;;  %v9316_v51 = vmul.f32 %v9252_v20, %v22578_v23  ;;  %v9317_v34 = vmul.f32 %v9256_v8, %v22581_v54  ;;  %v9318_v49 = vmul.f32 %v9260_v48, %v22584_v5 }
0x2d72   :  { %v9319_v3 = vmul.f32 %v9264_v21, %v22587_v11  ;;  %v9320_v26 = vmul.f32 %v9268_v22, %v22590_v46  ;;  %v9321_v36 = vmul.f32 %v9272_v25, %v22593_v1  ;;  %v9322_v63 = vmul.f32 %v9276_v7, %v22596_v16 }
0x2d73   :  { %v9391_v15 = vmul.f32 %v22674_v55, %v9315_v27  ;;  %v9392_v10 = vmul.f32 %v22680_v38, %v9316_v51  ;;  %v9393_v40 = vmul.f32 %v22701_v30, %v9317_v34  ;;  %v9394_v23 = vmul.f32 %v22707_v58, %v9318_v49 }
0x2d74   :  { %v9395_v54 = vmul.f32 %v22677_v33, %v9319_v3  ;;  %v9396_v5 = vmul.f32 %v22683_v59, %v9320_v26  ;;  %v9397_v13 = vmul.f32 %v9380_v24, %v9321_v36  ;;  %v9398_v11 = vmul.f32 %v9382_v2, %v9322_v63 }
0x2d75   :  { %v9467_v46 = vadd.f32 %v22686_v57, %v9391_v15  ;;  %v9468_v1 = vadd.f32 %v22694_v45, %v9392_v10  ;;  %v9469_v16 = vadd.f32 %v22713_v14, %v9393_v40  ;;  %v9470_v17 = vadd.f32 %v22720_v43, %v9394_v23 }
0x2d76   :  { %v9471_v9 = vadd.f32 %v22689_v19, %v9395_v54  ;;  %v9472_v20 = vadd.f32 %v22697_v41, %v9396_v5  ;;  %v9473_v8 = vadd.f32 %v9456_v44, %v9397_v13  ;;  %v9474_v48 = vadd.f32 %v9458_v32, %v9398_v11 }
0x2d77   :  { %v9495_v21 = vcombine.low %v9467_v46, %v9468_v1  ;;  %v9496_v22 = vcombine.low %v9469_v16, %v9470_v17 }
0x2d78   :  { %v9497_v25 = vcombine.low %v9471_v9, %v9472_v20  ;;  %v9498_v7 = vcombine.low %v9473_v8, %v9474_v48 }
0x2d79   :  { %v9505_v24 = vrot.slane %v9495_v21, %v20554_v60  ;;  %v9512_v2 = vrot.slane %v9496_v22, %v20554_v60 }
0x2d7a   :  { %v9519_v27 = vrot.slane %v9497_v25, %v20554_v60  ;;  %v9526_v51 = vrot.slane %v9498_v7, %v20554_v60 }
0x2d7b   :  { %v9527_v34 = vcombine.low %v9505_v24, %v9512_v2 }
0x2d7c   :  { %v9528_v49 = vcombine.low %v9519_v27, %v9526_v51 }
0x2d7d   :  { %v9535_v3 = vrot.slane %v9527_v34, %v20554_v60 }
0x2d7e   :  { %v9542_v26 = vrot.slane %v9528_v49, %v20554_v60 }
0x2d80   :  { %v9543_v44 = vcombine.low %v9535_v3, %v9542_v26 }
0x2d82   :  { %v9586_v32 = vsel %vm617_vm3, %v9543_v44, 0.0 }
0x2d83   :  { %9587 = vadd.xlane.f32.xlu1 %v9586_v32 }
0x2df3   :  { %v11743_v36 = vpop.f32.mrf.mxu0 }
0x2df4   :  { %19616 = vmatmul.mubr.msk.f32.vlgmr.msra.gmra.mxu1 %vm155_vm0, %v11743_v36 }
0x2df5   :  { %v19612_v63 = vpop.f32.mrf.mxu0 }
0x2df8   :  { %v9236_v15 = vpop.xlane.xlu0 %9235 }
0x2df9   :  { %v9238_v10 = vmul.f32 0.03125, %v9236_v15 }
0x2dfb   :  { %v9240_v40 = vadd.f32 1e-05, %v9238_v10 }
0x2dfd   :  { %20180 = vrsqrt.f32 %v9240_v40 }
0x2e0a   :  { %v20181_v23 = vpop.eup %20180 }
0x2e0b   :  { %v9280_v54 = vrot.slane %v20181_v23, %v20533_v31  ;;  %v9284_v5 = vrot.slane %v20181_v23, %v20825_v39  ;;  %v9288_v13 = vrot.slane %v20181_v23, %v21024_v56  ;;  %v9292_v11 = vrot.slane %v20181_v23, %v21027_v47 }
0x2e0c   :  { %v9588_v21 = vpop.xlane.xlu1 %9587  ;;  %v9296_v22 = vrot.slane %v20181_v23, %v21030_v52  ;;  %v9300_v25 = vrot.slane %v20181_v23, %v21033_v28 }
0x2e0d   :  { %v9592_v7 = vmul.f32 0.03125, %v9588_v21  ;;  %v9323_v24 = vmul.f32 %v9280_v54, %v22640_v4  ;;  %v9324_v2 = vmul.f32 %v9284_v5, %v22643_v12  ;;  %v9325_v27 = vmul.f32 %v9288_v13, %v22646_v42 }
0x2e0e   :  { %v9326_v51 = vmul.f32 %v9292_v11, %v22649_v0  ;;  %v9327_v34 = vmul.f32 %v9296_v22, %v22652_v53  ;;  %v9328_v49 = vmul.f32 %v9300_v25, %v22655_v18 }
0x2e0f   :  { %v9599_v3 = vrot.slane %v9592_v7, %v20533_v31  ;;  %v9603_v26 = vrot.slane %v9592_v7, %v20825_v39  ;;  %v9607_v44 = vrot.slane %v9592_v7, %v21024_v56  ;;  %v9611_v32 = vrot.slane %v9592_v7, %v21027_v47 }
0x2e10   :  { %v9615_v4 = vrot.slane %v9592_v7, %v21030_v52  ;;  %v9619_v12 = vrot.slane %v9592_v7, %v21033_v28  ;;  %v9623_v42 = vrot.slane %v9592_v7, %v21040_v61  ;;  %v9627_v0 = vrot.slane %v9592_v7, %v21043_v62 }
0x2e11   :  { %v22780_v36 = vsub.f32 %v9467_v46, %v9599_v3  ;;  %v22782_v53 = vsub.f32 %v9468_v1, %v9603_v26  ;;  %v22784_v18 = vsub.f32 %v9469_v16, %v9607_v44  ;;  %v22786_v63 = vsub.f32 %v9470_v17, %v9611_v32 }
0x2e12   :  { %v22788_v15 = vsub.f32 %v9471_v9, %v9615_v4  ;;  %v22790_v10 = vsub.f32 %v9472_v20, %v9619_v12  ;;  %v22792_v40 = vsub.f32 %v9473_v8, %v9623_v42  ;;  %v22794_v23 = vsub.f32 %v9474_v48, %v9627_v0 }
0x2e13   :  { %v9680_v54 = vmul.f32 %v22780_v36, %v22780_v36  ;;  %v9681_v46 = vmul.f32 %v22782_v53, %v22782_v53  ;;  %v9682_v1 = vmul.f32 %v22784_v18, %v22784_v18  ;;  %v9683_v16 = vmul.f32 %v22786_v63, %v22786_v63 }
0x2e14   :  { %v9684_v17 = vmul.f32 %v22788_v15, %v22788_v15  ;;  %v9685_v9 = vmul.f32 %v22790_v10, %v22790_v10  ;;  %v9686_v20 = vmul.f32 %v22792_v40, %v22792_v40  ;;  %v9687_v8 = vmul.f32 %v22794_v23, %v22794_v23 }
0x2e15   :  { %v9708_v48 = vcombine.low %v9680_v54, %v9681_v46  ;;  %v9709_v5 = vcombine.low %v9682_v1, %v9683_v16  ;;  %v9399_v13 = vmul.f32 %v22674_v55, %v9323_v24  ;;  %v9400_v11 = vmul.f32 %v22680_v38, %v9324_v2  ;;  %v22840_v16 = vld [vmem:[%s23926_s7 + $0x50] sm:$0xff] }
0x2e16   :  { %v9710_v21 = vcombine.low %v9684_v17, %v9685_v9  ;;  %v9711_v22 = vcombine.low %v9686_v20, %v9687_v8  ;;  %v9401_v25 = vmul.f32 %v22701_v30, %v9325_v27  ;;  %v9402_v7 = vmul.f32 %v22707_v58, %v9326_v51  ;;  %19618 = vmatprep.subr.mxu0 %v22840_v16  ;;  %v20324_v17 = vld [vmem:[%s23922_s3 + $0x10] sm:$0xff] }
0x2e17   :  { %v9718_v3 = vrot.slane %v9708_v48, %v20554_v60  ;;  %v9725_v26 = vrot.slane %v9709_v5, %v20554_v60  ;;  %v9403_v44 = vmul.f32 %v22677_v33, %v9327_v34  ;;  %v9404_v32 = vmul.f32 %v22683_v59, %v9328_v49  ;;  %19619 = vmatpush3.msra.mxu0 %v22840_v16 }
0x2e18   :  { %v9732_v4 = vrot.slane %v9710_v21, %v20554_v60  ;;  %v9739_v55 = vrot.slane %v9711_v22, %v20554_v60  ;;  %v9475_v38 = vadd.f32 %v22686_v57, %v9399_v13  ;;  %v9476_v24 = vadd.f32 %v22694_v45, %v9400_v11 }
0x2e19   :  { %v9740_v2 = vcombine.low %v9718_v3, %v9725_v26  ;;  %v9477_v30 = vadd.f32 %v22713_v14, %v9401_v25  ;;  %v9478_v58 = vadd.f32 %v22720_v43, %v9402_v7  ;;  %v9479_v27 = vadd.f32 %v22689_v19, %v9403_v44 }
0x2e1a   :  { %v9741_v51 = vcombine.low %v9732_v4, %v9739_v55  ;;  %v9480_v33 = vadd.f32 %v22697_v41, %v9404_v32  ;;  %v9544_v34 = vcombine.low %v9475_v38, %v9476_v24  ;;  %v9900_v9 = vrot.slane %v20324_v17, %v21024_v56 }
0x2e1b   :  { %v9748_v59 = vrot.slane %v9740_v2, %v20554_v60  ;;  %v9545_v49 = vcombine.low %v9477_v30, %v9478_v58  ;;  %v9976_v8 = vrot.slane %v20324_v17, %v21027_v47 }
0x2e1c   :  { %v9755_v12 = vrot.slane %v9741_v51, %v20554_v60  ;;  %v9546_v42 = vcombine.low %v9479_v27, %v9480_v33  ;;  %v9553_v57 = vrot.slane %v9544_v34, %v20554_v60  ;;  %v9902_v20 = vcombine.high %v9900_v9, %v9900_v9 }
0x2e1d   :  { %v9560_v45 = vrot.slane %v9545_v49, %v20554_v60  ;;  %v9909_v48 = vrot.slane %v9900_v9, %v20554_v60  ;;  %v9978_v21 = vcombine.high %v9976_v8, %v9976_v8  ;;  %v9985_v3 = vrot.slane %v9976_v8, %v20554_v60 }
0x2e1e   :  { %v9756_v0 = vcombine.low %v9748_v59, %v9755_v12  ;;  %v9567_v14 = vrot.slane %v9546_v42, %v20554_v60  ;;  %v9916_v5 = vrot.slane %v9902_v20, %v20554_v60 }
0x2e1f   :  { %v9568_v43 = vcombine.low %v9553_v57, %v9560_v45  ;;  %v9917_v25 = vcombine.high %v9909_v48, %v9909_v48  ;;  %v9992_v44 = vrot.slane %v9978_v21, %v20554_v60  ;;  %v22854_v4 = vrot.slane %v9909_v48, %v20554_v60 }
0x2e20   :  { %v9799_v19 = vsel %vm617_vm3, %v9756_v0, 0.0  ;;  %v9582_v54 = vrot.slane %v9567_v14, %v20554_v60  ;;  %v9918_v7 = vcombine.high %v9916_v5, %v9916_v5  ;;  %v22857_v55 = vrot.slane %v9916_v5, %v20554_v60 }
0x2e21   :  { %9800 = vadd.xlane.f32.xlu1 %v9799_v19  ;;  %v9575_v41 = vrot.slane %v9568_v43, %v20554_v60  ;;  %v22860_v2 = vrot.slane %v9917_v25, %v20554_v60  ;;  %v9993_v34 = vcombine.high %v9985_v3, %v9985_v3  ;;  %v9994_v0 = vcombine.high %v9992_v44, %v9992_v44 }
0x2e22   :  { %v22863_v51 = vrot.slane %v9918_v7, %v20554_v60  ;;  %v22872_v14 = vrot.slane %v9985_v3, %v20554_v60  ;;  %v22888_v20 = vrot.slane %v9992_v44, %v20554_v60  ;;  %v22919_v25 = vcombine.high %v22854_v4, %v22854_v4 }
0x2e23   :  { %v9583_v46 = vcombine.low %v9575_v41, %v9582_v54  ;;  %v22910_v21 = vrot.slane %v9994_v0, %v20554_v60 }
0x2e25   :  { %v9589_v1 = vsel %vm296_vm2, %v9583_v46, 0.0 }
0x2e26   :  { %9590 = vadd.xlane.f32.xlu0 %v9589_v1 }
0x2eaa   :  { %v9801_v13 = vpop.xlane.xlu1 %9800 }
0x2eab   :  { %v9805_v11 = vmul.f32 0.03125, %v9801_v13 }
0x2ead   :  { %v9807_v22 = vadd.f32 1e-05, %v9805_v11  ;;  %v22907_v11 = vrot.slane %v9993_v34, %v20554_v60  ;;  %v9950_v34 = vcombine.high %v22863_v51, %v22863_v51 }
0x2eaf   :  { %20182 = vrsqrt.f32 %v9807_v22  ;;  %v9591_v26 = vpop.xlane.xlu0 %9590 }
0x2eb0   :  { %v9593_v32 = vmul.f32 0.03125, %v9591_v26  ;;  %v9948_v26 = vcombine.high %v22857_v55, %v22857_v55 }
0x2eb2   :  { %v9631_v59 = vrot.slane %v9593_v32, %v20533_v31  ;;  %v9635_v49 = vrot.slane %v9593_v32, %v20825_v39  ;;  %v9639_v12 = vrot.slane %v9593_v32, %v21024_v56  ;;  %v9643_v42 = vrot.slane %v9593_v32, %v21027_v47 }
0x2eb3   :  { %v9647_v57 = vrot.slane %v9593_v32, %v21030_v52  ;;  %v9651_v45 = vrot.slane %v9593_v32, %v21033_v28 }
0x2eb4   :  { %v19617_v43 = vpop.f32.mrf.mxu1  ;;  %v22874_v19 = vsub.f32 %v9475_v38, %v9631_v59  ;;  %v22876_v41 = vsub.f32 %v9476_v24, %v9635_v49  ;;  %v22878_v54 = vsub.f32 %v9477_v30, %v9639_v12  ;;  %v22880_v46 = vsub.f32 %v9478_v58, %v9643_v42 }
0x2eb5   :  { %v11833_v1 = vadd.f32 %v19617_v43, %v22466_v29  ;;  %v22883_v17 = vsub.f32 %v9479_v27, %v9647_v57  ;;  %v22885_v9 = vsub.f32 %v9480_v33, %v9651_v45  ;;  %v22936_v59 = vcombine.high %v22872_v14, %v22872_v14 }
0x2eb6   :  { %v11823_v8 = vpop.f32.mrf.mxu1  ;;  %v9688_v38 = vmul.f32 %v22874_v19, %v22874_v19  ;;  %v9689_v24 = vmul.f32 %v22876_v41, %v22876_v41  ;;  %v9690_v30 = vmul.f32 %v22878_v54, %v22878_v54  ;;  %v9691_v29 = vmul.f32 %v22880_v46, %v22880_v46 }
0x2eb7   :  { %v22899_v58 = vadd.f32 %v11833_v1, %v22262_v35  ;;  %v11832_v27 = vadd.f32 %v11823_v8, %v22469_v50  ;;  %v9692_v33 = vmul.f32 %v22883_v17, %v22883_v17  ;;  %v9693_v48 = vmul.f32 %v22885_v9, %v22885_v9 }
0x2eb8   :  { %v9757_v5 = vcombine.low %v9688_v38, %v9689_v24  ;;  %v9758_v13 = vcombine.low %v9690_v30, %v9691_v29  ;;  %v10024_v42 = vcombine.high %v22888_v20, %v22888_v20  ;;  %v22942_v57 = vcombine.high %v22907_v11, %v22907_v11 }
0x2eb9   :  { %v22913_v22 = vadd.f32 %v11832_v27, %v22236_v6  ;;  %v11839_v35 = vsel %vm617_vm3, %v22899_v58, 0.0  ;;  %v9759_v50 = vcombine.low %v9692_v33, %v9693_v48  ;;  %v22927_v6 = vcombine.high %v22860_v2, %v22860_v2 }
0x2eba   :  { %11840 = vadd.xlane.f32.xlu0 %v11839_v35  ;;  %v9766_v7 = vrot.slane %v9757_v5, %v20554_v60  ;;  %v9773_v3 = vrot.slane %v9758_v13, %v20554_v60  ;;  %v10026_v45 = vcombine.high %v22910_v21, %v22910_v21 }
0x2ebb   :  { %v11836_v44 = vsel %vm617_vm3, %v22913_v22, 0.0  ;;  %v9780_v32 = vrot.slane %v9759_v50, %v20554_v60 }
0x2ebc   :  { %v20183_v49 = vpop.eup %20182  ;;  %11837 = vadd.xlane.f32.xlu1 %v11836_v44  ;;  %v9781_v12 = vcombine.low %v9766_v7, %v9773_v3 }
0x2ebd   :  { %v9795_v0 = vrot.slane %v9780_v32, %v20554_v60  ;;  %v9816_v43 = vrot.slane %v20183_v49, %v20533_v31  ;;  %v9820_v1 = vrot.slane %v20183_v49, %v20825_v39  ;;  %v9824_v8 = vrot.slane %v20183_v49, %v21024_v56 }
0x2ebe   :  { %v9788_v38 = vrot.slane %v9781_v12, %v20554_v60  ;;  %v9828_v24 = vrot.slane %v20183_v49, %v21027_v47  ;;  %v9832_v30 = vrot.slane %v20183_v49, %v21030_v52  ;;  %v9836_v29 = vrot.slane %v20183_v49, %v21033_v28 }
0x2ebf   :  { %v9840_v27 = vrot.slane %v20183_v49, %v21040_v61  ;;  %v9844_v33 = vrot.slane %v20183_v49, %v21043_v62  ;;  %v9883_v48 = vmul.f32 %v9816_v43, %v22780_v36  ;;  %v9884_v5 = vmul.f32 %v9820_v1, %v22782_v53 }
0x2ec0   :  { %v9796_v13 = vcombine.low %v9788_v38, %v9795_v0  ;;  %v9885_v35 = vmul.f32 %v9824_v8, %v22784_v18  ;;  %v9886_v50 = vmul.f32 %v9828_v24, %v22786_v63  ;;  %v9887_v7 = vmul.f32 %v9832_v30, %v22788_v15 }
0x2ec1   :  { %v9888_v3 = vmul.f32 %v9836_v29, %v22790_v10  ;;  %v9889_v44 = vmul.f32 %v9840_v27, %v22792_v40  ;;  %v9890_v32 = vmul.f32 %v9844_v33, %v22794_v23  ;;  %v9959_v12 = vmul.f32 %v22854_v4, %v9883_v48 }
0x2ec2   :  { %v9802_v49 = vsel %vm296_vm2, %v9796_v13, 0.0  ;;  %v9960_v36 = vmul.f32 %v22860_v2, %v9884_v5  ;;  %v9961_v53 = vmul.f32 %v22919_v25, %v9885_v35  ;;  %v9962_v18 = vmul.f32 %v22927_v6, %v9886_v50 }
0x2ec3   :  { %9803 = vadd.xlane.f32.xlu0 %v9802_v49  ;;  %v9963_v63 = vmul.f32 %v22857_v55, %v9887_v7  ;;  %v9964_v15 = vmul.f32 %v22863_v51, %v9888_v3  ;;  %v9965_v10 = vmul.f32 %v9948_v26, %v9889_v44  ;;  %v9966_v0 = vmul.f32 %v9950_v34, %v9890_v32  ;;  %v22999_v44 = vld [vmem:[%s23926_s7 + $0x38] sm:$0xff] }
0x2ec4   :  { %v10035_v40 = vadd.f32 %v22872_v14, %v9959_v12  ;;  %v10036_v23 = vadd.f32 %v22907_v11, %v9960_v36  ;;  %v10037_v43 = vadd.f32 %v22936_v59, %v9961_v53  ;;  %v10038_v1 = vadd.f32 %v22942_v57, %v9962_v18  ;;  %19620 = vmatprep.subr.mxu0 %v22999_v44 }
0x2ec5   :  { %v10039_v8 = vadd.f32 %v22888_v20, %v9963_v63  ;;  %v10040_v38 = vadd.f32 %v22910_v21, %v9964_v15  ;;  %v10041_v24 = vadd.f32 %v10024_v42, %v9965_v10  ;;  %v10042_v30 = vadd.f32 %v10026_v45, %v9966_v0  ;;  %v22988_v42 = vld [vmem:[%s23926_s7 + $0x20] sm:$0xff]  ;;  %19621 = vmatpush3.msra.mxu0 %v22999_v44 }
0x2ec6   :  { %v11977_v29 = vcombine.low %v10035_v40, %v10036_v23  ;;  %v11978_v27 = vcombine.low %v10037_v43, %v10038_v1  ;;  %19622 = vmatprep.subr.mxu0 %v22988_v42 }
0x2ec7   :  { %v11979_v33 = vcombine.low %v10039_v8, %v10040_v38  ;;  %v11980_v48 = vcombine.low %v10041_v24, %v10042_v30  ;;  %19623 = vmatpush3.msra.mxu0 %v22988_v42 }
0x2ec8   :  { %v11987_v26 = vrot.slane %v11977_v29, %v20554_v60  ;;  %v11994_v34 = vrot.slane %v11978_v27, %v20554_v60 }
0x2ec9   :  { %v12001_v5 = vrot.slane %v11979_v33, %v20554_v60  ;;  %v12008_v13 = vrot.slane %v11980_v48, %v20554_v60 }
0x2eca   :  { %v12009_v35 = vcombine.low %v11987_v26, %v11994_v34 }
0x2ecb   :  { %v12010_v50 = vcombine.low %v12001_v5, %v12008_v13 }
0x2ecc   :  { %v12017_v7 = vrot.slane %v12009_v35, %v20554_v60 }
0x2ecd   :  { %v12024_v3 = vrot.slane %v12010_v50, %v20554_v60  ;;  %12076 = vrot.lane.b32.xlu1 %v22840_v16, %s20404_s23  ;;  %v23008_v16 = vld [vmem:[%s23926_s7 + $0x8] sm:$0xff] }
0x2ece   :  { %19624 = vmatprep.subr.mxu0 %v23008_v16 }
0x2ecf   :  { %v22990_v45 = vcombine.low %v12017_v7, %v12024_v3  ;;  %19625 = vmatpush3.msra.mxu0 %v23008_v16 }
0x2ed0   :  { %19640 = vmatprep.subr.mxu0 %v23937_v37 }
0x2ed1   :  { %19637 = vmatprep.mubr.msk.f32.mxu1 %vm617_vm3, %v22990_v45  ;;  %12072 = vrot.lane.b32.xlu1 %v22988_v42, %s20404_s23 }
0x2f43   :  { %v11841_v32 = vpop.xlane.xlu0 %11840 }
0x2f44   :  { %v11843_v12 = vmul.f32 0.03125, %v11841_v32 }
0x2f45   :  { %v11838_v49 = vpop.xlane.xlu1 %11837 }
0x2f46   :  { %v23014_v36 = vsub.f32 %v22899_v58, %v11843_v12  ;;  %v11842_v53 = vmul.f32 0.03125, %v11838_v49 }
0x2f48   :  { %v23017_v18 = vsub.f32 %v22913_v22, %v11842_v53  ;;  %v11847_v63 = vmul.f32 %v23014_v36, %v23014_v36 }
0x2f49   :  { %v12077_v15 = vpop.permute.xlu1 %12076 }
0x2f4a   :  { %v11851_v10 = vsel %vm617_vm3, %v11847_v63, 0.0  ;;  %v11846_v0 = vmul.f32 %v23017_v18, %v23017_v18  ;;  %19629 = vmatprep.subr.mxu1 %v12077_v15 }
0x2f4b   :  { %11852 = vadd.xlane.f32.xlu0 %v11851_v10  ;;  %19630 = vmatpush3.msra.mxu1 %v12077_v15 }
0x2f4c   :  { %v11848_v40 = vsel %vm617_vm3, %v11846_v0, 0.0  ;;  %v9804_v58 = vpop.xlane.xlu0 %9803 }
0x2f4d   :  { %11849 = vadd.xlane.f32.xlu1 %v11848_v40  ;;  %v9806_v22 = vmul.f32 0.03125, %v9804_v58  ;;  %v12073_v32 = vpop.permute.xlu1 %12072  ;;  %v23068_v58 = vld [vmem:[%s23928_s9] sm:$0xff] }
0x2f4f   :  { %v9808_v23 = vadd.f32 1e-05, %v9806_v22  ;;  %v11865_v22 = vrot.slane %v23068_v58, %v21043_v62 }
0x2f51   :  { %20184 = vrsqrt.f32 %v9808_v23  ;;  %v23075_v23 = vld [vmem:[%s23928_s9 + $0x8] sm:$0x1f] }
0x2f5e   :  { %12070 = vrot.lane.b32.xlu1 %v23008_v16, %s20404_s23  ;;  %v20185_v43 = vpop.eup %20184 }
0x2f5f   :  { %v9848_v1 = vrot.slane %v20185_v43, %v20533_v31  ;;  %v9852_v8 = vrot.slane %v20185_v43, %v20825_v39  ;;  %v9856_v38 = vrot.slane %v20185_v43, %v21024_v56  ;;  %v9860_v24 = vrot.slane %v20185_v43, %v21027_v47 }
0x2f60   :  { %v9864_v48 = vrot.slane %v20185_v43, %v21030_v52  ;;  %v9868_v26 = vrot.slane %v20185_v43, %v21033_v28 }
0x2f61   :  { %12074 = vrot.lane.b32.xlu0 %v22999_v44, %s20404_s23  ;;  %v9891_v30 = vmul.f32 %v9848_v1, %v22874_v19  ;;  %v9892_v29 = vmul.f32 %v9852_v8, %v22876_v41  ;;  %v9893_v27 = vmul.f32 %v9856_v38, %v22878_v54  ;;  %v9894_v33 = vmul.f32 %v9860_v24, %v22880_v46 }
0x2f62   :  { %v9895_v19 = vmul.f32 %v9864_v48, %v22883_v17  ;;  %v9896_v41 = vmul.f32 %v9868_v26, %v22885_v9  ;;  %v11871_v24 = vrot.slane %v23075_v23, %v20533_v31 }
0x2f63   :  { %v9967_v34 = vmul.f32 %v22854_v4, %v9891_v30  ;;  %v9968_v5 = vmul.f32 %v22860_v2, %v9892_v29  ;;  %v9969_v13 = vmul.f32 %v22919_v25, %v9893_v27  ;;  %v9970_v35 = vmul.f32 %v22927_v6, %v9894_v33 }
0x2f64   :  { %v9971_v4 = vmul.f32 %v22857_v55, %v9895_v19  ;;  %v9972_v2 = vmul.f32 %v22863_v51, %v9896_v41 }
0x2f65   :  { %v10043_v54 = vadd.f32 %v22872_v14, %v9967_v34  ;;  %v10044_v46 = vadd.f32 %v22907_v11, %v9968_v5  ;;  %v10045_v50 = vadd.f32 %v22936_v59, %v9969_v13  ;;  %v10046_v7 = vadd.f32 %v22942_v57, %v9970_v35 }
0x2f66   :  { %v10047_v6 = vadd.f32 %v22888_v20, %v9971_v4  ;;  %v10048_v17 = vadd.f32 %v22910_v21, %v9972_v2 }
0x2f67   :  { %v12026_v3 = vcombine.low %v10043_v54, %v10044_v46  ;;  %v12027_v25 = vcombine.low %v10045_v50, %v10046_v7 }
0x2f68   :  { %v12028_v11 = vcombine.low %v10047_v6, %v10048_v17 }
0x2f69   :  { %v12035_v9 = vrot.slane %v12026_v3, %v20554_v60  ;;  %v12042_v14 = vrot.slane %v12027_v25, %v20554_v60 }
0x2f6a   :  { %v12049_v51 = vrot.slane %v12028_v11, %v20554_v60 }
0x2f6b   :  { %v12050_v49 = vcombine.low %v12035_v9, %v12042_v14 }
0x2f6c   :  { %v12064_v10 = vrot.slane %v12049_v51, %v20554_v60 }
0x2f6d   :  { %v12057_v20 = vrot.slane %v12050_v49, %v20554_v60 }
0x2f6f   :  { %v23058_v0 = vcombine.low %v12057_v20, %v12064_v10 }
0x2fd4   :  { %v11853_v12 = vpop.xlane.xlu0 %11852 }
0x2fd5   :  { %v11855_v59 = vmul.f32 0.03125, %v11853_v12 }
0x2fd6   :  { %v11850_v57 = vpop.xlane.xlu1 %11849 }
0x2fd7   :  { %v11857_v53 = vadd.f32 1e-05, %v11855_v59  ;;  %v11854_v55 = vmul.f32 0.03125, %v11850_v57 }
0x2fd8   :  { %v12075_v63 = vpop.permute.xlu0 %12074 }
0x2fd9   :  { %20186 = vrsqrt.f32 %v11857_v53  ;;  %v11856_v15 = vadd.f32 1e-05, %v11854_v55  ;;  %19631 = vmatprep.subr.mxu1 %v12075_v63 }
0x2fda   :  { %19632 = vmatpush3.msra.mxu1 %v12075_v63  ;;  %v12071_v21 = vpop.permute.xlu1 %12070 }
0x2fdb   :  { %20188 = vrsqrt.f32 %v11856_v15  ;;  %19633 = vmatprep.subr.mxu1 %v12073_v32 }
0x2fdc   :  { %19634 = vmatpush3.msra.mxu1 %v12073_v32 }
0x2fdd   :  { %19635 = vmatprep.subr.mxu1 %v12071_v21 }
0x2fde   :  { %19636 = vmatpush3.msra.mxu1 %v12071_v21 }
0x2fdf   :  { %19638 = vmatmul.mubr.msk.f32.vlgmr.msra.gmra.mxu1 %vm617_vm3, %v23058_v0  ;;  %19645 = vmatprep.subr.mxu1 %v23937_v37 }
0x2fe0   :  { %19647 = vmatprep.mubr.msk.f32.mxu1 %vm20403_vm5, %v23937_v37 }
0x2fe6   :  { %v20187_v40 = vpop.eup %20186 }
0x2fe7   :  { %v11861_v43 = vmul.f32 %v20187_v40, %v23014_v36  ;;  %v11962_v36 = vrot.slane %v23068_v58, %v21027_v47 }
0x2fe8   :  { %v20189_v1 = vpop.eup %20188 }
0x2fe9   :  { %v11860_v8 = vmul.f32 %v20189_v1, %v23017_v18  ;;  %v11867_v38 = vmul.f32 %v11865_v22, %v11861_v43 }
0x2feb   :  { %v11866_v30 = vmul.f32 %v11865_v22, %v11860_v8  ;;  %v23083_v27 = vadd.f32 %v11871_v24, %v11867_v38 }
0x2fed   :  { %v23081_v29 = vadd.f32 %v11871_v24, %v11866_v30 }
0x2fef   :  { %19626 = vmatprep.mubr.msk.f32.mxu0 %vm617_vm3, %v23081_v29 }
0x2ff0   :  { %19627 = vmatmul.mubr.msk.f32.vlgmr.msra.gmra.mxu0 %vm617_vm3, %v23083_v27 }
0x2ff1   :  { %19642 = vmatprep.mubr.msk.f32.mxu0 %vm20403_vm5, %v23937_v37 }
0x309f   :  { %v19639_v18 = vpop.f32.mrf.mxu1 }
0x30a0   :  { %v12158_v33 = vadd.f32 %v19639_v18, %v11962_v36 }
0x30a1   :  { %v12152_v48 = vpop.f32.mrf.mxu1 }
0x30a2   :  { %v12212_v26 = vcombine.high %v12158_v33, %v12158_v33  ;;  %v12219_v34 = vrot.slane %v12158_v33, %v20554_v60  ;;  %v12153_v5 = vadd.f32 %v12152_v48, %v11962_v36 }
0x30a4   :  { %v12226_v13 = vrot.slane %v12212_v26, %v20554_v60  ;;  %v12227_v35 = vcombine.high %v12219_v34, %v12219_v34  ;;  %v12235_v19 = vrot.slane %v12219_v34, %v20554_v60  ;;  %v12163_v41 = vcombine.high %v12153_v5, %v12153_v5 }
0x30a5   :  { %v12170_v54 = vrot.slane %v12153_v5, %v20554_v60 }
0x30a6   :  { %v12228_v46 = vcombine.high %v12226_v13, %v12226_v13  ;;  %v12249_v50 = vrot.slane %v12227_v35, %v20554_v60  ;;  %v12177_v7 = vrot.slane %v12163_v41, %v20554_v60  ;;  %v12242_v2 = vrot.slane %v12226_v13, %v20554_v60 }
0x30a7   :  { %v12178_v4 = vcombine.high %v12170_v54, %v12170_v54  ;;  %v12257_v3 = vcombine.high %v12235_v19, %v12235_v19  ;;  %v12186_v17 = vrot.slane %v12170_v54, %v20554_v60  ;;  %v11877_v13 = vrot.slane %v23068_v58, %v21024_v56 }
0x30a8   :  { %v12258_v25 = vcombine.high %v12249_v50, %v12249_v50  ;;  %v12179_v6 = vcombine.high %v12177_v7, %v12177_v7  ;;  %v12193_v9 = vrot.slane %v12177_v7, %v20554_v60  ;;  %v12256_v32 = vrot.slane %v12228_v46, %v20554_v60 }
0x30a9   :  { %v12200_v14 = vrot.slane %v12178_v4, %v20554_v60  ;;  %v12387_v53 = vcombine.low %v12249_v50, %v12257_v3 }
0x30aa   :  { %v12388_v11 = vcombine.low %v12258_v25, %v12242_v2  ;;  %v12207_v12 = vrot.slane %v12179_v6, %v20554_v60  ;;  %v12209_v59 = vcombine.high %v12193_v9, %v12193_v9  ;;  %v12416_v21 = vrot.slane %v12256_v32, %v20554_v60 }
0x30ab   :  { %v12263_v49 = vcombine.low %v12186_v17, %v12200_v14  ;;  %v18683_v57 = vcombine.high %v12186_v17, %v12200_v14  ;;  %v12402_v1 = vrot.slane %v12387_v53, %v20554_v60 }
0x30ac   :  { %v12409_v55 = vrot.slane %v12388_v11, %v20554_v60  ;;  %v12211_v51 = vcombine.high %v12207_v12, %v12207_v12  ;;  %v12265_v63 = vcombine.low %v12193_v9, %v12207_v12  ;;  %v12293_v40 = vrot.slane %v12209_v59, %v20554_v60 }
0x30ad   :  { %v12272_v15 = vrot.slane %v12263_v49, %v20554_v60  ;;  %v12279_v20 = vrot.slane %v18683_v57, %v20554_v60 }
0x30ae   :  { %v12286_v10 = vrot.slane %v12265_v63, %v20554_v60  ;;  %v12386_v43 = vcombine.low %v12211_v51, %v12235_v19  ;;  %v12418_v8 = vcombine.low %v12409_v55, %v12416_v21 }
0x30af   :  { %v12294_v22 = vcombine.low %v12272_v15, %v12279_v20 }
0x30b0   :  { %v12295_v38 = vcombine.low %v12286_v10, %v12293_v40  ;;  %v12395_v24 = vrot.slane %v12386_v43, %v20554_v60  ;;  %v19628_v30 = vpop.f32.mrf.mxu0  ;;  %v12432_v48 = vrot.slane %v12418_v8, %v20554_v60 }
0x30b1   :  { %v12302_v36 = vrot.slane %v12294_v22, %v20554_v60  ;;  %v23130_v41 = vadd.f32 %v19628_v30, %v11877_v13 }
0x30b2   :  { %v12309_v18 = vrot.slane %v12295_v38, %v20554_v60  ;;  %v12417_v33 = vcombine.low %v12395_v24, %v12402_v1  ;;  %v11950_v5 = vpop.f32.mrf.mxu0 }
0x30b3   :  { %v23125_v19 = vadd.f32 %v11950_v5, %v11877_v13 }
0x30b4   :  { %v23116_v26 = vcombine.low %v12302_v36, %v12309_v18  ;;  %v12425_v34 = vrot.slane %v12417_v33, %v20554_v60 }
0x30b6   :  { %v23121_v35 = vcombine.low %v12425_v34, %v12432_v48  ;;  %19641 = vmatpush3.xpose.msk.msra.mxu0 %vm155_vm0, %v23116_v26 }
0x30b7   :  { %19650 = vmatprep.subr.mxu0 %v23937_v37 }
0x30b8   :  { %19646 = vmatpush3.xpose.msk.msra.mxu1 %vm155_vm0, %v23121_v35 }
0x30b9   :  { %19643 = vmatmul.mubr.msk.f32.vlgmr.msra.gmra.mxu0 %vm155_vm0, %v23125_v19  ;;  %19655 = vmatprep.subr.mxu1 %v23937_v37 }
0x30ba   :  { %19652 = vmatprep.mubr.msk.f32.mxu0 %vm20403_vm5, %v23937_v37 }
0x30bb   :  { %19648 = vmatmul.mubr.msk.f32.vlgmr.msra.gmra.mxu1 %vm155_vm0, %v23130_v41 }
0x30bc   :  { %19657 = vmatprep.mubr.msk.f32.mxu1 %vm20403_vm5, %v23937_v37 }
0x3179   :  { %v12382_v54 = vpop.f32.mrf.mxu0 }
0x317a   :  { %v12509_v46 = vmul.f32 0.35355338, %v12382_v54 }
0x317b   :  { %v19644_v50 = vpop.f32.mrf.mxu0  ;;  %v12505_v7 = vpop.f32.mrf.mxu1 }
0x317c   :  { %v12510_v4 = vmul.f32 0.35355338, %v12505_v7  ;;  %v12511_v2 = vsel %vm1074_vm7, %v12509_v46, -inf }
0x317d   :  { %12512 = vmax.xlane.f32.xlu0 %v12511_v2  ;;  %v19649_v3 = vpop.f32.mrf.mxu1 }
0x317e   :  { %v12514_v25 = vsel %vm1074_vm7, %v12510_v4, -inf }
0x317f   :  { %12515 = vmax.xlane.f32.xlu1 %v12514_v25 }
0x3190   :  { %12533 = vrot.lane.b32.xlu1 %v23116_v26, %s20404_s23 }
0x3194   :  { %12687 = vrot.lane.b32.xlu1 %v23008_v16, %s20406_s2 }
0x3198   :  { %12775 = vrot.lane.b32.xlu1 %v23116_v26, %s20408_s6 }
0x319c   :  { %12773 = vrot.lane.b32.xlu1 %v23125_v19, %s20408_s6 }
0x3206   :  { %v12513_v6 = vpop.xlane.xlu0 %12512 }
0x3207   :  { %v12517_v17 = vsub.f32 %v12509_v46, %v12513_v6 }
0x3208   :  { %v12516_v9 = vpop.xlane.xlu1 %12515 }
0x3209   :  { %v12518_v14 = vsub.f32 %v12510_v4, %v12516_v9  ;;  %v12519_v32 = vmul.f32 1.442695, %v12517_v17 }
0x320b   :  { %v12521_v11 = vmul.f32 1.442695, %v12518_v14 }
0x320c   :  { %v12534_v12 = vpop.permute.xlu1 %12533 }
0x320d   :  { %20190 = vpow2.f32 %v12521_v11  ;;  %19651 = vmatpush3.msk.msra.mxu0 %vm421_vm4, %v12534_v12 }
0x320e   :  { %20192 = vpow2.f32 %v12519_v32 }
0x3210   :  { %v12688_v59 = vpop.permute.xlu1 %12687 }
0x3211   :  { %19660 = vmatprep.subr.mxu0 %v12688_v59 }
0x3214   :  { %v12776_v20 = vpop.permute.xlu1 %12775 }
0x3218   :  { %v12774_v22 = vpop.permute.xlu1 %12773 }
0x321a   :  { %v20191_v16 = vpop.eup %20190 }
0x321b   :  { %v12526_v49 = vsel %vm1074_vm7, %v20191_v16, 0.0  ;;  %v20193_v57 = vpop.eup %20192 }
0x321c   :  { %12527 = vadd.xlane.f32.xlu0 %v12526_v49  ;;  %v12523_v53 = vsel %vm1074_vm7, %v20193_v57, 0.0 }
0x3220   :  { %12524 = vadd.xlane.f32.xlu0 %v12523_v53 }
0x3236   :  { %12610 = vrot.lane.b32.xlu0 %v23121_v35, %s20404_s23 }
0x323a   :  { %12853 = vrot.lane.b32.xlu0 %v23121_v35, %s20408_s6 }
0x323e   :  { %12851 = vrot.lane.b32.xlu0 %v23130_v41, %s20408_s6 }
0x32a5   :  { %v12528_v55 = vpop.xlane.xlu0 %12527 }
0x32a6   :  { %20194 = vrcp.f32 %v12528_v55 }
0x32a9   :  { %v12525_v51 = vpop.xlane.xlu0 %12524 }
0x32aa   :  { %20196 = vrcp.f32 %v12525_v51 }
0x32ad   :  { %v12611_v63 = vpop.permute.xlu0 %12610 }
0x32ae   :  { %19656 = vmatpush3.msk.msra.mxu1 %vm421_vm4, %v12611_v63 }
0x32af   :  { %19665 = vmatprep.subr.mxu1 %v23937_v37 }
0x32b1   :  { %v12854_v8 = vpop.permute.xlu0 %12853 }
0x32b3   :  { %v20195_v15 = vpop.eup %20194 }
0x32b4   :  { %v12532_v21 = vmul.f32 %v20195_v15, %v20191_v16 }
0x32b5   :  { %v12852_v48 = vpop.permute.xlu0 %12851 }
0x32b6   :  { %19658 = vmatmul.mubr.msk.f32.vlgmr.msra.gmra.mxu1 %vm1074_vm7, %v12532_v21 }
0x32b7   :  { %v20197_v10 = vpop.eup %20196  ;;  %19666 = vmatpush3.xpose.msk.msra.mxu1 %vm155_vm0, %v12776_v20  ;;  %19667 = vmatprep.mubr.msk.f32.mxu1 %vm20403_vm5, %v23937_v37 }
0x32b8   :  { %v12530_v40 = vmul.f32 %v20197_v10, %v20193_v57  ;;  %19675 = vmatprep.subr.mxu1 %v23937_v37 }
0x32ba   :  { %19653 = vmatmul.mubr.msk.f32.vlgmr.msra.gmra.mxu0 %vm1074_vm7, %v12530_v40  ;;  %19668 = vmatmul.mubr.msk.f32.vlgmr.msra.gmra.mxu1 %vm155_vm0, %v12774_v22 }
0x32bb   :  { %19661 = vmatpush3.msra.mxu0 %v12688_v59  ;;  %19677 = vmatprep.mubr.msk.f32.mxu1 %vm20403_vm5, %v23937_v37 }
0x32bc   :  { %19670 = vmatprep.subr.mxu0 %v23937_v37 }
0x3376   :  { %v12683_v43 = vpop.f32.mrf.mxu1 }
0x3378   :  { %v19659_v1 = vpop.f32.mrf.mxu1 }
0x337a   :  { %v12606_v38 = vpop.f32.mrf.mxu0  ;;  %v12847_v24 = vpop.f32.mrf.mxu1 }
0x337b   :  { %v12929_v30 = vmul.f32 0.35355338, %v12847_v24  ;;  %19662 = vmatprep.mubr.msk.f32.mxu0 %vm155_vm0, %v12606_v38 }
0x337c   :  { %v19654_v36 = vpop.f32.mrf.mxu0  ;;  %19663 = vmatmul.mubr.msk.f32.vlgmr.msra.gmra.mxu0 %vm155_vm0, %v12683_v43  ;;  %v19669_v18 = vpop.f32.mrf.mxu1 }
0x337d   :  { %19671 = vmatpush3.xpose.msk.msra.mxu0 %vm155_vm0, %v12854_v8  ;;  %v12931_v33 = vsel %vm1074_vm7, %v12929_v30, -inf  ;;  %19672 = vmatprep.mubr.msk.f32.mxu0 %vm20403_vm5, %v23937_v37 }
0x337e   :  { %12932 = vmax.xlane.f32.xlu1 %v12931_v33  ;;  %19680 = vmatprep.subr.mxu0 %v23937_v37 }
0x3380   :  { %19673 = vmatmul.mubr.msk.f32.vlgmr.msra.gmra.mxu0 %vm155_vm0, %v12852_v48  ;;  %v12262_v48 = vrot.slane %v23068_v58, %v21030_v52 }
0x3381   :  { %19682 = vmatprep.mubr.msk.f32.mxu0 %vm20403_vm5, %v23937_v37 }
0x3407   :  { %v12933_v34 = vpop.xlane.xlu1 %12932 }
0x3408   :  { %v12937_v5 = vsub.f32 %v12929_v30, %v12933_v34 }
0x340a   :  { %v12939_v13 = vmul.f32 1.442695, %v12937_v5 }
0x340c   :  { %20198 = vpow2.f32 %v12939_v13 }
0x3419   :  { %v20199_v3 = vpop.eup %20198 }
0x341a   :  { %v12943_v25 = vsel %vm1074_vm7, %v20199_v3, 0.0 }
0x343c   :  { %v23182_v54 = vpop.f32.mrf.mxu0 }
0x343d   :  { %v12772_v34 = vadd.f32 %v23182_v54, %v12262_v48 }
0x343e   :  { %v23184_v46 = vpop.f32.mrf.mxu0 }
0x343f   :  { %v12771_v13 = vadd.f32 %v23184_v46, %v12262_v48 }
0x3440   :  { %v12925_v50 = vpop.f32.mrf.mxu0 }
0x3441   :  { %v12930_v7 = vmul.f32 0.35355338, %v12925_v50 }
0x3442   :  { %v19674_v4 = vpop.f32.mrf.mxu0 }
0x3443   :  { %v12934_v2 = vsel %vm1074_vm7, %v12930_v7, -inf }
0x3444   :  { %12935 = vmax.xlane.f32.xlu0 %v12934_v2 }
0x3448   :  { %12944 = vadd.xlane.f32.xlu0 %v12943_v25 }
0x345e   :  { %12953 = vrot.lane.b32.xlu0 %v23116_v26, %s20407_s25 }
0x3462   :  { %13195 = vrot.lane.b32.xlu0 %v23116_v26, %s20411_s28 }
0x3466   :  { %13193 = vrot.lane.b32.xlu0 %v23125_v19, %s20411_s28 }
0x34cd   :  { %v12936_v6 = vpop.xlane.xlu0 %12935 }
0x34ce   :  { %v12938_v17 = vsub.f32 %v12930_v7, %v12936_v6 }
0x34d0   :  { %v12941_v9 = vmul.f32 1.442695, %v12938_v17 }
0x34d1   :  { %v12945_v14 = vpop.xlane.xlu0 %12944 }
0x34d2   :  { %20200 = vpow2.f32 %v12941_v9 }
0x34d3   :  { %20202 = vrcp.f32 %v12945_v14 }
0x34d5   :  { %v12954_v32 = vpop.permute.xlu0 %12953 }
0x34d6   :  { %19676 = vmatpush3.msk.msra.mxu1 %vm421_vm4, %v12954_v32 }
0x34df   :  { %v20201_v11 = vpop.eup %20200 }
0x34e0   :  { %v20203_v12 = vpop.eup %20202  ;;  %v12946_v59 = vsel %vm1074_vm7, %v20201_v11, 0.0 }
0x34e1   :  { %12947 = vadd.xlane.f32.xlu1 %v12946_v59  ;;  %v12950_v16 = vmul.f32 %v20203_v12, %v20199_v3 }
0x34e3   :  { %19678 = vmatmul.mubr.msk.f32.vlgmr.msra.gmra.mxu1 %vm1074_vm7, %v12950_v16 }
0x34f2   :  { %13030 = vrot.lane.b32.xlu1 %v23121_v35, %s20407_s25 }
0x34f6   :  { %13107 = vrot.lane.b32.xlu1 %v22988_v42, %s20406_s2  ;;  %v13196_v42 = vpop.permute.xlu0 %13195 }
0x34fa   :  { %13273 = vrot.lane.b32.xlu1 %v23121_v35, %s20411_s28  ;;  %v13194_v63 = vpop.permute.xlu0 %13193 }
0x34fe   :  { %13271 = vrot.lane.b32.xlu1 %v23130_v41, %s20411_s28 }
0x356a   :  { %v12948_v49 = vpop.xlane.xlu1 %12947 }
0x356b   :  { %20204 = vrcp.f32 %v12948_v49 }
0x356e   :  { %v13031_v57 = vpop.permute.xlu1 %13030 }
0x356f   :  { %19681 = vmatpush3.msk.msra.mxu0 %vm421_vm4, %v13031_v57 }
0x3570   :  { %19690 = vmatprep.subr.mxu0 %v23937_v37 }
0x3572   :  { %v13108_v53 = vpop.permute.xlu1 %13107 }
0x3573   :  { %19685 = vmatprep.subr.mxu1 %v13108_v53 }
0x3574   :  { %19686 = vmatpush3.msra.mxu1 %v13108_v53 }
0x3575   :  { %19695 = vmatprep.subr.mxu1 %v23937_v37 }
0x3576   :  { %v13274_v21 = vpop.permute.xlu1 %13273 }
0x3578   :  { %v20205_v55 = vpop.eup %20204 }
0x3579   :  { %v12952_v51 = vmul.f32 %v20205_v55, %v20201_v11 }
0x357a   :  { %v13272_v22 = vpop.permute.xlu1 %13271 }
0x357b   :  { %19683 = vmatmul.mubr.msk.f32.vlgmr.msra.gmra.mxu0 %vm1074_vm7, %v12952_v51 }
0x357c   :  { %19691 = vmatpush3.xpose.msk.msra.mxu0 %vm155_vm0, %v13196_v42  ;;  %19692 = vmatprep.mubr.msk.f32.mxu0 %vm20403_vm5, %v23937_v37 }
0x357d   :  { %19700 = vmatprep.subr.mxu0 %v23937_v37 }
0x357f   :  { %19693 = vmatmul.mubr.msk.f32.vlgmr.msra.gmra.mxu0 %vm155_vm0, %v13194_v63 }
0x3580   :  { %19702 = vmatprep.mubr.msk.f32.mxu0 %vm20403_vm5, %v23937_v37 }
0x35a3   :  { %v13026_v15 = vpop.f32.mrf.mxu1 }
0x35a4   :  { %19687 = vmatprep.mubr.msk.f32.mxu1 %vm155_vm0, %v13026_v15 }
0x35a5   :  { %v19679_v20 = vpop.f32.mrf.mxu1 }
0x363b   :  { %v13103_v10 = vpop.f32.mrf.mxu0 }
0x363c   :  { %19688 = vmatmul.mubr.msk.f32.vlgmr.msra.gmra.mxu1 %vm155_vm0, %v13103_v10 }
0x363d   :  { %19696 = vmatpush3.xpose.msk.msra.mxu1 %vm155_vm0, %v13274_v21  ;;  %v19684_v40 = vpop.f32.mrf.mxu0  ;;  %19697 = vmatprep.mubr.msk.f32.mxu1 %vm20403_vm5, %v23937_v37 }
0x363e   :  { %19705 = vmatprep.subr.mxu1 %v23937_v37 }
0x363f   :  { %v13267_v43 = vpop.f32.mrf.mxu0 }
0x3640   :  { %v13349_v1 = vmul.f32 0.35355338, %v13267_v43  ;;  %19698 = vmatmul.mubr.msk.f32.vlgmr.msra.gmra.mxu1 %vm155_vm0, %v13272_v22 }
0x3641   :  { %v19694_v8 = vpop.f32.mrf.mxu0  ;;  %19707 = vmatprep.mubr.msk.f32.mxu1 %vm20403_vm5, %v23937_v37 }
0x3642   :  { %v13351_v38 = vsel %vm1074_vm7, %v13349_v1, -inf }
0x3643   :  { %13352 = vmax.xlane.f32.xlu0 %v13351_v38 }
0x36cc   :  { %v13353_v24 = vpop.xlane.xlu0 %13352 }
0x36cd   :  { %v13357_v30 = vsub.f32 %v13349_v1, %v13353_v24 }
0x36cf   :  { %v13359_v36 = vmul.f32 1.442695, %v13357_v30 }
0x36d1   :  { %20206 = vpow2.f32 %v13359_v36 }
0x36de   :  { %v20207_v18 = vpop.eup %20206 }
0x36df   :  { %v13363_v33 = vsel %vm1074_vm7, %v20207_v18, 0.0 }
0x36e0   :  { %13364 = vadd.xlane.f32.xlu0 %v13363_v33 }
0x36fc   :  { %v19689_v5 = vpop.f32.mrf.mxu1 }
0x36fd   :  { %v23231_v50 = vadd.f32 %v19689_v5, %v12772_v34 }
0x36fe   :  { %v13182_v7 = vpop.f32.mrf.mxu1 }
0x36ff   :  { %v23233_v4 = vadd.f32 %v13182_v7, %v12771_v13 }
0x3700   :  { %v13345_v2 = vpop.f32.mrf.mxu1 }
0x3701   :  { %v13350_v3 = vmul.f32 0.35355338, %v13345_v2 }
0x3702   :  { %v19699_v25 = vpop.f32.mrf.mxu1 }
0x3703   :  { %v13354_v6 = vsel %vm1074_vm7, %v13350_v3, -inf }
0x3704   :  { %13355 = vmax.xlane.f32.xlu1 %v13354_v6 }
0x3715   :  { %13373 = vrot.lane.b32.xlu1 %v23116_v26, %s20410_s27 }
0x3719   :  { %13527 = vrot.lane.b32.xlu1 %v22999_v44, %s20406_s2 }
0x371d   :  { %13615 = vrot.lane.b32.xlu1 %v23116_v26, %s20414_s1 }
0x3721   :  { %13613 = vrot.lane.b32.xlu1 %v23125_v19, %s20414_s1 }
0x3769   :  { %v13365_v54 = vpop.xlane.xlu0 %13364 }
0x376a   :  { %20208 = vrcp.f32 %v13365_v54 }
0x3777   :  { %v20209_v17 = vpop.eup %20208 }
0x3778   :  { %v13370_v11 = vmul.f32 %v20209_v17, %v20207_v18 }
0x378d   :  { %v13356_v46 = vpop.xlane.xlu1 %13355 }
0x378e   :  { %v13358_v9 = vsub.f32 %v13350_v3, %v13356_v46 }
0x3790   :  { %v13361_v14 = vmul.f32 1.442695, %v13358_v9 }
0x3791   :  { %v13374_v32 = vpop.permute.xlu1 %13373 }
0x3792   :  { %20210 = vpow2.f32 %v13361_v14  ;;  %19701 = vmatpush3.msk.msra.mxu0 %vm421_vm4, %v13374_v32 }
0x3793   :  { %19703 = vmatmul.mubr.msk.f32.vlgmr.msra.gmra.mxu0 %vm1074_vm7, %v13370_v11 }
0x3795   :  { %v13528_v44 = vpop.permute.xlu1 %13527 }
0x3796   :  { %19710 = vmatprep.subr.mxu0 %v13528_v44 }
0x3797   :  { %19711 = vmatpush3.msra.mxu0 %v13528_v44 }
0x3798   :  { %19720 = vmatprep.subr.mxu0 %v23937_v37 }
0x3799   :  { %v13616_v57 = vpop.permute.xlu1 %13615 }
0x379f   :  { %v20211_v12 = vpop.eup %20210 }
0x37a0   :  { %v13366_v19 = vsel %vm1074_vm7, %v20211_v12, 0.0 }
0x37a1   :  { %13367 = vadd.xlane.f32.xlu0 %v13366_v19 }
0x37b7   :  { %13450 = vrot.lane.b32.xlu0 %v23121_v35, %s20410_s27 }
0x37bb   :  { %13693 = vrot.lane.b32.xlu0 %v23121_v35, %s20414_s1 }
0x37bf   :  { %13691 = vrot.lane.b32.xlu0 %v23130_v41, %s20414_s1  ;;  %v13614_v41 = vpop.permute.xlu1 %13613 }
0x382a   :  { %v13368_v59 = vpop.xlane.xlu0 %13367 }
0x382b   :  { %20212 = vrcp.f32 %v13368_v59 }
0x382e   :  { %v13451_v16 = vpop.permute.xlu0 %13450 }
0x382f   :  { %19706 = vmatpush3.msk.msra.mxu1 %vm421_vm4, %v13451_v16 }
0x3830   :  { %19715 = vmatprep.subr.mxu1 %v23937_v37 }
0x3832   :  { %v13694_v51 = vpop.permute.xlu0 %13693 }
0x3836   :  { %v13692_v20 = vpop.permute.xlu0 %13691 }
0x3838   :  { %v20213_v49 = vpop.eup %20212 }
0x3839   :  { %v13372_v53 = vmul.f32 %v20213_v49, %v20211_v12 }
0x383b   :  { %19708 = vmatmul.mubr.msk.f32.vlgmr.msra.gmra.mxu1 %vm1074_vm7, %v13372_v53 }
0x383c   :  { %19716 = vmatpush3.xpose.msk.msra.mxu1 %vm155_vm0, %v13616_v57  ;;  %19717 = vmatprep.mubr.msk.f32.mxu1 %vm20403_vm5, %v23937_v37 }
0x383d   :  { %19725 = vmatprep.subr.mxu1 %v23937_v37 }
0x383f   :  { %19718 = vmatmul.mubr.msk.f32.vlgmr.msra.gmra.mxu1 %vm155_vm0, %v13614_v41 }
0x3840   :  { %19727 = vmatprep.mubr.msk.f32.mxu1 %vm20403_vm5, %v23937_v37 }
0x3853   :  { %v13446_v55 = vpop.f32.mrf.mxu0 }
0x3854   :  { %19712 = vmatprep.mubr.msk.f32.mxu0 %vm155_vm0, %v13446_v55 }
0x3855   :  { %v19704_v42 = vpop.f32.mrf.mxu0 }
0x38fb   :  { %v13523_v63 = vpop.f32.mrf.mxu1 }
0x38fc   :  { %19713 = vmatmul.mubr.msk.f32.vlgmr.msra.gmra.mxu0 %vm155_vm0, %v13523_v63 }
0x38fd   :  { %19721 = vmatpush3.xpose.msk.msra.mxu0 %vm155_vm0, %v13694_v51  ;;  %v19709_v15 = vpop.f32.mrf.mxu1  ;;  %19722 = vmatprep.mubr.msk.f32.mxu0 %vm20403_vm5, %v23937_v37 }
0x38fe   :  { %19730 = vmatprep.subr.mxu0 %v23937_v37 }
0x38ff   :  { %v13687_v21 = vpop.f32.mrf.mxu1 }
0x3900   :  { %v13769_v10 = vmul.f32 0.35355338, %v13687_v21  ;;  %19723 = vmatmul.mubr.msk.f32.vlgmr.msra.gmra.mxu0 %vm155_vm0, %v13692_v20 }
0x3901   :  { %v19719_v40 = vpop.f32.mrf.mxu1  ;;  %19732 = vmatprep.mubr.msk.f32.mxu0 %vm20403_vm5, %v23937_v37 }
0x3902   :  { %v13771_v22 = vsel %vm1074_vm7, %v13769_v10, -inf }
0x3903   :  { %13772 = vmax.xlane.f32.xlu1 %v13771_v22 }
0x398c   :  { %v13773_v43 = vpop.xlane.xlu1 %13772 }
0x398d   :  { %v13777_v1 = vsub.f32 %v13769_v10, %v13773_v43 }
0x398f   :  { %v13779_v8 = vmul.f32 1.442695, %v13777_v1  ;;  %v10057_v1 = vld [vmem:[%s23926_s7 + $0x40] sm:$0xff] }
0x3991   :  { %20214 = vpow2.f32 %v13779_v8  ;;  %v10054_v8 = vld [vmem:[%s23926_s7 + $0x28] sm:$0xff] }
0x399e   :  { %v20215_v5 = vpop.eup %20214 }
0x399f   :  { %v13783_v13 = vsel %vm1074_vm7, %v20215_v5, 0.0 }
0x39bc   :  { %v19714_v38 = vpop.f32.mrf.mxu0 }
0x39bd   :  { %v13612_v24 = vadd.f32 %v19714_v38, %v23231_v50  ;;  %v10051_v38 = vld [vmem:[%s23926_s7 + $0x10] sm:$0xff] }
0x39be   :  { %v13602_v30 = vpop.f32.mrf.mxu0 }
0x39bf   :  { %v13611_v36 = vadd.f32 %v13602_v30, %v23233_v4 }
0x39c0   :  { %v13765_v18 = vpop.f32.mrf.mxu0 }
0x39c1   :  { %v13770_v33 = vmul.f32 0.35355338, %v13765_v18 }
0x39c2   :  { %v19724_v48 = vpop.f32.mrf.mxu0 }
0x39c3   :  { %v13774_v34 = vsel %vm1074_vm7, %v13770_v33, -inf }
0x39c4   :  { %13775 = vmax.xlane.f32.xlu0 %v13774_v34  ;;  %v14064_v34 = vrot.slane %v23075_v23, %v20825_v39 }
0x39c8   :  { %13784 = vadd.xlane.f32.xlu0 %v13783_v13 }
0x39de   :  { %13793 = vrot.lane.b32.xlu0 %v23116_v26, %s20413_s30  ;;  %v20326_v26 = vld [vmem:[%s23926_s7 + $0x50] sm:$0xff] }
0x3a4d   :  { %v13776_v7 = vpop.xlane.xlu0 %13775 }
0x3a4e   :  { %v13778_v2 = vsub.f32 %v13770_v33, %v13776_v7  ;;  %v14070_v7 = vrot.slane %v23075_v23, %v21024_v56 }
0x3a50   :  { %v13781_v3 = vmul.f32 1.442695, %v13778_v2 }
0x3a51   :  { %v13785_v50 = vpop.xlane.xlu0 %13784 }
0x3a52   :  { %20216 = vpow2.f32 %v13781_v3 }
0x3a53   :  { %20218 = vrcp.f32 %v13785_v50 }
0x3a55   :  { %v13794_v4 = vpop.permute.xlu0 %13793 }
0x3a56   :  { %19726 = vmatpush3.msk.msra.mxu1 %vm421_vm4, %v13794_v4 }
0x3a5f   :  { %v20217_v25 = vpop.eup %20216 }
0x3a60   :  { %v20219_v6 = vpop.eup %20218  ;;  %v13786_v54 = vsel %vm1074_vm7, %v20217_v25, 0.0 }
0x3a61   :  { %13787 = vadd.xlane.f32.xlu1 %v13786_v54  ;;  %v13790_v46 = vmul.f32 %v20219_v6, %v20215_v5  ;;  %v10070_v54 = vld [vmem:[%s23927_s8 + $0x38] sm:$0xff] }
0x3a63   :  { %19728 = vmatmul.mubr.msk.f32.vlgmr.msra.gmra.mxu1 %vm1074_vm7, %v13790_v46  ;;  %v10069_v46 = vld [vmem:[%s23927_s8 + $0x30] sm:$0xff] }
0x3a72   :  { %13870 = vrot.lane.b32.xlu1 %v23121_v35, %s20413_s30 }
0x3a76   :  { %13947 = vrot.lane.b32.xlu1 %v20326_v26, %s20406_s2  ;;  %v10068_v26 = vld [vmem:[%s23927_s8 + $0x28] sm:$0xff] }
0x3aea   :  { %v13788_v17 = vpop.xlane.xlu1 %13787 }
0x3aeb   :  { %20220 = vrcp.f32 %v13788_v17  ;;  %v10067_v17 = vld [vmem:[%s23927_s8 + $0x20] sm:$0xff] }
0x3aee   :  { %v13871_v9 = vpop.permute.xlu1 %13870 }
0x3aef   :  { %19731 = vmatpush3.msk.msra.mxu0 %vm421_vm4, %v13871_v9  ;;  %v10066_v9 = vld [vmem:[%s23927_s8 + $0x18] sm:$0xff] }
0x3af2   :  { %v13948_v14 = vpop.permute.xlu1 %13947 }
0x3af3   :  { %19735 = vmatprep.subr.mxu1 %v13948_v14 }
0x3af4   :  { %19736 = vmatpush3.msra.mxu1 %v13948_v14  ;;  %v10065_v14 = vld [vmem:[%s23927_s8 + $0x10] sm:$0xff] }
0x3af5   :  { %19751 = vmatprep.subr.mxu1 %v10070_v54 }
0x3af8   :  { %v20221_v32 = vpop.eup %20220 }
0x3af9   :  { %v13792_v11 = vmul.f32 %v20221_v32, %v20217_v25  ;;  %v10064_v32 = vld [vmem:[%s23927_s8 + $0x8] sm:$0xff] }
0x3afb   :  { %19733 = vmatmul.mubr.msk.f32.vlgmr.msra.gmra.mxu0 %vm1074_vm7, %v13792_v11  ;;  %v10063_v11 = vld [vmem:[%s23927_s8] sm:$0xff] }
0x3b23   :  { %v13866_v44 = vpop.f32.mrf.mxu1 }
0x3b24   :  { %19737 = vmatprep.mubr.msk.f32.mxu1 %vm155_vm0, %v13866_v44  ;;  %v14076_v44 = vrot.slane %v23068_v58, %v21033_v28 }
0x3b25   :  { %v19729_v35 = vpop.f32.mrf.mxu1 }
0x3bbb   :  { %v13943_v12 = vpop.f32.mrf.mxu0 }
0x3bbc   :  { %19738 = vmatmul.mubr.msk.f32.vlgmr.msra.gmra.mxu1 %vm155_vm0, %v13943_v12 }
0x3bbd   :  { %v19734_v19 = vpop.f32.mrf.mxu0  ;;  %19752 = vmatpush3.msra.mxu1 %v10070_v54 }
0x3bbe   :  { %19753 = vmatprep.subr.mxu1 %v10069_v46 }
0x3bbf   :  { %19754 = vmatpush3.msra.mxu1 %v10069_v46 }
0x3bc0   :  { %19755 = vmatprep.subr.mxu1 %v10068_v26 }
0x3bc1   :  { %19756 = vmatpush3.msra.mxu1 %v10068_v26  ;;  %v14284_v26 = vrot.slane %v23075_v23, %v21027_v47 }
0x3bc2   :  { %19757 = vmatprep.subr.mxu1 %v10067_v17 }
0x3bc3   :  { %19758 = vmatpush3.msra.mxu1 %v10067_v17 }
0x3bc4   :  { %19759 = vmatprep.subr.mxu1 %v10066_v9 }
0x3bc5   :  { %19760 = vmatpush3.msra.mxu1 %v10066_v9 }
0x3bc6   :  { %19761 = vmatprep.subr.mxu1 %v10065_v14 }
0x3bc7   :  { %19762 = vmatpush3.msra.mxu1 %v10065_v14 }
0x3bc8   :  { %19763 = vmatprep.subr.mxu1 %v10064_v32 }
0x3bc9   :  { %19764 = vmatpush3.msra.mxu1 %v10064_v32 }
0x3bca   :  { %19765 = vmatprep.subr.mxu1 %v10063_v11 }
0x3bcb   :  { %19766 = vmatpush3.msra.mxu1 %v10063_v11  ;;  %v14290_v11 = vrot.slane %v23075_v23, %v21030_v52 }
0x3bcc   :  { %19786 = vmatprep.subr.mxu1 %v23937_v37 }
0x3c7c   :  { %v19739_v59 = vpop.f32.mrf.mxu1 }
0x3c7d   :  { %v14032_v16 = vadd.f32 %v19739_v59, %v13612_v24 }
0x3c7e   :  { %v14022_v49 = vpop.f32.mrf.mxu1 }
0x3c7f   :  { %v14034_v57 = vadd.f32 %v14032_v16, %v23083_v27  ;;  %v14031_v53 = vadd.f32 %v14022_v49, %v13611_v36 }
0x3c81   :  { %v14033_v41 = vadd.f32 %v14031_v53, %v23081_v29  ;;  %v14038_v55 = vsel %vm617_vm3, %v14034_v57, 0.0  ;;  %v10060_v29 = vld [vmem:[%s23926_s7 + $0x58] sm:$0xff] }
0x3c82   :  { %14039 = vadd.xlane.f32.xlu1 %v14038_v55  ;;  %19740 = vmatprep.subr.mxu0 %v10060_v29 }
0x3c83   :  { %v14035_v42 = vsel %vm617_vm3, %v14033_v41, 0.0  ;;  %19741 = vmatpush3.msra.mxu0 %v10060_v29 }
0x3c84   :  { %14036 = vadd.xlane.f32.xlu0 %v14035_v42  ;;  %19742 = vmatprep.subr.mxu0 %v10057_v1 }
0x3c85   :  { %19743 = vmatpush3.msra.mxu0 %v10057_v1 }
0x3c86   :  { %19744 = vmatprep.subr.mxu0 %v10054_v8 }
0x3c87   :  { %19745 = vmatpush3.msra.mxu0 %v10054_v8 }
0x3c88   :  { %19746 = vmatprep.subr.mxu0 %v10051_v38 }
0x3c89   :  { %19747 = vmatpush3.msra.mxu0 %v10051_v38 }
0x3d0b   :  { %v14040_v51 = vpop.xlane.xlu1 %14039 }
0x3d0c   :  { %v14042_v63 = vmul.f32 0.03125, %v14040_v51 }
0x3d0d   :  { %v14037_v15 = vpop.xlane.xlu0 %14036 }
0x3d0e   :  { %v14041_v20 = vmul.f32 0.03125, %v14037_v15  ;;  %v14044_v21 = vsub.f32 %v14034_v57, %v14042_v63 }
0x3d10   :  { %v14043_v10 = vsub.f32 %v14033_v41, %v14041_v20  ;;  %v14046_v43 = vmul.f32 %v14044_v21, %v14044_v21  ;;  %v14171_v20 = vrot.slane %v23068_v58, %v21040_v61 }
0x3d12   :  { %v14045_v40 = vmul.f32 %v14043_v10, %v14043_v10  ;;  %v14050_v27 = vsel %vm617_vm3, %v14046_v43, 0.0 }
0x3d14   :  { %v14047_v22 = vsel %vm617_vm3, %v14045_v40, 0.0 }
0x3d15   :  { %14048 = vadd.xlane.f32.xlu0 %v14047_v22 }
0x3d19   :  { %14051 = vadd.xlane.f32.xlu0 %v14050_v27 }
0x3d9e   :  { %v14049_v24 = vpop.xlane.xlu0 %14048 }
0x3d9f   :  { %v14053_v30 = vmul.f32 0.03125, %v14049_v24 }
0x3da1   :  { %v14055_v36 = vadd.f32 1e-05, %v14053_v30 }
0x3da2   :  { %v14052_v18 = vpop.xlane.xlu0 %14051 }
0x3da3   :  { %20222 = vrsqrt.f32 %v14055_v36  ;;  %v14054_v33 = vmul.f32 0.03125, %v14052_v18 }
0x3da5   :  { %v14056_v48 = vadd.f32 1e-05, %v14054_v33 }
0x3da7   :  { %20224 = vrsqrt.f32 %v14056_v48 }
0x3db0   :  { %v20223_v5 = vpop.eup %20222 }
0x3db1   :  { %v14059_v13 = vmul.f32 %v20223_v5, %v14043_v10  ;;  %v23357_v5 = vld [vmem:[%s23926_s7 + $0xa8] sm:$0xff] }
0x3db2   :  { %19770 = vmatprep.subr.mxu0 %v23357_v5 }
0x3db3   :  { %v14065_v2 = vmul.f32 %v14064_v34, %v14059_v13  ;;  %v23362_v13 = vld [vmem:[%s23926_s7 + $0x90] sm:$0xff] }
0x3db4   :  { %v20225_v3 = vpop.eup %20224 }
0x3db5   :  { %v14060_v50 = vmul.f32 %v20225_v3, %v14044_v21  ;;  %v14071_v4 = vadd.f32 %v14070_v7, %v14065_v2  ;;  %v23376_v2 = vld [vmem:[%s23926_s7 + $0x60] sm:$0xff] }
0x3db7   :  { %v14066_v25 = vmul.f32 %v14064_v34, %v14060_v50  ;;  %19748 = vmatprep.mubr.msk.f32.mxu0 %vm617_vm3, %v14071_v4 }
0x3db9   :  { %v14072_v6 = vadd.f32 %v14070_v7, %v14066_v25  ;;  %v23369_v7 = vld [vmem:[%s23926_s7 + $0x78] sm:$0xff] }
0x3dbb   :  { %19749 = vmatmul.mubr.msk.f32.vlgmr.msra.gmra.mxu0 %vm617_vm3, %v14072_v6 }
0x3dbc   :  { %19771 = vmatpush3.msra.mxu0 %v23357_v5 }
0x3dbd   :  { %19772 = vmatprep.subr.mxu0 %v23362_v13 }
0x3dbe   :  { %19773 = vmatpush3.msra.mxu0 %v23362_v13 }
0x3dbf   :  { %19774 = vmatprep.subr.mxu0 %v23369_v7 }
0x3dc0   :  { %19775 = vmatpush3.msra.mxu0 %v23369_v7 }
0x3dc1   :  { %19776 = vmatprep.subr.mxu0 %v23376_v2 }
0x3dc2   :  { %19777 = vmatpush3.msra.mxu0 %v23376_v2 }
0x3dc3   :  { %19781 = vmatprep.subr.mxu0 %v23937_v37 }
0x3e7b   :  { %v19750_v35 = vpop.f32.mrf.mxu0 }
0x3e7c   :  { %v14155_v12 = vadd.f32 %v19750_v35, %v14076_v44 }
0x3e7d   :  { %v14149_v19 = vpop.f32.mrf.mxu0 }
0x3e7e   :  { %v14161_v59 = vmul.f32 0.70710677, %v14155_v12  ;;  %v14150_v16 = vadd.f32 %v14149_v19, %v14076_v44  ;;  %v14159_v51 = vmul.f32 0.5, %v14155_v12  ;;  %v23400_v19 = vld [vmem:[%s23928_s9 + $0x10] sm:$0xff] }
0x3e7f   :  { %v14321_v23 = vrot.slane %v23400_v19, %v20533_v31 }
0x3e80   :  { %20226 = verf.f32 %v14161_v59  ;;  %v14160_v49 = vmul.f32 0.70710677, %v14150_v16  ;;  %v14158_v55 = vmul.f32 0.5, %v14150_v16 }
0x3e82   :  { %20228 = verf.f32 %v14160_v49 }
0x3e8d   :  { %v20227_v57 = vpop.eup %20226 }
0x3e8e   :  { %v14165_v41 = vadd.f32 1.0, %v20227_v57 }
0x3e8f   :  { %v20229_v53 = vpop.eup %20228 }
0x3e90   :  { %v14164_v42 = vadd.f32 1.0, %v20229_v53  ;;  %v14167_v15 = vmul.f32 %v14165_v41, %v14159_v51 }
0x3e92   :  { %v14166_v63 = vmul.f32 %v14164_v42, %v14158_v55 }
0x3e94   :  { %19767 = vmatprep.mubr.msk.f32.mxu1 %vm4212_vm8, %v14166_v63 }
0x3e95   :  { %19768 = vmatmul.mubr.msk.f32.vlgmr.msra.gmra.mxu1 %vm4212_vm8, %v14167_v15 }
0x3e96   :  { %19788 = vmatprep.mubr.msk.f32.mxu1 %vm20403_vm5, %v23937_v37 }
0x3f55   :  { %v19769_v21 = vpop.f32.mrf.mxu1 }
0x3f56   :  { %v14250_v10 = vadd.f32 %v19769_v21, %v14171_v20 }
0x3f57   :  { %v14244_v40 = vpop.f32.mrf.mxu1 }
0x3f58   :  { %v14254_v22 = vadd.f32 %v14250_v10, %v14072_v6  ;;  %v14245_v43 = vadd.f32 %v14244_v40, %v14171_v20 }
0x3f5a   :  { %v14253_v27 = vadd.f32 %v14245_v43, %v14071_v4  ;;  %v14258_v29 = vsel %vm617_vm3, %v14254_v22, 0.0 }
0x3f5b   :  { %14259 = vadd.xlane.f32.xlu0 %v14258_v29 }
0x3f5c   :  { %v14255_v1 = vsel %vm617_vm3, %v14253_v27, 0.0 }
0x3f5d   :  { %14256 = vadd.xlane.f32.xlu1 %v14255_v1 }
0x3fe4   :  { %v14260_v8 = vpop.xlane.xlu0 %14259 }
0x3fe5   :  { %v14262_v38 = vmul.f32 0.03125, %v14260_v8 }
0x3fe6   :  { %v14257_v24 = vpop.xlane.xlu1 %14256 }
0x3fe7   :  { %v14264_v30 = vsub.f32 %v14254_v22, %v14262_v38  ;;  %v14261_v36 = vmul.f32 0.03125, %v14257_v24 }
0x3fe9   :  { %v14263_v18 = vsub.f32 %v14253_v27, %v14261_v36  ;;  %v14266_v33 = vmul.f32 %v14264_v30, %v14264_v30 }
0x3feb   :  { %v14270_v58 = vsel %vm617_vm3, %v14266_v33, 0.0  ;;  %v14265_v48 = vmul.f32 %v14263_v18, %v14263_v18 }
0x3fec   :  { %14271 = vadd.xlane.f32.xlu0 %v14270_v58 }
0x3fed   :  { %v14267_v34 = vsel %vm617_vm3, %v14265_v48, 0.0 }
0x3fee   :  { %14268 = vadd.xlane.f32.xlu1 %v14267_v34 }
0x4075   :  { %v14272_v3 = vpop.xlane.xlu0 %14271 }
0x4076   :  { %v14274_v50 = vmul.f32 0.03125, %v14272_v3 }
0x4077   :  { %v14269_v4 = vpop.xlane.xlu1 %14268 }
0x4078   :  { %v14276_v25 = vadd.f32 1e-05, %v14274_v50  ;;  %v14273_v6 = vmul.f32 0.03125, %v14269_v4 }
0x407a   :  { %20230 = vrsqrt.f32 %v14276_v25  ;;  %v14275_v54 = vadd.f32 1e-05, %v14273_v6 }
0x407c   :  { %20232 = vrsqrt.f32 %v14275_v54 }
0x4087   :  { %v20231_v46 = vpop.eup %20230 }
0x4088   :  { %v14280_v17 = vmul.f32 %v20231_v46, %v14264_v30 }
0x4089   :  { %v20233_v9 = vpop.eup %20232 }
0x408a   :  { %v14279_v14 = vmul.f32 %v20233_v9, %v14263_v18  ;;  %v14286_v32 = vmul.f32 %v14284_v26, %v14280_v17 }
0x408c   :  { %v14285_v44 = vmul.f32 %v14284_v26, %v14279_v14  ;;  %v23389_v12 = vadd.f32 %v14290_v11, %v14286_v32 }
0x408e   :  { %v23387_v35 = vadd.f32 %v14290_v11, %v14285_v44 }
0x4090   :  { %19778 = vmatprep.mubr.msk.f32.mxu0 %vm617_vm3, %v23387_v35 }
0x4091   :  { %19779 = vmatmul.mubr.msk.f32.vlgmr.msra.gmra.mxu0 %vm617_vm3, %v23389_v12 }
0x4092   :  { %19783 = vmatprep.mubr.msk.f32.mxu0 %vm20403_vm5, %v23937_v37 }
0x4151   :  { %v19780_v59 = vpop.f32.mrf.mxu0 }
0x4152   :  { %v23404_v16 = vadd.f32 %v19780_v59, %v14321_v23 }
0x4153   :  { %v14394_v49 = vpop.f32.mrf.mxu0 }
0x4154   :  { %v23406_v57 = vadd.f32 %v14394_v49, %v14321_v23  ;;  %14485 = vrot.lane.b32.xlu0 %v23404_v16, %s20404_s23 }
0x4156   :  { %14408 = vrot.lane.b32.xlu1 %v23406_v57, %s20404_s23 }
0x41c6   :  { %v14486_v53 = vpop.permute.xlu0 %14485 }
0x41c7   :  { %19787 = vmatpush3.xpose.msk.msra.mxu1 %vm155_vm0, %v14486_v53 }
0x41c8   :  { %v14409_v41 = vpop.permute.xlu1 %14408  ;;  %19796 = vmatprep.subr.mxu1 %v23937_v37 }
0x41c9   :  { %19782 = vmatpush3.xpose.msk.msra.mxu0 %vm155_vm0, %v14409_v41 }
0x41ca   :  { %19789 = vmatmul.mubr.msk.f32.vlgmr.msra.gmra.mxu1 %vm155_vm0, %v23404_v16  ;;  %19791 = vmatprep.subr.mxu0 %v23937_v37 }
0x41cb   :  { %19798 = vmatprep.mubr.msk.f32.mxu1 %vm20403_vm5, %v23937_v37 }
0x41cc   :  { %19784 = vmatmul.mubr.msk.f32.vlgmr.msra.gmra.mxu0 %vm155_vm0, %v23406_v57 }
0x41cd   :  { %19793 = vmatprep.mubr.msk.f32.mxu0 %vm20403_vm5, %v23937_v37 }
0x428a   :  { %v14557_v55 = vpop.f32.mrf.mxu1 }
0x428b   :  { %v14562_v42 = vmul.f32 0.35355338, %v14557_v55 }
0x428c   :  { %v14480_v51 = vpop.f32.mrf.mxu0  ;;  %v19790_v63 = vpop.f32.mrf.mxu1 }
0x428d   :  { %v14561_v15 = vmul.f32 0.35355338, %v14480_v51  ;;  %v14566_v20 = vsel %vm155_vm0, %v14562_v42, -inf }
0x428e   :  { %14567 = vmax.xlane.f32.xlu0 %v14566_v20  ;;  %v19785_v21 = vpop.f32.mrf.mxu0 }
0x428f   :  { %v14563_v10 = vsel %vm155_vm0, %v14561_v15, -inf }
0x4290   :  { %14564 = vmax.xlane.f32.xlu1 %v14563_v10 }
0x4317   :  { %v14568_v40 = vpop.xlane.xlu0 %14567 }
0x4318   :  { %v14570_v22 = vsub.f32 %v14562_v42, %v14568_v40 }
0x4319   :  { %v14565_v43 = vpop.xlane.xlu1 %14564 }
0x431a   :  { %v14573_v27 = vmul.f32 1.442695, %v14570_v22  ;;  %v14569_v29 = vsub.f32 %v14561_v15, %v14565_v43 }
0x431c   :  { %20234 = vpow2.f32 %v14573_v27  ;;  %v14571_v1 = vmul.f32 1.442695, %v14569_v29 }
0x431e   :  { %20236 = vpow2.f32 %v14571_v1 }
0x4329   :  { %v20235_v8 = vpop.eup %20234 }
0x432a   :  { %v14578_v38 = vsel %vm155_vm0, %v20235_v8, 0.0 }
0x432b   :  { %v20237_v24 = vpop.eup %20236  ;;  %14579 = vadd.xlane.f32.xlu0 %v14578_v38 }
0x432c   :  { %v14575_v30 = vsel %vm155_vm0, %v20237_v24, 0.0 }
0x432d   :  { %14576 = vadd.xlane.f32.xlu1 %v14575_v30 }
0x433e   :  { %14585 = vrot.lane.b32.xlu1 %v23406_v57, %s20405_s24 }
0x4341   :  { %14661 = vrot.lane.b32.xlu0 %v23404_v16, %s20405_s24 }
0x4342   :  { %14738 = vrot.lane.b32.xlu1 %v23376_v2, %s20406_s2 }
0x4345   :  { %14904 = vrot.lane.b32.xlu0 %v23404_v16, %s20407_s25 }
0x4346   :  { %14826 = vrot.lane.b32.xlu1 %v23406_v57, %s20407_s25 }
0x4349   :  { %14902 = vrot.lane.b32.xlu0 %v23404_v16, %s20408_s6 }
0x434a   :  { %14824 = vrot.lane.b32.xlu1 %v23406_v57, %s20408_s6 }
0x43b4   :  { %v14580_v36 = vpop.xlane.xlu0 %14579 }
0x43b5   :  { %20238 = vrcp.f32 %v14580_v36 }
0x43b6   :  { %v14577_v18 = vpop.xlane.xlu1 %14576 }
0x43b7   :  { %20240 = vrcp.f32 %v14577_v18 }
0x43b8   :  { %v14662_v33 = vpop.permute.xlu0 %14661 }
0x43b9   :  { %19797 = vmatpush3.msra.mxu1 %v14662_v33 }
0x43ba   :  { %v14586_v58 = vpop.permute.xlu1 %14585  ;;  %19806 = vmatprep.subr.mxu1 %v23937_v37 }
0x43bb   :  { %19792 = vmatpush3.msra.mxu0 %v14586_v58 }
0x43bc   :  { %v14905_v54 = vpop.permute.xlu0 %14904 }
0x43be   :  { %v14739_v48 = vpop.permute.xlu1 %14738 }
0x43bf   :  { %19801 = vmatprep.subr.mxu0 %v14739_v48 }
0x43c0   :  { %v14903_v11 = vpop.permute.xlu0 %14902 }
0x43c2   :  { %v20239_v34 = vpop.eup %20238  ;;  %v14827_v2 = vpop.permute.xlu1 %14826 }
0x43c3   :  { %v14584_v3 = vmul.f32 %v20239_v34, %v20235_v8 }
0x43c4   :  { %v20241_v50 = vpop.eup %20240 }
0x43c5   :  { %19799 = vmatmul.mubr.msk.f32.vlgmr.msra.gmra.mxu1 %vm155_vm0, %v14584_v3  ;;  %v14582_v4 = vmul.f32 %v20241_v50, %v20237_v24 }
0x43c6   :  { %19807 = vmatpush3.xpose.msk.msra.mxu1 %vm155_vm0, %v14827_v2  ;;  %19808 = vmatprep.mubr.msk.f32.mxu1 %vm20403_vm5, %v23937_v37  ;;  %v14825_v25 = vpop.permute.xlu1 %14824 }
0x43c7   :  { %19794 = vmatmul.mubr.msk.f32.vlgmr.msra.gmra.mxu0 %vm155_vm0, %v14582_v4  ;;  %19816 = vmatprep.subr.mxu1 %v23937_v37 }
0x43c8   :  { %19802 = vmatpush3.msra.mxu0 %v14739_v48 }
0x43c9   :  { %19809 = vmatmul.mubr.msk.f32.vlgmr.msra.gmra.mxu1 %vm155_vm0, %v14825_v25  ;;  %19811 = vmatprep.subr.mxu0 %v23937_v37 }
0x43ca   :  { %19818 = vmatprep.mubr.msk.f32.mxu1 %vm20403_vm5, %v23937_v37 }
0x4485   :  { %v14733_v6 = vpop.f32.mrf.mxu1 }
0x4487   :  { %v14657_v46 = vpop.f32.mrf.mxu0  ;;  %v19800_v26 = vpop.f32.mrf.mxu1 }
0x4488   :  { %19803 = vmatprep.mubr.msk.f32.mxu0 %vm155_vm0, %v14657_v46 }
0x4489   :  { %v19795_v17 = vpop.f32.mrf.mxu0  ;;  %19804 = vmatmul.mubr.msk.f32.vlgmr.msra.gmra.mxu0 %vm155_vm0, %v14733_v6  ;;  %v14898_v9 = vpop.f32.mrf.mxu1 }
0x448a   :  { %v14980_v14 = vmul.f32 0.35355338, %v14898_v9  ;;  %19812 = vmatpush3.xpose.msk.msra.mxu0 %vm155_vm0, %v14905_v54  ;;  %19813 = vmatprep.mubr.msk.f32.mxu0 %vm20403_vm5, %v23937_v37 }
0x448b   :  { %v19810_v32 = vpop.f32.mrf.mxu1  ;;  %19821 = vmatprep.subr.mxu0 %v23937_v37 }
0x448c   :  { %v14982_v44 = vsel %vm155_vm0, %v14980_v14, -inf  ;;  %v14406_v32 = vrot.slane %v23400_v19, %v20825_v39 }
0x448d   :  { %14983 = vmax.xlane.f32.xlu1 %v14982_v44  ;;  %19814 = vmatmul.mubr.msk.f32.vlgmr.msra.gmra.mxu0 %vm155_vm0, %v14903_v11 }
0x448e   :  { %19823 = vmatprep.mubr.msk.f32.mxu0 %vm20403_vm5, %v23937_v37 }
0x4516   :  { %v14984_v23 = vpop.xlane.xlu1 %14983 }
0x4517   :  { %v14988_v59 = vsub.f32 %v14980_v14, %v14984_v23 }
0x4519   :  { %v14990_v49 = vmul.f32 1.442695, %v14988_v59 }
0x451b   :  { %20242 = vpow2.f32 %v14990_v49 }
0x4528   :  { %v20243_v15 = vpop.eup %20242 }
0x4529   :  { %v14994_v20 = vsel %vm155_vm0, %v20243_v15, 0.0 }
0x4549   :  { %v23463_v53 = vpop.f32.mrf.mxu0 }
0x454a   :  { %v14823_v11 = vadd.f32 %v23463_v53, %v14406_v32 }
0x454b   :  { %v23465_v41 = vpop.f32.mrf.mxu0 }
0x454c   :  { %v14822_v23 = vadd.f32 %v23465_v41, %v14406_v32 }
0x454d   :  { %v14976_v55 = vpop.f32.mrf.mxu0 }
0x454e   :  { %v14981_v42 = vmul.f32 0.35355338, %v14976_v55 }
0x454f   :  { %v19815_v51 = vpop.f32.mrf.mxu0 }
0x4550   :  { %v14985_v63 = vsel %vm155_vm0, %v14981_v42, -inf }
0x4551   :  { %14986 = vmax.xlane.f32.xlu0 %v14985_v63 }
0x4555   :  { %14995 = vadd.xlane.f32.xlu0 %v14994_v20 }
0x456b   :  { %15004 = vrot.lane.b32.xlu0 %v23406_v57, %s20409_s26 }
0x456f   :  { %15245 = vrot.lane.b32.xlu0 %v23406_v57, %s20410_s27 }
0x4573   :  { %15243 = vrot.lane.b32.xlu0 %v23406_v57, %s20411_s28 }
0x45da   :  { %v14987_v21 = vpop.xlane.xlu0 %14986 }
0x45db   :  { %v14989_v10 = vsub.f32 %v14981_v42, %v14987_v21 }
0x45dd   :  { %v14992_v40 = vmul.f32 1.442695, %v14989_v10 }
0x45de   :  { %v14996_v22 = vpop.xlane.xlu0 %14995 }
0x45df   :  { %20244 = vpow2.f32 %v14992_v40 }
0x45e0   :  { %20246 = vrcp.f32 %v14996_v22 }
0x45e2   :  { %v15005_v43 = vpop.permute.xlu0 %15004 }
0x45e3   :  { %19817 = vmatpush3.msra.mxu1 %v15005_v43 }
0x45e6   :  { %v15246_v18 = vpop.permute.xlu0 %15245 }
0x45ea   :  { %v15244_v33 = vpop.permute.xlu0 %15243 }
0x45ec   :  { %v20245_v27 = vpop.eup %20244 }
0x45ed   :  { %v20247_v29 = vpop.eup %20246  ;;  %v14997_v1 = vsel %vm155_vm0, %v20245_v27, 0.0 }
0x45ee   :  { %14998 = vadd.xlane.f32.xlu1 %v14997_v1  ;;  %v15001_v8 = vmul.f32 %v20247_v29, %v20243_v15 }
0x45f0   :  { %19819 = vmatmul.mubr.msk.f32.vlgmr.msra.gmra.mxu1 %vm155_vm0, %v15001_v8 }
0x45ff   :  { %15080 = vrot.lane.b32.xlu1 %v23404_v16, %s20409_s26 }
0x4603   :  { %15157 = vrot.lane.b32.xlu1 %v23369_v7, %s20406_s2 }
0x4607   :  { %15323 = vrot.lane.b32.xlu1 %v23404_v16, %s20410_s27 }
0x460b   :  { %15321 = vrot.lane.b32.xlu1 %v23404_v16, %s20411_s28 }
0x4677   :  { %v14999_v38 = vpop.xlane.xlu1 %14998 }
0x4678   :  { %20248 = vrcp.f32 %v14999_v38 }
0x467b   :  { %v15081_v24 = vpop.permute.xlu1 %15080 }
0x467c   :  { %19822 = vmatpush3.msra.mxu0 %v15081_v24 }
0x467d   :  { %19831 = vmatprep.subr.mxu0 %v23937_v37 }
0x467f   :  { %v15158_v30 = vpop.permute.xlu1 %15157 }
0x4680   :  { %19826 = vmatprep.subr.mxu1 %v15158_v30 }
0x4681   :  { %19827 = vmatpush3.msra.mxu1 %v15158_v30 }
0x4682   :  { %19836 = vmatprep.subr.mxu1 %v23937_v37 }
0x4683   :  { %v15324_v34 = vpop.permute.xlu1 %15323 }
0x4685   :  { %v20249_v36 = vpop.eup %20248 }
0x4686   :  { %v15003_v7 = vmul.f32 %v20249_v36, %v20245_v27 }
0x4687   :  { %v15322_v50 = vpop.permute.xlu1 %15321 }
0x4688   :  { %19824 = vmatmul.mubr.msk.f32.vlgmr.msra.gmra.mxu0 %vm155_vm0, %v15003_v7 }
0x4689   :  { %19832 = vmatpush3.xpose.msk.msra.mxu0 %vm155_vm0, %v15246_v18  ;;  %19833 = vmatprep.mubr.msk.f32.mxu0 %vm20403_vm5, %v23937_v37 }
0x468a   :  { %19841 = vmatprep.subr.mxu0 %v23937_v37 }
0x468c   :  { %19834 = vmatmul.mubr.msk.f32.vlgmr.msra.gmra.mxu0 %vm155_vm0, %v15244_v33 }
0x468d   :  { %19843 = vmatprep.mubr.msk.f32.mxu0 %vm20403_vm5, %v23937_v37 }
0x46b0   :  { %v15076_v58 = vpop.f32.mrf.mxu1 }
0x46b1   :  { %19828 = vmatprep.mubr.msk.f32.mxu1 %vm155_vm0, %v15076_v58 }
0x46b2   :  { %v19820_v48 = vpop.f32.mrf.mxu1 }
0x4748   :  { %v15152_v2 = vpop.f32.mrf.mxu0 }
0x4749   :  { %19829 = vmatmul.mubr.msk.f32.vlgmr.msra.gmra.mxu1 %vm155_vm0, %v15152_v2 }
0x474a   :  { %19837 = vmatpush3.xpose.msk.msra.mxu1 %vm155_vm0, %v15324_v34  ;;  %v19825_v3 = vpop.f32.mrf.mxu0  ;;  %19838 = vmatprep.mubr.msk.f32.mxu1 %vm20403_vm5, %v23937_v37 }
0x474b   :  { %19846 = vmatprep.subr.mxu1 %v23937_v37 }
0x474c   :  { %v15317_v4 = vpop.f32.mrf.mxu0 }
0x474d   :  { %v15399_v25 = vmul.f32 0.35355338, %v15317_v4  ;;  %19839 = vmatmul.mubr.msk.f32.vlgmr.msra.gmra.mxu1 %vm155_vm0, %v15322_v50 }
0x474e   :  { %v19835_v6 = vpop.f32.mrf.mxu0  ;;  %19848 = vmatprep.mubr.msk.f32.mxu1 %vm20403_vm5, %v23937_v37 }
0x474f   :  { %v15401_v54 = vsel %vm155_vm0, %v15399_v25, -inf }
0x4750   :  { %15402 = vmax.xlane.f32.xlu0 %v15401_v54 }
0x47d9   :  { %v15403_v46 = vpop.xlane.xlu0 %15402 }
0x47da   :  { %v15407_v26 = vsub.f32 %v15399_v25, %v15403_v46 }
0x47dc   :  { %v15409_v17 = vmul.f32 1.442695, %v15407_v26 }
0x47de   :  { %20250 = vpow2.f32 %v15409_v17 }
0x47eb   :  { %v20251_v9 = vpop.eup %20250 }
0x47ec   :  { %v15413_v14 = vsel %vm155_vm0, %v20251_v9, 0.0 }
0x47ed   :  { %15414 = vadd.xlane.f32.xlu0 %v15413_v14 }
0x4809   :  { %v19830_v44 = vpop.f32.mrf.mxu1 }
0x480a   :  { %v23510_v59 = vadd.f32 %v19830_v44, %v14823_v11 }
0x480b   :  { %v15232_v49 = vpop.f32.mrf.mxu1 }
0x480c   :  { %v23512_v55 = vadd.f32 %v15232_v49, %v14822_v23 }
0x480d   :  { %v15395_v42 = vpop.f32.mrf.mxu1 }
0x480e   :  { %v15400_v51 = vmul.f32 0.35355338, %v15395_v42 }
0x480f   :  { %v19840_v63 = vpop.f32.mrf.mxu1 }
0x4810   :  { %v15404_v15 = vsel %vm155_vm0, %v15400_v51, -inf }
0x4811   :  { %15405 = vmax.xlane.f32.xlu1 %v15404_v15 }
0x4822   :  { %15423 = vrot.lane.b32.xlu1 %v23406_v57, %s20412_s29 }
0x4826   :  { %15576 = vrot.lane.b32.xlu1 %v23362_v13, %s20406_s2 }
0x482a   :  { %15664 = vrot.lane.b32.xlu1 %v23406_v57, %s20413_s30 }
0x482e   :  { %15662 = vrot.lane.b32.xlu1 %v23406_v57, %s20414_s1 }
0x4876   :  { %v15415_v53 = vpop.xlane.xlu0 %15414 }
0x4877   :  { %20252 = vrcp.f32 %v15415_v53 }
0x4884   :  { %v20253_v20 = vpop.eup %20252 }
0x4885   :  { %v15420_v22 = vmul.f32 %v20253_v20, %v20251_v9 }
0x489a   :  { %v15406_v41 = vpop.xlane.xlu1 %15405 }
0x489b   :  { %v15408_v21 = vsub.f32 %v15400_v51, %v15406_v41 }
0x489d   :  { %v15411_v10 = vmul.f32 1.442695, %v15408_v21 }
0x489e   :  { %v15424_v40 = vpop.permute.xlu1 %15423 }
0x489f   :  { %20254 = vpow2.f32 %v15411_v10  ;;  %19842 = vmatpush3.msra.mxu0 %v15424_v40 }
0x48a0   :  { %19844 = vmatmul.mubr.msk.f32.vlgmr.msra.gmra.mxu0 %vm155_vm0, %v15420_v22 }
0x48a2   :  { %v15577_v43 = vpop.permute.xlu1 %15576 }
0x48a3   :  { %19851 = vmatprep.subr.mxu0 %v15577_v43 }
0x48a4   :  { %19852 = vmatpush3.msra.mxu0 %v15577_v43 }
0x48a5   :  { %19861 = vmatprep.subr.mxu0 %v23937_v37 }
0x48a6   :  { %v15665_v38 = vpop.permute.xlu1 %15664 }
0x48aa   :  { %v15663_v30 = vpop.permute.xlu1 %15662 }
0x48ac   :  { %v20255_v13 = vpop.eup %20254 }
0x48ad   :  { %v15416_v27 = vsel %vm155_vm0, %v20255_v13, 0.0 }
0x48ae   :  { %15417 = vadd.xlane.f32.xlu0 %v15416_v27 }
0x48c4   :  { %15499 = vrot.lane.b32.xlu0 %v23404_v16, %s20412_s29 }
0x48c8   :  { %15742 = vrot.lane.b32.xlu0 %v23404_v16, %s20413_s30 }
0x48cc   :  { %15740 = vrot.lane.b32.xlu0 %v23404_v16, %s20414_s1 }
0x4937   :  { %v15418_v29 = vpop.xlane.xlu0 %15417 }
0x4938   :  { %20256 = vrcp.f32 %v15418_v29 }
0x493b   :  { %v15500_v1 = vpop.permute.xlu0 %15499 }
0x493c   :  { %19847 = vmatpush3.msra.mxu1 %v15500_v1 }
0x493d   :  { %19856 = vmatprep.subr.mxu1 %v23937_v37 }
0x493f   :  { %v15743_v7 = vpop.permute.xlu0 %15742 }
0x4943   :  { %v15741_v48 = vpop.permute.xlu0 %15740 }
0x4945   :  { %v20257_v8 = vpop.eup %20256 }
0x4946   :  { %v15422_v24 = vmul.f32 %v20257_v8, %v20255_v13 }
0x4948   :  { %19849 = vmatmul.mubr.msk.f32.vlgmr.msra.gmra.mxu1 %vm155_vm0, %v15422_v24 }
0x4949   :  { %19857 = vmatpush3.xpose.msk.msra.mxu1 %vm155_vm0, %v15665_v38  ;;  %19858 = vmatprep.mubr.msk.f32.mxu1 %vm20403_vm5, %v23937_v37 }
0x494a   :  { %19866 = vmatprep.subr.mxu1 %v23937_v37 }
0x494c   :  { %19859 = vmatmul.mubr.msk.f32.vlgmr.msra.gmra.mxu1 %vm155_vm0, %v15663_v30 }
0x494d   :  { %19868 = vmatprep.mubr.msk.f32.mxu1 %vm20403_vm5, %v23937_v37 }
0x4960   :  { %v15495_v36 = vpop.f32.mrf.mxu0 }
0x4961   :  { %19853 = vmatprep.mubr.msk.f32.mxu0 %vm155_vm0, %v15495_v36  ;;  %v23575_v36 = vld [vmem:[%s23926_s7 + $0xb0] sm:$0xff] }
0x4962   :  { %v19845_v18 = vpop.f32.mrf.mxu0 }
0x4a08   :  { %v15571_v33 = vpop.f32.mrf.mxu1 }
0x4a09   :  { %19854 = vmatmul.mubr.msk.f32.vlgmr.msra.gmra.mxu0 %vm155_vm0, %v15571_v33 }
0x4a0a   :  { %19862 = vmatpush3.xpose.msk.msra.mxu0 %vm155_vm0, %v15743_v7  ;;  %v19850_v58 = vpop.f32.mrf.mxu1  ;;  %19863 = vmatprep.mubr.msk.f32.mxu0 %vm20403_vm5, %v23937_v37 }
0x4a0b   :  { %19871 = vmatprep.subr.mxu0 %v23937_v37 }
0x4a0c   :  { %v15736_v34 = vpop.f32.mrf.mxu1 }
0x4a0d   :  { %v15818_v2 = vmul.f32 0.35355338, %v15736_v34  ;;  %19864 = vmatmul.mubr.msk.f32.vlgmr.msra.gmra.mxu0 %vm155_vm0, %v15741_v48 }
0x4a0e   :  { %v19860_v3 = vpop.f32.mrf.mxu1  ;;  %19873 = vmatprep.mubr.msk.f32.mxu0 %vm20403_vm5, %v23937_v37 }
0x4a0f   :  { %v15820_v50 = vsel %vm155_vm0, %v15818_v2, -inf }
0x4a10   :  { %15821 = vmax.xlane.f32.xlu1 %v15820_v50 }
0x4a99   :  { %v15822_v4 = vpop.xlane.xlu1 %15821 }
0x4a9a   :  { %v15826_v25 = vsub.f32 %v15818_v2, %v15822_v4 }
0x4a9c   :  { %v15828_v6 = vmul.f32 1.442695, %v15826_v25 }
0x4a9e   :  { %20258 = vpow2.f32 %v15828_v6 }
0x4aab   :  { %v20259_v44 = vpop.eup %20258 }
0x4aac   :  { %v15832_v23 = vsel %vm155_vm0, %v20259_v44, 0.0 }
0x4ac9   :  { %v19855_v54 = vpop.f32.mrf.mxu0 }
0x4aca   :  { %v15661_v46 = vadd.f32 %v19855_v54, %v23510_v59 }
0x4acb   :  { %v15651_v26 = vpop.f32.mrf.mxu0 }
0x4acc   :  { %v15660_v17 = vadd.f32 %v15651_v26, %v23512_v55 }
0x4acd   :  { %v15814_v9 = vpop.f32.mrf.mxu0 }
0x4ace   :  { %v15819_v14 = vmul.f32 0.35355338, %v15814_v9 }
0x4acf   :  { %v19865_v32 = vpop.f32.mrf.mxu0 }
0x4ad0   :  { %v15823_v11 = vsel %vm155_vm0, %v15819_v14, -inf }
0x4ad1   :  { %15824 = vmax.xlane.f32.xlu0 %v15823_v11 }
0x4ad5   :  { %15833 = vadd.xlane.f32.xlu0 %v15832_v23 }
0x4aeb   :  { %15842 = vrot.lane.b32.xlu0 %v23406_v57, %s20415_s11 }
0x4b5a   :  { %v15825_v49 = vpop.xlane.xlu0 %15824 }
0x4b5b   :  { %v15827_v42 = vsub.f32 %v15819_v14, %v15825_v49  ;;  %v16112_v49 = vrot.slane %v23400_v19, %v21043_v62  ;;  %v16209_v62 = vrot.slane %v23400_v19, %v21027_v47 }
0x4b5d   :  { %v15830_v51 = vmul.f32 1.442695, %v15827_v42  ;;  %v23621_v42 = vld [vmem:[%s23928_s9 + $0x18] sm:$0x1f] }
0x4b5e   :  { %v15834_v59 = vpop.xlane.xlu0 %15833 }
0x4b5f   :  { %20260 = vpow2.f32 %v15830_v51 }
0x4b60   :  { %20262 = vrcp.f32 %v15834_v59 }
0x4b62   :  { %v15843_v55 = vpop.permute.xlu0 %15842 }
0x4b63   :  { %19867 = vmatpush3.msra.mxu1 %v15843_v55 }
0x4b6c   :  { %v20261_v63 = vpop.eup %20260 }
0x4b6d   :  { %v20263_v15 = vpop.eup %20262  ;;  %v15835_v53 = vsel %vm155_vm0, %v20261_v63, 0.0 }
0x4b6e   :  { %15836 = vadd.xlane.f32.xlu1 %v15835_v53  ;;  %v15839_v41 = vmul.f32 %v20263_v15, %v20259_v44 }
0x4b70   :  { %19869 = vmatmul.mubr.msk.f32.vlgmr.msra.gmra.mxu1 %vm155_vm0, %v15839_v41 }
0x4b7f   :  { %15918 = vrot.lane.b32.xlu1 %v23404_v16, %s20415_s11 }
0x4b83   :  { %15995 = vrot.lane.b32.xlu1 %v23357_v5, %s20406_s2 }
0x4bf7   :  { %v15837_v57 = vpop.xlane.xlu1 %15836 }
0x4bf8   :  { %20264 = vrcp.f32 %v15837_v57 }
0x4bfb   :  { %v15919_v20 = vpop.permute.xlu1 %15918 }
0x4bfc   :  { %19872 = vmatpush3.msra.mxu0 %v15919_v20 }
0x4bfd   :  { %19881 = vmatprep.subr.mxu0 %v23575_v36 }
0x4bff   :  { %v15996_v21 = vpop.permute.xlu1 %15995 }
0x4c00   :  { %19876 = vmatprep.subr.mxu1 %v15996_v21 }
0x4c01   :  { %19877 = vmatpush3.msra.mxu1 %v15996_v21 }
0x4c05   :  { %v20265_v10 = vpop.eup %20264 }
0x4c06   :  { %v15841_v40 = vmul.f32 %v20265_v10, %v20261_v63 }
0x4c08   :  { %19874 = vmatmul.mubr.msk.f32.vlgmr.msra.gmra.mxu0 %vm155_vm0, %v15841_v40 }
0x4c09   :  { %19882 = vmatpush3.msra.mxu0 %v23575_v36 }
0x4c30   :  { %v15914_v22 = vpop.f32.mrf.mxu1 }
0x4c31   :  { %19878 = vmatprep.mubr.msk.f32.mxu1 %vm155_vm0, %v15914_v22 }
0x4c32   :  { %v19870_v43 = vpop.f32.mrf.mxu1 }
0x4cc8   :  { %v15990_v13 = vpop.f32.mrf.mxu0 }
0x4cc9   :  { %19879 = vmatmul.mubr.msk.f32.vlgmr.msra.gmra.mxu1 %vm155_vm0, %v15990_v13 }
0x4cca   :  { %v19875_v16 = vpop.f32.mrf.mxu0  ;;  %19900 = vmatprep.mubr.msk.f32.mxu1 %vm617_vm3, %v22990_v45  ;;  %v23583_v45 = vld [vmem:[%s23926_s7 + $0x80] sm:$0xff] }
0x4d89   :  { %v19880_v5 = vpop.f32.mrf.mxu1 }
0x4d8a   :  { %v16080_v27 = vadd.f32 %v19880_v5, %v15661_v46 }
0x4d8b   :  { %v16070_v29 = vpop.f32.mrf.mxu1 }
0x4d8c   :  { %v16082_v1 = vadd.f32 %v16080_v27, %v23389_v12  ;;  %v16079_v8 = vadd.f32 %v16070_v29, %v15660_v17  ;;  %v23600_v12 = vld [vmem:[%s23926_s7 + $0x68] sm:$0xff] }
0x4d8e   :  { %v16081_v38 = vadd.f32 %v16079_v8, %v23387_v35  ;;  %v16086_v24 = vsel %vm617_vm3, %v16082_v1, 0.0  ;;  %v23588_v35 = vld [vmem:[%s23926_s7 + $0x98] sm:$0xff] }
0x4d8f   :  { %16087 = vadd.xlane.f32.xlu1 %v16086_v24  ;;  %19883 = vmatprep.subr.mxu0 %v23588_v35 }
0x4d90   :  { %v16083_v30 = vsel %vm617_vm3, %v16081_v38, 0.0  ;;  %19884 = vmatpush3.msra.mxu0 %v23588_v35 }
0x4d91   :  { %16084 = vadd.xlane.f32.xlu0 %v16083_v30  ;;  %19885 = vmatprep.subr.mxu0 %v23583_v45 }
0x4d92   :  { %19886 = vmatpush3.msra.mxu0 %v23583_v45 }
0x4d93   :  { %19887 = vmatprep.subr.mxu0 %v23600_v12 }
0x4d94   :  { %19888 = vmatpush3.msra.mxu0 %v23600_v12 }
0x4d95   :  { %19903 = vmatprep.subr.mxu0 %v23937_v37 }
0x4da0   :  { %16220 = vrot.lane.b32.xlu1 %v23575_v36, %s20404_s23 }
0x4da4   :  { %16216 = vrot.lane.b32.xlu1 %v23583_v45, %s20404_s23 }
0x4da8   :  { %16214 = vrot.lane.b32.xlu1 %v23600_v12, %s20404_s23 }
0x4e18   :  { %v16088_v18 = vpop.xlane.xlu1 %16087 }
0x4e19   :  { %v16090_v7 = vmul.f32 0.03125, %v16088_v18 }
0x4e1a   :  { %v16085_v33 = vpop.xlane.xlu0 %16084 }
0x4e1b   :  { %v16092_v58 = vsub.f32 %v16082_v1, %v16090_v7  ;;  %v16089_v48 = vmul.f32 0.03125, %v16085_v33 }
0x4e1c   :  { %v16221_v25 = vpop.permute.xlu1 %16220 }
0x4e1d   :  { %v16091_v34 = vsub.f32 %v16081_v38, %v16089_v48  ;;  %v16094_v2 = vmul.f32 %v16092_v58, %v16092_v58  ;;  %19892 = vmatprep.subr.mxu1 %v16221_v25 }
0x4e1e   :  { %19893 = vmatpush3.msra.mxu1 %v16221_v25 }
0x4e1f   :  { %v16098_v3 = vsel %vm617_vm3, %v16094_v2, 0.0  ;;  %v16093_v50 = vmul.f32 %v16091_v34, %v16091_v34 }
0x4e20   :  { %16099 = vadd.xlane.f32.xlu0 %v16098_v3  ;;  %v16217_v17 = vpop.permute.xlu1 %16216 }
0x4e21   :  { %v16095_v4 = vsel %vm617_vm3, %v16093_v50, 0.0 }
0x4e24   :  { %16096 = vadd.xlane.f32.xlu0 %v16095_v4  ;;  %v16215_v11 = vpop.permute.xlu1 %16214 }
0x4e3a   :  { %16218 = vrot.lane.b32.xlu0 %v23588_v35, %s20404_s23 }
0x4ea9   :  { %v16100_v6 = vpop.xlane.xlu0 %16099 }
0x4eaa   :  { %v16102_v54 = vmul.f32 0.03125, %v16100_v6 }
0x4eac   :  { %v16104_v46 = vadd.f32 1e-05, %v16102_v54 }
0x4ead   :  { %v16097_v26 = vpop.xlane.xlu0 %16096 }
0x4eae   :  { %20266 = vrsqrt.f32 %v16104_v46  ;;  %v16101_v9 = vmul.f32 0.03125, %v16097_v26 }
0x4eb0   :  { %v16103_v14 = vadd.f32 1e-05, %v16101_v9 }
0x4eb1   :  { %v16219_v32 = vpop.permute.xlu0 %16218 }
0x4eb2   :  { %20268 = vrsqrt.f32 %v16103_v14  ;;  %19894 = vmatprep.subr.mxu1 %v16219_v32 }
0x4eb3   :  { %19895 = vmatpush3.msra.mxu1 %v16219_v32 }
0x4eb4   :  { %19896 = vmatprep.subr.mxu1 %v16217_v17 }
0x4eb5   :  { %19897 = vmatpush3.msra.mxu1 %v16217_v17 }
0x4eb6   :  { %19898 = vmatprep.subr.mxu1 %v16215_v11 }
0x4eb7   :  { %19899 = vmatpush3.msra.mxu1 %v16215_v11 }
0x4eb8   :  { %19901 = vmatmul.mubr.msk.f32.vlgmr.msra.gmra.mxu1 %vm617_vm3, %v23058_v0  ;;  %19908 = vmatprep.subr.mxu1 %v23937_v37  ;;  %v16118_v0 = vrot.slane %v23621_v42, %v20533_v31 }
0x4eb9   :  { %19910 = vmatprep.mubr.msk.f32.mxu1 %vm20403_vm5, %v23937_v37 }
0x4ebb   :  { %v20267_v44 = vpop.eup %20266 }
0x4ebc   :  { %v16108_v23 = vmul.f32 %v20267_v44, %v16092_v58 }
0x4ebe   :  { %v16114_v55 = vmul.f32 %v16112_v49, %v16108_v23 }
0x4ebf   :  { %v20269_v51 = vpop.eup %20268 }
0x4ec0   :  { %v16107_v59 = vmul.f32 %v20269_v51, %v16091_v34  ;;  %v23627_v53 = vadd.f32 %v16118_v0, %v16114_v55 }
0x4ec2   :  { %v16113_v63 = vmul.f32 %v16112_v49, %v16107_v59 }
0x4ec4   :  { %v23625_v15 = vadd.f32 %v16118_v0, %v16113_v63 }
0x4ec6   :  { %19889 = vmatprep.mubr.msk.f32.mxu0 %vm617_vm3, %v23625_v15 }
0x4ec7   :  { %19890 = vmatmul.mubr.msk.f32.vlgmr.msra.gmra.mxu0 %vm617_vm3, %v23627_v53 }
0x4ec8   :  { %19905 = vmatprep.mubr.msk.f32.mxu0 %vm20403_vm5, %v23937_v37 }
0x4f78   :  { %v19902_v41 = vpop.f32.mrf.mxu1 }
0x4f79   :  { %v16298_v57 = vadd.f32 %v19902_v41, %v16209_v62 }
0x4f7a   :  { %v16292_v31 = vpop.f32.mrf.mxu1 }
0x4f7b   :  { %v16352_v20 = vcombine.high %v16298_v57, %v16298_v57  ;;  %v16359_v21 = vrot.slane %v16298_v57, %v20554_v60  ;;  %v16293_v10 = vadd.f32 %v16292_v31, %v16209_v62 }
0x4f7d   :  { %v16366_v40 = vrot.slane %v16352_v20, %v20554_v60  ;;  %v16367_v22 = vcombine.high %v16359_v21, %v16359_v21  ;;  %v16375_v43 = vrot.slane %v16359_v21, %v20554_v60  ;;  %v16303_v13 = vcombine.high %v16293_v10, %v16293_v10 }
0x4f7e   :  { %v16310_v16 = vrot.slane %v16293_v10, %v20554_v60  ;;  %v16124_v20 = vrot.slane %v23400_v19, %v21024_v56 }
0x4f7f   :  { %v16368_v5 = vcombine.high %v16366_v40, %v16366_v40  ;;  %v16389_v27 = vrot.slane %v16367_v22, %v20554_v60  ;;  %v16317_v29 = vrot.slane %v16303_v13, %v20554_v60  ;;  %v16382_v8 = vrot.slane %v16366_v40, %v20554_v60 }
0x4f80   :  { %v16318_v1 = vcombine.high %v16310_v16, %v16310_v16  ;;  %v16397_v38 = vcombine.high %v16375_v43, %v16375_v43  ;;  %v16326_v18 = vrot.slane %v16310_v16, %v20554_v60 }
0x4f81   :  { %v16398_v24 = vcombine.high %v16389_v27, %v16389_v27  ;;  %v16319_v30 = vcombine.high %v16317_v29, %v16317_v29  ;;  %v16333_v7 = vrot.slane %v16317_v29, %v20554_v60  ;;  %v16396_v58 = vrot.slane %v16368_v5, %v20554_v60 }
0x4f82   :  { %v16340_v33 = vrot.slane %v16318_v1, %v20554_v60  ;;  %v16527_v4 = vcombine.low %v16389_v27, %v16397_v38 }
0x4f83   :  { %v16528_v48 = vcombine.low %v16398_v24, %v16382_v8  ;;  %v16347_v34 = vrot.slane %v16319_v30, %v20554_v60  ;;  %v16349_v2 = vcombine.high %v16333_v7, %v16333_v7  ;;  %v16556_v17 = vrot.slane %v16396_v58, %v20554_v60 }
0x4f84   :  { %v16403_v3 = vcombine.low %v16326_v18, %v16340_v33  ;;  %v18788_v50 = vcombine.high %v16326_v18, %v16340_v33  ;;  %v16542_v44 = vrot.slane %v16527_v4, %v20554_v60 }
0x4f85   :  { %v16549_v25 = vrot.slane %v16528_v48, %v20554_v60  ;;  %v16351_v6 = vcombine.high %v16347_v34, %v16347_v34  ;;  %v16405_v54 = vcombine.low %v16333_v7, %v16347_v34  ;;  %v16433_v14 = vrot.slane %v16349_v2, %v20554_v60 }
0x4f86   :  { %v16412_v46 = vrot.slane %v16403_v3, %v20554_v60  ;;  %v16419_v26 = vrot.slane %v18788_v50, %v20554_v60 }
0x4f87   :  { %v16426_v9 = vrot.slane %v16405_v54, %v20554_v60  ;;  %v16526_v11 = vcombine.low %v16351_v6, %v16375_v43  ;;  %v16558_v23 = vcombine.low %v16549_v25, %v16556_v17  ;;  %v19891_v59 = vpop.f32.mrf.mxu0 }
0x4f88   :  { %v16434_v32 = vcombine.low %v16412_v46, %v16419_v26  ;;  %v23674_v40 = vadd.f32 %v19891_v59, %v16124_v20 }
0x4f89   :  { %v16435_v49 = vcombine.low %v16426_v9, %v16433_v14  ;;  %v16535_v51 = vrot.slane %v16526_v11, %v20554_v60  ;;  %v16572_v62 = vrot.slane %v16558_v23, %v20554_v60  ;;  %v16197_v31 = vpop.f32.mrf.mxu0 }
0x4f8a   :  { %v16442_v55 = vrot.slane %v16434_v32, %v20554_v60  ;;  %v23669_v10 = vadd.f32 %v16197_v31, %v16124_v20 }
0x4f8b   :  { %v16449_v0 = vrot.slane %v16435_v49, %v20554_v60  ;;  %v16557_v63 = vcombine.low %v16535_v51, %v16542_v44 }
0x4f8d   :  { %v23660_v41 = vcombine.low %v16442_v55, %v16449_v0  ;;  %v16565_v57 = vrot.slane %v16557_v63, %v20554_v60 }
0x4f8f   :  { %v23665_v21 = vcombine.low %v16565_v57, %v16572_v62  ;;  %19904 = vmatpush3.xpose.msk.msra.mxu0 %vm155_vm0, %v23660_v41 }
0x4f90   :  { %19913 = vmatprep.subr.mxu0 %v23937_v37 }
0x4f91   :  { %19909 = vmatpush3.xpose.msk.msra.mxu1 %vm155_vm0, %v23665_v21 }
0x4f92   :  { %19906 = vmatmul.mubr.msk.f32.vlgmr.msra.gmra.mxu0 %vm155_vm0, %v23669_v10  ;;  %19918 = vmatprep.subr.mxu1 %v23937_v37 }
0x4f93   :  { %19915 = vmatprep.mubr.msk.f32.mxu0 %vm20403_vm5, %v23937_v37 }
0x4f94   :  { %19911 = vmatmul.mubr.msk.f32.vlgmr.msra.gmra.mxu1 %vm155_vm0, %v23674_v40 }
0x4f95   :  { %19920 = vmatprep.mubr.msk.f32.mxu1 %vm20403_vm5, %v23937_v37 }
0x5052   :  { %v16522_v60 = vpop.f32.mrf.mxu0 }
0x5053   :  { %v16649_v19 = vmul.f32 0.35355338, %v16522_v60 }
0x5054   :  { %v19907_v22 = vpop.f32.mrf.mxu0  ;;  %v16645_v43 = vpop.f32.mrf.mxu1 }
0x5055   :  { %v16650_v13 = vmul.f32 0.35355338, %v16645_v43  ;;  %v16651_v16 = vsel %vm1074_vm7, %v16649_v19, -inf }
0x5056   :  { %16652 = vmax.xlane.f32.xlu0 %v16651_v16  ;;  %v19912_v5 = vpop.f32.mrf.mxu1 }
0x5057   :  { %v16654_v27 = vsel %vm1074_vm7, %v16650_v13, -inf }
0x5058   :  { %16655 = vmax.xlane.f32.xlu1 %v16654_v27 }
0x5069   :  { %16673 = vrot.lane.b32.xlu1 %v23660_v41, %s20404_s23 }
0x506d   :  { %16827 = vrot.lane.b32.xlu1 %v23600_v12, %s20406_s2 }
0x5071   :  { %16915 = vrot.lane.b32.xlu1 %v23660_v41, %s20408_s6 }
0x5075   :  { %16913 = vrot.lane.b32.xlu1 %v23669_v10, %s20408_s6 }
0x50df   :  { %v16653_v29 = vpop.xlane.xlu0 %16652 }
0x50e0   :  { %v16657_v1 = vsub.f32 %v16649_v19, %v16653_v29 }
0x50e1   :  { %v16656_v8 = vpop.xlane.xlu1 %16655 }
0x50e2   :  { %v16658_v38 = vsub.f32 %v16650_v13, %v16656_v8  ;;  %v16659_v24 = vmul.f32 1.442695, %v16657_v1 }
0x50e4   :  { %v16661_v30 = vmul.f32 1.442695, %v16658_v38 }
0x50e5   :  { %v16674_v18 = vpop.permute.xlu1 %16673 }
0x50e6   :  { %20270 = vpow2.f32 %v16661_v30  ;;  %19914 = vmatpush3.msk.msra.mxu0 %vm421_vm4, %v16674_v18 }
0x50e7   :  { %20272 = vpow2.f32 %v16659_v24 }
0x50e9   :  { %v16828_v7 = vpop.permute.xlu1 %16827 }
0x50ea   :  { %19923 = vmatprep.subr.mxu0 %v16828_v7 }
0x50ed   :  { %v16916_v4 = vpop.permute.xlu1 %16915 }
0x50f1   :  { %v16914_v46 = vpop.permute.xlu1 %16913 }
0x50f3   :  { %v20271_v12 = vpop.eup %20270 }
0x50f4   :  { %v16666_v33 = vsel %vm1074_vm7, %v20271_v12, 0.0  ;;  %v20273_v58 = vpop.eup %20272 }
0x50f5   :  { %16667 = vadd.xlane.f32.xlu0 %v16666_v33  ;;  %v16663_v48 = vsel %vm1074_vm7, %v20273_v58, 0.0 }
0x50f9   :  { %16664 = vadd.xlane.f32.xlu0 %v16663_v48 }
0x510f   :  { %16750 = vrot.lane.b32.xlu0 %v23665_v21, %s20404_s23  ;;  %s18512_s23 = sshll.u32 %s20416_s20, 4  ;;  %s18513_s23 = int_to_ptr.vmem [resolvable:$true] %s18512_s23 }
0x5110   :  { %p20374_p11 = scmp.lt.s32.totalorder %s18513_s23, %s18513_s23 }
0x5113   :  { %16993 = vrot.lane.b32.xlu0 %v23665_v21, %s20408_s6 }
0x5117   :  { %16991 = vrot.lane.b32.xlu0 %v23674_v40, %s20408_s6 }
0x517e   :  { %v16668_v34 = vpop.xlane.xlu0 %16667 }
0x517f   :  { %20274 = vrcp.f32 %v16668_v34 }
0x5182   :  { %v16665_v2 = vpop.xlane.xlu0 %16664 }
0x5183   :  { %20276 = vrcp.f32 %v16665_v2 }
0x5186   :  { %v16751_v3 = vpop.permute.xlu0 %16750 }
0x5187   :  { %19919 = vmatpush3.msk.msra.mxu1 %vm421_vm4, %v16751_v3 }
0x5188   :  { %19928 = vmatprep.subr.mxu1 %v23937_v37 }
0x518a   :  { %v16994_v9 = vpop.permute.xlu0 %16993 }
0x518c   :  { %v20275_v50 = vpop.eup %20274 }
0x518d   :  { %v16672_v25 = vmul.f32 %v20275_v50, %v20271_v12 }
0x518e   :  { %v16992_v51 = vpop.permute.xlu0 %16991 }
0x518f   :  { %19921 = vmatmul.mubr.msk.f32.vlgmr.msra.gmra.mxu1 %vm1074_vm7, %v16672_v25 }
0x5190   :  { %v20277_v6 = vpop.eup %20276  ;;  %19929 = vmatpush3.xpose.msk.msra.mxu1 %vm155_vm0, %v16916_v4  ;;  %19930 = vmatprep.mubr.msk.f32.mxu1 %vm20403_vm5, %v23937_v37 }
0x5191   :  { %v16670_v54 = vmul.f32 %v20277_v6, %v20273_v58  ;;  %19938 = vmatprep.subr.mxu1 %v23937_v37 }
0x5193   :  { %19916 = vmatmul.mubr.msk.f32.vlgmr.msra.gmra.mxu0 %vm1074_vm7, %v16670_v54  ;;  %19931 = vmatmul.mubr.msk.f32.vlgmr.msra.gmra.mxu1 %vm155_vm0, %v16914_v46 }
0x5194   :  { %19924 = vmatpush3.msra.mxu0 %v16828_v7  ;;  %19940 = vmatprep.mubr.msk.f32.mxu1 %vm20403_vm5, %v23937_v37 }
0x5195   :  { %19933 = vmatprep.subr.mxu0 %v23937_v37 }
0x524f   :  { %v16823_v26 = vpop.f32.mrf.mxu1 }
0x5251   :  { %v19922_v17 = vpop.f32.mrf.mxu1 }
0x5253   :  { %v16746_v14 = vpop.f32.mrf.mxu0  ;;  %v16987_v32 = vpop.f32.mrf.mxu1 }
0x5254   :  { %v17069_v11 = vmul.f32 0.35355338, %v16987_v32  ;;  %19925 = vmatprep.mubr.msk.f32.mxu0 %vm155_vm0, %v16746_v14  ;;  %v23774_v32 = vld [vmem:[%s23928_s9 + $0x10] sm:$0xff] }
0x5255   :  { %v19917_v44 = vpop.f32.mrf.mxu0  ;;  %19926 = vmatmul.mubr.msk.f32.vlgmr.msra.gmra.mxu0 %vm155_vm0, %v16823_v26  ;;  %v19932_v23 = vpop.f32.mrf.mxu1 }
0x5256   :  { %19934 = vmatpush3.xpose.msk.msra.mxu0 %vm155_vm0, %v16994_v9  ;;  %v17071_v49 = vsel %vm1074_vm7, %v17069_v11, -inf  ;;  %19935 = vmatprep.mubr.msk.f32.mxu0 %vm20403_vm5, %v23937_v37 }
0x5257   :  { %17072 = vmax.xlane.f32.xlu1 %v17071_v49  ;;  %19943 = vmatprep.subr.mxu0 %v23937_v37 }
0x5259   :  { %19936 = vmatmul.mubr.msk.f32.vlgmr.msra.gmra.mxu0 %vm155_vm0, %v16992_v51 }
0x525a   :  { %19945 = vmatprep.mubr.msk.f32.mxu0 %vm20403_vm5, %v23937_v37 }
0x52e0   :  { %v17073_v59 = vpop.xlane.xlu1 %17072 }
0x52e1   :  { %v17077_v55 = vsub.f32 %v17069_v11, %v17073_v59  ;;  %v16402_v11 = vrot.slane %v23774_v32, %v21030_v52 }
0x52e3   :  { %v17079_v0 = vmul.f32 1.442695, %v17077_v55 }
0x52e5   :  { %20278 = vpow2.f32 %v17079_v0 }
0x52f2   :  { %v20279_v19 = vpop.eup %20278 }
0x52f3   :  { %v17083_v22 = vsel %vm1074_vm7, %v20279_v19, 0.0 }
0x5315   :  { %v23726_v63 = vpop.f32.mrf.mxu0 }
0x5316   :  { %v16912_v44 = vadd.f32 %v23726_v63, %v16402_v11 }
0x5317   :  { %v23728_v62 = vpop.f32.mrf.mxu0 }
0x5318   :  { %v16911_v49 = vadd.f32 %v23728_v62, %v16402_v11 }
0x5319   :  { %v17065_v57 = vpop.f32.mrf.mxu0 }
0x531a   :  { %v17070_v31 = vmul.f32 0.35355338, %v17065_v57 }
0x531b   :  { %v19937_v20 = vpop.f32.mrf.mxu0 }
0x531c   :  { %v17074_v60 = vsel %vm1074_vm7, %v17070_v31, -inf }
0x531d   :  { %17075 = vmax.xlane.f32.xlu0 %v17074_v60 }
0x5321   :  { %17084 = vadd.xlane.f32.xlu0 %v17083_v22 }
0x5337   :  { %17093 = vrot.lane.b32.xlu0 %v23660_v41, %s20407_s25 }
0x533b   :  { %17335 = vrot.lane.b32.xlu0 %v23660_v41, %s20411_s28 }
0x533f   :  { %17333 = vrot.lane.b32.xlu0 %v23669_v10, %s20411_s28 }
0x53a6   :  { %v17076_v43 = vpop.xlane.xlu0 %17075 }
0x53a7   :  { %v17078_v13 = vsub.f32 %v17070_v31, %v17076_v43 }
0x53a9   :  { %v17081_v16 = vmul.f32 1.442695, %v17078_v13 }
0x53aa   :  { %v17085_v5 = vpop.xlane.xlu0 %17084 }
0x53ab   :  { %20280 = vpow2.f32 %v17081_v16 }
0x53ac   :  { %20282 = vrcp.f32 %v17085_v5 }
0x53ae   :  { %v17094_v27 = vpop.permute.xlu0 %17093 }
0x53af   :  { %19939 = vmatpush3.msk.msra.mxu1 %vm421_vm4, %v17094_v27 }
0x53b8   :  { %v20281_v29 = vpop.eup %20280 }
0x53b9   :  { %v20283_v1 = vpop.eup %20282  ;;  %v17086_v8 = vsel %vm1074_vm7, %v20281_v29, 0.0 }
0x53ba   :  { %v17090_v38 = vmul.f32 %v20283_v1, %v20279_v19  ;;  %17087 = vadd.xlane.f32.xlu1 %v17086_v8 }
0x53bc   :  { %19941 = vmatmul.mubr.msk.f32.vlgmr.msra.gmra.mxu1 %vm1074_vm7, %v17090_v38 }
0x53cb   :  { %17170 = vrot.lane.b32.xlu1 %v23665_v21, %s20407_s25  ;;  %s20369_s25 = scalar_lea.vmem %s18513_s23, 32 }
0x53cc   :  { %p20370_p10 = scmp.ne.s32.totalorder %s18513_s23, %s20369_s25  ;;  %p20375_p12 = scmp.lt.s32.totalorder %s20369_s25, %s20369_s25 }
0x53ce   :  { %p20376_p13 = por %p20375_p12, %p20374_p11 }
0x53cf   :  { %17247 = vrot.lane.b32.xlu1 %v23583_v45, %s20406_s2  ;;  %v17336_v45 = vpop.permute.xlu0 %17335 }
0x53d0   :  { %p20377_p0 = pnand %p20376_p13, %p20370_p10 }
0x53d3   :  { %17413 = vrot.lane.b32.xlu1 %v23665_v21, %s20411_s28  ;;  %v17334_v33 = vpop.permute.xlu0 %17333 }
0x53d7   :  { %17411 = vrot.lane.b32.xlu1 %v23674_v40, %s20411_s28 }
0x5443   :  { %v17088_v24 = vpop.xlane.xlu1 %17087 }
0x5444   :  { %20284 = vrcp.f32 %v17088_v24 }
0x5447   :  { %v17171_v30 = vpop.permute.xlu1 %17170 }
0x5448   :  { %19944 = vmatpush3.msk.msra.mxu0 %vm421_vm4, %v17171_v30 }
0x5449   :  { %19953 = vmatprep.subr.mxu0 %v23937_v37 }
0x544b   :  { %v17248_v18 = vpop.permute.xlu1 %17247 }
0x544c   :  { %19948 = vmatprep.subr.mxu1 %v17248_v18 }
0x544d   :  { %19949 = vmatpush3.msra.mxu1 %v17248_v18 }
0x544e   :  { %19958 = vmatprep.subr.mxu1 %v23937_v37 }
0x544f   :  { %v17414_v34 = vpop.permute.xlu1 %17413 }
0x5451   :  { %v20285_v7 = vpop.eup %20284 }
0x5452   :  { %v17092_v12 = vmul.f32 %v20285_v7, %v20281_v29 }
0x5453   :  { %v17412_v50 = vpop.permute.xlu1 %17411 }
0x5454   :  { %19946 = vmatmul.mubr.msk.f32.vlgmr.msra.gmra.mxu0 %vm1074_vm7, %v17092_v12 }
0x5455   :  { %19954 = vmatpush3.xpose.msk.msra.mxu0 %vm155_vm0, %v17336_v45  ;;  %19955 = vmatprep.mubr.msk.f32.mxu0 %vm20403_vm5, %v23937_v37 }
0x5456   :  { %19963 = vmatprep.subr.mxu0 %v23937_v37 }
0x5458   :  { %19956 = vmatmul.mubr.msk.f32.vlgmr.msra.gmra.mxu0 %vm155_vm0, %v17334_v33 }
0x5459   :  { %19965 = vmatprep.mubr.msk.f32.mxu0 %vm20403_vm5, %v23937_v37 }
0x547c   :  { %v17166_v58 = vpop.f32.mrf.mxu1 }
0x547d   :  { %19950 = vmatprep.mubr.msk.f32.mxu1 %vm155_vm0, %v17166_v58 }
0x547e   :  { %v19942_v48 = vpop.f32.mrf.mxu1 }
0x5514   :  { %v17243_v2 = vpop.f32.mrf.mxu0 }
0x5515   :  { %19951 = vmatmul.mubr.msk.f32.vlgmr.msra.gmra.mxu1 %vm155_vm0, %v17243_v2 }
0x5516   :  { %19959 = vmatpush3.xpose.msk.msra.mxu1 %vm155_vm0, %v17414_v34  ;;  %v19947_v3 = vpop.f32.mrf.mxu0  ;;  %19960 = vmatprep.mubr.msk.f32.mxu1 %vm20403_vm5, %v23937_v37 }
0x5517   :  { %19968 = vmatprep.subr.mxu1 %v23937_v37 }
0x5518   :  { %v17407_v4 = vpop.f32.mrf.mxu0 }
0x5519   :  { %v17489_v25 = vmul.f32 0.35355338, %v17407_v4  ;;  %19961 = vmatmul.mubr.msk.f32.vlgmr.msra.gmra.mxu1 %vm155_vm0, %v17412_v50 }
0x551a   :  { %v19957_v6 = vpop.f32.mrf.mxu0  ;;  %19970 = vmatprep.mubr.msk.f32.mxu1 %vm20403_vm5, %v23937_v37 }
0x551b   :  { %v17491_v54 = vsel %vm1074_vm7, %v17489_v25, -inf }
0x551c   :  { %17492 = vmax.xlane.f32.xlu0 %v17491_v54 }
0x55a5   :  { %v17493_v46 = vpop.xlane.xlu0 %17492 }
0x55a6   :  { %v17497_v26 = vsub.f32 %v17489_v25, %v17493_v46 }
0x55a8   :  { %v17499_v17 = vmul.f32 1.442695, %v17497_v26 }
0x55aa   :  { %20286 = vpow2.f32 %v17499_v17 }
0x55b7   :  { %v20287_v9 = vpop.eup %20286 }
0x55b8   :  { %v17503_v14 = vsel %vm1074_vm7, %v20287_v9, 0.0 }
0x55b9   :  { %17504 = vadd.xlane.f32.xlu0 %v17503_v14 }
0x55d5   :  { %v19952_v23 = vpop.f32.mrf.mxu1 }
0x55d6   :  { %v23780_v51 = vadd.f32 %v19952_v23, %v16912_v44 }
0x55d7   :  { %v17322_v59 = vpop.f32.mrf.mxu1 }
0x55d8   :  { %v23782_v55 = vadd.f32 %v17322_v59, %v16911_v49 }
0x55d9   :  { %v17485_v0 = vpop.f32.mrf.mxu1 }
0x55da   :  { %v17490_v57 = vmul.f32 0.35355338, %v17485_v0 }
0x55db   :  { %v19962_v31 = vpop.f32.mrf.mxu1 }
0x55dc   :  { %v17494_v20 = vsel %vm1074_vm7, %v17490_v57, -inf }
0x55dd   :  { %17495 = vmax.xlane.f32.xlu1 %v17494_v20 }
0x55ee   :  { %17513 = vrot.lane.b32.xlu1 %v23660_v41, %s20410_s27 }
0x55f2   :  { %17667 = vrot.lane.b32.xlu1 %v23588_v35, %s20406_s2 }
0x55f6   :  { %17755 = vrot.lane.b32.xlu1 %v23660_v41, %s20414_s1 }
0x55fa   :  { %17753 = vrot.lane.b32.xlu1 %v23669_v10, %s20414_s1 }
0x5642   :  { %v17505_v63 = vpop.xlane.xlu0 %17504 }
0x5643   :  { %20288 = vrcp.f32 %v17505_v63 }
0x5650   :  { %v20289_v60 = vpop.eup %20288 }
0x5651   :  { %v17510_v43 = vmul.f32 %v20289_v60, %v20287_v9 }
0x5666   :  { %v17496_v62 = vpop.xlane.xlu1 %17495 }
0x5667   :  { %v17498_v19 = vsub.f32 %v17490_v57, %v17496_v62 }
0x5669   :  { %v17501_v22 = vmul.f32 1.442695, %v17498_v19 }
0x566a   :  { %v17514_v13 = vpop.permute.xlu1 %17513 }
0x566b   :  { %20290 = vpow2.f32 %v17501_v22  ;;  %19964 = vmatpush3.msk.msra.mxu0 %vm421_vm4, %v17514_v13 }
0x566c   :  { %19966 = vmatmul.mubr.msk.f32.vlgmr.msra.gmra.mxu0 %vm1074_vm7, %v17510_v43 }
0x566e   :  { %v17668_v35 = vpop.permute.xlu1 %17667 }
0x566f   :  { %19973 = vmatprep.subr.mxu0 %v17668_v35 }
0x5670   :  { %19974 = vmatpush3.msra.mxu0 %v17668_v35 }
0x5671   :  { %19983 = vmatprep.subr.mxu0 %v23937_v37 }
0x5672   :  { %v17756_v1 = vpop.permute.xlu1 %17755 }
0x5678   :  { %v20291_v16 = vpop.eup %20290 }
0x5679   :  { %v17506_v10 = vsel %vm1074_vm7, %v20291_v16, 0.0 }
0x567a   :  { %17507 = vadd.xlane.f32.xlu0 %v17506_v10 }
0x5690   :  { %17590 = vrot.lane.b32.xlu0 %v23665_v21, %s20410_s27 }
0x5694   :  { %17833 = vrot.lane.b32.xlu0 %v23665_v21, %s20414_s1 }
0x5698   :  { %17831 = vrot.lane.b32.xlu0 %v23674_v40, %s20414_s1  ;;  %v17754_v40 = vpop.permute.xlu1 %17753 }
0x5703   :  { %v17508_v5 = vpop.xlane.xlu0 %17507 }
0x5704   :  { %20292 = vrcp.f32 %v17508_v5 }
0x5707   :  { %v17591_v27 = vpop.permute.xlu0 %17590 }
0x5708   :  { %19969 = vmatpush3.msk.msra.mxu1 %vm421_vm4, %v17591_v27 }
0x5709   :  { %19978 = vmatprep.subr.mxu1 %v23937_v37 }
0x570b   :  { %v17834_v30 = vpop.permute.xlu0 %17833 }
0x570f   :  { %v17832_v45 = vpop.permute.xlu0 %17831 }
0x5711   :  { %v20293_v29 = vpop.eup %20292 }
0x5712   :  { %v17512_v8 = vmul.f32 %v20293_v29, %v20291_v16 }
0x5714   :  { %19971 = vmatmul.mubr.msk.f32.vlgmr.msra.gmra.mxu1 %vm1074_vm7, %v17512_v8 }
0x5715   :  { %19979 = vmatpush3.xpose.msk.msra.mxu1 %vm155_vm0, %v17756_v1  ;;  %19980 = vmatprep.mubr.msk.f32.mxu1 %vm20403_vm5, %v23937_v37 }
0x5716   :  { %19988 = vmatprep.subr.mxu1 %v23937_v37 }
0x5718   :  { %19981 = vmatmul.mubr.msk.f32.vlgmr.msra.gmra.mxu1 %vm155_vm0, %v17754_v40 }
0x5719   :  { %19990 = vmatprep.mubr.msk.f32.mxu1 %vm20403_vm5, %v23937_v37 }
0x572c   :  { %v17586_v38 = vpop.f32.mrf.mxu0 }
0x572d   :  { %19975 = vmatprep.mubr.msk.f32.mxu0 %vm155_vm0, %v17586_v38 }
0x572e   :  { %v19967_v24 = vpop.f32.mrf.mxu0 }
0x57d4   :  { %v17663_v18 = vpop.f32.mrf.mxu1 }
0x57d5   :  { %19976 = vmatmul.mubr.msk.f32.vlgmr.msra.gmra.mxu0 %vm155_vm0, %v17663_v18 }
0x57d6   :  { %19984 = vmatpush3.xpose.msk.msra.mxu0 %vm155_vm0, %v17834_v30  ;;  %v19972_v7 = vpop.f32.mrf.mxu1  ;;  %19985 = vmatprep.mubr.msk.f32.mxu0 %vm20403_vm5, %v23937_v37 }
0x57d7   :  { %19993 = vmatprep.subr.mxu0 %v23937_v37  ;;  %v18736_v7 = vld [vmem:[%s23926_s7 + $0xa0] sm:$0xff] }
0x57d8   :  { %v17827_v12 = vpop.f32.mrf.mxu1 }
0x57d9   :  { %v17909_v33 = vmul.f32 0.35355338, %v17827_v12  ;;  %19986 = vmatmul.mubr.msk.f32.vlgmr.msra.gmra.mxu0 %vm155_vm0, %v17832_v45  ;;  %v18733_v45 = vld [vmem:[%s23926_s7 + $0x88] sm:$0xff]  ;;  %v18730_v12 = vld [vmem:[%s23926_s7 + $0x70] sm:$0xff] }
0x57da   :  { %v19982_v58 = vpop.f32.mrf.mxu1  ;;  %19995 = vmatprep.mubr.msk.f32.mxu0 %vm20403_vm5, %v23937_v37 }
0x57db   :  { %v17911_v48 = vsel %vm1074_vm7, %v17909_v33, -inf }
0x57dc   :  { %17912 = vmax.xlane.f32.xlu1 %v17911_v48 }
0x5865   :  { %v17913_v34 = vpop.xlane.xlu1 %17912 }
0x5866   :  { %v17917_v2 = vsub.f32 %v17909_v33, %v17913_v34 }
0x5868   :  { %v17919_v3 = vmul.f32 1.442695, %v17917_v2 }
0x586a   :  { %20294 = vpow2.f32 %v17919_v3 }
0x5877   :  { %v20295_v9 = vpop.eup %20294 }
0x5878   :  { %v17923_v37 = vsel %vm1074_vm7, %v20295_v9, 0.0 }
0x5895   :  { %v19977_v50 = vpop.f32.mrf.mxu0 }
0x5896   :  { %v17752_v4 = vadd.f32 %v19977_v50, %v23780_v51  ;;  %v18204_v50 = vrot.slane %v23621_v42, %v20825_v39  ;;  %v18748_v39 = vld [vmem:[%s23927_s8 + $0x70] sm:$0xff] }
0x5897   :  { %v17742_v25 = vpop.f32.mrf.mxu0 }
0x5898   :  { %v17751_v6 = vadd.f32 %v17742_v25, %v23782_v55 }
0x5899   :  { %v17905_v54 = vpop.f32.mrf.mxu0 }
0x589a   :  { %v17910_v46 = vmul.f32 0.35355338, %v17905_v54 }
0x589b   :  { %v19987_v26 = vpop.f32.mrf.mxu0 }
0x589c   :  { %v17914_v17 = vsel %vm1074_vm7, %v17910_v46, -inf }
0x589d   :  { %17915 = vmax.xlane.f32.xlu0 %v17914_v17 }
0x58a1   :  { %17924 = vadd.xlane.f32.xlu0 %v17923_v37 }
0x58b7   :  { %17933 = vrot.lane.b32.xlu0 %v23660_v41, %s20413_s30 }
0x5926   :  { %v17916_v14 = vpop.xlane.xlu0 %17915 }
0x5927   :  { %v17918_v11 = vsub.f32 %v17910_v46, %v17916_v14  ;;  %v18749_v14 = vld [vmem:[%s23927_s8 + $0x78] sm:$0xff] }
0x5929   :  { %v17921_v44 = vmul.f32 1.442695, %v17918_v11  ;;  %v18746_v11 = vld [vmem:[%s23927_s8 + $0x60] sm:$0xff] }
0x592a   :  { %v17925_v23 = vpop.xlane.xlu0 %17924 }
0x592b   :  { %20296 = vpow2.f32 %v17921_v44  ;;  %v18745_v44 = vld [vmem:[%s23927_s8 + $0x58] sm:$0xff] }
0x592c   :  { %20298 = vrcp.f32 %v17925_v23  ;;  %v18744_v23 = vld [vmem:[%s23927_s8 + $0x50] sm:$0xff] }
0x592e   :  { %v17934_v49 = vpop.permute.xlu0 %17933 }
0x592f   :  { %19989 = vmatpush3.msk.msra.mxu1 %vm421_vm4, %v17934_v49  ;;  %v18743_v49 = vld [vmem:[%s23927_s8 + $0x48] sm:$0xff] }
0x5938   :  { %v20297_v51 = vpop.eup %20296 }
0x5939   :  { %v20299_v59 = vpop.eup %20298  ;;  %v17926_v55 = vsel %vm1074_vm7, %v20297_v51, 0.0 }
0x593a   :  { %v17930_v0 = vmul.f32 %v20299_v59, %v20295_v9  ;;  %17927 = vadd.xlane.f32.xlu1 %v17926_v55  ;;  %v18216_v59 = vrot.slane %v23774_v32, %v21033_v28 }
0x593c   :  { %19991 = vmatmul.mubr.msk.f32.vlgmr.msra.gmra.mxu1 %vm1074_vm7, %v17930_v0 }
0x594b   :  { %18010 = vrot.lane.b32.xlu1 %v23665_v21, %s20413_s30 }
0x594f   :  { %18087 = vrot.lane.b32.xlu1 %v23575_v36, %s20406_s2 }
0x59c3   :  { %v17928_v41 = vpop.xlane.xlu1 %17927 }
0x59c4   :  { %20300 = vrcp.f32 %v17928_v41 }
0x59c7   :  { %v18011_v57 = vpop.permute.xlu1 %18010 }
0x59c8   :  { %19994 = vmatpush3.msk.msra.mxu0 %vm421_vm4, %v18011_v57 }
0x59cb   :  { %v18088_v31 = vpop.permute.xlu1 %18087 }
0x59cc   :  { %19998 = vmatprep.subr.mxu1 %v18088_v31 }
0x59cd   :  { %19999 = vmatpush3.msra.mxu1 %v18088_v31 }
0x59ce   :  { %20014 = vmatprep.subr.mxu1 %v18749_v14 }
0x59d1   :  { %v20301_v20 = vpop.eup %20300 }
0x59d2   :  { %v17932_v63 = vmul.f32 %v20301_v20, %v20297_v51  ;;  %v18742_v51 = vld [vmem:[%s23927_s8 + $0x40] sm:$0xff] }
0x59d4   :  { %19996 = vmatmul.mubr.msk.f32.vlgmr.msra.gmra.mxu0 %vm1074_vm7, %v17932_v63 }
0x59fc   :  { %v18006_v62 = vpop.f32.mrf.mxu1 }
0x59fd   :  { %20000 = vmatprep.mubr.msk.f32.mxu1 %vm155_vm0, %v18006_v62 }
0x59fe   :  { %v19992_v60 = vpop.f32.mrf.mxu1 }
0x5a94   :  { %v18083_v21 = vpop.f32.mrf.mxu0 }
0x5a95   :  { %20001 = vmatmul.mubr.msk.f32.vlgmr.msra.gmra.mxu1 %vm155_vm0, %v18083_v21 }
0x5a96   :  { %v19997_v36 = vpop.f32.mrf.mxu0  ;;  %20015 = vmatpush3.msra.mxu1 %v18749_v14 }
0x5a97   :  { %20016 = vmatprep.subr.mxu1 %v18748_v39 }
0x5a98   :  { %20017 = vmatpush3.msra.mxu1 %v18748_v39 }
0x5b55   :  { %v20002_v19 = vpop.f32.mrf.mxu1 }
0x5b56   :  { %v18172_v22 = vadd.f32 %v20002_v19, %v17752_v4 }
0x5b57   :  { %v18162_v43 = vpop.f32.mrf.mxu1 }
0x5b58   :  { %v18174_v13 = vadd.f32 %v18172_v22, %v23627_v53  ;;  %v18171_v35 = vadd.f32 %v18162_v43, %v17751_v6  ;;  %v18210_v6 = vrot.slane %v23621_v42, %v21024_v56  ;;  %v18747_v56 = vld [vmem:[%s23927_s8 + $0x68] sm:$0xff] }
0x5b59   :  { %20018 = vmatprep.subr.mxu1 %v18747_v56 }
0x5b5a   :  { %v18173_v16 = vadd.f32 %v18171_v35, %v23625_v15  ;;  %v18178_v10 = vsel %vm617_vm3, %v18174_v13, 0.0  ;;  %v18739_v15 = vld [vmem:[%s23926_s7 + $0xb8] sm:$0xff]  ;;  %20019 = vmatpush3.msra.mxu1 %v18747_v56 }
0x5b5b   :  { %18179 = vadd.xlane.f32.xlu1 %v18178_v10  ;;  %20003 = vmatprep.subr.mxu0 %v18739_v15 }
0x5b5c   :  { %v18175_v5 = vsel %vm617_vm3, %v18173_v16, 0.0  ;;  %20004 = vmatpush3.msra.mxu0 %v18739_v15  ;;  %20020 = vmatprep.subr.mxu1 %v18746_v11 }
0x5b5d   :  { %18176 = vadd.xlane.f32.xlu0 %v18175_v5  ;;  %20005 = vmatprep.subr.mxu0 %v18736_v7 }
0x5b5e   :  { %20006 = vmatpush3.msra.mxu0 %v18736_v7  ;;  %20021 = vmatpush3.msra.mxu1 %v18746_v11 }
0x5b5f   :  { %20007 = vmatprep.subr.mxu0 %v18733_v45  ;;  %20022 = vmatprep.subr.mxu1 %v18745_v44 }
0x5b60   :  { %20008 = vmatpush3.msra.mxu0 %v18733_v45  ;;  %20023 = vmatpush3.msra.mxu1 %v18745_v44 }
0x5b61   :  { %20009 = vmatprep.subr.mxu0 %v18730_v12  ;;  %20024 = vmatprep.subr.mxu1 %v18744_v23 }
0x5b62   :  { %20010 = vmatpush3.msra.mxu0 %v18730_v12  ;;  %20025 = vmatpush3.msra.mxu1 %v18744_v23 }
0x5b63   :  { %20026 = vmatprep.subr.mxu1 %v18743_v49 }
0x5b64   :  { %20027 = vmatpush3.msra.mxu1 %v18743_v49 }
0x5b65   :  { %20028 = vmatprep.subr.mxu1 %v18742_v51 }
0x5b66   :  { %20029 = vmatpush3.msra.mxu1 %v18742_v51 }
0x5be4   :  { %v18180_v27 = vpop.xlane.xlu1 %18179 }
0x5be5   :  { %v18182_v29 = vmul.f32 0.03125, %v18180_v27 }
0x5be6   :  { %v18177_v1 = vpop.xlane.xlu0 %18176 }
0x5be7   :  { %v18181_v8 = vmul.f32 0.03125, %v18177_v1  ;;  %v18184_v40 = vsub.f32 %v18174_v13, %v18182_v29  ;;  %v18311_v13 = vrot.slane %v23774_v32, %v21040_v61 }
0x5be9   :  { %v18183_v38 = vsub.f32 %v18173_v16, %v18181_v8  ;;  %v18186_v18 = vmul.f32 %v18184_v40, %v18184_v40 }
0x5beb   :  { %v18185_v24 = vmul.f32 %v18183_v38, %v18183_v38  ;;  %v18190_v53 = vsel %vm617_vm3, %v18186_v18, 0.0 }
0x5bed   :  { %v18187_v30 = vsel %vm617_vm3, %v18185_v24, 0.0 }
0x5bee   :  { %18188 = vadd.xlane.f32.xlu0 %v18187_v30 }
0x5bf2   :  { %18191 = vadd.xlane.f32.xlu0 %v18190_v53 }
0x5c77   :  { %v18189_v33 = vpop.xlane.xlu0 %18188 }
0x5c78   :  { %v18193_v58 = vmul.f32 0.03125, %v18189_v33 }
0x5c7a   :  { %v18195_v48 = vadd.f32 1e-05, %v18193_v58 }
0x5c7b   :  { %v18192_v34 = vpop.xlane.xlu0 %18191 }
0x5c7c   :  { %20302 = vrsqrt.f32 %v18195_v48  ;;  %v18194_v2 = vmul.f32 0.03125, %v18192_v34 }
0x5c7e   :  { %v18196_v3 = vadd.f32 1e-05, %v18194_v2 }
0x5c80   :  { %20304 = vrsqrt.f32 %v18196_v3  ;;  %v18424_v3 = vrot.slane %v23621_v42, %v21027_v47 }
0x5c89   :  { %v20303_v4 = vpop.eup %20302 }
0x5c8a   :  { %v18199_v25 = vmul.f32 %v20303_v4, %v18183_v38 }
0x5c8c   :  { %v18205_v54 = vmul.f32 %v18204_v50, %v18199_v25  ;;  %v18430_v25 = vrot.slane %v23621_v42, %v21030_v52 }
0x5c8d   :  { %v20305_v46 = vpop.eup %20304 }
0x5c8e   :  { %v18200_v26 = vmul.f32 %v20305_v46, %v18184_v40  ;;  %v18211_v17 = vadd.f32 %v18210_v6, %v18205_v54 }
0x5c90   :  { %v18206_v9 = vmul.f32 %v18204_v50, %v18200_v26  ;;  %20011 = vmatprep.mubr.msk.f32.mxu0 %vm617_vm3, %v18211_v17 }
0x5c92   :  { %v18212_v37 = vadd.f32 %v18210_v6, %v18206_v9 }
0x5c94   :  { %20012 = vmatmul.mubr.msk.f32.vlgmr.msra.gmra.mxu0 %vm617_vm3, %v18212_v37 }
0x5d54   :  { %v20013_v55 = vpop.f32.mrf.mxu0 }
0x5d55   :  { %v18295_v0 = vadd.f32 %v20013_v55, %v18216_v59  ;;  %v20328_v55 = vld [vmem:[%s23922_s3 + $0x10] sm:$0xff] }
0x5d56   :  { %v18289_v41 = vpop.f32.mrf.mxu0 }
0x5d57   :  { %v18301_v57 = vmul.f32 0.70710677, %v18295_v0  ;;  %v18290_v31 = vadd.f32 %v18289_v41, %v18216_v59  ;;  %v18299_v19 = vmul.f32 0.5, %v18295_v0  ;;  %v18483_v0 = vrot.slane %v20328_v55, 7 }
0x5d59   :  { %20306 = verf.f32 %v18301_v57  ;;  %v18300_v20 = vmul.f32 0.70710677, %v18290_v31  ;;  %v18298_v21 = vmul.f32 0.5, %v18290_v31  ;;  %20033 = vpush %v18483_v0 }
0x5d5b   :  { %20308 = verf.f32 %v18300_v20 }
0x5d66   :  { %v20307_v63 = vpop.eup %20306 }
0x5d67   :  { %v18305_v60 = vadd.f32 1.0, %v20307_v63 }
0x5d68   :  { %v20309_v62 = vpop.eup %20308 }
0x5d69   :  { %v18304_v36 = vadd.f32 1.0, %v20309_v62  ;;  %v18307_v43 = vmul.f32 %v18305_v60, %v18299_v19  ;;  %v18462_v60 = vrot.slane %v20328_v55, %v21030_v52  ;;  %v18468_v19 = vrot.slane %v20328_v55, %v21033_v28 }
0x5d6a   :  { %v23940_v52 = vlaneseq }
0x5d6b   :  { %v18306_v22 = vmul.f32 %v18304_v36, %v18298_v21 }
0x5d6d   :  { %20030 = vmatprep.mubr.msk.f32.mxu1 %vm4212_vm8, %v18306_v22 }
0x5d6e   :  { %20031 = vmatmul.mubr.msk.f32.vlgmr.msra.gmra.mxu1 %vm4212_vm8, %v18307_v43 }
0x5d8a   :  { %s20034_s3 = spop %20033 }
0x5d8b   :  { %v18485_v28 = vstv %s20034_s3 }
0x5e2e   :  { %v20032_v35 = vpop.f32.mrf.mxu1 }
0x5e2f   :  { %v18390_v16 = vadd.f32 %v20032_v35, %v18311_v13 }
0x5e30   :  { %v18384_v10 = vpop.f32.mrf.mxu1 }
0x5e31   :  { %v18394_v5 = vadd.f32 %v18390_v16, %v18212_v37  ;;  %v18385_v27 = vadd.f32 %v18384_v10, %v18311_v13  ;;  %v18474_v13 = vrot.slane %v20328_v55, %v21040_v61 }
0x5e33   :  { %v18393_v29 = vadd.f32 %v18385_v27, %v18211_v17  ;;  %v18398_v1 = vsel %vm617_vm3, %v18394_v5, 0.0 }
0x5e34   :  { %18399 = vadd.xlane.f32.xlu0 %v18398_v1 }
0x5e35   :  { %v18395_v8 = vsel %vm617_vm3, %v18393_v29, 0.0 }
0x5e36   :  { %18396 = vadd.xlane.f32.xlu1 %v18395_v8 }
0x5ebd   :  { %v18400_v40 = vpop.xlane.xlu0 %18399 }
0x5ebe   :  { %v18402_v38 = vmul.f32 0.03125, %v18400_v40  ;;  %v18492_v40 = vand.u32 127, %v23940_v52 }
0x5ebf   :  { %v18397_v24 = vpop.xlane.xlu1 %18396 }
0x5ec0   :  { %v18404_v30 = vsub.f32 %v18394_v5, %v18402_v38  ;;  %v18401_v18 = vmul.f32 0.03125, %v18397_v24  ;;  %v23941_v24 = vld [vmem:[#allocation12_spill] sm:$0xff] }
0x5ec2   :  { %v18403_v53 = vsub.f32 %v18393_v29, %v18401_v18  ;;  %v18406_v15 = vmul.f32 %v18404_v30, %v18404_v30 }
0x5ec4   :  { %v18410_v32 = vsel %vm617_vm3, %v18406_v15, 0.0  ;;  %v18405_v7 = vmul.f32 %v18403_v53, %v18403_v53 }
0x5ec5   :  { %18411 = vadd.xlane.f32.xlu0 %v18410_v32 }
0x5ec6   :  { %v18407_v45 = vsel %vm617_vm3, %v18405_v7, 0.0 }
0x5ec7   :  { %18408 = vadd.xlane.f32.xlu1 %v18407_v45 }
0x5f4e   :  { %v18412_v12 = vpop.xlane.xlu0 %18411 }
0x5f4f   :  { %v18414_v33 = vmul.f32 0.03125, %v18412_v12 }
0x5f50   :  { %v18409_v58 = vpop.xlane.xlu1 %18408 }
0x5f51   :  { %v18416_v48 = vadd.f32 1e-05, %v18414_v33  ;;  %v18413_v34 = vmul.f32 0.03125, %v18409_v58 }
0x5f53   :  { %20310 = vrsqrt.f32 %v18416_v48  ;;  %v18415_v2 = vadd.f32 1e-05, %v18413_v34 }
0x5f55   :  { %20312 = vrsqrt.f32 %v18415_v2 }
0x5f60   :  { %v20311_v50 = vpop.eup %20310 }
0x5f61   :  { %v18420_v4 = vmul.f32 %v20311_v50, %v18404_v30  ;;  %v18495_v30 = vsub.s32 %v18492_v40, %v23941_v24 }
0x5f62   :  { %v20313_v6 = vpop.eup %20312 }
0x5f63   :  { %v18426_v54 = vmul.f32 %v18424_v3, %v18420_v4  ;;  %v18419_v46 = vmul.f32 %v20313_v6, %v18403_v53 }
0x5f65   :  { %v18432_v26 = vadd.f32 %v18430_v25, %v18426_v54  ;;  %v18425_v17 = vmul.f32 %v18424_v3, %v18419_v46 }
0x5f67   :  { %v18436_v9 = vsel %vm617_vm3, %v18432_v26, 0.0  ;;  %v18431_v37 = vadd.f32 %v18430_v25, %v18425_v17 }
0x5f68   :  { %18437 = vadd.xlane.f32.xlu0 %v18436_v9 }
0x5f69   :  { %v18433_v14 = vsel %vm617_vm3, %v18431_v37, 0.0 }
0x5f6a   :  { %18434 = vadd.xlane.f32.xlu1 %v18433_v14 }
0x5ff1   :  { %v18438_v39 = vpop.xlane.xlu0 %18437 }
0x5ff2   :  { %v18440_v56 = vmul.f32 0.03125, %v18438_v39 }
0x5ff3   :  { %v18435_v47 = vpop.xlane.xlu1 %18434 }
0x5ff4   :  { %v18442_v11 = vsub.f32 %v18432_v26, %v18440_v56  ;;  %v18439_v44 = vmul.f32 0.03125, %v18435_v47 }
0x5ff6   :  { %v18441_v23 = vsub.f32 %v18431_v37, %v18439_v44  ;;  %v18444_v49 = vmul.f32 %v18442_v11, %v18442_v11 }
0x5ff8   :  { %v18448_v42 = vsel %vm617_vm3, %v18444_v49, 0.0  ;;  %v18443_v51 = vmul.f32 %v18441_v23, %v18441_v23 }
0x5ff9   :  { %18449 = vadd.xlane.f32.xlu0 %v18448_v42 }
0x5ffa   :  { %v18445_v59 = vsel %vm617_vm3, %v18443_v51, 0.0 }
0x5ffb   :  { %18446 = vadd.xlane.f32.xlu1 %v18445_v59 }
0x6082   :  { %v18450_v41 = vpop.xlane.xlu0 %18449 }
0x6083   :  { %v18452_v57 = vmul.f32 0.03125, %v18450_v41 }
0x6084   :  { %v18447_v31 = vpop.xlane.xlu1 %18446 }
0x6085   :  { %v18454_v20 = vadd.f32 1e-05, %v18452_v57  ;;  %v18451_v63 = vmul.f32 0.03125, %v18447_v31 }
0x6087   :  { %20314 = vrsqrt.f32 %v18454_v20  ;;  %v18453_v62 = vadd.f32 1e-05, %v18451_v63 }
0x6089   :  { %20316 = vrsqrt.f32 %v18453_v62 }
0x6094   :  { %v20315_v21 = vpop.eup %20314 }
0x6095   :  { %v18458_v36 = vmul.f32 %v20315_v21, %v18442_v11 }
0x6096   :  { %v20317_v22 = vpop.eup %20316 }
0x6097   :  { %v18464_v43 = vmul.f32 %v18462_v60, %v18458_v36  ;;  %v18457_v35 = vmul.f32 %v20317_v22, %v18441_v23 }
0x6099   :  { %v18470_v16 = vadd.f32 %v18468_v19, %v18464_v43  ;;  %v18463_v10 = vmul.f32 %v18462_v60, %v18457_v35 }
0x609b   :  { %v18476_v5 = vmul.f32 %v18474_v13, %v18470_v16  ;;  %v18469_v27 = vadd.f32 %v18468_v19, %v18463_v10 }
0x609d   :  { %v18480_v29 = vsel %vm617_vm3, %v18476_v5, 0.0  ;;  %v18475_v1 = vmul.f32 %v18474_v13, %v18469_v27 }
0x609e   :  { %18481 = vadd.xlane.f32.xlu0 %v18480_v29 }
0x609f   :  { %v18477_v8 = vsel %vm617_vm3, %v18475_v1, 0.0 }
0x60a0   :  { %18478 = vadd.xlane.f32.xlu1 %v18477_v8 }
0x6127   :  { %v18482_v38 = vpop.xlane.xlu0 %18481 }
0x6128   :  { %v18488_v61 = vadd.f32 %v18485_v28, %v18482_v38 }
0x6129   :  { %v18479_v18 = vpop.xlane.xlu1 %18478 }
0x612a   :  { %v18487_v53 = vadd.f32 %v18485_v28, %v18479_v18  ;;  %v18500_v15 = vrot.slane %v18488_v61, %v18495_v30 }
0x612c   :  { %v18496_v32 = vrot.slane %v18487_v53, %v18495_v30 }
0x612e   :  { %v18502_v7 = vsel %vm18501_vm9, %v18500_v15, %v18496_v32 }
0x612f   :  { %18505 = vst.msk [vmem:[#allocation8] sm:$0x3] %vm18504_vm10, %v18502_v7 }
0x6130   :  { %20380 = shalt.err (!%p20377_p0)
}
0x6131   :  { %18515 = dma.vmem_to_hbm [thread:$0]  %s18513_s23, 32, %s23929_s10, [#allocation5]  }
0x6132   :  { %20393 = dma.done.wait [#allocation5], 32  }
0x6133   :  { %20394 = vsyncadd [#allocation5], 4294967264 }
0x6134   :  { %18519 = vsyncpa [#allocation4], 1 }
0x6135   :  { %18520 = vsyncpa [#allocation7], 1 }
0x6136   :  { %18521 = vsyncpa [#allocation5], 1 }

</bundles_post_ra>
